<compile_context>
chip_gen: v7x
topology: tpu7x:2x2x1
jax: 0.10.0
libtpu: 0.0.40
codegen_flags: <defaults>
</compile_context>

<pallas_src>
import functools

import numpy as np
import jax
import jax.numpy as jnp
from jax.experimental import pallas as pl
from jax.experimental.pallas import tpu as pltpu


# --------------------------- host-side helpers --------------------------------

def _adaptive_pool_matrix(in_size: int, out_size: int) -> np.ndarray:
    """(out_size, in_size) averaging matrix matching nn.AdaptiveAvgPool2d windows."""
    m = np.zeros((out_size, in_size), np.float32)
    for i in range(out_size):
        start = (i * in_size) // out_size
        end = -((-(i + 1) * in_size) // out_size)      # ceil((i+1)*in/out)
        m[i, start:end] = 1.0 / (end - start)
    return m


def _round_up(x: int, m: int) -> int:
    return ((x + m - 1) // m) * m


# ------------------------------- Pallas kernel ---------------------------------

def _sample_kernel(*refs, num_layers, t_hw):
    """refs = [x_0, w_0, x_1, w_1, ..., out].

    x_s : (B, C_s*H_s*W_s)  flattened NCHW feature block (lane-dense)
    w_s : (C_s*H_s*W_s, t_hw) fused (channel-mean + exact adaptive-avg-pool) weights
    out : (B, S*t_hw)       flat per-batch-block output slab
    """
    out_ref = refs[-1]
    for s in range(num_layers):                       # static unroll over heterogeneous layers
        x = refs[2 * s][...].astype(jnp.float32)      # (B, K_s)  (bf16 inputs cast up here)
        w = refs[2 * s + 1][...]                      # (K_s, t_hw)
        pooled = jnp.dot(x * x, w,
                         preferred_element_type=jnp.float32,
                         precision=jax.lax.Precision.HIGHEST)   # (B, t_hw)
        out_ref[:, s * t_hw:(s + 1) * t_hw] = pooled


# ---------------------------------- wrapper ------------------------------------

def sample_forward(g_s, t_hw, *, block_budget_bytes=24 << 20):
    """Sample.forward: list of NCHW feature maps -> (bs, S, t_H*t_W)."""
    t_H, t_W = t_hw
    thw = t_H * t_W
    bs = g_s[0].shape[0]
    S = len(g_s)

    # Flatten inputs (free reshape) and build fused pooling weights on the host.
    xs, ws, Ks = [], [], []
    per_elem_in_bytes = 0
    for f in g_s:
        _, C, H, W = f.shape
        K = C * H * W
        ph = _adaptive_pool_matrix(H, t_H)                     # (t_H, H)
        pw = _adaptive_pool_matrix(W, t_W)                     # (t_W, W)
        kron = np.kron(ph, pw)                                 # (t_H*t_W, H*W)
        w = np.tile(kron.T, (C, 1)) * np.float32(1.0 / C)      # (C*H*W, t_hw)
        xs.append(f.reshape(bs, K))
        ws.append(jnp.asarray(w, jnp.float32))
        Ks.append(K)
        per_elem_in_bytes += K * jnp.dtype(f.dtype).itemsize

    per_elem_bytes = per_elem_in_bytes + S * thw * 4           # inputs + output per element

    # Batch-block sizing: multiple of 8 (sublane), double-buffered inputs/outputs
    # within a budget that is safe on all generations (v7x has only 64 MiB VMEM),
    # and keep >= 2 grid steps when bs allows so both v7x TensorCores get work.
    bs_pad8 = _round_up(bs, 8)
    B = max(8, (block_budget_bytes // (2 * per_elem_bytes)) // 8 * 8)
    B = min(B, 256, bs_pad8)
    if bs_pad8 >= 16:
        B = min(B, max(8, (bs_pad8 // 2) // 8 * 8))
    bs_padded = _round_up(bs, B)

    # Ragged tail: pad batch with zeros (Pallas would otherwise feed garbage blocks).
    if bs_padded != bs:
        xs = [jnp.pad(x, ((0, bs_padded - bs), (0, 0))) for x in xs]

    inputs, in_specs = [], []
    for x, w, K in zip(xs, ws, Ks):
        inputs += [x, w]
        in_specs += [
            pl.BlockSpec((B, K), lambda b: (b, 0)),            # batch block, lane-dense
            pl.BlockSpec((K, thw), lambda b: (0, 0)),          # pooling weights: resident
        ]

    weight_bytes = sum(int(w.size) * 4 for w in ws)
    vmem_estimate = 2 * B * per_elem_bytes + weight_bytes
    vmem_limit = int(min(max(2 * vmem_estimate + (4 << 20), 32 << 20), 48 << 20))

    out = pl.pallas_call(
        functools.partial(_sample_kernel, num_layers=S, t_hw=thw),
        grid=(bs_padded // B,),
        out_shape=jax.ShapeDtypeStruct((bs_padded, S * thw), jnp.float32),
        in_specs=in_specs,
        out_specs=pl.BlockSpec((B, S * thw), lambda b: (b, 0)),
        compiler_params=pltpu.CompilerParams(
            dimension_semantics=("parallel",),
            vmem_limit_bytes=vmem_limit),
    )(*inputs)

    # stack(dim=1) + .view(bs, -1): the flat slab already has layer-major last dim;
    # slicing off the pad rows and splitting the last dim is a free metadata reshape.
    return out[:bs].reshape(bs, S, thw)


# ---------------------- independent NumPy reference ----------------------------

def _reference_np(g_s, t_H, t_W):
    outs = []
    for f in g_s:
        f = np.asarray(f, np.float32)
        bs, C, H, W = f.shape
        m = np.mean(f * f, axis=1)                    # pow(2).mean(1) -> (bs, H, W)
        p = np.zeros((bs, t_H, t_W), np.float32)
        for i in range(t_H):
            h0, h1 = (i * H) // t_H, -((-(i + 1) * H) // t_H)
            for j in range(t_W):
                w0, w1 = (j * W) // t_W, -((-(j + 1) * W) // t_W)
                p[:, i, j] = m[:, h0:h1, w0:w1].mean(axis=(1, 2))
        outs.append(p.reshape(bs, -1))
    return np.stack(outs, axis=1)


# ------------------------------------ main --------------------------------------

if __name__ == "__main__":
    bs = 10                                           # not a multiple of 8: exercises padding path
    t_shape = (bs, 8, 4, 4)                           # Sample(t_shape) -> target (t_H, t_W) = (4, 4)
    t_H, t_W = t_shape[2], t_shape[3]
    # Student feature maps (NCHW), including one non-divisible spatial size (10 -> 4)
    # to exercise exact adaptive-pooling window semantics.
    s_shapes = [(bs, 4, 16, 16), (bs, 8, 8, 8), (bs, 16, 4, 4), (bs, 6, 10, 10)]

    root = jax.random.PRNGKey(0)
    keys = jax.random.split(root, len(s_shapes))
    g_s = [jax.random.normal(k, shp, jnp.float32) for k, shp in zip(keys, s_shapes)]

    out = sample_forward(g_s, (t_H, t_W))
    out = jax.block_until_ready(out)
    assert out.shape == (bs, len(s_shapes), t_H * t_W)

    ref = _reference_np(g_s, t_H, t_W)
    np.testing.assert_allclose(np.asarray(out), ref, rtol=1e-4, atol=1e-5)

    print("KERNEL_OK")
</pallas_src>

<mosaic_0001>
module attributes {stable_mosaic.version = 11 : i64} {
  func.func @_sample_kernel(%arg0: i32, %arg1: memref<8x1024xf32, #tpu.memory_space<vmem>>, %arg2: memref<1024x16xf32, #tpu.memory_space<vmem>>, %arg3: memref<8x512xf32, #tpu.memory_space<vmem>>, %arg4: memref<512x16xf32, #tpu.memory_space<vmem>>, %arg5: memref<8x256xf32, #tpu.memory_space<vmem>>, %arg6: memref<256x16xf32, #tpu.memory_space<vmem>>, %arg7: memref<8x600xf32, #tpu.memory_space<vmem>>, %arg8: memref<600x16xf32, #tpu.memory_space<vmem>>, %arg9: memref<8x64xf32, #tpu.memory_space<vmem>>) attributes {dimension_semantics = [#tpu.dimension_semantics<parallel>], iteration_bounds = array<i64: 2>, scalar_prefetch = 0 : i64, scratch_operands = 0 : i64, tpu.core_type = #tpu.core_type<tc>, window_params = [{transform_indices = @transform_0, window_bounds = array<i64: 8, 1024>}, {pipeline_mode = #tpu.pipeline_mode<synchronous>, transform_indices = @transform_1, window_bounds = array<i64: 1024, 16>}, {transform_indices = @transform_2, window_bounds = array<i64: 8, 512>}, {pipeline_mode = #tpu.pipeline_mode<synchronous>, transform_indices = @transform_3, window_bounds = array<i64: 512, 16>}, {transform_indices = @transform_4, window_bounds = array<i64: 8, 256>}, {pipeline_mode = #tpu.pipeline_mode<synchronous>, transform_indices = @transform_5, window_bounds = array<i64: 256, 16>}, {transform_indices = @transform_6, window_bounds = array<i64: 8, 600>}, {pipeline_mode = #tpu.pipeline_mode<synchronous>, transform_indices = @transform_7, window_bounds = array<i64: 600, 16>}, {transform_indices = @transform_8, window_bounds = array<i64: 8, 64>}]} {
    %c0 = arith.constant 0 : index
    %c0_0 = arith.constant 0 : index
    %0 = vector.load %arg1[%c0, %c0_0] : memref<8x1024xf32, #tpu.memory_space<vmem>>, vector<8x1024xf32>
    %c0_1 = arith.constant 0 : index
    %c0_2 = arith.constant 0 : index
    %1 = vector.load %arg2[%c0_1, %c0_2] : memref<1024x16xf32, #tpu.memory_space<vmem>>, vector<1024x16xf32>
    %2 = arith.mulf %0, %0 : vector<8x1024xf32>
    %cst = arith.constant dense<0.000000e+00> : vector<8x16xf32>
    %3 = tpu.matmul %2, %1, %cst {dimension_numbers = #tpu.dot_dimension_numbers<[1], [0], [0], [1], [0, 0, 1, 1], [], []>, precision = #tpu.contract_precision<fp32>} : vector<8x1024xf32>, vector<1024x16xf32>, vector<8x16xf32> -> vector<8x16xf32>
    %c0_3 = arith.constant 0 : index
    %c0_4 = arith.constant 0 : index
    %4 = vector.load %arg9[%c0_3, %c0_4] : memref<8x64xf32, #tpu.memory_space<vmem>>, vector<8x16xf32>
    tpu.vector_store %arg9[%c0_3, %c0_4], %3 {strides = array<i32>} : memref<8x64xf32, #tpu.memory_space<vmem>>, vector<8x16xf32>,
    %c0_5 = arith.constant 0 : index
    %c0_6 = arith.constant 0 : index
    %5 = vector.load %arg3[%c0_5, %c0_6] : memref<8x512xf32, #tpu.memory_space<vmem>>, vector<8x512xf32>
    %c0_7 = arith.constant 0 : index
    %c0_8 = arith.constant 0 : index
    %6 = vector.load %arg4[%c0_7, %c0_8] : memref<512x16xf32, #tpu.memory_space<vmem>>, vector<512x16xf32>
    %7 = arith.mulf %5, %5 : vector<8x512xf32>
    %cst_9 = arith.constant dense<0.000000e+00> : vector<8x16xf32>
    %8 = tpu.matmul %7, %6, %cst_9 {dimension_numbers = #tpu.dot_dimension_numbers<[1], [0], [0], [1], [0, 0, 1, 1], [], []>, precision = #tpu.contract_precision<fp32>} : vector<8x512xf32>, vector<512x16xf32>, vector<8x16xf32> -> vector<8x16xf32>
    %c0_10 = arith.constant 0 : index
    %c16 = arith.constant 16 : index
    %9 = vector.load %arg9[%c0_10, %c16] : memref<8x64xf32, #tpu.memory_space<vmem>>, vector<8x16xf32>
    tpu.vector_store %arg9[%c0_10, %c16], %8 {strides = array<i32>} : memref<8x64xf32, #tpu.memory_space<vmem>>, vector<8x16xf32>,
    %c0_11 = arith.constant 0 : index
    %c0_12 = arith.constant 0 : index
    %10 = vector.load %arg5[%c0_11, %c0_12] : memref<8x256xf32, #tpu.memory_space<vmem>>, vector<8x256xf32>
    %c0_13 = arith.constant 0 : index
    %c0_14 = arith.constant 0 : index
    %11 = vector.load %arg6[%c0_13, %c0_14] : memref<256x16xf32, #tpu.memory_space<vmem>>, vector<256x16xf32>
    %12 = arith.mulf %10, %10 : vector<8x256xf32>
    %cst_15 = arith.constant dense<0.000000e+00> : vector<8x16xf32>
    %13 = tpu.matmul %12, %11, %cst_15 {dimension_numbers = #tpu.dot_dimension_numbers<[1], [0], [0], [1], [0, 0, 1, 1], [], []>, precision = #tpu.contract_precision<fp32>} : vector<8x256xf32>, vector<256x16xf32>, vector<8x16xf32> -> vector<8x16xf32>
    %c0_16 = arith.constant 0 : index
    %c32 = arith.constant 32 : index
    %14 = vector.load %arg9[%c0_16, %c32] : memref<8x64xf32, #tpu.memory_space<vmem>>, vector<8x16xf32>
    tpu.vector_store %arg9[%c0_16, %c32], %13 {strides = array<i32>} : memref<8x64xf32, #tpu.memory_space<vmem>>, vector<8x16xf32>,
    %c0_17 = arith.constant 0 : index
    %c0_18 = arith.constant 0 : index
    %15 = vector.load %arg7[%c0_17, %c0_18] : memref<8x600xf32, #tpu.memory_space<vmem>>, vector<8x600xf32>
    %c0_19 = arith.constant 0 : index
    %c0_20 = arith.constant 0 : index
    %16 = vector.load %arg8[%c0_19, %c0_20] : memref<600x16xf32, #tpu.memory_space<vmem>>, vector<600x16xf32>
    %17 = arith.mulf %15, %15 : vector<8x600xf32>
    %cst_21 = arith.constant dense<0.000000e+00> : vector<8x16xf32>
    %18 = tpu.matmul %17, %16, %cst_21 {dimension_numbers = #tpu.dot_dimension_numbers<[1], [0], [0], [1], [0, 0, 1, 1], [], []>, precision = #tpu.contract_precision<fp32>} : vector<8x600xf32>, vector<600x16xf32>, vector<8x16xf32> -> vector<8x16xf32>
    %c0_22 = arith.constant 0 : index
    %c48 = arith.constant 48 : index
    %19 = vector.load %arg9[%c0_22, %c48] : memref<8x64xf32, #tpu.memory_space<vmem>>, vector<8x16xf32>
    tpu.vector_store %arg9[%c0_22, %c48], %18 {strides = array<i32>} : memref<8x64xf32, #tpu.memory_space<vmem>>, vector<8x16xf32>,
    return
  }
  func.func @transform_0(%arg0: i32) -> (i32, i32) {
    %c0_i32 = arith.constant 0 : i32
    %c0_i32_0 = arith.constant 0 : i32
    return %arg0, %c0_i32 : i32, i32
  }
  func.func @transform_1(%arg0: i32) -> (i32, i32) {
    %c0_i32 = arith.constant 0 : i32
    %c0_i32_0 = arith.constant 0 : i32
    %c0_i32_1 = arith.constant 0 : i32
    return %c0_i32, %c0_i32_0 : i32, i32
  }
  func.func @transform_2(%arg0: i32) -> (i32, i32) {
    %c0_i32 = arith.constant 0 : i32
    %c0_i32_0 = arith.constant 0 : i32
    return %arg0, %c0_i32 : i32, i32
  }
  func.func @transform_3(%arg0: i32) -> (i32, i32) {
    %c0_i32 = arith.constant 0 : i32
    %c0_i32_0 = arith.constant 0 : i32
    %c0_i32_1 = arith.constant 0 : i32
    return %c0_i32, %c0_i32_0 : i32, i32
  }
  func.func @transform_4(%arg0: i32) -> (i32, i32) {
    %c0_i32 = arith.constant 0 : i32
    %c0_i32_0 = arith.constant 0 : i32
    return %arg0, %c0_i32 : i32, i32
  }
  func.func @transform_5(%arg0: i32) -> (i32, i32) {
    %c0_i32 = arith.constant 0 : i32
    %c0_i32_0 = arith.constant 0 : i32
    %c0_i32_1 = arith.constant 0 : i32
    return %c0_i32, %c0_i32_0 : i32, i32
  }
  func.func @transform_6(%arg0: i32) -> (i32, i32) {
    %c0_i32 = arith.constant 0 : i32
    %c0_i32_0 = arith.constant 0 : i32
    return %arg0, %c0_i32 : i32, i32
  }
  func.func @transform_7(%arg0: i32) -> (i32, i32) {
    %c0_i32 = arith.constant 0 : i32
    %c0_i32_0 = arith.constant 0 : i32
    %c0_i32_1 = arith.constant 0 : i32
    return %c0_i32, %c0_i32_0 : i32, i32
  }
  func.func @transform_8(%arg0: i32) -> (i32, i32) {
    %c0_i32 = arith.constant 0 : i32
    %c0_i32_0 = arith.constant 0 : i32
    return %arg0, %c0_i32 : i32, i32
  }
}

</mosaic_0001>

<bundles_post_ra>
// kernel: tpu_custom_call.1
= control target key start
LH: loop header
LB: loop body
LE: loop exit
PB: predicated region body
PF: predicated region fallthrough
CT: control target
= control target key end

     0   :  { %13 = vsyncpa [#allocation3], 0  ;;  %s20058_s0 = inlined_call_operand.vmem [shape: f32[16,1024], index: 0, kind: input, shape index: {}]   ;;  %s20059_s1 = inlined_call_operand.vmem [shape: f32[1024,16], index: 1, kind: input, shape index: {}]   ;;  %s20060_s2 = inlined_call_operand.vmem [shape: f32[16,512], index: 2, kind: input, shape index: {}]   ;;  %s20061_s3 = inlined_call_operand.vmem [shape: f32[512,16], index: 3, kind: input, shape index: {}]   ;;  %s20062_s4 = inlined_call_operand.vmem [shape: f32[16,256], index: 4, kind: input, shape index: {}]   ;;  %s20063_s5 = inlined_call_operand.vmem [shape: f32[256,16], index: 5, kind: input, shape index: {}]   ;;  %s20064_s6 = inlined_call_operand.vmem [shape: f32[16,600], index: 6, kind: input, shape index: {}]   ;;  %s20065_s7 = inlined_call_operand.vmem [shape: f32[600,16], index: 7, kind: input, shape index: {}]   ;;  %s20066_s8 = inlined_call_operand.hbm [shape: f32[16,64], index: 8, kind: output, shape index: {}]  }
   0x1   :  { %15 = vsyncpa [#allocation3 + $0x1], 0  ;;  %s13290_s27 = smov 0   ;;  %s13292_s28 = smov 0  }
   0x2   :  { %s13294_s29 = smov 0   ;;  %s13296_s30 = smov 0  }
   0x3 LB: > { %s13311_s9 = sadd.s32 4294967295, %s13236_s30   ;;  %s9168_s10 = sadd.s32 4294967294, %s13236_s30   ;;  %s13236_s30 = sphi %s13296_s30, %s22434_s30   ;;  %s13232_s29 = sphi %s13294_s29, %s22433_s29   ;;  %s13228_s28 = sphi %s13292_s28, %s22432_s28   ;;  %s13224_s27 = sphi %s13290_s27, %s22431_s27  }
   0x4   : > { %s13315_s11 = sadd.s32 1, %s13236_s30   ;;  %s216_s12 = sadd.s32 1, %s13232_s29 }
   0x5   : > { %s213_s13 = ssub.s32 %s13236_s30, %s13315_s11  ;;  %p226_p0 = scmp.ne.s32.totalorder %s13232_s29, %s13228_s28 }
   0x6   : > { %p214_p1 = scmp.eq.s32.totalorder %s213_s13, 0  ;;  %p227_p2 = scmp.eq.s32.totalorder %s13311_s9, 1 }
   0x7   : > { %p232_p3 = scmp.ne.s32.totalorder %s13228_s28, %s13224_s27  ;;  %p233_p4 = scmp.eq.s32.totalorder %s9168_s10, 1 }
   0x8   : > { %s13326_s14 = scalar_select %p214_p1, %s13232_s29, %s216_s12  }
   0x9   : > { %p13328_p5 = por %p227_p2, %p226_p0  ;;  %p13332_p6 = por %p233_p4, %p232_p3 }
   0xa   : > { %p9171_p7 = scmp.ge.s32.totalorder %s13236_s30, 1  ;;  %p295_p8 = scmp.lt.s32.totalorder %s13236_s30, 3 }
   0xc   : > { %p296_p9 = pnand %p9171_p7, %p295_p8 }
   0xe   : > { %299 = sbr.rel (%p296_p9) target bundleno = 1366 (0x556), region = 52 }
  0x15   : > { %v388_v0 = vld [vmem:[%s20059_s1 + $0x80] sm:$0xff]  ;;  %v389_v1 = vld [vmem:[%s20059_s1 + $0x88] sm:$0xff]  ;;  %v390_v7 = vld [vmem:[%s20059_s1 + $0x90] sm:$0xff]  ;;  %p344_p10 = scmp.lt.s32.totalorder %s13311_s9, 1  ;;  %vm3956_vm0 = vcmask 130048   ;;  %vm6749_vm1 = vcmask 719872  }
  0x16   : > { %v372_v2 = vld [vmem:[%s20059_s1] sm:$0xff]  ;;  %v557_v3 = vand.u32 4294901760, %v388_v0  ;;  %v560_v4 = vand.u32 4294901760, %v389_v1  ;;  %v373_v5 = vld [vmem:[%s20059_s1 + $0x8] sm:$0xff]  ;;  %v391_v8 = vld [vmem:[%s20059_s1 + $0x98] sm:$0xff]  ;;  %v563_v10 = vand.u32 4294901760, %v390_v7 }
  0x17   : > { %v509_v6 = vand.u32 4294901760, %v372_v2  ;;  %v512_v9 = vand.u32 4294901760, %v373_v5  ;;  %v566_v11 = vand.u32 4294901760, %v391_v8  ;;  %v374_v12 = vld [vmem:[%s20059_s1 + $0x10] sm:$0xff]  ;;  %v375_v13 = vld [vmem:[%s20059_s1 + $0x18] sm:$0xff]  ;;  %v392_v18 = vld [vmem:[%s20059_s1 + $0xa0] sm:$0xff] }
  0x18   : > { %v13362_v14 = vpack.c.bf16 %v560_v4, %v557_v3  ;;  %v13364_v15 = vsub.f32 %v388_v0, %v557_v3  ;;  %v13366_v16 = vsub.f32 %v389_v1, %v560_v4  ;;  %v515_v17 = vand.u32 4294901760, %v374_v12  ;;  %v393_v19 = vld [vmem:[%s20059_s1 + $0xa8] sm:$0xff]  ;;  %v376_v38 = vld [vmem:[%s20059_s1 + $0x20] sm:$0xff]  ;;  %v394_v40 = vld [vmem:[%s20059_s1 + $0xb0] sm:$0xff]  ;;  %s13531_s12 = scalar_select %p344_p10, %s13311_s9, 1 }
  0x19   : > { %v13374_v20 = vpack.c.bf16 %v512_v9, %v509_v6  ;;  %v13376_v21 = vpack.c.bf16 %v566_v11, %v563_v10  ;;  %v13379_v22 = vsub.f32 %v390_v7, %v563_v10  ;;  %v518_v25 = vand.u32 4294901760, %v375_v13  ;;  %v377_v39 = vld [vmem:[%s20059_s1 + $0x28] sm:$0xff]  ;;  %v395_v49 = vld [vmem:[%s20059_s1 + $0xb8] sm:$0xff]  ;;  %v378_v52 = vld [vmem:[%s20059_s1 + $0x30] sm:$0xff]  ;;  %s13242_s25 = smov 32  }
  0x1a   : > { %20928 = vst [vmem:[#allocation5_spill] sm:$0xff] %v13362_v14  ;;  %11300 = vmatprep.subr.bf16.mxu1 %v13362_v14  ;;  %v735_v23 = vand.u32 4294901760, %v13364_v15  ;;  %v742_v24 = vand.u32 4294901760, %v13366_v16  ;;  %v13384_v26 = vsub.f32 %v372_v2, %v509_v6  ;;  %v13386_v27 = vsub.f32 %v373_v5, %v512_v9  ;;  %v379_v59 = vld [vmem:[%s20059_s1 + $0x38] sm:$0xff]  ;;  %v396_v0 = vld [vmem:[%s20059_s1 + $0xc0] sm:$0xff]  ;;  %v397_v1 = vld [vmem:[%s20059_s1 + $0xc8] sm:$0xff] }
  0x1b   : > { %20929 = vst [vmem:[#allocation6_spill] sm:$0xff] %v13374_v20  ;;  %20930 = vst [vmem:[#allocation7_spill] sm:$0xff] %v13376_v21  ;;  %11302 = vmatpush3.bf16.msra.mxu1 %v13374_v20  ;;  %v569_v28 = vand.u32 4294901760, %v392_v18  ;;  %v572_v29 = vand.u32 4294901760, %v393_v19  ;;  %v13389_v30 = vsub.f32 %v391_v8, %v566_v11  ;;  %v13395_v32 = vpack.c.bf16 %v518_v25, %v515_v17  ;;  %s9184_s20 = sshll.u32 %s13531_s12, 6  ;;  %v13785_v20 = vld [vmem:[%s20059_s1 + $0x1a0] sm:$0xff] }
  0x1c   : > { %11304 = vmatprep.subr.bf16.mxu1 %v13376_v21  ;;  %v11427_v31 = vpack.c.bf16 %v742_v24, %v735_v23  ;;  %v13397_v33 = vsub.f32 %v374_v12, %v515_v17  ;;  %v13399_v34 = vsub.f32 %v375_v13, %v518_v25  ;;  %v623_v35 = vand.u32 4294901760, %v13384_v26  ;;  %v380_v12 = vld [vmem:[%s20059_s1 + $0x40] sm:$0xff]  ;;  %s13596_s17 = scalar_lea.vmem %s20058_s0, %s9184_s20  ;;  %20971 = vst [vmem:[#allocation30_spill] sm:$0xff] %v13785_v20  ;;  %s9185_s26 = sshll.u32 %s13531_s12, 5 }
  0x1d   : > { %20931 = vst [vmem:[#allocation8_spill] sm:$0xff] %v13395_v32  ;;  %v20087_v36 = vand.u32 4294901760, %v13386_v27  ;;  %v13403_v37 = vpack.c.bf16 %v572_v29, %v569_v28  ;;  %v13419_v42 = vsub.f32 %v392_v18, %v569_v28  ;;  %v13421_v43 = vsub.f32 %v393_v19, %v572_v29  ;;  %v381_v19 = vld [vmem:[%s20059_s1 + $0x48] sm:$0xff]  ;;  %s15756_s13 = scalar_lea.vmem %s20060_s2, %s9185_s26  ;;  %s9186_s23 = sshll.u32 %s13531_s12, 4 }
  0x1e   : > { %20932 = vst [vmem:[#allocation9_spill] sm:$0xff] %v13397_v33  ;;  %20933 = vst [vmem:[#allocation10_spill] sm:$0xff] %v13399_v34  ;;  %11428 = vmatprep.subr.bf16.mxu0 %v11427_v31  ;;  %v20080_v44 = vand.u32 4294901760, %v13379_v22  ;;  %v20079_v45 = vand.u32 4294901760, %v13389_v30  ;;  %v521_v46 = vand.u32 4294901760, %v376_v38  ;;  %v524_v47 = vand.u32 4294901760, %v377_v39  ;;  %s17203_s26 = scalar_lea.vmem %s20062_s4, %s9186_s23 }
  0x1f   : > { %20934 = vst [vmem:[#allocation11_spill] sm:$0xff] %v13403_v37  ;;  %11306 = vmatpush3.bf16.msra.mxu1 %v13395_v32  ;;  %v11429_v41 = vpack.c.bf16 %v20087_v36, %v623_v35  ;;  %v20082_v48 = vand.u32 4294901760, %v13397_v33  ;;  %v20081_v50 = vand.u32 4294901760, %v13399_v34  ;;  %v575_v51 = vand.u32 4294901760, %v394_v40  ;;  %v398_v31 = vld [vmem:[%s20059_s1 + $0xd0] sm:$0xff]  ;;  %s13128_s22 = smul.u32 40, %s13531_s12 }
  0x20   : > { %11308 = vmatprep.subr.bf16.mxu1 %v13403_v37  ;;  %v11431_v53 = vpack.c.bf16 %v20079_v45, %v20080_v44  ;;  %v13438_v54 = vpack.c.bf16 %v524_v47, %v521_v46  ;;  %v13440_v55 = vsub.f32 %v376_v38, %v521_v46  ;;  %v13442_v56 = vsub.f32 %v377_v39, %v524_v47  ;;  %v399_v38 = vld [vmem:[%s20059_s1 + $0xd8] sm:$0xff]  ;;  %s13241_s23 = smov 16  }
  0x21   : > { %11430 = vmatpush3.bf16.msra.mxu0 %v11429_v41  ;;  %v11433_v57 = vpack.c.bf16 %v20081_v50, %v20082_v48  ;;  %v578_v58 = vand.u32 4294901760, %v395_v49  ;;  %v13452_v60 = vsub.f32 %v394_v40, %v575_v51  ;;  %v20076_v61 = vand.u32 4294901760, %v13419_v42  ;;  %v365_v48 = vld [vmem:[%s13596_s17 + $0x8] sm:$0xff]  ;;  %s17979_s24 = scalar_lea.vmem %s20064_s6, %s13128_s22 }
  0x22   : > { %20935 = vst [vmem:[#allocation12_spill] sm:$0xff] %v13438_v54  ;;  %11432 = vmatprep.subr.bf16.mxu0 %v11431_v53  ;;  %v20073_v62 = vand.u32 4294901760, %v13421_v43  ;;  %v527_v63 = vand.u32 4294901760, %v378_v52  ;;  %v530_v5 = vand.u32 4294901760, %v379_v59  ;;  %v20078_v7 = vand.u32 4294901760, %v13440_v55 }
  0x23   : > { %11310 = vmatpush3.bf16.msra.mxu1 %v13438_v54  ;;  %v13462_v2 = vpack.c.bf16 %v578_v58, %v575_v51  ;;  %v13464_v3 = vsub.f32 %v395_v49, %v578_v58  ;;  %v20077_v8 = vand.u32 4294901760, %v13442_v56  ;;  %v581_v9 = vand.u32 4294901760, %v396_v0 }
  0x24   : > { %v11435_v4 = vpack.c.bf16 %v20073_v62, %v20076_v61  ;;  %v13470_v6 = vsub.f32 %v378_v52, %v527_v63  ;;  %v584_v10 = vand.u32 4294901760, %v397_v1  ;;  %v20068_v11 = vand.u32 4294901760, %v13452_v60 }
  0x25   : > { %11434 = vmatpush3.bf16.msra.mxu0 %v11433_v57  ;;  %20936 = vst [vmem:[#allocation13_spill] sm:$0xff] %v13462_v2  ;;  %11312 = vmatprep.subr.bf16.mxu1 %v13462_v2  ;;  %v13479_v13 = vpack.c.bf16 %v530_v5, %v527_v63  ;;  %v13481_v17 = vsub.f32 %v379_v59, %v530_v5  ;;  %v20067_v18 = vand.u32 4294901760, %v13464_v3  ;;  %v533_v40 = vand.u32 4294901760, %v380_v12  ;;  %v382_v57 = vld [vmem:[%s20059_s1 + $0x50] sm:$0xff] }
  0x26   : > { %11436 = vmatprep.subr.bf16.mxu0 %v11435_v4  ;;  %v11437_v25 = vpack.c.bf16 %v20077_v8, %v20078_v7  ;;  %v13491_v28 = vpack.c.bf16 %v584_v10, %v581_v9  ;;  %v13493_v29 = vsub.f32 %v396_v0, %v581_v9  ;;  %v13508_v41 = vsub.f32 %v397_v1, %v584_v10  ;;  %v383_v0 = vld [vmem:[%s20059_s1 + $0x58] sm:$0xff]  ;;  %v400_v1 = vld [vmem:[%s20059_s1 + $0xe0] sm:$0xff]  ;;  %v401_v10 = vld [vmem:[%s20059_s1 + $0xe8] sm:$0xff] }
  0x27   : > { %20937 = vst [vmem:[#allocation14_spill] sm:$0xff] %v13479_v13  ;;  %11314 = vmatpush3.bf16.msra.mxu1 %v13479_v13  ;;  %v11439_v39 = vpack.c.bf16 %v20067_v18, %v20068_v11  ;;  %v536_v46 = vand.u32 4294901760, %v381_v19  ;;  %v20070_v47 = vand.u32 4294901760, %v13470_v6  ;;  %v20069_v49 = vand.u32 4294901760, %v13481_v17 }
  0x28   : > { %20938 = vst [vmem:[#allocation15_spill] sm:$0xff] %v13491_v28  ;;  %11316 = vmatprep.subr.bf16.mxu1 %v13491_v28  ;;  %v13512_v51 = vsub.f32 %v380_v12, %v533_v40  ;;  %v587_v52 = vand.u32 4294901760, %v398_v31  ;;  %v590_v53 = vand.u32 4294901760, %v399_v38  ;;  %v20072_v63 = vand.u32 4294901760, %v13493_v29 }
  0x29   : > { %11438 = vmatpush3.bf16.msra.mxu0 %v11437_v25  ;;  %v13517_v58 = vpack.c.bf16 %v536_v46, %v533_v40  ;;  %v13519_v59 = vsub.f32 %v381_v19, %v536_v46  ;;  %v11441_v4 = vpack.c.bf16 %v20069_v49, %v20070_v47  ;;  %v20071_v19 = vand.u32 4294901760, %v13508_v41 }
  0x2a   : > { %11440 = vmatprep.subr.bf16.mxu0 %v11439_v39  ;;  %v13537_v5 = vpack.c.bf16 %v590_v53, %v587_v52  ;;  %v13539_v9 = vsub.f32 %v398_v31, %v587_v52  ;;  %v13545_v12 = vsub.f32 %v399_v38, %v590_v53  ;;  %v539_v25 = vand.u32 4294901760, %v382_v57  ;;  %v384_v53 = vld [vmem:[%s20059_s1 + $0x60] sm:$0xff] }
  0x2b   : > { %20939 = vst [vmem:[#allocation16_spill] sm:$0xff] %v13517_v58  ;;  %11318 = vmatpush3.bf16.msra.mxu1 %v13517_v58  ;;  %v542_v39 = vand.u32 4294901760, %v383_v0  ;;  %v20075_v40 = vand.u32 4294901760, %v13512_v51  ;;  %v20074_v31 = vand.u32 4294901760, %v13519_v59  ;;  %v593_v46 = vand.u32 4294901760, %v400_v1  ;;  %v13732_v58 = vld [vmem:[%s20059_s1 + $0x198] sm:$0xff] }
  0x2c   : > { %20940 = vst [vmem:[#allocation17_spill] sm:$0xff] %v13537_v5  ;;  %11320 = vmatprep.subr.bf16.mxu1 %v13537_v5  ;;  %v11443_v52 = vpack.c.bf16 %v20071_v19, %v20072_v63  ;;  %v13555_v18 = vsub.f32 %v382_v57, %v539_v25  ;;  %v596_v38 = vand.u32 4294901760, %v401_v10  ;;  %v20084_v47 = vand.u32 4294901760, %v13539_v9  ;;  %v385_v57 = vld [vmem:[%s20059_s1 + $0x68] sm:$0xff]  ;;  %v402_v19 = vld [vmem:[%s20059_s1 + $0xf0] sm:$0xff] }
  0x2d   : > { %11442 = vmatpush3.bf16.msra.mxu0 %v11441_v4  ;;  %v736_v4 = vsub.f32 %v13364_v15, %v735_v23  ;;  %v13564_v11 = vpack.c.bf16 %v542_v39, %v539_v25  ;;  %v13566_v49 = vsub.f32 %v383_v0, %v542_v39  ;;  %v743_v63 = vsub.f32 %v13366_v16, %v742_v24  ;;  %v403_v39 = vld [vmem:[%s20059_s1 + $0xf8] sm:$0xff] }
  0x2e   : > { %11444 = vmatprep.subr.bf16.mxu0 %v11443_v52  ;;  %v11445_v23 = vpack.c.bf16 %v20074_v31, %v20075_v40  ;;  %v13582_v0 = vpack.c.bf16 %v596_v38, %v593_v46  ;;  %v13584_v25 = vsub.f32 %v400_v1, %v593_v46  ;;  %v13590_v62 = vsub.f32 %v401_v10, %v596_v38 }
  0x2f   : > { %20941 = vst [vmem:[#allocation18_spill] sm:$0xff] %v13564_v11  ;;  %11322 = vmatpush3.bf16.msra.mxu1 %v13564_v11  ;;  %v20083_v24 = vand.u32 4294901760, %v13545_v12  ;;  %v545_v52 = vand.u32 4294901760, %v384_v53  ;;  %v548_v1 = vand.u32 4294901760, %v385_v57  ;;  %v20086_v46 = vand.u32 4294901760, %v13555_v18 }
  0x30   : > { %20942 = vst [vmem:[#allocation19_spill] sm:$0xff] %v13582_v0  ;;  %11324 = vmatprep.subr.bf16.mxu1 %v13582_v0  ;;  %v20085_v31 = vand.u32 4294901760, %v13566_v49  ;;  %v599_v40 = vand.u32 4294901760, %v402_v19  ;;  %v737_v10 = vand.u32 4294901760, %v736_v4  ;;  %v602_v8 = vand.u32 4294901760, %v403_v39  ;;  %v387_v4 = vld [vmem:[%s20059_s1 + $0x78] sm:$0xff] }
  0x31   : > { %11446 = vmatpush3.bf16.msra.mxu0 %v11445_v23  ;;  %v11447_v38 = vpack.c.bf16 %v20083_v24, %v20084_v47  ;;  %v13605_v61 = vsub.f32 %v384_v53, %v545_v52  ;;  %v386_v23 = vld [vmem:[%s20059_s1 + $0x70] sm:$0xff]  ;;  %v744_v7 = vand.u32 4294901760, %v743_v63  ;;  %v13610_v45 = vpack.c.bf16 %v548_v1, %v545_v52 }
  0x32   : > { %v13612_v44 = vsub.f32 %v385_v57, %v548_v1  ;;  %v20095_v50 = vand.u32 4294901760, %v13584_v25  ;;  %v11449_v53 = vpack.c.bf16 %v20085_v31, %v20086_v46  ;;  %v13623_v24 = vpack.c.bf16 %v602_v8, %v599_v40  ;;  %v364_v46 = vld [vmem:[%s13596_s17] sm:$0xff] }
  0x33   : > { %20943 = vst [vmem:[#allocation20_spill] sm:$0xff] %v13605_v61  ;;  %20944 = vst [vmem:[#allocation21_spill] sm:$0xff] %v13610_v45  ;;  %11448 = vmatprep.subr.bf16.mxu0 %v11447_v38  ;;  %v13625_v63 = vsub.f32 %v402_v19, %v599_v40  ;;  %v624_v57 = vsub.f32 %v13384_v26, %v623_v35  ;;  %11326 = vmatpush3.bf16.msra.mxu1 %v13610_v45  ;;  %v20094_v1 = vand.u32 4294901760, %v13590_v62  ;;  %vm13239_vm2 = vmmov 0  }
  0x34   : > { %20945 = vst [vmem:[#allocation22_spill] sm:$0xff] %v13623_v24  ;;  %v13631_v52 = vsub.f32 %v403_v39, %v602_v8  ;;  %v551_v38 = vand.u32 4294901760, %v386_v23  ;;  %11328 = vmatprep.subr.bf16.mxu1 %v13623_v24  ;;  %v554_v47 = vand.u32 4294901760, %v387_v4  ;;  %v20096_v19 = vand.u32 4294901760, %v13612_v44 }
  0x35   : > { %11450 = vmatpush3.bf16.msra.mxu0 %v11449_v53  ;;  %v501_v40 = vmul.f32 %v365_v48, %v365_v48  ;;  %v11451_v35 = vpack.c.bf16 %v20094_v1, %v20095_v50  ;;  %v11331_v39 = vpack.c.bf16 %v744_v7, %v737_v10  ;;  %v20098_v36 = vand.u32 4294901760, %v13625_v63 }
  0x36   : > { %v13642_v8 = vsub.f32 %v386_v23, %v551_v38  ;;  %v20946_v53 = vand.u32 4294901760, %v13386_v27  ;;  %v13648_v45 = vpack.c.bf16 %v554_v47, %v551_v38  ;;  %v13650_v31 = vsub.f32 %v387_v4, %v554_v47  ;;  %v13662_v23 = vld [vmem:[%s20059_s1 + $0x180] sm:$0xff] }
  0x37   : > { %11452 = vmatprep.subr.bf16.mxu0 %v11451_v35  ;;  %v20948_v48 = vand.u32 4294901760, %v13605_v61  ;;  %v13656_v1 = vand.u32 4294901760, %v501_v40  ;;  %v20097_v7 = vand.u32 4294901760, %v13631_v52  ;;  %v500_v10 = vmul.f32 %v364_v46, %v364_v46 }
  0x38   : > { %v631_v24 = vsub.f32 %v13386_v27, %v20946_v53  ;;  %20947 = vst [vmem:[#allocation23_spill] sm:$0xff] %v13648_v45  ;;  %v625_v38 = vand.u32 4294901760, %v624_v57  ;;  %v20950_v47 = vand.u32 4294901760, %v13397_v33  ;;  %v20951_v35 = vand.u32 4294901760, %v13399_v34  ;;  %11330 = vmatpush3.bf16.msra.mxu1 %v13648_v45 }
  0x39   : > { %v11453_v0 = vpack.c.bf16 %v20096_v19, %v20948_v48  ;;  %20949 = vst [vmem:[#allocation24_spill] sm:$0xff] %v13656_v1  ;;  %v13677_v48 = vsub.f32 %v501_v40, %v13656_v1  ;;  %11332 = vmatprep.subr.bf16.mxu1 %v11331_v39  ;;  %v11455_v57 = vpack.c.bf16 %v20097_v7, %v20098_v36  ;;  %v20954_v39 = vand.u32 4294901760, %v13389_v30 }
  0x3a   : > { %v13667_v4 = vsub.f32 %v13397_v33, %v20950_v47  ;;  %v13672_v53 = vsub.f32 %v13399_v34, %v20951_v35  ;;  %v13683_v47 = vand.u32 4294901760, %v500_v10  ;;  %v13689_v35 = vld [vmem:[%s20059_s1 + $0x188] sm:$0xff]  ;;  %v632_v19 = vand.u32 4294901760, %v631_v24  ;;  %1259 = vmatprep.mubr.f32.mxu0 %v13656_v1 }
  0x3b   : > { %11454 = vmatpush3.bf16.msra.mxu0 %v11453_v0  ;;  %20952 = vst [vmem:[#allocation25_spill] sm:$0xff] %v13677_v48  ;;  %v20953_v0 = vand.u32 4294901760, %v13379_v22  ;;  %v757_v7 = vsub.f32 %v13389_v30, %v20954_v39  ;;  %v20109_v50 = vand.u32 4294901760, %v13677_v48  ;;  %v20956_v24 = vand.u32 4294901760, %v13642_v8  ;;  %v13713_v39 = vld [vmem:[%s20059_s1 + $0x100] sm:$0xff] }
  0x3c   : > { %11456 = vmatprep.subr.bf16.mxu0 %v11455_v57  ;;  %v13701_v46 = vsub.f32 %v500_v10, %v13683_v47  ;;  %v20957_v45 = vand.u32 4294901760, %v13650_v31  ;;  %v639_v5 = vand.u32 4294901760, %v13667_v4  ;;  %v13718_v10 = vld [vmem:[%s20059_s1 + $0x108] sm:$0xff]  ;;  %v20958_v36 = vand.u32 4294901760, %v13440_v55 }
  0x3d   : > { %v750_v40 = vsub.f32 %v13379_v22, %v20953_v0  ;;  %v646_v0 = vand.u32 4294901760, %v13672_v53  ;;  %v758_v57 = vand.u32 4294901760, %v757_v7  ;;  %v20960_v7 = vand.u32 4294901760, %v13662_v23 }
  0x3e   : > { %20955 = vst [vmem:[#allocation26_spill] sm:$0xff] %v13701_v46  ;;  %v11457_v11 = vpack.c.bf16 %v20957_v45, %v20956_v24  ;;  %v607_v45 = vsub.f32 %v13677_v48, %v20109_v50  ;;  %v13727_v24 = vld [vmem:[%s20059_s1 + $0x190] sm:$0xff]  ;;  %v652_v28 = vsub.f32 %v13440_v55, %v20958_v36  ;;  %v20959_v50 = vand.u32 4294901760, %v13442_v56  ;;  %v13769_v36 = vld [vmem:[%s20059_s1 + $0x118] sm:$0xff] }
  0x3f   : > { %v751_v53 = vand.u32 4294901760, %v750_v40  ;;  %v11333_v40 = vpack.c.bf16 %v632_v19, %v625_v38  ;;  %v20961_v4 = vand.u32 4294901760, %v13689_v35  ;;  %v20963_v54 = vand.u32 4294901760, %v13701_v46  ;;  %20966 = vst [vmem:[#allocation28_spill] sm:$0xff] %v13769_v36 }
  0x40   : > { %11458 = vmatpush3.bf16.msra.mxu0 %v11457_v11  ;;  %v659_v11 = vsub.f32 %v13442_v56, %v20959_v50  ;;  %v608_v2 = vand.u32 4294901760, %v607_v45  ;;  %v20964_v50 = vand.u32 4294901760, %v13419_v42  ;;  %v20965_v38 = vand.u32 4294901760, %v13421_v43 }
  0x41   : > { %v13744_v13 = vpack.c.bf16 %v20961_v4, %v20960_v7  ;;  %v613_v37 = vsub.f32 %v13701_v46, %v20963_v54  ;;  %v13764_v7 = vld [vmem:[%s20059_s1 + $0x110] sm:$0xff]  ;;  %v11335_v4 = vpack.c.bf16 %v758_v57, %v751_v53  ;;  %v20968_v54 = vand.u32 4294901760, %v13713_v39 }
  0x42   : > { %v764_v19 = vsub.f32 %v13419_v42, %v20964_v50  ;;  %v771_v45 = vsub.f32 %v13421_v43, %v20965_v38  ;;  %v20967_v50 = vand.u32 4294901760, %v13470_v6  ;;  %609 = vmatprep.mubr.f32.mxu1 %v608_v2  ;;  %v20972_v46 = vand.u32 4294901760, %v13481_v17 }
  0x43   : > { %20962 = vst [vmem:[#allocation27_spill] sm:$0xff] %v13744_v13  ;;  %1261 = vmatmul.mubr.f32.vlgmr.msra.gmra.mrb[0].mxu0 %v13683_v47  ;;  %11492 = vmatprep.subr.bf16.mxu0 %v13744_v13  ;;  %v614_v38 = vand.u32 4294901760, %v613_v37  ;;  %v20969_v13 = vand.u32 4294901760, %v13718_v10  ;;  %v20973_v37 = vand.u32 4294901760, %v13727_v24  ;;  %v20974_v2 = vand.u32 4294901760, %v13732_v58 }
  0x44   : > { %v13774_v32 = vsub.f32 %v13470_v6, %v20967_v50  ;;  %v673_v14 = vsub.f32 %v13481_v17, %v20972_v46  ;;  %v765_v50 = vand.u32 4294901760, %v764_v19  ;;  %v772_v48 = vand.u32 4294901760, %v771_v45 }
  0x45   : > { %v13780_v21 = vpack.c.bf16 %v20969_v13, %v20968_v54  ;;  %v13794_v53 = vpack.c.bf16 %v20974_v2, %v20973_v37  ;;  %v13799_v13 = vld [vmem:[%s20059_s1 + $0x1a8] sm:$0xff]  ;;  %v653_v57 = vand.u32 4294901760, %v652_v28  ;;  %v660_v54 = vand.u32 4294901760, %v659_v11  ;;  %615 = vmatmul.mubr.f32.vlgmr.msra.gmra.mrb[0].mxu1 %v614_v38  ;;  %v13815_v38 = vld [vmem:[%s20059_s1 + $0x120] sm:$0xff] }
  0x46   : > { %20976 = vst [vmem:[#allocation32_spill] sm:$0xff] %v13799_v13  ;;  %v20138_v46 = vand.u32 4294901760, %v13764_v7  ;;  %v20137_v19 = vand.u32 4294901760, %v13769_v36  ;;  %11334 = vmatpush3.bf16.msra.mxu1 %v11333_v40  ;;  %v11337_v45 = vpack.c.bf16 %v646_v0, %v639_v5  ;;  %v20977_v37 = vand.u32 4294901760, %v13452_v60  ;;  %20979 = vst [vmem:[#allocation33_spill] sm:$0xff] %v13815_v38  ;;  %v13820_v5 = vld [vmem:[%s20059_s1 + $0x128] sm:$0xff]  ;;  %845 = vmatprep.mubr.f32.mxu1 %v13656_v1 }
  0x47   : > { %20970 = vst [vmem:[#allocation29_spill] sm:$0xff] %v13780_v21  ;;  %20975 = vst [vmem:[#allocation31_spill] sm:$0xff] %v13794_v53  ;;  %11494 = vmatpush3.bf16.msra.mxu0 %v13780_v21  ;;  %v20978_v34 = vand.u32 4294901760, %v13464_v3  ;;  %v20981_v0 = vand.u32 4294901760, %v13512_v51  ;;  %11336 = vmatprep.subr.bf16.mxu1 %v11335_v4  ;;  %v674_v21 = vand.u32 4294901760, %v673_v14  ;;  %v20986_v11 = vand.u32 4294901760, %v13785_v20 }
  0x48   : > { %11496 = vmatprep.subr.bf16.mxu0 %v13794_v53  ;;  %v778_v2 = vsub.f32 %v13452_v60, %v20977_v37  ;;  %20980 = vst [vmem:[#allocation34_spill] sm:$0xff] %v13820_v5  ;;  %v11339_v37 = vpack.c.bf16 %v772_v48, %v765_v50  ;;  %v13837_v53 = vld [vmem:[%s20059_s1 + $0x1b0] sm:$0xff]  ;;  %v13844_v50 = vld [vmem:[%s20059_s1 + $0x1b8] sm:$0xff]  ;;  %v20987_v1 = vand.u32 4294901760, %v13799_v13  ;;  %v20150_v14 = vand.u32 4294901760, %v13815_v38 }
  0x49   : > { %v785_v28 = vsub.f32 %v13464_v3, %v20978_v34  ;;  %v13825_v40 = vsub.f32 %v13512_v51, %v20981_v0  ;;  %v13831_v34 = vpack.c.bf16 %v20137_v19, %v20138_v46  ;;  %20983 = vst [vmem:[#allocation36_spill] sm:$0xff] %v13837_v53  ;;  %v667_v0 = vand.u32 4294901760, %v13774_v32  ;;  %20984 = vst [vmem:[#allocation37_spill] sm:$0xff] %v13844_v50 }
  0x4a   : > { %v779_v4 = vand.u32 4294901760, %v778_v2  ;;  %v20985_v19 = vand.u32 4294901760, %v13519_v59  ;;  %v13854_v33 = vpack.c.bf16 %v20987_v1, %v20986_v11  ;;  %v20149_v32 = vand.u32 4294901760, %v13820_v5  ;;  %11338 = vmatpush3.bf16.msra.mxu1 %v11337_v45  ;;  %v13868_v1 = vld [vmem:[%s20059_s1 + $0x130] sm:$0xff]  ;;  %v13873_v45 = vld [vmem:[%s20059_s1 + $0x138] sm:$0xff] }
  0x4b   : > { %20982 = vst [vmem:[#allocation35_spill] sm:$0xff] %v13831_v34  ;;  %v786_v48 = vand.u32 4294901760, %v785_v28  ;;  %11498 = vmatpush3.bf16.msra.mxu0 %v13831_v34  ;;  %v11341_v2 = vpack.c.bf16 %v660_v54, %v653_v57  ;;  %v20989_v28 = vand.u32 4294901760, %v13493_v29  ;;  %20991 = vst [vmem:[#allocation39_spill] sm:$0xff] %v13873_v45  ;;  %v681_v57 = vand.u32 4294901760, %v13825_v40  ;;  %11340 = vmatprep.subr.bf16.mxu1 %v11339_v37 }
  0x4c   : > { %v687_v46 = vsub.f32 %v13519_v59, %v20985_v19  ;;  %20988 = vst [vmem:[#allocation38_spill] sm:$0xff] %v13854_v33  ;;  %v20990_v19 = vand.u32 4294901760, %v13508_v41  ;;  %11500 = vmatprep.subr.bf16.mxu0 %v13854_v33  ;;  %v13881_v11 = vpack.c.bf16 %v20149_v32, %v20150_v14  ;;  %v20994_v20 = vand.u32 4294901760, %v13555_v18  ;;  %v13898_v32 = vld [vmem:[%s20059_s1 + $0x1c8] sm:$0xff] }
  0x4d   : > { %v792_v36 = vsub.f32 %v13493_v29, %v20989_v28  ;;  %v11343_v54 = vpack.c.bf16 %v786_v48, %v779_v4  ;;  %v20995_v37 = vand.u32 4294901760, %v13566_v49  ;;  %20996 = vst [vmem:[#allocation42_spill] sm:$0xff] %v13898_v32  ;;  %v20997_v28 = vand.u32 4294901760, %v13837_v53  ;;  %v13942_v53 = vld [vmem:[%s20059_s1 + $0x1d0] sm:$0xff] }
  0x4e   : > { %v799_v34 = vsub.f32 %v13508_v41, %v20990_v19  ;;  %20992 = vst [vmem:[#allocation40_spill] sm:$0xff] %v13881_v11  ;;  %v13887_v19 = vld [vmem:[%s20059_s1 + $0x1c0] sm:$0xff]  ;;  %v694_v40 = vsub.f32 %v13555_v18, %v20994_v20  ;;  %v688_v14 = vand.u32 4294901760, %v687_v46  ;;  %v20998_v5 = vand.u32 4294901760, %v13844_v50  ;;  %11342 = vmatpush3.bf16.msra.mxu1 %v11341_v2  ;;  %v13924_v2 = vld [vmem:[%s20059_s1 + $0x148] sm:$0xff]  ;;  %21006 = vst [vmem:[#allocation47_spill] sm:$0xff] %v13942_v53 }
  0x4f   : > { %20993 = vst [vmem:[#allocation41_spill] sm:$0xff] %v13887_v19  ;;  %v701_v4 = vsub.f32 %v13566_v49, %v20995_v37  ;;  %v793_v48 = vand.u32 4294901760, %v792_v36  ;;  %11502 = vmatpush3.bf16.msra.mxu0 %v13881_v11  ;;  %v20166_v20 = vand.u32 4294901760, %v13868_v1  ;;  %v20165_v37 = vand.u32 4294901760, %v13873_v45  ;;  %21003 = vst [vmem:[#allocation45_spill] sm:$0xff] %v13924_v2  ;;  %11344 = vmatprep.subr.bf16.mxu1 %v11343_v54 }
  0x50   : > { %v800_v33 = vand.u32 4294901760, %v799_v34  ;;  %v13905_v38 = vpack.c.bf16 %v20998_v5, %v20997_v28  ;;  %v11345_v36 = vpack.c.bf16 %v674_v21, %v667_v0  ;;  %v21000_v34 = vand.u32 4294901760, %v13539_v9  ;;  %v13919_v5 = vld [vmem:[%s20059_s1 + $0x140] sm:$0xff] }
  0x51   : > { %v21001_v46 = vand.u32 4294901760, %v13545_v12  ;;  %21002 = vst [vmem:[#allocation44_spill] sm:$0xff] %v13919_v5  ;;  %v21004_v21 = vand.u32 4294901760, %v13605_v61  ;;  %v695_v50 = vand.u32 4294901760, %v694_v40  ;;  %v11349_v40 = vpack.c.bf16 %v688_v14, %v681_v57 }
  0x52   : > { %20999 = vst [vmem:[#allocation43_spill] sm:$0xff] %v13905_v38  ;;  %v806_v13 = vsub.f32 %v13539_v9, %v21000_v34  ;;  %v11347_v28 = vpack.c.bf16 %v800_v33, %v793_v48  ;;  %11504 = vmatprep.subr.bf16.mxu0 %v13905_v38  ;;  %v13936_v34 = vpack.c.bf16 %v20165_v37, %v20166_v20  ;;  %v13947_v33 = vld [vmem:[%s20059_s1 + $0x1d8] sm:$0xff]  ;;  %v21007_v48 = vand.u32 4294901760, %v13612_v44 }
  0x53   : > { %v813_v11 = vsub.f32 %v13545_v12, %v21001_v46  ;;  %v13929_v0 = vsub.f32 %v13605_v61, %v21004_v21  ;;  %v20175_v46 = vand.u32 4294901760, %v13898_v32  ;;  %v702_v21 = vand.u32 4294901760, %v701_v4  ;;  %11346 = vmatpush3.bf16.msra.mxu1 %v11345_v36  ;;  %v13976_v36 = vld [vmem:[%s20059_s1 + $0x158] sm:$0xff] }
  0x54   : > { %21005 = vst [vmem:[#allocation46_spill] sm:$0xff] %v13936_v34  ;;  %v807_v61 = vand.u32 4294901760, %v806_v13  ;;  %v715_v37 = vsub.f32 %v13612_v44, %v21007_v48  ;;  %11506 = vmatpush3.bf16.msra.mxu0 %v13936_v34  ;;  %v21008_v20 = vand.u32 4294901760, %v13887_v19  ;;  %v20179_v13 = vand.u32 4294901760, %v13919_v5  ;;  %21013 = vst [vmem:[#allocation50_spill] sm:$0xff] %v13976_v36  ;;  %11348 = vmatprep.subr.bf16.mxu1 %v11347_v28 }
  0x55   : > { %v814_v54 = vand.u32 4294901760, %v813_v11  ;;  %v20178_v11 = vand.u32 4294901760, %v13924_v2  ;;  %v21010_v4 = vand.u32 4294901760, %v13584_v25  ;;  %v21011_v48 = vand.u32 4294901760, %v13590_v62 }
  0x56   : > { %v13957_v38 = vpack.c.bf16 %v20175_v46, %v21008_v20  ;;  %v13971_v20 = vld [vmem:[%s20059_s1 + $0x150] sm:$0xff]  ;;  %v709_v14 = vand.u32 4294901760, %v13929_v0  ;;  %v13990_v46 = vld [vmem:[%s20059_s1 + $0x1e0] sm:$0xff]  ;;  %v21015_v19 = vand.u32 4294901760, %v13642_v8  ;;  %v21018_v2 = vand.u32 4294901760, %v13947_v33 }
  0x57   : > { %v820_v45 = vsub.f32 %v13584_v25, %v21010_v4  ;;  %v827_v34 = vsub.f32 %v13590_v62, %v21011_v48  ;;  %21012 = vst [vmem:[#allocation49_spill] sm:$0xff] %v13971_v20  ;;  %v11351_v57 = vpack.c.bf16 %v814_v54, %v807_v61  ;;  %v13984_v4 = vpack.c.bf16 %v20178_v11, %v20179_v13  ;;  %v14001_v11 = vld [vmem:[%s20059_s1 + $0x1e8] sm:$0xff] }
  0x58   : > { %21009 = vst [vmem:[#allocation48_spill] sm:$0xff] %v13957_v38  ;;  %11508 = vmatprep.subr.bf16.mxu0 %v13957_v38  ;;  %v722_v0 = vsub.f32 %v13642_v8, %v21015_v19  ;;  %v21016_v61 = vand.u32 4294901760, %v13650_v31  ;;  %v716_v13 = vand.u32 4294901760, %v715_v37  ;;  %v21017_v48 = vand.u32 4294901760, %v13942_v53  ;;  %11350 = vmatpush3.bf16.msra.mxu1 %v11349_v40  ;;  %v14027_v40 = vld [vmem:[%s20059_s1 + $0x168] sm:$0xff] }
  0x59   : > { %21014 = vst [vmem:[#allocation51_spill] sm:$0xff] %v13984_v4  ;;  %v821_v54 = vand.u32 4294901760, %v820_v45  ;;  %v828_v38 = vand.u32 4294901760, %v827_v34  ;;  %11510 = vmatpush3.bf16.msra.mxu0 %v13984_v4  ;;  %v20191_v19 = vand.u32 4294901760, %v13971_v20  ;;  %v11353_v45 = vpack.c.bf16 %v702_v21, %v695_v50  ;;  %11352 = vmatprep.subr.bf16.mxu1 %v11351_v57  ;;  %v14045_v57 = vld [vmem:[%s20059_s1 + $0x1f8] sm:$0xff] }
  0x5a   : > { %v729_v28 = vsub.f32 %v13650_v31, %v21016_v61  ;;  %v14008_v5 = vpack.c.bf16 %v21018_v2, %v21017_v48  ;;  %v20190_v61 = vand.u32 4294901760, %v13976_v36  ;;  %v21020_v34 = vand.u32 4294901760, %v13625_v63  ;;  %v14022_v2 = vld [vmem:[%s20059_s1 + $0x160] sm:$0xff] }
  0x5b   : > { %v21021_v37 = vand.u32 4294901760, %v13631_v52  ;;  %v11355_v50 = vpack.c.bf16 %v828_v38, %v821_v54  ;;  %v723_v38 = vand.u32 4294901760, %v722_v0  ;;  %v21025_v0 = vand.u32 4294901760, %v14001_v11 }
  0x5c   : > { %21019 = vst [vmem:[#allocation52_spill] sm:$0xff] %v14008_v5  ;;  %v834_v32 = vsub.f32 %v13625_v63, %v21020_v34  ;;  %11512 = vmatprep.subr.bf16.mxu0 %v14008_v5  ;;  %v14034_v21 = vpack.c.bf16 %v20190_v61, %v20191_v19  ;;  %v14040_v34 = vld [vmem:[%s20059_s1 + $0x1f0] sm:$0xff]  ;;  %v730_v54 = vand.u32 4294901760, %v729_v28  ;;  %v21023_v19 = vand.u32 4294901760, %v13662_v23  ;;  %11354 = vmatpush3.bf16.msra.mxu1 %v11353_v45 }
  0x5d   : > { %v841_v4 = vsub.f32 %v13631_v52, %v21021_v37  ;;  %v14050_v61 = vld [vmem:[%s20059_s1 + $0x170] sm:$0xff]  ;;  %v21024_v5 = vand.u32 4294901760, %v13990_v46  ;;  %v21027_v36 = vand.u32 4294901760, %v13689_v35  ;;  %11356 = vmatprep.subr.bf16.mxu1 %v11355_v50  ;;  %vm5758_vm3 = vcmask 261248  }
  0x5e   : > { %21022 = vst [vmem:[#allocation53_spill] sm:$0xff] %v14034_v21  ;;  %v835_v37 = vand.u32 4294901760, %v834_v32  ;;  %v14055_v48 = vsub.f32 %v13662_v23, %v21023_v19  ;;  %11514 = vmatpush3.bf16.msra.mxu0 %v14034_v21  ;;  %v11357_v23 = vpack.c.bf16 %v716_v13, %v709_v14  ;;  %v20201_v19 = vand.u32 4294901760, %v14040_v34  ;;  %v366_v14 = vld [vmem:[%s13596_s17 + $0x10] sm:$0xff] }
  0x5f   : > { %v842_v53 = vand.u32 4294901760, %v841_v4  ;;  %v14062_v28 = vpack.c.bf16 %v21025_v0, %v21024_v5  ;;  %v14069_v20 = vsub.f32 %v13689_v35, %v21027_v36  ;;  %v20200_v21 = vand.u32 4294901760, %v14045_v57  ;;  %v14076_v5 = vld [vmem:[%s20059_s1 + $0x178] sm:$0xff] }
  0x60   : > { %v367_v0 = vld [vmem:[%s13596_s17 + $0x18] sm:$0xff]  ;;  %v21028_v4 = vand.u32 4294901760, %v14022_v2  ;;  %v21029_v35 = vand.u32 4294901760, %v14027_v40  ;;  %11358 = vmatpush3.bf16.msra.mxu1 %v11357_v23  ;;  %v11363_v13 = vpack.c.bf16 %v13366_v16, %v13364_v15  ;;  %v21036_v16 = vand.u32 4294901760, %v13718_v10 }
  0x61   : > { %21026 = vst [vmem:[#allocation54_spill] sm:$0xff] %v14062_v28  ;;  %v11359_v32 = vpack.c.bf16 %v842_v53, %v835_v37  ;;  %11516 = vmatprep.subr.bf16.mxu0 %v14062_v28  ;;  %v14092_v45 = vpack.c.bf16 %v20200_v21, %v20201_v19  ;;  %v1416_v53 = vand.u32 4294901760, %v14076_v5  ;;  %v503_v50 = vmul.f32 %v367_v0, %v367_v0 }
  0x62   : > { %v14084_v36 = vpack.c.bf16 %v21029_v35, %v21028_v4  ;;  %v11361_v37 = vpack.c.bf16 %v730_v54, %v723_v38  ;;  %v502_v4 = vmul.f32 %v366_v14, %v366_v14  ;;  %v11555_v35 = vpack.c.bf16 %v14069_v20, %v14055_v48 }
  0x63   : > { %21031 = vst [vmem:[#allocation56_spill] sm:$0xff] %v14092_v45  ;;  %11360 = vmatprep.subr.bf16.mxu1 %v11359_v32  ;;  %v21032_v21 = vand.u32 4294901760, %v14050_v61  ;;  %v11371_v38 = vpack.c.bf16 %v13421_v43, %v13419_v42  ;;  %v11373_v54 = vpack.c.bf16 %v13442_v56, %v13440_v55  ;;  %v21035_v32 = vand.u32 4294901760, %v13713_v39 }
  0x64   : > { %21030 = vst [vmem:[#allocation55_spill] sm:$0xff] %v14084_v36  ;;  %11518 = vmatpush3.bf16.msra.mxu0 %v14084_v36  ;;  %v14107_v36 = vand.u32 4294901760, %v503_v50  ;;  %v14109_v23 = vand.u32 4294901760, %v502_v4  ;;  %v11375_v42 = vpack.c.bf16 %v13464_v3, %v13452_v60  ;;  %11362 = vmatpush3.bf16.msra.mxu1 %v11361_v37  ;;  %v11365_v43 = vpack.c.bf16 %v13386_v27, %v13384_v26  ;;  %v21046_v37 = vld [vmem:[#allocation20_spill] sm:$0xff] }
  0x65   : > { %11520 = vmatprep.subr.bf16.mxu0 %v14092_v45  ;;  %v14105_v19 = vpack.c.bf16 %v1416_v53, %v21032_v21  ;;  %v14118_v15 = vsub.f32 %v13713_v39, %v21035_v32  ;;  %v14123_v21 = vsub.f32 %v13718_v10, %v21036_v16  ;;  %v11377_v56 = vpack.c.bf16 %v13481_v17, %v13470_v6  ;;  %v21048_v32 = vld [vmem:[#allocation30_spill] sm:$0xff]  ;;  %v21090_v45 = vld [vmem:[#allocation7_spill] sm:$0xff] }
  0x66   : > { %21034 = vst [vmem:[#allocation58_spill] sm:$0xff] %v14109_v23  ;;  %v14127_v0 = vsub.f32 %v503_v50, %v14107_v36  ;;  %v14134_v55 = vsub.f32 %v502_v4, %v14109_v23  ;;  %11364 = vmatprep.subr.bf16.mxu1 %v11363_v13  ;;  %v11367_v10 = vpack.c.bf16 %v13389_v30, %v13379_v22  ;;  %v21039_v26 = vand.u32 4294901760, %v13727_v24  ;;  %v21045_v13 = vld [vmem:[#allocation10_spill] sm:$0xff] }
  0x67   : > { %21033 = vst [vmem:[#allocation57_spill] sm:$0xff] %v14105_v19  ;;  %v11379_v60 = vpack.c.bf16 %v13508_v41, %v13493_v29  ;;  %v11381_v3 = vpack.c.bf16 %v13519_v59, %v13512_v51  ;;  %v21040_v14 = vand.u32 4294901760, %v13732_v58  ;;  %v11383_v22 = vpack.c.bf16 %v13545_v12, %v13539_v9  ;;  %847 = vmatmul.mubr.f32.vlgmr.msra.gmra.mrb[2].mxu1 %v13683_v47  ;;  %v21042_v59 = vld [vmem:[#allocation28_spill] sm:$0xff] }
  0x68   : > { %11522 = vmatpush3.bf16.msra.mxu0 %v14105_v19  ;;  %21037 = vst [vmem:[#allocation59_spill] sm:$0xff] %v14127_v0  ;;  %21038 = vst [vmem:[#allocation60_spill] sm:$0xff] %v14134_v55  ;;  %v20205_v39 = vand.u32 4294901760, %v14127_v0  ;;  %v14148_v27 = vsub.f32 %v13727_v24, %v21039_v26  ;;  %v20204_v17 = vand.u32 4294901760, %v14134_v55  ;;  %v21041_v30 = vand.u32 4294901760, %v13764_v7  ;;  %11366 = vmatpush3.bf16.msra.mxu1 %v11365_v43  ;;  %v21050_v26 = vld [vmem:[#allocation32_spill] sm:$0xff] }
  0x69   : > { %11556 = vmatprep.subr.bf16.mxu0 %v11555_v35  ;;  %v14153_v6 = vsub.f32 %v13732_v58, %v21040_v14  ;;  %v11385_v51 = vpack.c.bf16 %v13566_v49, %v13555_v18  ;;  %v11387_v58 = vpack.c.bf16 %v13590_v62, %v13584_v25  ;;  %v21043_v24 = vand.u32 4294901760, %v21042_v59  ;;  %11368 = vmatprep.subr.bf16.mxu1 %v11367_v10  ;;  %v21047_v35 = vld [vmem:[#allocation25_spill] sm:$0xff] }
  0x6a   : > { %v14161_v29 = vsub.f32 %v13764_v7, %v21041_v30  ;;  %v1469_v41 = vsub.f32 %v14127_v0, %v20205_v39  ;;  %v1475_v12 = vsub.f32 %v14134_v55, %v20204_v17  ;;  %v21044_v7 = vld [vmem:[#allocation9_spill] sm:$0xff]  ;;  %v11389_v4 = vpack.c.bf16 %v13612_v44, %v21046_v37  ;;  %982 = vmatprep.mubr.f32.mxu1 %v21047_v35 }
  0x6b   : > { %v14174_v9 = vsub.f32 %v21042_v59, %v21043_v24  ;;  %v11369_v50 = vpack.c.bf16 %v21045_v13, %v21044_v7  ;;  %v11557_v62 = vpack.c.bf16 %v14123_v21, %v14118_v15  ;;  %v11391_v49 = vpack.c.bf16 %v13631_v52, %v13625_v63  ;;  %v21052_v59 = vld [vmem:[#allocation33_spill] sm:$0xff]  ;;  %v21054_v13 = vld [vmem:[#allocation34_spill] sm:$0xff] }
  0x6c   : > { %v1470_v18 = vand.u32 4294901760, %v1469_v41  ;;  %v21049_v16 = vand.u32 4294901760, %v21048_v32  ;;  %v21051_v14 = vand.u32 4294901760, %v21050_v26  ;;  %v1476_v30 = vand.u32 4294901760, %v1475_v12 }
  0x6d   : > { %v11559_v41 = vpack.c.bf16 %v14153_v6, %v14148_v27  ;;  %11370 = vmatpush3.bf16.msra.mxu1 %v11369_v50  ;;  %v21053_v24 = vand.u32 4294901760, %v21052_v59  ;;  %v11561_v12 = vpack.c.bf16 %v14174_v9, %v14161_v29  ;;  %v21058_v50 = vld [vmem:[#allocation37_spill] sm:$0xff]  ;;  %v1485_v37 = vand.u32 4294901760, %v14118_v15 }
  0x6e   : > { %v14193_v43 = vsub.f32 %v21048_v32, %v21049_v16  ;;  %v14198_v10 = vsub.f32 %v21050_v26, %v21051_v14  ;;  %1471 = vmatprep.mubr.f32.mxu0 %v1470_v18  ;;  %v21055_v32 = vand.u32 4294901760, %v21054_v13  ;;  %11372 = vmatprep.subr.bf16.mxu1 %v11371_v38  ;;  %v21056_v26 = vld [vmem:[#allocation36_spill] sm:$0xff]  ;;  %v21060_v38 = vand.u32 4294901760, %v13868_v1 }
  0x6f   : > { %1477 = vmatmul.mubr.f32.vlgmr.msra.gmra.mrb[2].mxu0 %v1476_v30  ;;  %v14205_v7 = vsub.f32 %v21052_v59, %v21053_v24  ;;  %v21057_v14 = vand.u32 4294901760, %v21056_v26  ;;  %v21059_v30 = vand.u32 4294901760, %v21058_v50  ;;  %v1618_v63 = vand.u32 4294901760, %v14153_v6 }
  0x70   : > { %v14210_v16 = vsub.f32 %v21054_v13, %v21055_v32  ;;  %11558 = vmatpush3.bf16.msra.mxu0 %v11557_v62  ;;  %v11563_v24 = vpack.c.bf16 %v14198_v10, %v14193_v43  ;;  %1844 = vmatprep.mubr.f32.mxu0 %v14127_v0  ;;  %v14230_v62 = vsub.f32 %v13868_v1, %v21060_v38  ;;  %v21061_v13 = vld [vmem:[#allocation39_spill] sm:$0xff]  ;;  %vm6662_vm4 = vcmask 392448  }
  0x71   : > { %v14217_v18 = vsub.f32 %v21056_v26, %v21057_v14  ;;  %v14222_v59 = vsub.f32 %v21058_v50, %v21059_v30  ;;  %11560 = vmatprep.subr.bf16.mxu0 %v11559_v41  ;;  %11374 = vmatpush3.bf16.msra.mxu1 %v11373_v54  ;;  %v21062_v32 = vand.u32 4294901760, %v21061_v13  ;;  %v21063_v14 = vld [vmem:[#allocation41_spill] sm:$0xff]  ;;  %v21065_v54 = vld [vmem:[#allocation42_spill] sm:$0xff]  ;;  %v21085_v52 = vpack.c.bf16 %v13650_v31, %v13642_v8  ;;  %v21091_v8 = vld [vmem:[#allocation8_spill] sm:$0xff] }
  0x72   : > { %11376 = vmatprep.subr.bf16.mxu1 %v11375_v42  ;;  %v11565_v41 = vpack.c.bf16 %v14210_v16, %v14205_v7  ;;  %v21064_v50 = vand.u32 4294901760, %v21063_v14  ;;  %v21066_v17 = vand.u32 4294901760, %v21065_v54  ;;  %v1632_v31 = vand.u32 4294901760, %v14198_v10 }
  0x73   : > { %v14235_v26 = vsub.f32 %v21061_v13, %v21062_v32  ;;  %v11567_v38 = vpack.c.bf16 %v14222_v59, %v14217_v18  ;;  %v21069_v32 = vld [vmem:[#allocation45_spill] sm:$0xff]  ;;  %v1486_v28 = vsub.f32 %v14118_v15, %v1485_v37  ;;  %v21093_v15 = vand.u32 4294901760, %v14210_v16 }
  0x74   : > { %11562 = vmatpush3.bf16.msra.mxu0 %v11561_v12  ;;  %v14242_v30 = vsub.f32 %v21063_v14, %v21064_v50  ;;  %v14247_v1 = vsub.f32 %v21065_v54, %v21066_v17  ;;  %v21067_v12 = vld [vmem:[#allocation44_spill] sm:$0xff]  ;;  %v21070_v39 = vand.u32 4294901760, %v21069_v32  ;;  %vm9057_vm5 = vcmask 523648  }
  0x75   : > { %11564 = vmatprep.subr.bf16.mxu0 %v11563_v24  ;;  %11378 = vmatpush3.bf16.msra.mxu1 %v11377_v56  ;;  %v21068_v42 = vand.u32 4294901760, %v21067_v12  ;;  %v11569_v17 = vpack.c.bf16 %v14235_v26, %v14230_v62  ;;  %v21071_v24 = vld [vmem:[#allocation47_spill] sm:$0xff]  ;;  %v21073_v56 = vand.u32 4294901760, %v13947_v33 }
  0x76   : > { %v14259_v14 = vsub.f32 %v21069_v32, %v21070_v39  ;;  %11380 = vmatprep.subr.bf16.mxu1 %v11379_v60  ;;  %v21072_v50 = vand.u32 4294901760, %v21071_v24  ;;  %v11571_v39 = vpack.c.bf16 %v14247_v1, %v14242_v30  ;;  %v21076_v32 = vld [vmem:[#allocation50_spill] sm:$0xff] }
  0x77   : > { %v14254_v13 = vsub.f32 %v21067_v12, %v21068_v42  ;;  %v14271_v12 = vsub.f32 %v13947_v33, %v21073_v56  ;;  %v21077_v25 = vand.u32 4294901760, %v21076_v32 }
  0x78   : > { %11566 = vmatpush3.bf16.msra.mxu0 %v11565_v41  ;;  %v14266_v54 = vsub.f32 %v21071_v24, %v21072_v50  ;;  %v21074_v41 = vld [vmem:[#allocation49_spill] sm:$0xff] }
  0x79   : > { %11568 = vmatprep.subr.bf16.mxu0 %v11567_v38  ;;  %11382 = vmatpush3.bf16.msra.mxu1 %v11381_v3  ;;  %v21075_v60 = vand.u32 4294901760, %v21074_v41  ;;  %v14283_v24 = vsub.f32 %v21076_v32, %v21077_v25  ;;  %v11573_v33 = vpack.c.bf16 %v14259_v14, %v14254_v13  ;;  %v21078_v38 = vand.u32 4294901760, %v13990_v46 }
  0x7a   : > { %11384 = vmatprep.subr.bf16.mxu1 %v11383_v22  ;;  %v21079_v3 = vand.u32 4294901760, %v14001_v11  ;;  %v11575_v25 = vpack.c.bf16 %v14271_v12, %v14266_v54  ;;  %v21080_v22 = vand.u32 4294901760, %v14022_v2  ;;  %v21084_v32 = vand.u32 4294901760, %v14050_v61 }
  0x7b   : > { %v14278_v42 = vsub.f32 %v21074_v41, %v21075_v60  ;;  %v14290_v50 = vsub.f32 %v13990_v46, %v21078_v38  ;;  %v21081_v41 = vand.u32 4294901760, %v14027_v40 }
  0x7c   : > { %11570 = vmatpush3.bf16.msra.mxu0 %v11569_v17  ;;  %v14295_v56 = vsub.f32 %v14001_v11, %v21079_v3  ;;  %v14302_v17 = vsub.f32 %v14022_v2, %v21080_v22  ;;  %v1506_v22 = vand.u32 4294901760, %v14174_v9 }
  0x7d   : > { %11572 = vmatprep.subr.bf16.mxu0 %v11571_v39  ;;  %11386 = vmatpush3.bf16.msra.mxu1 %v11385_v51  ;;  %v14307_v46 = vsub.f32 %v14027_v40, %v21081_v41  ;;  %v11577_v11 = vpack.c.bf16 %v14283_v24, %v14278_v42  ;;  %v21082_v39 = vand.u32 4294901760, %v14040_v34  ;;  %v21083_v51 = vand.u32 4294901760, %v14045_v57 }
  0x7e   : > { %11388 = vmatprep.subr.bf16.mxu1 %v11387_v58  ;;  %v11579_v40 = vpack.c.bf16 %v14295_v56, %v14290_v50  ;;  %v14326_v58 = vsub.f32 %v14050_v61, %v21084_v32  ;;  %v1597_v61 = vand.u32 4294901760, %v14055_v48  ;;  %v1625_v41 = vand.u32 4294901760, %v14193_v43 }
  0x7f   : > { %v14314_v60 = vsub.f32 %v14040_v34, %v21082_v39  ;;  %v14319_v2 = vsub.f32 %v14045_v57, %v21083_v51  ;;  %v14334_v34 = vsub.f32 %v14076_v5, %v1416_v53  ;;  %v11581_v57 = vpack.c.bf16 %v14307_v46, %v14302_v17 }
  0x80   : > { %11574 = vmatpush3.bf16.msra.mxu0 %v11573_v33  ;;  %v1604_v33 = vand.u32 4294901760, %v14069_v20  ;;  %v1492_v5 = vand.u32 4294901760, %v14123_v21  ;;  %v1611_v53 = vand.u32 4294901760, %v14148_v27  ;;  %v21092_v51 = vand.u32 4294901760, %v14205_v7 }
  0x81   : > { %11576 = vmatprep.subr.bf16.mxu0 %v11575_v25  ;;  %11390 = vmatpush3.bf16.msra.mxu1 %v11389_v4  ;;  %v11583_v44 = vpack.c.bf16 %v14319_v2, %v14314_v60  ;;  %v21086_v4 = vld [vmem:[#allocation5_spill] sm:$0xff]  ;;  %v1499_v25 = vand.u32 4294901760, %v14161_v29 }
  0x82   : > { %11392 = vmatprep.subr.bf16.mxu1 %v11391_v49  ;;  %v11585_v49 = vpack.c.bf16 %v14334_v34, %v14326_v58  ;;  %v11619_v38 = vpack.c.bf16 %v1604_v33, %v1597_v61  ;;  %v11621_v3 = vpack.c.bf16 %v1492_v5, %v1485_v37  ;;  %v11623_v39 = vpack.c.bf16 %v1618_v63, %v1611_v53 }
  0x83   : > { %v1605_v19 = vsub.f32 %v14069_v20, %v1604_v33  ;;  %v1493_v32 = vsub.f32 %v14123_v21, %v1492_v5  ;;  %v11627_v20 = vpack.c.bf16 %v1632_v31, %v1625_v41  ;;  %v1487_v33 = vand.u32 4294901760, %v1486_v28  ;;  %v21096_v28 = vld [vmem:[#allocation11_spill] sm:$0xff] }
  0x84   : > { %11578 = vmatpush3.bf16.msra.mxu0 %v11577_v11  ;;  %v21087_v11 = vld [vmem:[#allocation26_spill] sm:$0xff]  ;;  %v11629_v21 = vpack.c.bf16 %v21093_v15, %v21092_v51  ;;  %v21094_v37 = vand.u32 4294901760, %v14217_v18  ;;  %v21095_v5 = vand.u32 4294901760, %v14222_v59  ;;  %v1612_v15 = vsub.f32 %v14148_v27, %v1611_v53  ;;  %v21101_v53 = vld [vmem:[#allocation12_spill] sm:$0xff] }
  0x85   : > { %11580 = vmatprep.subr.bf16.mxu0 %v11579_v40  ;;  %11394 = vmatpush3.bf16.msra.mxu1 %v21085_v52  ;;  %v21088_v40 = vld [vmem:[#allocation6_spill] sm:$0xff]  ;;  %v1598_v52 = vsub.f32 %v14055_v48, %v1597_v61  ;;  %v1606_v48 = vand.u32 4294901760, %v1605_v19  ;;  %v11625_v61 = vpack.c.bf16 %v1506_v22, %v1499_v25  ;;  %v1541_v19 = vand.u32 4294901760, %v14254_v13 }
  0x86   : > { %11396 = vmatprep.subr.bf16.mxu1 %v21086_v4  ;;  %v1507_v27 = vsub.f32 %v14174_v9, %v1506_v22  ;;  %v21104_v22 = vand.u32 4294901760, %v14271_v12 }
  0x88   : > { %11582 = vmatpush3.bf16.msra.mxu0 %v11581_v57  ;;  %985 = vmatmul.mubr.f32.vlgmr.msra.gmra.mrb[4].mxu1 %v21087_v11  ;;  %v1508_v9 = vand.u32 4294901760, %v1507_v27  ;;  %v21105_v27 = vand.u32 4294901760, %v14205_v7 }
  0x89   : > { %11584 = vmatprep.subr.bf16.mxu0 %v11583_v44  ;;  %11398 = vmatpush3.bf16.msra.mxu1 %v21088_v40  ;;  %v21089_v44 = vand.u32 4294901760, %v21047_v35  ;;  %v21098_v35 = vand.u32 4294901760, %v14235_v26 }
  0x8a   : > { %11400 = vmatprep.subr.bf16.mxu1 %v21090_v45 }
  0x8b   : > { %1089 = vmatprep.mubr.f32.mxu1 %v21089_v44  ;;  %v1599_v44 = vand.u32 4294901760, %v1598_v52 }
  0x8c   : > { %11586 = vmatpush3.bf16.msra.mxu0 %v11585_v49  ;;  %v1494_v49 = vand.u32 4294901760, %v1493_v32  ;;  %v21097_v32 = vand.u32 4294901760, %v14230_v62 }
  0x8d   : > { %11620 = vmatprep.subr.bf16.mxu0 %v11619_v38  ;;  %11402 = vmatpush3.bf16.msra.mxu1 %v21091_v8  ;;  %v11631_v38 = vpack.c.bf16 %v21095_v5, %v21094_v37  ;;  %v14387_v52 = vpack.c.bf16 %v1606_v48, %v1599_v44  ;;  %v21099_v37 = vand.u32 4294901760, %v14242_v30  ;;  %v21100_v44 = vand.u32 4294901760, %v14247_v1 }
  0x8e   : > { %11404 = vmatprep.subr.bf16.mxu1 %v21096_v28  ;;  %v11633_v57 = vpack.c.bf16 %v21098_v35, %v21097_v32  ;;  %v14395_v51 = vpack.c.bf16 %v1494_v49, %v1487_v33  ;;  %v1619_v35 = vsub.f32 %v14153_v6, %v1618_v63  ;;  %v20213_v32 = vand.u32 4294901760, %v14278_v42 }
  0x8f   : > { %1847 = vmatmul.mubr.f32.vlgmr.msra.gmra.mrb[4].mxu0 %v14134_v55  ;;  %v1548_v55 = vand.u32 4294901760, %v14259_v14  ;;  %v11635_v48 = vpack.c.bf16 %v21100_v44, %v21099_v37  ;;  %v1613_v33 = vand.u32 4294901760, %v1612_v15  ;;  %v1500_v49 = vsub.f32 %v14161_v29, %v1499_v25  ;;  %v369_v37 = vld [vmem:[%s13596_s17 + $0x28] sm:$0xff] }
  0x90   : > { %11622 = vmatpush3.bf16.msra.mxu0 %v11621_v3  ;;  %2121 = vmatprep.mubr.f32.mxu0 %v14107_v36  ;;  %v1620_v44 = vand.u32 4294901760, %v1619_v35  ;;  %v1626_v5 = vsub.f32 %v14193_v43, %v1625_v41  ;;  %v21102_v3 = vld [vmem:[#allocation13_spill] sm:$0xff]  ;;  %v1633_v63 = vsub.f32 %v14198_v10, %v1632_v31  ;;  %v21103_v25 = vand.u32 4294901760, %v14266_v54  ;;  %v21106_v31 = vld [vmem:[#allocation14_spill] sm:$0xff] }
  0x91   : > { %11624 = vmatprep.subr.bf16.mxu0 %v11623_v39  ;;  %11406 = vmatpush3.bf16.msra.mxu1 %v21101_v53  ;;  %v11637_v6 = vpack.c.bf16 %v1548_v55, %v1541_v19  ;;  %v1501_v29 = vand.u32 4294901760, %v1500_v49  ;;  %v20214_v43 = vand.u32 4294901760, %v14295_v56  ;;  %v1514_v10 = vsub.f32 %v14205_v7, %v21105_v27  ;;  %v21110_v7 = vld [vmem:[#allocation15_spill] sm:$0xff] }
  0x92   : > { %11408 = vmatprep.subr.bf16.mxu1 %v21102_v3  ;;  %v11639_v15 = vpack.c.bf16 %v21104_v22, %v21103_v25  ;;  %v14424_v41 = vpack.c.bf16 %v1620_v44, %v1613_v33  ;;  %v1634_v49 = vand.u32 4294901760, %v1633_v63  ;;  %v21108_v33 = vand.u32 4294901760, %v14210_v16 }
  0x93   : > { %v14428_v39 = vpack.c.bf16 %v1508_v9, %v1501_v29  ;;  %v21109_v29 = vand.u32 4294901760, %v14217_v18  ;;  %v1695_v63 = vand.u32 4294901760, %v14314_v60  ;;  %v1515_v27 = vand.u32 4294901760, %v1514_v10 }
  0x94   : > { %11626 = vmatpush3.bf16.msra.mxu0 %v11625_v61  ;;  %v1627_v61 = vand.u32 4294901760, %v1626_v5  ;;  %v1521_v44 = vsub.f32 %v14210_v16, %v21108_v33  ;;  %v1702_v5 = vand.u32 4294901760, %v14319_v2  ;;  %v505_v16 = vmul.f32 %v369_v37, %v369_v37 }
  0x95   : > { %11628 = vmatprep.subr.bf16.mxu0 %v11627_v20  ;;  %11410 = vmatpush3.bf16.msra.mxu1 %v21106_v31  ;;  %v21107_v20 = vand.u32 4294901760, %v14283_v24  ;;  %v1640_v9 = vsub.f32 %v14217_v18, %v21109_v29  ;;  %v21112_v18 = vand.u32 4294901760, %v14290_v50  ;;  %v21114_v10 = vand.u32 4294901760, %v14235_v26 }
  0x96   : > { %11412 = vmatprep.subr.bf16.mxu1 %v21110_v7  ;;  %v14449_v22 = vpack.c.bf16 %v1634_v49, %v1627_v61  ;;  %v1522_v33 = vand.u32 4294901760, %v1521_v44  ;;  %v21113_v61 = vand.u32 4294901760, %v14230_v62  ;;  %v21120_v44 = vand.u32 4294901760, %v14247_v1 }
  0x97   : > { %v14438_v25 = vpack.c.bf16 %v21107_v20, %v20213_v32  ;;  %v21111_v20 = vand.u32 4294901760, %v14222_v59  ;;  %v1641_v35 = vand.u32 4294901760, %v1640_v9  ;;  %v14471_v9 = vld [vmem:[%s20059_s1 + $0x280] sm:$0xff] }
  0x98   : > { %11630 = vmatpush3.bf16.msra.mxu0 %v11629_v21  ;;  %v11643_v21 = vpack.c.bf16 %v20214_v43, %v21112_v18  ;;  %v1528_v49 = vsub.f32 %v14230_v62, %v21113_v61  ;;  %v21118_v18 = vld [vmem:[#allocation17_spill] sm:$0xff]  ;;  %v1661_v37 = vsub.f32 %v14247_v1, %v21120_v44  ;;  %v14484_v43 = vand.u32 4294901760, %v505_v16 }
  0x99   : > { %v1647_v32 = vsub.f32 %v14222_v59, %v21111_v20  ;;  %11632 = vmatprep.subr.bf16.mxu0 %v11631_v38  ;;  %v1535_v59 = vsub.f32 %v14235_v26, %v21114_v10  ;;  %v21115_v38 = vld [vmem:[#allocation16_spill] sm:$0xff]  ;;  %v21117_v20 = vand.u32 4294901760, %v14242_v30  ;;  %v21126_v44 = vand.u32 4294901760, %v14307_v46 }
  0x9a   : > { %11414 = vmatpush3.bf16.msra.mxu1 %v21115_v38  ;;  %v1529_v61 = vand.u32 4294901760, %v1528_v49  ;;  %21121 = vst [vmem:[#allocation10_spill] sm:$0xff] %v14484_v43  ;;  %v21123_v49 = vand.u32 4294901760, %v14266_v54 }
  0x9b   : > { %v1648_v29 = vand.u32 4294901760, %v1647_v32  ;;  %v14473_v32 = vpack.c.bf16 %v1522_v33, %v1515_v27  ;;  %v1654_v62 = vsub.f32 %v14242_v30, %v21117_v20  ;;  %11416 = vmatprep.subr.bf16.mxu1 %v21118_v18  ;;  %v1536_v10 = vand.u32 4294901760, %v1535_v59 }
  0x9c   : > { %11634 = vmatpush3.bf16.msra.mxu0 %v11633_v57  ;;  %v1542_v33 = vsub.f32 %v14254_v13, %v1541_v19  ;;  %v1549_v30 = vsub.f32 %v14259_v14, %v1548_v55  ;;  %v20216_v57 = vand.u32 4294901760, %v14471_v9  ;;  %v1668_v1 = vsub.f32 %v14266_v54, %v21123_v49 }
  0x9d   : > { %21116 = vst [vmem:[#allocation28_spill] sm:$0xff] %v14473_v32  ;;  %v14479_v26 = vpack.c.bf16 %v1648_v29, %v1641_v35  ;;  %11636 = vmatprep.subr.bf16.mxu0 %v11635_v48  ;;  %v1655_v27 = vand.u32 4294901760, %v1654_v62  ;;  %v14493_v35 = vpack.c.bf16 %v1536_v10, %v1529_v61  ;;  %v1662_v29 = vand.u32 4294901760, %v1661_v37  ;;  %v21124_v48 = vld [vmem:[#allocation18_spill] sm:$0xff]  ;;  %v21128_v62 = vld [vmem:[#allocation19_spill] sm:$0xff] }
  0x9e   : > { %11418 = vmatpush3.bf16.msra.mxu1 %v21124_v48  ;;  %v21125_v59 = vand.u32 4294901760, %v14302_v17  ;;  %v1543_v19 = vand.u32 4294901760, %v1542_v33  ;;  %v1550_v20 = vand.u32 4294901760, %v1549_v30  ;;  %v21127_v55 = vand.u32 4294901760, %v14271_v12  ;;  %v14518_v33 = vld [vmem:[%s20059_s1 + $0x288] sm:$0xff] }
  0x9f   : > { %21119 = vst [vmem:[#allocation9_spill] sm:$0xff] %v14479_v26  ;;  %21122 = vst [vmem:[#allocation20_spill] sm:$0xff] %v14493_v35  ;;  %11420 = vmatprep.subr.bf16.mxu1 %v21128_v62  ;;  %v14507_v37 = vpack.c.bf16 %v1662_v29, %v1655_v27  ;;  %v1669_v61 = vand.u32 4294901760, %v1668_v1  ;;  %v21130_v54 = vand.u32 4294901760, %v14278_v42  ;;  %v21131_v49 = vand.u32 4294901760, %v14283_v24 }
  0xa0   : > { %v11645_v13 = vpack.c.bf16 %v21126_v44, %v21125_v59  ;;  %v1675_v14 = vsub.f32 %v14271_v12, %v21127_v55  ;;  %11638 = vmatpush3.bf16.msra.mxu0 %v11637_v6  ;;  %v14521_v12 = vsub.f32 %v505_v16, %v14484_v43  ;;  %v14523_v6 = vpack.c.bf16 %v1550_v20, %v1543_v19  ;;  %v21136_v16 = vld [vmem:[#allocation21_spill] sm:$0xff] }
  0xa1   : > { %21129 = vst [vmem:[#allocation25_spill] sm:$0xff] %v14507_v37  ;;  %v1556_v10 = vsub.f32 %v14278_v42, %v21130_v54  ;;  %v1563_v59 = vsub.f32 %v14283_v24, %v21131_v49  ;;  %11640 = vmatprep.subr.bf16.mxu0 %v11639_v15  ;;  %v21134_v30 = vand.u32 4294901760, %v14290_v50  ;;  %v11647_v24 = vpack.c.bf16 %v1702_v5, %v1695_v63 }
  0xa2   : > { %21132 = vst [vmem:[#allocation30_spill] sm:$0xff] %v14521_v12  ;;  %21133 = vst [vmem:[#allocation32_spill] sm:$0xff] %v14523_v6  ;;  %v1676_v27 = vand.u32 4294901760, %v1675_v14  ;;  %v21135_v1 = vand.u32 4294901760, %v14295_v56  ;;  %11422 = vmatpush3.bf16.msra.mxu1 %v21136_v16  ;;  %v21138_v55 = vand.u32 4294901760, %v14302_v17  ;;  %v21139_v14 = vand.u32 4294901760, %v14307_v46 }
  0xa3   : > { %v1682_v42 = vsub.f32 %v14290_v50, %v21134_v30  ;;  %v1557_v15 = vand.u32 4294901760, %v1556_v10  ;;  %v1564_v29 = vand.u32 4294901760, %v1563_v59  ;;  %v21140_v10 = vld [vmem:[#allocation22_spill] sm:$0xff]  ;;  %v20215_v49 = vand.u32 4294901760, %v14518_v33 }
  0xa4   : > { %v1689_v44 = vsub.f32 %v14295_v56, %v21135_v1  ;;  %v14536_v19 = vpack.c.bf16 %v1676_v27, %v1669_v61  ;;  %v1570_v50 = vsub.f32 %v14302_v17, %v21138_v55  ;;  %v1577_v54 = vsub.f32 %v14307_v46, %v21139_v14  ;;  %11642 = vmatpush3.bf16.msra.mxu0 %v14438_v25  ;;  %v14550_v56 = vld [vmem:[%s20059_s1 + $0x200] sm:$0xff]  ;;  %v14560_v46 = vld [vmem:[%s20059_s1 + $0x208] sm:$0xff]  ;;  %v14565_v25 = vld [vmem:[%s20059_s1 + $0x290] sm:$0xff] }
  0xa5   : > { %v1683_v20 = vand.u32 4294901760, %v1682_v42  ;;  %11424 = vmatprep.subr.bf16.mxu1 %v21140_v10  ;;  %v14552_v61 = vpack.c.bf16 %v1564_v29, %v1557_v15  ;;  %v1696_v17 = vsub.f32 %v14314_v60, %v1695_v63  ;;  %11644 = vmatprep.subr.bf16.mxu0 %v11643_v21  ;;  %v1703_v15 = vsub.f32 %v14319_v2, %v1702_v5  ;;  %v14574_v60 = vld [vmem:[%s20059_s1 + $0x298] sm:$0xff] }
  0xa6   : > { %21137 = vst [vmem:[#allocation33_spill] sm:$0xff] %v14536_v19  ;;  %v1690_v59 = vand.u32 4294901760, %v1689_v44  ;;  %v1571_v30 = vand.u32 4294901760, %v1570_v50  ;;  %v1578_v42 = vand.u32 4294901760, %v1577_v54  ;;  %v21143_v29 = vand.u32 4294901760, %v14326_v58  ;;  %v21145_v50 = vld [vmem:[#allocation23_spill] sm:$0xff] }
  0xa7   : > { %21141 = vst [vmem:[#allocation34_spill] sm:$0xff] %v14552_v61  ;;  %v1697_v21 = vand.u32 4294901760, %v1696_v17  ;;  %v21144_v44 = vand.u32 4294901760, %v14334_v34  ;;  %11426 = vmatpush3.bf16.msra.mxu1 %v21145_v50  ;;  %v2233_v54 = vand.u32 4294901760, %v14550_v56  ;;  %v2236_v17 = vand.u32 4294901760, %v14560_v46 }
  0xa8   : > { %v14576_v63 = vpack.c.bf16 %v1690_v59, %v1683_v20  ;;  %v1584_v1 = vsub.f32 %v14326_v58, %v21143_v29  ;;  %v21146_v2 = vmov %v21143_v29  ;;  %v14590_v20 = vpack.c.bf16 %v1578_v42, %v1571_v30  ;;  %11646 = vmatpush3.bf16.msra.mxu0 %v11645_v13  ;;  %11460 = vmatprep.subr.bf16.mxu1 %v21086_v4  ;;  %v438_v13 = vld [vmem:[%s20059_s1 + $0x210] sm:$0xff]  ;;  %v439_v4 = vld [vmem:[%s20059_s1 + $0x218] sm:$0xff] }
  0xa9   : > { %v1591_v55 = vsub.f32 %v14334_v34, %v21144_v44  ;;  %v21147_v5 = vmov %v21144_v44  ;;  %v1704_v59 = vand.u32 4294901760, %v1703_v15  ;;  %v2287_v29 = vand.u32 4294901760, %v14565_v25  ;;  %11648 = vmatprep.subr.bf16.mxu0 %v11647_v24 }
  0xaa   : > { %21142 = vst [vmem:[#allocation36_spill] sm:$0xff] %v14576_v63  ;;  %v11649_v14 = vpack.c.bf16 %v21147_v5, %v21146_v2  ;;  %21148 = vst [vmem:[#allocation37_spill] sm:$0xff] %v14590_v20  ;;  %v1585_v44 = vand.u32 4294901760, %v1584_v1  ;;  %v14599_v58 = vpack.c.bf16 %v20215_v49, %v20216_v57  ;;  %v2290_v34 = vand.u32 4294901760, %v14574_v60  ;;  %v456_v1 = vld [vmem:[%s20059_s1 + $0x2a0] sm:$0xff]  ;;  %v21154_v5 = vld [vmem:[#allocation24_spill] sm:$0xff] }
  0xab   : > { %v1592_v27 = vand.u32 4294901760, %v1591_v55  ;;  %v21150_v30 = vand.u32 4294901760, %v14521_v12  ;;  %v14611_v42 = vpack.c.bf16 %v1704_v59, %v1697_v21  ;;  %v21152_v15 = vand.u32 4294901760, %v21087_v11  ;;  %v457_v55 = vld [vmem:[%s20059_s1 + $0x2a8] sm:$0xff] }
  0xac   : > { %21149 = vst [vmem:[#allocation39_spill] sm:$0xff] %v14599_v58  ;;  %11650 = vmatpush3.bf16.msra.mxu0 %v11649_v14  ;;  %v14626_v11 = vpack.c.bf16 %v2236_v17, %v2233_v54  ;;  %v2239_v21 = vand.u32 4294901760, %v438_v13  ;;  %v2242_v59 = vand.u32 4294901760, %v439_v4  ;;  %v2296_v49 = vand.u32 4294901760, %v457_v55 }
  0xad   : > { %v2331_v24 = vsub.f32 %v14521_v12, %v21150_v30  ;;  %21151 = vst [vmem:[#allocation41_spill] sm:$0xff] %v14611_v42  ;;  %1093 = vmatmul.mubr.f32.vlgmr.msra.gmra.mrb[6].mxu1 %v21152_v15  ;;  %v14621_v2 = vpack.c.bf16 %v1592_v27, %v1585_v44  ;;  %11684 = vmatprep.subr.bf16.mxu0 %v14599_v58  ;;  %v2293_v15 = vand.u32 4294901760, %v456_v1  ;;  %v441_v27 = vld [vmem:[%s20059_s1 + $0x228] sm:$0xff]  ;;  %v459_v44 = vld [vmem:[%s20059_s1 + $0x2b8] sm:$0xff]  ;;  %v21159_v42 = vand.u32 4294901760, %v14471_v9 }
  0xae   : > { %11462 = vmatpush3.bf16.msra.mxu1 %v21088_v40  ;;  %1363 = vmatprep.mubr.f32.mxu1 %v21154_v5  ;;  %21155 = vst [vmem:[#allocation44_spill] sm:$0xff] %v14626_v11  ;;  %v14629_v30 = vpack.c.bf16 %v2290_v34, %v2287_v29  ;;  %v440_v40 = vld [vmem:[%s20059_s1 + $0x220] sm:$0xff]  ;;  %v14648_v57 = vpack.c.bf16 %v2242_v59, %v2239_v21  ;;  %v2248_v58 = vand.u32 4294901760, %v441_v27  ;;  %v21160_v63 = vand.u32 4294901760, %v14518_v33 }
  0xaf   : > { %21153 = vst [vmem:[#allocation42_spill] sm:$0xff] %v14621_v2  ;;  %11464 = vmatprep.subr.bf16.mxu1 %v21090_v45  ;;  %v2332_v14 = vand.u32 4294901760, %v2331_v24  ;;  %v458_v45 = vld [vmem:[%s20059_s1 + $0x2b0] sm:$0xff]  ;;  %2123 = vmatmul.mubr.f32.vlgmr.msra.gmra.mrb[6].mxu0 %v14109_v23  ;;  %v368_v5 = vld [vmem:[%s13596_s17 + $0x20] sm:$0xff]  ;;  %v2245_v24 = vand.u32 4294901760, %v440_v40  ;;  %v14651_v43 = vpack.c.bf16 %v2296_v49, %v2293_v15  ;;  %v2302_v2 = vand.u32 4294901760, %v459_v44 }
  0xb0   : > { %21156 = vst [vmem:[#allocation45_spill] sm:$0xff] %v14629_v30  ;;  %11686 = vmatpush3.bf16.msra.mxu0 %v14626_v11  ;;  %21157 = vst [vmem:[#allocation47_spill] sm:$0xff] %v14648_v57  ;;  %v2299_v0 = vand.u32 4294901760, %v458_v45  ;;  %v442_v23 = vld [vmem:[%s20059_s1 + $0x230] sm:$0xff]  ;;  %v504_v11 = vmul.f32 %v368_v5, %v368_v5  ;;  %v14668_v20 = vsub.f32 %v14471_v9, %v21159_v42 }
  0xb1   : > { %11688 = vmatprep.subr.bf16.mxu0 %v14629_v30  ;;  %21158 = vst [vmem:[#allocation49_spill] sm:$0xff] %v14651_v43  ;;  %2333 = vmatprep.mubr.f32.mxu0 %v2332_v14  ;;  %v461_v30 = vld [vmem:[%s20059_s1 + $0x2c8] sm:$0xff]  ;;  %v14673_v61 = vsub.f32 %v14518_v33, %v21160_v63  ;;  %v14676_v14 = vsub.f32 %v14550_v56, %v2233_v54  ;;  %v2251_v42 = vand.u32 4294901760, %v442_v23  ;;  %v444_v56 = vld [vmem:[%s20059_s1 + $0x240] sm:$0xff] }
  0xb2   : > { %11466 = vmatpush3.bf16.msra.mxu1 %v21091_v8  ;;  %v443_v8 = vld [vmem:[%s20059_s1 + $0x238] sm:$0xff]  ;;  %v14679_v19 = vsub.f32 %v14560_v46, %v2236_v17  ;;  %v14683_v5 = vsub.f32 %v14565_v25, %v2287_v29  ;;  %v14687_v9 = vpack.c.bf16 %v2248_v58, %v2245_v24  ;;  %v445_v46 = vld [vmem:[%s20059_s1 + $0x248] sm:$0xff]  ;;  %v14699_v25 = vpack.c.bf16 %v2302_v2, %v2299_v0 }
  0xb3   : > { %11468 = vmatprep.subr.bf16.mxu1 %v21096_v28  ;;  %v460_v28 = vld [vmem:[%s20059_s1 + $0x2c0] sm:$0xff]  ;;  %v2254_v33 = vand.u32 4294901760, %v443_v8  ;;  %v2308_v63 = vand.u32 4294901760, %v461_v30  ;;  %v14701_v54 = vsub.f32 %v438_v13, %v2239_v21  ;;  %v14703_v17 = vsub.f32 %v439_v4, %v2242_v59 }
  0xb4   : > { %11690 = vmatpush3.bf16.msra.mxu0 %v14648_v57  ;;  %21161 = vst [vmem:[#allocation50_spill] sm:$0xff] %v14687_v9  ;;  %21162 = vst [vmem:[#allocation5_spill] sm:$0xff] %v14699_v25  ;;  %v14705_v29 = vsub.f32 %v456_v1, %v2293_v15  ;;  %v462_v57 = vld [vmem:[%s20059_s1 + $0x2d0] sm:$0xff]  ;;  %v14718_v13 = vsub.f32 %v440_v40, %v2245_v24  ;;  %v2257_v4 = vand.u32 4294901760, %v444_v56  ;;  %v2260_v21 = vand.u32 4294901760, %v445_v46 }
  0xb5   : > { %11692 = vmatprep.subr.bf16.mxu0 %v14651_v43  ;;  %v14715_v43 = vsub.f32 %v457_v55, %v2296_v49  ;;  %v14721_v1 = vsub.f32 %v441_v27, %v2248_v58  ;;  %v14724_v59 = vsub.f32 %v458_v45, %v2299_v0  ;;  %v14726_v15 = vpack.c.bf16 %v2254_v33, %v2251_v42  ;;  %v446_v49 = vld [vmem:[%s20059_s1 + $0x250] sm:$0xff]  ;;  %v464_v0 = vld [vmem:[%s20059_s1 + $0x2e0] sm:$0xff]  ;;  %v465_v27 = vld [vmem:[%s20059_s1 + $0x2e8] sm:$0xff] }
  0xb6   : > { %11470 = vmatpush3.bf16.msra.mxu1 %v21101_v53  ;;  %v14696_v53 = vsub.f32 %v14574_v60, %v2290_v34  ;;  %v463_v60 = vld [vmem:[%s20059_s1 + $0x2d8] sm:$0xff]  ;;  %v14713_v34 = vand.u32 4294901760, %v504_v11  ;;  %v14735_v55 = vsub.f32 %v459_v44, %v2302_v2  ;;  %v2311_v40 = vand.u32 4294901760, %v462_v57  ;;  %v448_v2 = vld [vmem:[%s20059_s1 + $0x260] sm:$0xff]  ;;  %v449_v44 = vld [vmem:[%s20059_s1 + $0x268] sm:$0xff] }
  0xb7   : > { %11472 = vmatprep.subr.bf16.mxu1 %v21102_v3  ;;  %v2305_v3 = vand.u32 4294901760, %v460_v28  ;;  %21164 = vst [vmem:[#allocation6_spill] sm:$0xff] %v14726_v15  ;;  %v14745_v45 = vsub.f32 %v442_v23, %v2251_v42  ;;  %v14747_v24 = vsub.f32 %v443_v8, %v2254_v33  ;;  %v14761_v6 = vsub.f32 %v461_v30, %v2308_v63  ;;  %v466_v42 = vld [vmem:[%s20059_s1 + $0x2f0] sm:$0xff]  ;;  %v467_v33 = vld [vmem:[%s20059_s1 + $0x2f8] sm:$0xff] }
  0xb8   : > { %21163 = vst [vmem:[#allocation26_spill] sm:$0xff] %v14713_v34  ;;  %11694 = vmatpush3.bf16.msra.mxu0 %v14687_v9  ;;  %v14763_v23 = vpack.c.bf16 %v2260_v21, %v2257_v4  ;;  %v2263_v8 = vand.u32 4294901760, %v446_v49  ;;  %v2317_v30 = vand.u32 4294901760, %v464_v0 }
  0xb9   : > { %11696 = vmatprep.subr.bf16.mxu0 %v14699_v25  ;;  %v14737_v58 = vpack.c.bf16 %v2308_v63, %v2305_v3  ;;  %v14749_v9 = vsub.f32 %v460_v28, %v2305_v3  ;;  %v14758_v25 = vsub.f32 %v504_v11, %v14713_v34  ;;  %v14773_v11 = vsub.f32 %v444_v56, %v2257_v4  ;;  %v450_v63 = vld [vmem:[%s20059_s1 + $0x270] sm:$0xff]  ;;  %v451_v34 = vld [vmem:[%s20059_s1 + $0x278] sm:$0xff] }
  0xba   : > { %11474 = vmatpush3.bf16.msra.mxu1 %v21106_v31  ;;  %v447_v31 = vld [vmem:[%s20059_s1 + $0x258] sm:$0xff]  ;;  %21167 = vst [vmem:[#allocation11_spill] sm:$0xff] %v14763_v23  ;;  %v2320_v3 = vand.u32 4294901760, %v465_v27  ;;  %v2272_v56 = vand.u32 4294901760, %v449_v44  ;;  %v2323_v4 = vand.u32 4294901760, %v466_v42  ;;  %v14794_v32 = vsub.f32 %v446_v49, %v2263_v8 }
  0xbb   : > { %11476 = vmatprep.subr.bf16.mxu1 %v21110_v7  ;;  %21165 = vst [vmem:[#allocation7_spill] sm:$0xff] %v14737_v58  ;;  %v2314_v7 = vand.u32 4294901760, %v463_v60  ;;  %21166 = vst [vmem:[#allocation8_spill] sm:$0xff] %v14758_v25  ;;  %v2266_v28 = vand.u32 4294901760, %v447_v31  ;;  %v2275_v12 = vand.u32 4294901760, %v450_v63 }
  0xbc   : > { %11698 = vmatpush3.bf16.msra.mxu0 %v14726_v15  ;;  %v14786_v15 = vsub.f32 %v462_v57, %v2311_v40 }
  0xbd   : > { %11700 = vmatprep.subr.bf16.mxu0 %v14737_v58  ;;  %v14784_v37 = vpack.c.bf16 %v2314_v7, %v2311_v40  ;;  %v14792_v26 = vpack.c.bf16 %v2266_v28, %v2263_v8  ;;  %v2278_v58 = vand.u32 4294901760, %v451_v34  ;;  %v14798_v57 = vsub.f32 %v447_v31, %v2266_v28 }
  0xbe   : > { %11478 = vmatpush3.bf16.msra.mxu1 %v21115_v38  ;;  %v14775_v38 = vsub.f32 %v445_v46, %v2260_v21  ;;  %v14788_v46 = vsub.f32 %v463_v60, %v2314_v7  ;;  %v2326_v21 = vand.u32 4294901760, %v467_v33  ;;  %v14800_v60 = vpack.c.bf16 %v2320_v3, %v2317_v30 }
  0xbf   : > { %11480 = vmatprep.subr.bf16.mxu1 %v21118_v18  ;;  %21168 = vst [vmem:[#allocation12_spill] sm:$0xff] %v14784_v37  ;;  %v2269_v18 = vand.u32 4294901760, %v448_v2  ;;  %21169 = vst [vmem:[#allocation13_spill] sm:$0xff] %v14792_v26  ;;  %v14802_v40 = vsub.f32 %v464_v0, %v2317_v30  ;;  %v14805_v7 = vsub.f32 %v465_v27, %v2320_v3  ;;  %v21173_v31 = vand.u32 4294901760, %v14758_v25 }
  0xc0   : > { %11702 = vmatpush3.bf16.msra.mxu0 %v14763_v23  ;;  %21170 = vst [vmem:[#allocation14_spill] sm:$0xff] %v14800_v60  ;;  %v14811_v8 = vsub.f32 %v449_v44, %v2272_v56  ;;  %v14813_v35 = vpack.c.bf16 %v2326_v21, %v2323_v4  ;;  %v14815_v23 = vsub.f32 %v466_v42, %v2323_v4  ;;  %v20246_v44 = vand.u32 4294901760, %v14673_v61 }
  0xc1   : > { %11704 = vmatprep.subr.bf16.mxu0 %v14784_v37  ;;  %v14809_v49 = vsub.f32 %v448_v2, %v2269_v18  ;;  %v14822_v0 = vsub.f32 %v14758_v25, %v21173_v31  ;;  %v14825_v27 = vpack.c.bf16 %v2278_v58, %v2275_v12  ;;  %v14827_v28 = vsub.f32 %v450_v63, %v2275_v12 }
  0xc2   : > { %11482 = vmatpush3.bf16.msra.mxu1 %v21124_v48  ;;  %v14807_v48 = vpack.c.bf16 %v2272_v56, %v2269_v18  ;;  %21172 = vst [vmem:[#allocation16_spill] sm:$0xff] %v14813_v35  ;;  %v20249_v2 = vand.u32 4294901760, %v14668_v20  ;;  %v14833_v42 = vsub.f32 %v451_v34, %v2278_v58  ;;  %v20247_v30 = vand.u32 4294901760, %v14676_v14 }
  0xc3   : > { %11484 = vmatprep.subr.bf16.mxu1 %v21128_v62  ;;  %v14817_v62 = vsub.f32 %v467_v33, %v2326_v21  ;;  %21174 = vst [vmem:[#allocation17_spill] sm:$0xff] %v14825_v27  ;;  %v11747_v33 = vpack.c.bf16 %v14673_v61, %v14668_v20  ;;  %v11751_v12 = vpack.c.bf16 %v14696_v53, %v14683_v5  ;;  %v20248_v3 = vand.u32 4294901760, %v14679_v19 }
  0xc4   : > { %21171 = vst [vmem:[#allocation15_spill] sm:$0xff] %v14807_v48  ;;  %11706 = vmatpush3.bf16.msra.mxu0 %v14792_v26  ;;  %v2467_v34 = vsub.f32 %v14673_v61, %v20246_v44  ;;  %v2338_v58 = vand.u32 4294901760, %v14822_v0  ;;  %v2348_v31 = vsub.f32 %v14676_v14, %v20247_v30  ;;  %v21210_v26 = vld [vmem:[#allocation34_spill] sm:$0xff] }
  0xc5   : > { %11708 = vmatprep.subr.bf16.mxu0 %v14800_v60  ;;  %v2355_v0 = vsub.f32 %v14679_v19, %v20248_v3  ;;  %v21209_v60 = vand.u32 4294901760, %v14811_v8 }
  0xc6   : > { %11486 = vmatpush3.bf16.msra.mxu1 %v21136_v16  ;;  %v11749_v16 = vpack.c.bf16 %v14679_v19, %v14676_v14  ;;  %v2468_v21 = vand.u32 4294901760, %v2467_v34  ;;  %v20250_v34 = vand.u32 4294901760, %v14696_v53 }
  0xc7   : > { %11488 = vmatprep.subr.bf16.mxu1 %v21140_v10  ;;  %v2460_v10 = vsub.f32 %v14668_v20, %v20249_v2  ;;  %v2349_v2 = vand.u32 4294901760, %v2348_v31  ;;  %v2356_v56 = vand.u32 4294901760, %v2355_v0  ;;  %v20254_v0 = vand.u32 4294901760, %v14715_v43 }
  0xc8   : > { %11710 = vmatpush3.bf16.msra.mxu0 %v14807_v48  ;;  %v2481_v30 = vsub.f32 %v14696_v53, %v20250_v34  ;;  %v20256_v34 = vand.u32 4294901760, %v14718_v13 }
  0xc9   : > { %v2461_v4 = vand.u32 4294901760, %v2460_v10  ;;  %v20251_v10 = vand.u32 4294901760, %v14683_v5  ;;  %11712 = vmatprep.subr.bf16.mxu0 %v14813_v35  ;;  %v14893_v31 = vpack.c.bf16 %v2356_v56, %v2349_v2 }
  0xca   : > { %11490 = vmatpush3.bf16.msra.mxu1 %v21145_v50  ;;  %v20257_v50 = vand.u32 4294901760, %v14721_v1 }
  0xcb   : > { %11524 = vmatprep.subr.bf16.mxu1 %v14387_v52  ;;  %v14875_v3 = vpack.c.bf16 %v2468_v21, %v2461_v4  ;;  %v2474_v44 = vsub.f32 %v14683_v5, %v20251_v10  ;;  %v20253_v4 = vand.u32 4294901760, %v14703_v17  ;;  %v20255_v21 = vand.u32 4294901760, %v14705_v29  ;;  %21176 = vst [vmem:[#allocation19_spill] sm:$0xff] %v14893_v31 }
  0xcc   : > { %11714 = vmatpush3.bf16.msra.mxu0 %v14825_v27  ;;  %v20258_v52 = vand.u32 4294901760, %v14724_v59  ;;  %v21198_v27 = vand.u32 4294901760, %v14794_v32 }
  0xcd   : > { %21175 = vst [vmem:[#allocation18_spill] sm:$0xff] %v14875_v3  ;;  %1365 = vmatmul.mubr.f32.vlgmr.msra.gmra.mrb[8].mxu1 %v13683_v47  ;;  %v20252_v47 = vand.u32 4294901760, %v14701_v54  ;;  %v2475_v10 = vand.u32 4294901760, %v2474_v44  ;;  %11748 = vmatprep.subr.bf16.mxu0 %v11747_v33  ;;  %v2369_v56 = vsub.f32 %v14703_v17, %v20253_v4  ;;  %v2488_v44 = vsub.f32 %v14705_v29, %v20255_v21 }
  0xce   : > { %11526 = vmatpush3.bf16.msra.mxu1 %v14395_v51  ;;  %1707 = vmatprep.mubr.f32.mxu1 %v14107_v36  ;;  %v2482_v51 = vand.u32 4294901760, %v2481_v30  ;;  %v20260_v33 = vand.u32 4294901760, %v14747_v24  ;;  %v2495_v4 = vsub.f32 %v14715_v43, %v20254_v0 }
  0xcf   : > { %11528 = vmatprep.subr.bf16.mxu1 %v14424_v41  ;;  %v2362_v2 = vsub.f32 %v14701_v54, %v20252_v47  ;;  %v20259_v41 = vand.u32 4294901760, %v14735_v55  ;;  %2339 = vmatmul.mubr.f32.vlgmr.msra.gmra.mrb[8].mxu0 %v2338_v58  ;;  %v2370_v47 = vand.u32 4294901760, %v2369_v56  ;;  %v2489_v18 = vand.u32 4294901760, %v2488_v44  ;;  %v21178_v58 = vld [vmem:[#allocation30_spill] sm:$0xff]  ;;  %v21187_v44 = vld [vmem:[#allocation20_spill] sm:$0xff] }
  0xd0   : > { %v14909_v63 = vpack.c.bf16 %v2482_v51, %v2475_v10  ;;  %11750 = vmatpush3.bf16.msra.mxu0 %v11749_v16  ;;  %v20261_v10 = vand.u32 4294901760, %v14749_v9  ;;  %v20262_v51 = vand.u32 4294901760, %v14761_v6  ;;  %2706 = vmatprep.mubr.f32.mxu0 %v21178_v58  ;;  %v2496_v0 = vand.u32 4294901760, %v2495_v4 }
  0xd1   : > { %v2363_v30 = vand.u32 4294901760, %v2362_v2  ;;  %11752 = vmatprep.subr.bf16.mxu0 %v11751_v12  ;;  %v2502_v12 = vsub.f32 %v14724_v59, %v20258_v52  ;;  %v21184_v2 = vand.u32 4294901760, %v14745_v45 }
  0xd2   : > { %21177 = vst [vmem:[#allocation21_spill] sm:$0xff] %v14909_v63  ;;  %11530 = vmatpush3.bf16.msra.mxu1 %v14428_v39  ;;  %v2376_v39 = vsub.f32 %v14718_v13, %v20256_v34  ;;  %v21180_v34 = vld [vmem:[#allocation28_spill] sm:$0xff] }
  0xd3   : > { %11532 = vmatprep.subr.bf16.mxu1 %v14449_v22  ;;  %v14927_v56 = vpack.c.bf16 %v2370_v47, %v2363_v30  ;;  %v2383_v22 = vsub.f32 %v14721_v1, %v20257_v50  ;;  %v14939_v47 = vpack.c.bf16 %v2496_v0, %v2489_v18  ;;  %v2509_v30 = vsub.f32 %v14735_v55, %v20259_v41 }
  0xd4   : > { %v2377_v21 = vand.u32 4294901760, %v2376_v39  ;;  %v21182_v50 = vpack.c.bf16 %v14703_v17, %v14701_v54  ;;  %v21183_v39 = vld [vmem:[#allocation9_spill] sm:$0xff]  ;;  %v2390_v18 = vsub.f32 %v14745_v45, %v21184_v2  ;;  %v21185_v0 = vpack.c.bf16 %v14715_v43, %v14705_v29 }
  0xd5   : > { %21179 = vst [vmem:[#allocation22_spill] sm:$0xff] %v14927_v56  ;;  %21181 = vst [vmem:[#allocation23_spill] sm:$0xff] %v14939_v47  ;;  %v2384_v4 = vand.u32 4294901760, %v2383_v22  ;;  %v2516_v2 = vsub.f32 %v14749_v9, %v20261_v10  ;;  %v21191_v10 = vld [vmem:[#allocation25_spill] sm:$0xff] }
  0xd6   : > { %11534 = vmatpush3.bf16.msra.mxu1 %v21180_v34  ;;  %11754 = vmatpush3.bf16.msra.mxu0 %v21182_v50  ;;  %v2503_v34 = vand.u32 4294901760, %v2502_v12  ;;  %v2510_v50 = vand.u32 4294901760, %v2509_v30  ;;  %v2391_v12 = vand.u32 4294901760, %v2390_v18  ;;  %v21190_v18 = vpack.c.bf16 %v14721_v1, %v14718_v13  ;;  %v494_v56 = vld [vmem:[%s20059_s1 + $0x3d0] sm:$0xff] }
  0xd7   : > { %11536 = vmatprep.subr.bf16.mxu1 %v21183_v39  ;;  %11756 = vmatprep.subr.bf16.mxu0 %v21185_v0  ;;  %v14957_v41 = vpack.c.bf16 %v2384_v4, %v2377_v21  ;;  %v2397_v39 = vsub.f32 %v14747_v24, %v20260_v33  ;;  %v2523_v0 = vsub.f32 %v14761_v6, %v20262_v51  ;;  %v21189_v33 = vand.u32 4294901760, %v14773_v11 }
  0xd8   : > { %v14971_v4 = vpack.c.bf16 %v2510_v50, %v2503_v34  ;;  %v2517_v51 = vand.u32 4294901760, %v2516_v2  ;;  %v21193_v50 = vpack.c.bf16 %v14735_v55, %v14724_v59  ;;  %v21195_v21 = vand.u32 4294901760, %v14786_v15 }
  0xd9   : > { %21186 = vst [vmem:[#allocation24_spill] sm:$0xff] %v14957_v41  ;;  %v2398_v30 = vand.u32 4294901760, %v2397_v39  ;;  %v2404_v52 = vsub.f32 %v14773_v11, %v21189_v33  ;;  %v2524_v16 = vand.u32 4294901760, %v2523_v0 }
  0xda   : > { %11538 = vmatpush3.bf16.msra.mxu1 %v21187_v44  ;;  %21188 = vst [vmem:[#allocation28_spill] sm:$0xff] %v14971_v4  ;;  %11758 = vmatpush3.bf16.msra.mxu0 %v21190_v18  ;;  %v21192_v44 = vand.u32 4294901760, %v14775_v38  ;;  %v2530_v18 = vsub.f32 %v14786_v15, %v21195_v21  ;;  %v21200_v21 = vand.u32 4294901760, %v14798_v57 }
  0xdb   : > { %11540 = vmatprep.subr.bf16.mxu1 %v21191_v10  ;;  %11760 = vmatprep.subr.bf16.mxu0 %v21193_v50  ;;  %v14987_v39 = vpack.c.bf16 %v2398_v30, %v2391_v12  ;;  %v2405_v33 = vand.u32 4294901760, %v2404_v52  ;;  %v21196_v10 = vand.u32 4294901760, %v14788_v46  ;;  %v14996_v22 = vpack.c.bf16 %v2524_v16, %v2517_v51  ;;  %v21199_v12 = vld [vmem:[#allocation32_spill] sm:$0xff]  ;;  %v21202_v51 = vld [vmem:[#allocation33_spill] sm:$0xff] }
  0xdc   : > { %v2411_v34 = vsub.f32 %v14775_v38, %v21192_v44  ;;  %v2418_v50 = vsub.f32 %v14794_v32, %v21198_v27  ;;  %v2531_v30 = vand.u32 4294901760, %v2530_v18  ;;  %v2425_v48 = vsub.f32 %v14798_v57, %v21200_v21 }
  0xdd   : > { %21194 = vst [vmem:[#allocation9_spill] sm:$0xff] %v14987_v39  ;;  %v2537_v2 = vsub.f32 %v14788_v46, %v21196_v10  ;;  %21197 = vst [vmem:[#allocation20_spill] sm:$0xff] %v14996_v22  ;;  %v21201_v10 = vpack.c.bf16 %v14747_v24, %v14745_v45  ;;  %v21204_v27 = vand.u32 4294901760, %v14802_v40  ;;  %v21205_v18 = vand.u32 4294901760, %v14805_v7  ;;  %v21278_v22 = vld [vmem:[#allocation48_spill] sm:$0xff] }
  0xde   : > { %v2412_v44 = vand.u32 4294901760, %v2411_v34  ;;  %11542 = vmatpush3.bf16.msra.mxu1 %v21199_v12  ;;  %v2419_v34 = vand.u32 4294901760, %v2418_v50  ;;  %v21206_v21 = vpack.c.bf16 %v14761_v6, %v14749_v9 }
  0xdf   : > { %v2538_v35 = vand.u32 4294901760, %v2537_v2  ;;  %11762 = vmatpush3.bf16.msra.mxu0 %v21201_v10  ;;  %11544 = vmatprep.subr.bf16.mxu1 %v21202_v51  ;;  %v2544_v12 = vsub.f32 %v14802_v40, %v21204_v27  ;;  %v2551_v2 = vsub.f32 %v14805_v7, %v21205_v18  ;;  %v2426_v51 = vand.u32 4294901760, %v2425_v48 }
  0xe0   : > { %v15010_v16 = vpack.c.bf16 %v2412_v44, %v2405_v33  ;;  %11764 = vmatprep.subr.bf16.mxu0 %v21206_v21  ;;  %v21208_v33 = vand.u32 4294901760, %v14809_v49  ;;  %v2439_v18 = vsub.f32 %v14811_v8, %v21209_v60 }
  0xe1   : > { %v15022_v10 = vpack.c.bf16 %v2538_v35, %v2531_v30  ;;  %v2545_v27 = vand.u32 4294901760, %v2544_v12  ;;  %v2552_v0 = vand.u32 4294901760, %v2551_v2  ;;  %v15032_v21 = vpack.c.bf16 %v2426_v51, %v2419_v34  ;;  %v21215_v2 = vld [vmem:[#allocation36_spill] sm:$0xff] }
  0xe2   : > { %21203 = vst [vmem:[#allocation25_spill] sm:$0xff] %v15010_v16  ;;  %v2432_v44 = vsub.f32 %v14809_v49, %v21208_v33  ;;  %11546 = vmatpush3.bf16.msra.mxu1 %v21210_v26  ;;  %v21212_v35 = vand.u32 4294901760, %v14815_v23  ;;  %v21213_v30 = vand.u32 4294901760, %v14817_v62  ;;  %v21214_v12 = vpack.c.bf16 %v14775_v38, %v14773_v11  ;;  %v492_v16 = vld [vmem:[%s20059_s1 + $0x3c0] sm:$0xff] }
  0xe3   : > { %21207 = vst [vmem:[#allocation32_spill] sm:$0xff] %v15022_v10  ;;  %21211 = vst [vmem:[#allocation33_spill] sm:$0xff] %v15032_v21  ;;  %11548 = vmatprep.subr.bf16.mxu1 %v21215_v2  ;;  %v11769_v26 = vpack.c.bf16 %v14798_v57, %v14794_v32  ;;  %v15046_v60 = vpack.c.bf16 %v2552_v0, %v2545_v27  ;;  %v2440_v34 = vand.u32 4294901760, %v2439_v18  ;;  %v21217_v51 = vand.u32 4294901760, %v14827_v28  ;;  %v21221_v18 = vld [vmem:[#allocation37_spill] sm:$0xff] }
  0xe4   : > { %v2433_v52 = vand.u32 4294901760, %v2432_v44  ;;  %v2558_v48 = vsub.f32 %v14815_v23, %v21212_v35  ;;  %v2565_v33 = vsub.f32 %v14817_v62, %v21213_v30  ;;  %11766 = vmatpush3.bf16.msra.mxu0 %v21214_v12  ;;  %v21218_v35 = vpack.c.bf16 %v14788_v46, %v14786_v15 }
  0xe5   : > { %21216 = vst [vmem:[#allocation34_spill] sm:$0xff] %v15046_v60  ;;  %v2446_v44 = vsub.f32 %v14827_v28, %v21217_v51  ;;  %v11771_v30 = vpack.c.bf16 %v14805_v7, %v14802_v40  ;;  %v21219_v2 = vand.u32 4294901760, %v14833_v42  ;;  %v21223_v60 = vld [vmem:[#allocation41_spill] sm:$0xff] }
  0xe6   : > { %11768 = vmatprep.subr.bf16.mxu0 %v21218_v35  ;;  %v2559_v12 = vand.u32 4294901760, %v2558_v48  ;;  %v2566_v50 = vand.u32 4294901760, %v2565_v33  ;;  %v15059_v0 = vpack.c.bf16 %v2440_v34, %v2433_v52  ;;  %11550 = vmatpush3.bf16.msra.mxu1 %v21221_v18  ;;  %v11773_v35 = vpack.c.bf16 %v14811_v8, %v14809_v49  ;;  %v21225_v52 = vld [vmem:[#allocation42_spill] sm:$0xff]  ;;  %v21226_v34 = vld [vmem:[#allocation27_spill] sm:$0xff] }
  0xe7   : > { %v2453_v37 = vsub.f32 %v14833_v42, %v21219_v2  ;;  %v2447_v27 = vand.u32 4294901760, %v2446_v44  ;;  %11552 = vmatprep.subr.bf16.mxu1 %v21223_v60  ;;  %v11775_v48 = vpack.c.bf16 %v14817_v62, %v14815_v23  ;;  %v21229_v44 = vld [vmem:[#allocation58_spill] sm:$0xff]  ;;  %v21234_v18 = vand.u32 4294901760, %v14676_v14 }
  0xe8   : > { %21220 = vst [vmem:[#allocation36_spill] sm:$0xff] %v15059_v0  ;;  %v15062_v58 = vpack.c.bf16 %v2566_v50, %v2559_v12  ;;  %11770 = vmatpush3.bf16.msra.mxu0 %v11769_v26  ;;  %v21227_v50 = vand.u32 4294901760, %v14668_v20  ;;  %v21228_v26 = vand.u32 4294901760, %v14673_v61  ;;  %v21231_v12 = vld [vmem:[#allocation59_spill] sm:$0xff]  ;;  %v21236_v20 = vand.u32 4294901760, %v14683_v5  ;;  %v490_v0 = vld [vmem:[%s20059_s1 + $0x3b0] sm:$0xff] }
  0xe9   : > { %v2454_v51 = vand.u32 4294901760, %v2453_v37  ;;  %11772 = vmatprep.subr.bf16.mxu0 %v11771_v30  ;;  %v11777_v37 = vpack.c.bf16 %v14833_v42, %v14827_v28  ;;  %v21230_v30 = vld [vmem:[#allocation29_spill] sm:$0xff]  ;;  %v21232_v2 = vand.u32 4294901760, %v21231_v12  ;;  %v21237_v61 = vand.u32 4294901760, %v14696_v53 }
  0xea   : > { %21222 = vst [vmem:[#allocation37_spill] sm:$0xff] %v15062_v58  ;;  %11554 = vmatpush3.bf16.msra.mxu1 %v21225_v52  ;;  %v11811_v60 = vpack.c.bf16 %v21228_v26, %v21227_v50  ;;  %v484_v52 = vld [vmem:[%s20059_s1 + $0x380] sm:$0xff]  ;;  %v21238_v50 = vand.u32 4294901760, %v14701_v54  ;;  %v21239_v14 = vand.u32 4294901760, %v14703_v17  ;;  %v21240_v26 = vand.u32 4294901760, %v14705_v29  ;;  %v469_v54 = vld [vmem:[%s20059_s1 + $0x308] sm:$0xff] }
  0xeb   : > { %v15069_v33 = vpack.c.bf16 %v2454_v51, %v2447_v27  ;;  %11588 = vmatprep.subr.bf16.mxu1 %v21226_v34  ;;  %v21233_v27 = vld [vmem:[#allocation31_spill] sm:$0xff]  ;;  %v21235_v51 = vand.u32 4294901760, %v14679_v19  ;;  %v21241_v5 = vand.u32 4294901760, %v14715_v43  ;;  %v21242_v53 = vand.u32 4294901760, %v14718_v13 }
  0xec   : > { %11774 = vmatpush3.bf16.msra.mxu0 %v11773_v35  ;;  %v11817_v19 = vpack.c.bf16 %v21239_v14, %v21238_v50  ;;  %v21243_v12 = vand.u32 4294901760, %v14721_v1  ;;  %v21244_v17 = vld [vmem:[#allocation35_spill] sm:$0xff]  ;;  %v21245_v43 = vand.u32 4294901760, %v14724_v59  ;;  %v21246_v29 = vand.u32 4294901760, %v14735_v55  ;;  %v486_v59 = vld [vmem:[%s20059_s1 + $0x390] sm:$0xff]  ;;  %v21251_v55 = vld [vmem:[#allocation38_spill] sm:$0xff] }
  0xed   : > { %21224 = vst [vmem:[#allocation41_spill] sm:$0xff] %v15069_v33  ;;  %11776 = vmatprep.subr.bf16.mxu0 %v11775_v48  ;;  %1709 = vmatmul.mubr.f32.vlgmr.msra.gmra.mrb[10].mxu1 %v21229_v44  ;;  %v11813_v35 = vpack.c.bf16 %v21235_v51, %v21234_v18  ;;  %v11815_v48 = vpack.c.bf16 %v21237_v61, %v21236_v20  ;;  %v468_v18 = vld [vmem:[%s20059_s1 + $0x300] sm:$0xff]  ;;  %v21247_v1 = vand.u32 4294901760, %v14745_v45  ;;  %v21248_v51 = vand.u32 4294901760, %v14747_v24 }
  0xee   : > { %11590 = vmatpush3.bf16.msra.mxu1 %v21230_v30  ;;  %1951 = vmatprep.mubr.f32.mxu1 %v21232_v2  ;;  %v11821_v2 = vpack.c.bf16 %v21243_v12, %v21242_v53  ;;  %v15122_v13 = vpack.c.bf16 %v21246_v29, %v21245_v43  ;;  %v21249_v61 = vand.u32 4294901760, %v14749_v9  ;;  %v21250_v50 = vand.u32 4294901760, %v14761_v6 }
  0xef   : > { %11592 = vmatprep.subr.bf16.mxu1 %v21233_v27  ;;  %v15128_v20 = vpack.c.bf16 %v21248_v51, %v21247_v1  ;;  %v21253_v45 = vand.u32 4294901760, %v14775_v38  ;;  %v21255_v9 = vand.u32 4294901760, %v14788_v46  ;;  %v3143_v53 = vand.u32 4294901760, %v484_v52  ;;  %v471_v38 = vld [vmem:[%s20059_s1 + $0x318] sm:$0xff] }
  0xf0   : > { %11778 = vmatpush3.bf16.msra.mxu0 %v11777_v37  ;;  %v485_v37 = vld [vmem:[%s20059_s1 + $0x388] sm:$0xff]  ;;  %v15134_v14 = vpack.c.bf16 %v21250_v50, %v21249_v61  ;;  %v21257_v46 = vand.u32 4294901760, %v14798_v57  ;;  %v21258_v29 = vand.u32 4294901760, %v14802_v40  ;;  %v21259_v1 = vand.u32 4294901760, %v14805_v7  ;;  %v21260_v61 = vld [vmem:[#allocation10_spill] sm:$0xff] }
  0xf1   : > { %11812 = vmatprep.subr.bf16.mxu0 %v11811_v60  ;;  %v11819_v60 = vpack.c.bf16 %v21241_v5, %v21240_v26  ;;  %v21252_v26 = vand.u32 4294901760, %v14773_v11  ;;  %v21254_v5 = vand.u32 4294901760, %v14786_v15  ;;  %v3146_v12 = vand.u32 4294901760, %v485_v37  ;;  %v470_v11 = vld [vmem:[%s20059_s1 + $0x310] sm:$0xff] }
  0xf2   : > { %11594 = vmatpush3.bf16.msra.mxu1 %v21244_v17  ;;  %v21256_v15 = vand.u32 4294901760, %v14794_v32  ;;  %v15171_v51 = vpack.c.bf16 %v21259_v1, %v21258_v29  ;;  %v3095_v50 = vand.u32 4294901760, %v468_v18  ;;  %v21263_v57 = vand.u32 4294901760, %v14815_v23  ;;  %v489_v23 = vld [vmem:[%s20059_s1 + $0x3a8] sm:$0xff] }
  0xf3   : > { %2709 = vmatmul.mubr.f32.vlgmr.msra.gmra.mrb[10].mxu0 %v14758_v25  ;;  %11596 = vmatprep.subr.bf16.mxu1 %v21251_v55  ;;  %v15144_v24 = vpack.c.bf16 %v21253_v45, %v21252_v26  ;;  %v15150_v6 = vpack.c.bf16 %v21255_v9, %v21254_v5  ;;  %v3098_v26 = vand.u32 4294901760, %v469_v54  ;;  %v21261_v45 = vand.u32 4294901760, %v14809_v49  ;;  %v488_v49 = vld [vmem:[%s20059_s1 + $0x3a0] sm:$0xff] }
  0xf4   : > { %11814 = vmatpush3.bf16.msra.mxu0 %v11813_v35  ;;  %v487_v35 = vld [vmem:[%s20059_s1 + $0x398] sm:$0xff]  ;;  %v15165_v43 = vpack.c.bf16 %v21257_v46, %v21256_v15  ;;  %2983 = vmatprep.mubr.f32.mxu0 %v21260_v61  ;;  %v21264_v5 = vand.u32 4294901760, %v14817_v62  ;;  %v21265_v7 = vand.u32 4294901760, %v14827_v28  ;;  %v21266_v9 = vand.u32 4294901760, %v14833_v42  ;;  %v21268_v62 = vld [vmem:[#allocation40_spill] sm:$0xff] }
  0xf5   : > { %11816 = vmatprep.subr.bf16.mxu0 %v11815_v48  ;;  %v21262_v48 = vand.u32 4294901760, %v14811_v8  ;;  %v15192_v46 = vsub.f32 %v484_v52, %v3143_v53  ;;  %v472_v8 = vld [vmem:[%s20059_s1 + $0x320] sm:$0xff]  ;;  %v3149_v28 = vand.u32 4294901760, %v486_v59  ;;  %v3152_v42 = vand.u32 4294901760, %v487_v35  ;;  %v473_v52 = vld [vmem:[%s20059_s1 + $0x328] sm:$0xff] }
  0xf6   : > { %v15184_v40 = vpack.c.bf16 %v21264_v5, %v21263_v57  ;;  %v15190_v15 = vpack.c.bf16 %v21266_v9, %v21265_v7  ;;  %11598 = vmatpush3.bf16.msra.mxu1 %v21268_v62  ;;  %v3101_v29 = vand.u32 4294901760, %v470_v11  ;;  %v3104_v1 = vand.u32 4294901760, %v471_v38 }
  0xf7   : > { %v15178_v32 = vpack.c.bf16 %v21262_v48, %v21261_v45  ;;  %21267 = vst [vmem:[#allocation42_spill] sm:$0xff] %v15192_v46  ;;  %v371_v45 = vld [vmem:[%s13596_s17 + $0x38] sm:$0xff]  ;;  %v21269_v48 = vld [vmem:[#allocation43_spill] sm:$0xff]  ;;  %v15209_v57 = vpack.c.bf16 %v3146_v12, %v3143_v53  ;;  %v15211_v5 = vsub.f32 %v485_v37, %v3146_v12  ;;  %v15213_v7 = vsub.f32 %v468_v18, %v3095_v50 }
  0xf8   : > { %11818 = vmatpush3.bf16.msra.mxu0 %v11817_v19  ;;  %11600 = vmatprep.subr.bf16.mxu1 %v21269_v48  ;;  %v15215_v9 = vpack.c.bf16 %v3098_v26, %v3095_v50  ;;  %v15217_v25 = vsub.f32 %v469_v54, %v3098_v26  ;;  %v3155_v33 = vand.u32 4294901760, %v488_v49  ;;  %v3158_v58 = vand.u32 4294901760, %v489_v23  ;;  %v491_v19 = vld [vmem:[%s20059_s1 + $0x3b8] sm:$0xff] }
  0xf9   : > { %21270 = vst [vmem:[#allocation27_spill] sm:$0xff] %v15209_v57  ;;  %21271 = vst [vmem:[#allocation29_spill] sm:$0xff] %v15211_v5  ;;  %11820 = vmatprep.subr.bf16.mxu0 %v11819_v60  ;;  %v15225_v53 = vsub.f32 %v486_v59, %v3149_v28  ;;  %v3107_v37 = vand.u32 4294901760, %v472_v8  ;;  %v3110_v18 = vand.u32 4294901760, %v473_v52  ;;  %v474_v60 = vld [vmem:[%s20059_s1 + $0x330] sm:$0xff]  ;;  %v475_v54 = vld [vmem:[%s20059_s1 + $0x338] sm:$0xff]  ;;  %v507_v12 = vmul.f32 %v371_v45, %v371_v45 }
  0xfa   : > { %21272 = vst [vmem:[#allocation59_spill] sm:$0xff] %v15213_v7  ;;  %21273 = vst [vmem:[#allocation31_spill] sm:$0xff] %v15215_v9  ;;  %v21275_v50 = vld [vmem:[#allocation46_spill] sm:$0xff]  ;;  %v15234_v26 = vpack.c.bf16 %v3152_v42, %v3149_v28  ;;  %v15236_v21 = vsub.f32 %v487_v35, %v3152_v42  ;;  %v15238_v10 = vpack.c.bf16 %v3104_v1, %v3101_v29  ;;  %v3161_v4 = vand.u32 4294901760, %v490_v0  ;;  %v493_v35 = vld [vmem:[%s20059_s1 + $0x3c8] sm:$0xff] }
  0xfb   : > { %21274 = vst [vmem:[#allocation35_spill] sm:$0xff] %v15217_v25  ;;  %11602 = vmatpush3.bf16.msra.mxu1 %v21275_v50  ;;  %v15240_v59 = vsub.f32 %v470_v11, %v3101_v29  ;;  %v15246_v39 = vsub.f32 %v471_v38, %v3104_v1  ;;  %v15248_v45 = vsub.f32 %v488_v49, %v3155_v33  ;;  %v3164_v28 = vand.u32 4294901760, %v491_v19  ;;  %v476_v11 = vld [vmem:[%s20059_s1 + $0x340] sm:$0xff] }
  0xfc   : > { %21276 = vst [vmem:[#allocation38_spill] sm:$0xff] %v15234_v26  ;;  %21277 = vst [vmem:[#allocation40_spill] sm:$0xff] %v15238_v10  ;;  %11822 = vmatpush3.bf16.msra.mxu0 %v11821_v2  ;;  %11604 = vmatprep.subr.bf16.mxu1 %v21278_v22  ;;  %v477_v2 = vld [vmem:[%s20059_s1 + $0x348] sm:$0xff]  ;;  %v15260_v38 = vpack.c.bf16 %v3158_v58, %v3155_v33  ;;  %v15262_v49 = vsub.f32 %v489_v23, %v3158_v58  ;;  %v3113_v42 = vand.u32 4294901760, %v474_v60  ;;  %v21282_v58 = vld [vmem:[#allocation51_spill] sm:$0xff] }
  0xfd   : > { %11824 = vmatprep.subr.bf16.mxu0 %v15122_v13  ;;  %v3116_v29 = vand.u32 4294901760, %v475_v54  ;;  %v15264_v1 = vpack.c.bf16 %v3110_v18, %v3107_v37  ;;  %v15266_v41 = vsub.f32 %v472_v8, %v3107_v37  ;;  %v15268_v47 = vsub.f32 %v473_v52, %v3110_v18  ;;  %v495_v13 = vld [vmem:[%s20059_s1 + $0x3d8] sm:$0xff]  ;;  %v478_v8 = vld [vmem:[%s20059_s1 + $0x350] sm:$0xff]  ;;  %v21283_v37 = vld [vmem:[#allocation52_spill] sm:$0xff] }
  0xfe   : > { %21279 = vst [vmem:[#allocation61_spill] sm:$0xff] %v15260_v38  ;;  %v15276_v33 = vand.u32 4294901760, %v507_v12  ;;  %v3167_v23 = vand.u32 4294901760, %v492_v16  ;;  %v3170_v63 = vand.u32 4294901760, %v493_v35  ;;  %v3119_v61 = vand.u32 4294901760, %v476_v11  ;;  %v479_v52 = vld [vmem:[%s20059_s1 + $0x358] sm:$0xff] }
  0xff   : > { %21280 = vst [vmem:[#allocation62_spill] sm:$0xff] %v15264_v1  ;;  %11606 = vmatpush3.bf16.msra.mxu1 %v21282_v58  ;;  %v3122_v31 = vand.u32 4294901760, %v477_v2  ;;  %v15287_v18 = vpack.c.bf16 %v3164_v28, %v3161_v4  ;;  %v15289_v44 = vsub.f32 %v490_v0, %v3161_v4  ;;  %v15291_v3 = vsub.f32 %v491_v19, %v3164_v28  ;;  %v15308_v0 = vld [vmem:[%s20059_s1 + $0x3e8] sm:$0xff]  ;;  %v21292_v38 = vld [vmem:[#allocation54_spill] sm:$0xff] }
 0x100   : > { %21281 = vst [vmem:[#allocation63_spill] sm:$0xff] %v15276_v33  ;;  %11826 = vmatpush3.bf16.msra.mxu0 %v15128_v20  ;;  %11608 = vmatprep.subr.bf16.mxu1 %v21283_v37  ;;  %v15294_v58 = vpack.c.bf16 %v3116_v29, %v3113_v42  ;;  %v15296_v22 = vsub.f32 %v474_v60, %v3113_v42  ;;  %v3173_v50 = vand.u32 4294901760, %v494_v56  ;;  %v15303_v20 = vld [vmem:[%s20059_s1 + $0x3e0] sm:$0xff]  ;;  %v3176_v37 = vand.u32 4294901760, %v495_v13  ;;  %v370_v60 = vld [vmem:[%s13596_s17 + $0x30] sm:$0xff]  ;;  %s341_s17 = sand.u32 1, %s13228_s28  }
 0x101   : > { %21284 = vst [vmem:[#allocation64_spill] sm:$0xff] %v15287_v18  ;;  %11828 = vmatprep.subr.bf16.mxu0 %v15134_v14  ;;  %v15298_v1 = vsub.f32 %v475_v54, %v3116_v29  ;;  %21286 = vst [vmem:[#allocation66_spill] sm:$0xff] %v15303_v20  ;;  %v3125_v18 = vand.u32 4294901760, %v478_v8  ;;  %v3128_v4 = vand.u32 4294901760, %v479_v52  ;;  %v15313_v14 = vld [vmem:[%s20059_s1 + $0x360] sm:$0xff]  ;;  %v15316_v19 = vsub.f32 %v507_v12, %v15276_v33  ;;  %v21289_v54 = vld [vmem:[#allocation53_spill] sm:$0xff] }
 0x102   : > { %21285 = vst [vmem:[#allocation65_spill] sm:$0xff] %v15294_v58  ;;  %21287 = vst [vmem:[#allocation67_spill] sm:$0xff] %v15308_v0  ;;  %v15320_v28 = vpack.c.bf16 %v3170_v63, %v3167_v23  ;;  %v15322_v42 = vsub.f32 %v492_v16, %v3167_v23  ;;  %v15324_v29 = vsub.f32 %v493_v35, %v3170_v63  ;;  %v15339_v33 = vld [vmem:[%s20059_s1 + $0x368] sm:$0xff]  ;;  %v20283_v63 = vand.u32 4294901760, %v15303_v20  ;;  %v21297_v23 = vld [vmem:[#allocation55_spill] sm:$0xff]  ;;  %s9172_s18 = sshll.u32 %s341_s17, 3 }
 0x103   : > { %21288 = vst [vmem:[#allocation68_spill] sm:$0xff] %v15316_v19  ;;  %11610 = vmatpush3.bf16.msra.mxu1 %v21289_v54  ;;  %v15326_v58 = vpack.c.bf16 %v3122_v31, %v3119_v61  ;;  %v15330_v48 = vsub.f32 %v476_v11, %v3119_v61  ;;  %v15332_v10 = vsub.f32 %v477_v2, %v3122_v31  ;;  %v20284_v16 = vand.u32 4294901760, %v15308_v0  ;;  %v15354_v11 = vld [vmem:[%s20059_s1 + $0x3f0] sm:$0xff]  ;;  %s18693_s19 = scalar_lea.vmem [#allocation2], %s9172_s18  ;;  %s9060_s21 = scalar_lea.sflag [#allocation3], %s341_s17 }
 0x104   : > { %21290 = vst [vmem:[#allocation53_spill] sm:$0xff] %v15320_v28  ;;  %11830 = vmatpush3.bf16.msra.mxu0 %v15144_v24  ;;  %11612 = vmatprep.subr.bf16.mxu1 %v21292_v38  ;;  %v15334_v12 = vsub.f32 %v494_v56, %v3173_v50  ;;  %v506_v35 = vmul.f32 %v370_v60, %v370_v60  ;;  %21295 = vst [vmem:[#allocation71_spill] sm:$0xff] %v15354_v11  ;;  %v21298_v24 = vld [vmem:[#allocation56_spill] sm:$0xff]  ;;  %s9073_s10 = sshll.u32 %s18693_s19, 4  ;;  %s20015_s10 = int_to_ptr.vmem [resolvable:$true] %s9073_s10 }
 0x105   : > { %21291 = vst [vmem:[#allocation69_spill] sm:$0xff] %v15326_v58  ;;  %11832 = vmatprep.subr.bf16.mxu0 %v15150_v6  ;;  %v15345_v61 = vpack.c.bf16 %v3176_v37, %v3173_v50  ;;  %v15347_v31 = vsub.f32 %v495_v13, %v3176_v37  ;;  %v15349_v56 = vpack.c.bf16 %v3128_v4, %v3125_v18  ;;  %v15359_v6 = vld [vmem:[%s20059_s1 + $0x3f8] sm:$0xff]  ;;  %s13174_s22 = scalar_lea.vmem %s20015_s10, 128 }
 0x106   : > { %21296 = vst [vmem:[#allocation72_spill] sm:$0xff] %v15359_v6  ;;  %v15363_v50 = vsub.f32 %v478_v8, %v3125_v18  ;;  %v15365_v13 = vsub.f32 %v479_v52, %v3128_v4  ;;  %v15370_v37 = vsub.f32 %v15303_v20, %v20283_v63  ;;  %v15378_v2 = vsub.f32 %v15308_v0, %v20284_v16  ;;  %v15383_v8 = vld [vmem:[%s20059_s1 + $0x370] sm:$0xff]  ;;  %v15394_v16 = vld [vmem:[%s20059_s1 + $0x378] sm:$0xff]  ;;  %p13175_p11 = scmp.ne.s32.totalorder %s20015_s10, %s13174_s22 }
 0x107   : > { %21293 = vst [vmem:[#allocation54_spill] sm:$0xff] %v15345_v61  ;;  %21294 = vst [vmem:[#allocation70_spill] sm:$0xff] %v15349_v56  ;;  %11614 = vmatpush3.bf16.msra.mxu1 %v21297_v23  ;;  %v15396_v60 = vand.u32 4294901760, %v506_v35  ;;  %v21300_v52 = vand.u32 4294901760, %v15316_v19  ;;  %v21301_v4 = vand.u32 4294901760, %v15192_v46  ;;  %v21303_v56 = vand.u32 4294901760, %v15213_v7 }
 0x108   : > { %11834 = vmatpush3.bf16.msra.mxu0 %v15165_v43  ;;  %11616 = vmatprep.subr.bf16.mxu1 %v21298_v24  ;;  %v21302_v43 = vand.u32 4294901760, %v15211_v5  ;;  %v21304_v0 = vld [vmem:[#allocation57_spill] sm:$0xff]  ;;  %v21305_v24 = vand.u32 4294901760, %v15313_v14  ;;  %p13176_p12 = pnand %p13175_p11, %p13328_p5 }
 0x109   : > { %11836 = vmatprep.subr.bf16.mxu0 %v15171_v51  ;;  %21299 = vst [vmem:[#allocation73_spill] sm:$0xff] %v15396_v60  ;;  %v3193_v18 = vsub.f32 %v15316_v19, %v21300_v52  ;;  %v3322_v51 = vsub.f32 %v15192_v46, %v21301_v4  ;;  %v3210_v23 = vsub.f32 %v15213_v7, %v21303_v56  ;;  %v21306_v52 = vand.u32 4294901760, %v15339_v33 }
 0x10a   : > { %v3329_v63 = vsub.f32 %v15211_v5, %v21302_v43  ;;  %v15415_v20 = vsub.f32 %v15313_v14, %v21305_v24  ;;  %v21307_v43 = vand.u32 4294901760, %v15217_v25  ;;  %v21308_v56 = vand.u32 4294901760, %v15354_v11  ;;  %p13177_p13 = pneg %p13176_p12 }
 0x10b   : > { %11618 = vmatpush3.bf16.msra.mxu1 %v21304_v0  ;;  %v15420_v19 = vsub.f32 %v15339_v33, %v21306_v52  ;;  %v21309_v7 = vand.u32 4294901760, %v15359_v6  ;;  %v20300_v4 = vand.u32 4294901760, %v15394_v16  ;;  %v3323_v46 = vand.u32 4294901760, %v3322_v51 }
 0x10c   : > { %v3217_v5 = vsub.f32 %v15217_v25, %v21307_v43  ;;  %11838 = vmatpush3.bf16.msra.mxu0 %v15178_v32  ;;  %11652 = vmatprep.subr.bf16.mxu1 %v21226_v34  ;;  %v15431_v24 = vsub.f32 %v15354_v11, %v21308_v56  ;;  %v21310_v43 = vand.u32 4294901760, %v15383_v8  ;;  %v3330_v34 = vand.u32 4294901760, %v3329_v63  ;;  %v21311_v56 = vld [vmem:[#allocation60_spill] sm:$0xff] }
 0x10d   : > { %v15436_v52 = vsub.f32 %v15359_v6, %v21309_v7  ;;  %11840 = vmatprep.subr.bf16.mxu0 %v15184_v40  ;;  %v3211_v25 = vand.u32 4294901760, %v3210_v23  ;;  %v21312_v11 = vand.u32 4294901760, %v21311_v56  ;;  %v15450_v7 = vsub.f32 %v15394_v16, %v20300_v4  ;;  %v21314_v4 = vld [vmem:[#allocation26_spill] sm:$0xff] }
 0x10e   : > { %v15443_v32 = vsub.f32 %v15383_v8, %v21310_v43  ;;  %v3218_v0 = vand.u32 4294901760, %v3217_v5  ;;  %v3194_v6 = vand.u32 4294901760, %v3193_v18  ;;  %v15453_v51 = vsub.f32 %v506_v35, %v15396_v60 }
 0x10f   : > { %1955 = vmatmul.mubr.f32.vlgmr.msra.gmra.mrb[12].mxu1 %v21312_v11  ;;  %v20301_v40 = vand.u32 4294901760, %v15225_v53  ;;  %v20302_v5 = vand.u32 4294901760, %v15236_v21  ;;  %v20303_v63 = vand.u32 4294901760, %v15240_v59  ;;  %v15460_v11 = vpack.c.bf16 %v3330_v34, %v3323_v46 }
 0x110   : > { %21313 = vst [vmem:[#allocation60_spill] sm:$0xff] %v15453_v51  ;;  %11654 = vmatpush3.bf16.msra.mxu1 %v21230_v30  ;;  %2225 = vmatprep.mubr.f32.mxu1 %v14107_v36  ;;  %v15462_v23 = vpack.c.bf16 %v3218_v0, %v3211_v25  ;;  %v20304_v35 = vand.u32 4294901760, %v15246_v39  ;;  %v20305_v18 = vand.u32 4294901760, %v15248_v45  ;;  %v20306_v30 = vand.u32 4294901760, %v15262_v49 }
 0x111   : > { %11842 = vmatpush3.bf16.msra.mxu0 %v15190_v15  ;;  %11656 = vmatprep.subr.bf16.mxu1 %v21233_v27  ;;  %v20307_v36 = vand.u32 4294901760, %v15266_v41  ;;  %v20308_v43 = vand.u32 4294901760, %v15268_v47  ;;  %v3336_v25 = vsub.f32 %v15225_v53, %v20301_v40  ;;  %v3343_v27 = vsub.f32 %v15236_v21, %v20302_v5 }
 0x112   : > { %11876 = vmatprep.subr.bf16.mxu0 %v15209_v57  ;;  %v3224_v34 = vsub.f32 %v15240_v59, %v20303_v63  ;;  %v3231_v56 = vsub.f32 %v15246_v39, %v20304_v35  ;;  %v3350_v35 = vsub.f32 %v15248_v45, %v20305_v18 }
 0x113   : > { %v3337_v46 = vand.u32 4294901760, %v3336_v25  ;;  %v3344_v15 = vand.u32 4294901760, %v3343_v27  ;;  %v3238_v18 = vsub.f32 %v15266_v41, %v20307_v36  ;;  %v3245_v5 = vsub.f32 %v15268_v47, %v20308_v43 }
 0x114   : > { %2985 = vmatmul.mubr.f32.vlgmr.msra.gmra.mrb[12].mxu0 %v21314_v4  ;;  %11658 = vmatpush3.bf16.msra.mxu1 %v21244_v17  ;;  %v3225_v0 = vand.u32 4294901760, %v3224_v34  ;;  %v3232_v63 = vand.u32 4294901760, %v3231_v56  ;;  %v3357_v17 = vsub.f32 %v15262_v49, %v20306_v30  ;;  %v3351_v56 = vand.u32 4294901760, %v3350_v35  ;;  %v21317_v35 = vld [vmem:[#allocation40_spill] sm:$0xff] }
 0x115   : > { %11878 = vmatpush3.bf16.msra.mxu0 %v15215_v9  ;;  %11660 = vmatprep.subr.bf16.mxu1 %v21251_v55  ;;  %v15503_v55 = vpack.c.bf16 %v3344_v15, %v3337_v46  ;;  %v21316_v46 = vand.u32 4294901760, %v15289_v44  ;;  %v21318_v15 = vld [vmem:[#allocation43_spill] sm:$0xff]  ;;  %v21320_v36 = vand.u32 4294901760, %v15291_v3  ;;  %v3246_v43 = vand.u32 4294901760, %v3245_v5 }
 0x116   : > { %11880 = vmatprep.subr.bf16.mxu0 %v15234_v26  ;;  %3195 = vmatprep.mubr.f32.mxu0 %v3194_v6  ;;  %v15505_v34 = vpack.c.bf16 %v3232_v63, %v3225_v0  ;;  %v3358_v40 = vand.u32 4294901760, %v3357_v17  ;;  %v21321_v6 = vld [vmem:[#allocation61_spill] sm:$0xff]  ;;  %v21322_v25 = vand.u32 4294901760, %v15296_v22  ;;  %v21327_v9 = vand.u32 4294901760, %v15330_v48 }
 0x117   : > { %v3364_v63 = vsub.f32 %v15289_v44, %v21316_v46  ;;  %v3371_v30 = vsub.f32 %v15291_v3, %v21320_v36  ;;  %v21325_v36 = vand.u32 4294901760, %v15324_v29 }
 0x118   : > { %21315 = vst [vmem:[#allocation26_spill] sm:$0xff] %v15505_v34  ;;  %11662 = vmatpush3.bf16.msra.mxu1 %v21268_v62  ;;  %v15522_v17 = vpack.c.bf16 %v3358_v40, %v3351_v56  ;;  %v3239_v62 = vand.u32 4294901760, %v3238_v18  ;;  %v3252_v46 = vsub.f32 %v15296_v22, %v21322_v25  ;;  %v21324_v18 = vand.u32 4294901760, %v15322_v42  ;;  %v21328_v40 = vld [vmem:[#allocation62_spill] sm:$0xff]  ;;  %v21331_v34 = vld [vmem:[#allocation64_spill] sm:$0xff] }
 0x119   : > { %11882 = vmatpush3.bf16.msra.mxu0 %v21317_v35  ;;  %11664 = vmatprep.subr.bf16.mxu1 %v21318_v15  ;;  %v3365_v27 = vand.u32 4294901760, %v3364_v63  ;;  %v21323_v35 = vand.u32 4294901760, %v15298_v1  ;;  %v3372_v56 = vand.u32 4294901760, %v3371_v30  ;;  %v3385_v5 = vsub.f32 %v15324_v29, %v21325_v36  ;;  %v21326_v63 = vld [vmem:[#allocation46_spill] sm:$0xff]  ;;  %v21329_v30 = vld [vmem:[#allocation48_spill] sm:$0xff] }
 0x11a   : > { %21319 = vst [vmem:[#allocation43_spill] sm:$0xff] %v15522_v17  ;;  %11884 = vmatprep.subr.bf16.mxu0 %v21321_v6  ;;  %v3378_v0 = vsub.f32 %v15322_v42, %v21324_v18  ;;  %v15542_v6 = vpack.c.bf16 %v3246_v43, %v3239_v62  ;;  %v3253_v25 = vand.u32 4294901760, %v3252_v46  ;;  %v21333_v46 = vand.u32 4294901760, %v15332_v10  ;;  %v21341_v18 = vld [vmem:[#allocation52_spill] sm:$0xff] }
 0x11b   : > { %v3259_v15 = vsub.f32 %v15298_v1, %v21323_v35  ;;  %v3266_v35 = vsub.f32 %v15330_v48, %v21327_v9  ;;  %v15550_v57 = vpack.c.bf16 %v3372_v56, %v3365_v27  ;;  %v3386_v36 = vand.u32 4294901760, %v3385_v5 }
 0x11c   : > { %11666 = vmatpush3.bf16.msra.mxu1 %v21326_v63  ;;  %v3379_v17 = vand.u32 4294901760, %v3378_v0  ;;  %v21334_v9 = vand.u32 4294901760, %v15334_v12  ;;  %v21336_v0 = vand.u32 4294901760, %v15347_v31 }
 0x11d   : > { %v3260_v26 = vand.u32 4294901760, %v3259_v15  ;;  %11886 = vmatpush3.bf16.msra.mxu0 %v21328_v40  ;;  %11668 = vmatprep.subr.bf16.mxu1 %v21329_v30  ;;  %21330 = vst [vmem:[#allocation46_spill] sm:$0xff] %v15550_v57  ;;  %v3267_v62 = vand.u32 4294901760, %v3266_v35  ;;  %v3273_v15 = vsub.f32 %v15332_v10, %v21333_v46  ;;  %v9359_v30 = vpop.f32.mrb[0].mxu0  ;;  %v21339_v40 = vand.u32 4294901760, %v15365_v13 }
 0x11e   : > { %11888 = vmatprep.subr.bf16.mxu0 %v21331_v34  ;;  %v3392_v63 = vsub.f32 %v15334_v12, %v21334_v9  ;;  %v15562_v27 = vpack.c.bf16 %v3386_v36, %v3379_v17  ;;  %v3399_v56 = vsub.f32 %v15347_v31, %v21336_v0  ;;  %v9360_v35 = vpop.f32.mrb[1].mxu0  ;;  %v21340_v36 = vld [vmem:[#allocation65_spill] sm:$0xff] }
 0x11f   : > { %v15553_v43 = vpack.c.bf16 %v3260_v26, %v3253_v25  ;;  %v21337_v26 = vand.u32 4294901760, %v15363_v50  ;;  %v21338_v25 = vld [vmem:[#allocation51_spill] sm:$0xff]  ;;  %v3274_v34 = vand.u32 4294901760, %v3273_v15  ;;  %v3287_v17 = vsub.f32 %v15365_v13, %v21339_v40 }
 0x120   : > { %21335 = vst [vmem:[#allocation74_spill] sm:$0xff] %v15562_v27  ;;  %11670 = vmatpush3.bf16.msra.mxu1 %v21338_v25  ;;  %v3393_v9 = vand.u32 4294901760, %v3392_v63  ;;  %v15577_v0 = vadd.f32 %v9360_v35, %v9359_v30  ;;  %v20315_v27 = vand.u32 4294901760, %v15420_v19  ;;  %v9219_v25 = vpop.f32.mrb[0].mxu1  ;;  %v21342_v40 = vand.u32 4294901760, %v15370_v37 }
 0x121   : > { %21332 = vst [vmem:[#allocation48_spill] sm:$0xff] %v15553_v43  ;;  %v3280_v5 = vsub.f32 %v15363_v50, %v21337_v26  ;;  %11890 = vmatpush3.bf16.msra.mxu0 %v21340_v36  ;;  %11672 = vmatprep.subr.bf16.mxu1 %v21341_v18  ;;  %v3400_v26 = vand.u32 4294901760, %v3399_v56  ;;  %v15582_v63 = vpack.c.bf16 %v3274_v34, %v3267_v62  ;;  %v3288_v46 = vand.u32 4294901760, %v3287_v17  ;;  %v9220_v57 = vpop.f32.mrb[1].mxu1 }
 0x122   : > { %11892 = vmatprep.subr.bf16.mxu0 %v15320_v28  ;;  %v3406_v36 = vsub.f32 %v15370_v37, %v21342_v40  ;;  %v21343_v56 = vand.u32 4294901760, %v15378_v2  ;;  %v21344_v35 = vand.u32 4294901760, %v15415_v20  ;;  %v15597_v34 = vadd.f32 %v9220_v57, %v9219_v25  ;;  %v21345_v57 = vld [vmem:[#allocation66_spill] sm:$0xff] }
 0x123   : > { %v3281_v43 = vand.u32 4294901760, %v3280_v5  ;;  %v15588_v30 = vpack.c.bf16 %v3400_v26, %v3393_v9  ;;  %v3301_v9 = vsub.f32 %v15420_v19, %v20315_v27  ;;  %v21350_v27 = vand.u32 4294901760, %v15431_v24 }
 0x124   : > { %v3413_v5 = vsub.f32 %v15378_v2, %v21343_v56  ;;  %v3294_v15 = vsub.f32 %v15415_v20, %v21344_v35  ;;  %11674 = vmatpush3.bf16.msra.mxu1 %v21289_v54  ;;  %v3407_v17 = vand.u32 4294901760, %v3406_v36  ;;  %v21346_v54 = vand.u32 4294901760, %v21345_v57 }
 0x125   : > { %v15599_v62 = vpack.c.bf16 %v3288_v46, %v3281_v43  ;;  %11894 = vmatpush3.bf16.msra.mxu0 %v15326_v58  ;;  %11676 = vmatprep.subr.bf16.mxu1 %v21292_v38  ;;  %v21347_v43 = vld [vmem:[#allocation67_spill] sm:$0xff]  ;;  %v3302_v25 = vand.u32 4294901760, %v3301_v9  ;;  %v3420_v18 = vsub.f32 %v15431_v24, %v21350_v27  ;;  %v21351_v38 = vand.u32 4294901760, %v15436_v52  ;;  %v21355_v58 = vld [vmem:[#allocation70_spill] sm:$0xff] }
 0x126   : > { %v3414_v56 = vand.u32 4294901760, %v3413_v5  ;;  %v3295_v35 = vand.u32 4294901760, %v3294_v15  ;;  %11896 = vmatprep.subr.bf16.mxu0 %v15345_v61  ;;  %v21348_v46 = vand.u32 4294901760, %v21347_v43  ;;  %v21352_v15 = vand.u32 4294901760, %v15443_v32  ;;  %v21354_v43 = vld [vmem:[#allocation55_spill] sm:$0xff] }
 0x127   : > { %v3427_v26 = vsub.f32 %v15436_v52, %v21351_v38  ;;  %v21353_v57 = vand.u32 4294901760, %v15450_v7  ;;  %v3421_v27 = vand.u32 4294901760, %v3420_v18  ;;  %v21358_v38 = vand.u32 4294901760, %v15339_v33 }
 0x128   : > { %v15613_v36 = vpack.c.bf16 %v21348_v46, %v21346_v54  ;;  %v15621_v40 = vpack.c.bf16 %v3414_v56, %v3407_v17  ;;  %v3308_v5 = vsub.f32 %v15443_v32, %v21352_v15  ;;  %11678 = vmatpush3.bf16.msra.mxu1 %v21354_v43  ;;  %v15631_v46 = vpack.c.bf16 %v3302_v25, %v3295_v35  ;;  %v21356_v17 = vld [vmem:[#allocation56_spill] sm:$0xff]  ;;  %v21360_v43 = vld [vmem:[#allocation71_spill] sm:$0xff] }
 0x129   : > { %v3315_v54 = vsub.f32 %v15450_v7, %v21353_v57  ;;  %v3428_v61 = vand.u32 4294901760, %v3427_v26  ;;  %11898 = vmatpush3.bf16.msra.mxu0 %v21355_v58  ;;  %11680 = vmatprep.subr.bf16.mxu1 %v21356_v17  ;;  %v21357_v56 = vand.u32 4294901760, %v15313_v14  ;;  %v21361_v9 = vand.u32 4294901760, %v21360_v43  ;;  %v21362_v35 = vld [vmem:[#allocation72_spill] sm:$0xff]  ;;  %v21366_v17 = vld [vmem:[#allocation57_spill] sm:$0xff] }
 0x12a   : > { %21349 = vst [vmem:[#allocation51_spill] sm:$0xff] %v15613_v36  ;;  %v3309_v28 = vand.u32 4294901760, %v3308_v5  ;;  %11900 = vmatprep.subr.bf16.mxu0 %v15613_v36  ;;  %v21363_v25 = vand.u32 4294901760, %v21362_v35  ;;  %v21367_v33 = vand.u32 4294901760, %v15453_v51  ;;  %v21368_v5 = vld [vmem:[#allocation18_spill] sm:$0xff] }
 0x12b   : > { %v15639_v15 = vpack.c.bf16 %v21358_v38, %v21357_v56  ;;  %v3316_v57 = vand.u32 4294901760, %v3315_v54  ;;  %v15648_v26 = vpack.c.bf16 %v3428_v61, %v3421_v27  ;;  %v21369_v54 = vand.u32 4294901760, %v15383_v8  ;;  %v21373_v61 = vld [vmem:[#allocation29_spill] sm:$0xff]  ;;  %v21374_v38 = vld [vmem:[#allocation58_spill] sm:$0xff]  ;;  %v21378_v8 = vld [vmem:[#allocation59_spill] sm:$0xff] }
 0x12c   : > { %v15646_v18 = vpack.c.bf16 %v21363_v25, %v21361_v9  ;;  %11682 = vmatpush3.bf16.msra.mxu1 %v21366_v17  ;;  %v3199_v14 = vsub.f32 %v15453_v51, %v21367_v33  ;;  %v21370_v56 = vand.u32 4294901760, %v15394_v16  ;;  %v21376_v35 = vld [vmem:[#allocation10_spill] sm:$0xff]  ;;  %v21377_v25 = vld [vmem:[#allocation21_spill] sm:$0xff]  ;;  %v21379_v16 = vld [vmem:[#allocation35_spill] sm:$0xff]  ;;  %v11943_v33 = vpack.c.bf16 %v15236_v21, %v15225_v53 }
 0x12d   : > { %21359 = vst [vmem:[#allocation52_spill] sm:$0xff] %v15639_v15  ;;  %v15650_v58 = vpack.c.bf16 %v3316_v57, %v3309_v28  ;;  %11902 = vmatpush3.bf16.msra.mxu0 %v15639_v15  ;;  %11716 = vmatprep.subr.bf16.mxu1 %v21368_v5  ;;  %v21372_v28 = vld [vmem:[#allocation42_spill] sm:$0xff]  ;;  %v21375_v57 = vld [vmem:[#allocation19_spill] sm:$0xff]  ;;  %v11941_v17 = vpack.c.bf16 %v21379_v16, %v21378_v8  ;;  %v21391_v15 = vld [vmem:[#allocation36_spill] sm:$0xff] }
 0x12e   : > { %21364 = vst [vmem:[#allocation66_spill] sm:$0xff] %v15646_v18  ;;  %v15662_v9 = vpack.c.bf16 %v21370_v56, %v21369_v54  ;;  %11904 = vmatprep.subr.bf16.mxu0 %v15646_v18  ;;  %v11939_v27 = vpack.c.bf16 %v21373_v61, %v21372_v28  ;;  %v3200_v43 = vand.u32 4294901760, %v3199_v14  ;;  %v21380_v5 = vld [vmem:[#allocation22_spill] sm:$0xff]  ;;  %v21381_v54 = vld [vmem:[#allocation23_spill] sm:$0xff]  ;;  %v11945_v14 = vpack.c.bf16 %v15246_v39, %v15240_v59 }
 0x12f   : > { %21365 = vst [vmem:[#allocation67_spill] sm:$0xff] %v15650_v58  ;;  %2227 = vmatmul.mubr.f32.vlgmr.msra.gmra.mrb[14].mxu1 %v21374_v38  ;;  %v11947_v56 = vpack.c.bf16 %v15262_v49, %v15248_v45  ;;  %v21382_v38 = vld [vmem:[#allocation68_spill] sm:$0xff] }
 0x130   : > { %21371 = vst [vmem:[#allocation55_spill] sm:$0xff] %v15662_v9  ;;  %11718 = vmatpush3.bf16.msra.mxu1 %v21375_v57  ;;  %2569 = vmatprep.mubr.f32.mxu1 %v21376_v35  ;;  %v21383_v57 = vld [vmem:[#allocation24_spill] sm:$0xff] }
 0x131   : > { %11906 = vmatpush3.bf16.msra.mxu0 %v15662_v9  ;;  %11720 = vmatprep.subr.bf16.mxu1 %v21377_v25  ;;  %v11951_v25 = vpack.c.bf16 %v15291_v3, %v15289_v44  ;;  %v21389_v9 = vld [vmem:[#allocation33_spill] sm:$0xff] }
 0x132   : > { %11940 = vmatprep.subr.bf16.mxu0 %v11939_v27  ;;  %v21384_v27 = vld [vmem:[#allocation28_spill] sm:$0xff] }
 0x134   : > { %3201 = vmatmul.mubr.f32.vlgmr.msra.gmra.mrb[14].mxu0 %v3200_v43  ;;  %11722 = vmatpush3.bf16.msra.mxu1 %v21380_v5  ;;  %v11949_v43 = vpack.c.bf16 %v15268_v47, %v15266_v41  ;;  %v11953_v5 = vpack.c.bf16 %v15298_v1, %v15296_v22 }
 0x135   : > { %11942 = vmatpush3.bf16.msra.mxu0 %v11941_v17  ;;  %11724 = vmatprep.subr.bf16.mxu1 %v21381_v54  ;;  %v21385_v17 = vld [vmem:[#allocation9_spill] sm:$0xff]  ;;  %v11955_v54 = vpack.c.bf16 %v15324_v29, %v15322_v42 }
 0x136   : > { %11944 = vmatprep.subr.bf16.mxu0 %v11943_v33  ;;  %3568 = vmatprep.mubr.f32.mxu0 %v21382_v38  ;;  %v21386_v33 = vld [vmem:[#allocation20_spill] sm:$0xff] }
 0x138   : > { %11726 = vmatpush3.bf16.msra.mxu1 %v21383_v57  ;;  %v21388_v57 = vld [vmem:[#allocation32_spill] sm:$0xff] }
 0x139   : > { %11946 = vmatpush3.bf16.msra.mxu0 %v11945_v14  ;;  %11728 = vmatprep.subr.bf16.mxu1 %v21384_v27  ;;  %v21387_v14 = vld [vmem:[#allocation25_spill] sm:$0xff] }
 0x13a   : > { %11948 = vmatprep.subr.bf16.mxu0 %v11947_v56  ;;  %v11957_v56 = vpack.c.bf16 %v15332_v10, %v15330_v48  ;;  %v9254_v27 = vpop.f32.mrb[2].mxu1 }
 0x13c   : > { %11730 = vmatpush3.bf16.msra.mxu1 %v21385_v17  ;;  %v9255_v17 = vpop.f32.mrb[3].mxu1 }
 0x13d   : > { %11950 = vmatpush3.bf16.msra.mxu0 %v11949_v43  ;;  %11732 = vmatprep.subr.bf16.mxu1 %v21386_v33  ;;  %v11959_v43 = vpack.c.bf16 %v15347_v31, %v15334_v12  ;;  %v9256_v33 = vadd.f32 %v9255_v17, %v9254_v27  ;;  %v21394_v17 = vld [vmem:[#allocation39_spill] sm:$0xff] }
 0x13e   : > { %11952 = vmatprep.subr.bf16.mxu0 %v11951_v25  ;;  %v21390_v25 = vld [vmem:[#allocation34_spill] sm:$0xff] }
 0x140   : > { %11734 = vmatpush3.bf16.msra.mxu1 %v21387_v14  ;;  %v15706_v14 = vadd.f32 %v9256_v33, %v15597_v34  ;;  %v11967_v34 = vpack.c.bf16 %v15436_v52, %v15431_v24  ;;  %v21396_v33 = vand.u32 4294901760, %v21373_v61  ;;  %v21404_v61 = vand.u32 4294901760, %v15236_v21 }
 0x141   : > { %11954 = vmatpush3.bf16.msra.mxu0 %v11953_v5  ;;  %11736 = vmatprep.subr.bf16.mxu1 %v21388_v57  ;;  %v11961_v5 = vpack.c.bf16 %v15365_v13, %v15363_v50 }
 0x142   : > { %11956 = vmatprep.subr.bf16.mxu0 %v11955_v54  ;;  %v11963_v54 = vpack.c.bf16 %v15378_v2, %v15370_v37  ;;  %v9429_v57 = vpop.f32.mrb[2].mxu0 }
 0x143   : > { %v9430_v18 = vpop.f32.mrb[3].mxu0 }
 0x144   : > { %11738 = vmatpush3.bf16.msra.mxu1 %v21389_v9  ;;  %v15711_v27 = vadd.f32 %v9430_v18, %v9429_v57  ;;  %v21392_v9 = vld [vmem:[#allocation37_spill] sm:$0xff]  ;;  %v21395_v18 = vand.u32 4294901760, %v21372_v28  ;;  %v21403_v28 = vand.u32 4294901760, %v15225_v53  ;;  %v21410_v53 = vand.u32 4294901760, %v15262_v49 }
 0x145   : > { %11958 = vmatpush3.bf16.msra.mxu0 %v11957_v56  ;;  %11740 = vmatprep.subr.bf16.mxu1 %v21390_v25  ;;  %v11965_v56 = vpack.c.bf16 %v15420_v19, %v15415_v20  ;;  %v21416_v49 = vand.u32 4294901760, %v15289_v44 }
 0x146   : > { %11960 = vmatprep.subr.bf16.mxu0 %v11959_v43  ;;  %v21393_v43 = vld [vmem:[#allocation41_spill] sm:$0xff]  ;;  %v12003_v25 = vpack.c.bf16 %v21396_v33, %v21395_v18  ;;  %v12007_v18 = vpack.c.bf16 %v21404_v61, %v21403_v28  ;;  %v21405_v33 = vld [vmem:[#allocation47_spill] sm:$0xff]  ;;  %v3959_v61 = vld [vmem:[%s15756_s13 + $0x8] sm:$0xff] }
 0x148   : > { %11742 = vmatpush3.bf16.msra.mxu1 %v21391_v15  ;;  %v11969_v15 = vpack.c.bf16 %v15450_v7, %v15443_v32 }
 0x149   : > { %11962 = vmatpush3.bf16.msra.mxu0 %v11961_v5  ;;  %11744 = vmatprep.subr.bf16.mxu1 %v21392_v9  ;;  %v21397_v5 = vld [vmem:[#allocation44_spill] sm:$0xff]  ;;  %v21400_v9 = vld [vmem:[#allocation45_spill] sm:$0xff] }
 0x14a   : > { %11964 = vmatprep.subr.bf16.mxu0 %v11963_v54  ;;  %v21398_v54 = vld [vmem:[#allocation30_spill] sm:$0xff] }
 0x14b   : > { %v21399_v57 = vand.u32 4294901760, %v21398_v54  ;;  %v21406_v54 = vld [vmem:[#allocation49_spill] sm:$0xff] }
 0x14c   : > { %11746 = vmatpush3.bf16.msra.mxu1 %v21393_v43  ;;  %v21402_v43 = vand.u32 4294901760, %v21379_v16  ;;  %v21409_v16 = vand.u32 4294901760, %v15248_v45  ;;  %v21415_v45 = vand.u32 4294901760, %v15268_v47  ;;  %v21422_v47 = vand.u32 4294901760, %v15322_v42 }
 0x14d   : > { %11966 = vmatpush3.bf16.msra.mxu0 %v11965_v56  ;;  %11780 = vmatprep.subr.bf16.mxu1 %v21394_v17  ;;  %v21401_v56 = vand.u32 4294901760, %v21378_v8  ;;  %v21408_v8 = vand.u32 4294901760, %v15246_v39  ;;  %v21413_v39 = vld [vmem:[#allocation5_spill] sm:$0xff]  ;;  %v21429_v42 = vand.u32 4294901760, %v15347_v31  ;;  %v21436_v31 = vand.u32 4294901760, %v15378_v2  ;;  %v21440_v2 = vld [vmem:[#allocation16_spill] sm:$0xff] }
 0x14e   : > { %11968 = vmatprep.subr.bf16.mxu0 %v11967_v34  ;;  %v12011_v21 = vpack.c.bf16 %v21410_v53, %v21409_v16  ;;  %v21423_v16 = vand.u32 4294901760, %v15324_v29  ;;  %v4027_v53 = vmul.f32 %v3959_v61, %v3959_v61  ;;  %v21431_v61 = vld [vmem:[#allocation13_spill] sm:$0xff] }
 0x14f   : > { %2571 = vmatmul.mubr.f32.vlgmr.msra.gmra.mrb[16].mxu1 %v21314_v4  ;;  %v12005_v34 = vpack.c.bf16 %v21402_v43, %v21401_v56  ;;  %v21412_v56 = vld [vmem:[#allocation50_spill] sm:$0xff] }
 0x150   : > { %11782 = vmatpush3.bf16.msra.mxu1 %v21397_v5  ;;  %2813 = vmatprep.mubr.f32.mxu1 %v21399_v57  ;;  %v12019_v44 = vpack.c.bf16 %v21423_v16, %v21422_v47  ;;  %v15788_v29 = vand.u32 4294901760, %v4027_v53 }
 0x151   : > { %11970 = vmatpush3.bf16.msra.mxu0 %v11969_v15  ;;  %11784 = vmatprep.subr.bf16.mxu1 %v21400_v9  ;;  %v21407_v15 = vand.u32 4294901760, %v15240_v59  ;;  %v21414_v59 = vand.u32 4294901760, %v15266_v41 }
 0x152   : > { %12004 = vmatprep.subr.bf16.mxu0 %v12003_v25  ;;  %v21411_v25 = vld [vmem:[#allocation63_spill] sm:$0xff]  ;;  %21430 = vst [vmem:[#allocation56_spill] sm:$0xff] %v15788_v29  ;;  %v15804_v16 = vsub.f32 %v4027_v53, %v15788_v29  ;;  %v21441_v53 = vand.u32 4294901760, %v15415_v20  ;;  %v15838_v20 = vld [vmem:[%s20061_s3 + $0x8] sm:$0xff] }
 0x153   : > { %v12009_v57 = vpack.c.bf16 %v21408_v8, %v21407_v15  ;;  %v12013_v43 = vpack.c.bf16 %v21415_v45, %v21414_v59  ;;  %v21419_v15 = vld [vmem:[#allocation7_spill] sm:$0xff]  ;;  %v21420_v8 = vand.u32 4294901760, %v15296_v22  ;;  %v21426_v59 = vand.u32 4294901760, %v15330_v48 }
 0x154   : > { %3571 = vmatmul.mubr.f32.vlgmr.msra.gmra.mrb[16].mxu0 %v15453_v51  ;;  %11786 = vmatpush3.bf16.msra.mxu1 %v21405_v33  ;;  %v21427_v45 = vand.u32 4294901760, %v15332_v10  ;;  %v21433_v48 = vand.u32 4294901760, %v15363_v50  ;;  %v21434_v10 = vand.u32 4294901760, %v15365_v13  ;;  %21437 = vst [vmem:[#allocation71_spill] sm:$0xff] %v15804_v16  ;;  %v15809_v50 = vld [vmem:[%s20061_s3 + $0x80] sm:$0xff]  ;;  %v15814_v13 = vld [vmem:[%s20061_s3 + $0x88] sm:$0xff] }
 0x155   : > { %12006 = vmatpush3.bf16.msra.mxu0 %v12005_v34  ;;  %11788 = vmatprep.subr.bf16.mxu1 %v21406_v54  ;;  %v21417_v34 = vand.u32 4294901760, %v15291_v3  ;;  %v21424_v3 = vld [vmem:[#allocation11_spill] sm:$0xff] }
 0x156   : > { %12008 = vmatprep.subr.bf16.mxu0 %v12007_v18  ;;  %3845 = vmatprep.mubr.f32.mxu0 %v21411_v25  ;;  %v21418_v18 = vld [vmem:[#allocation6_spill] sm:$0xff]  ;;  %v12021_v22 = vpack.c.bf16 %v21427_v45, %v21426_v59  ;;  %v21438_v59 = vld [vmem:[#allocation15_spill] sm:$0xff]  ;;  %v21442_v45 = vand.u32 4294901760, %v15420_v19  ;;  %v20328_v19 = vand.u32 4294901760, %v15804_v16 }
 0x157   : > { %v12015_v28 = vpack.c.bf16 %v21417_v34, %v21416_v49 }
 0x158   : > { %11790 = vmatpush3.bf16.msra.mxu1 %v21412_v56 }
 0x159   : > { %12010 = vmatpush3.bf16.msra.mxu0 %v12009_v57  ;;  %11792 = vmatprep.subr.bf16.mxu1 %v21413_v39  ;;  %v21421_v57 = vand.u32 4294901760, %v15298_v1  ;;  %v21428_v1 = vand.u32 4294901760, %v15334_v12  ;;  %v21435_v12 = vand.u32 4294901760, %v15370_v37 }
 0x15a   : > { %12012 = vmatprep.subr.bf16.mxu0 %v12011_v21  ;;  %v21425_v21 = vld [vmem:[#allocation12_spill] sm:$0xff] }
 0x15b   : > { %v12017_v41 = vpack.c.bf16 %v21421_v57, %v21420_v8  ;;  %v12023_v49 = vpack.c.bf16 %v21429_v42, %v21428_v1  ;;  %v21432_v8 = vld [vmem:[#allocation14_spill] sm:$0xff]  ;;  %v12025_v57 = vpack.c.bf16 %v21434_v10, %v21433_v48  ;;  %v12027_v47 = vpack.c.bf16 %v21436_v31, %v21435_v12  ;;  %v21445_v48 = vld [vmem:[#allocation17_spill] sm:$0xff] }
 0x15c   : > { %11794 = vmatpush3.bf16.msra.mxu1 %v21418_v18  ;;  %v21444_v1 = vand.u32 4294901760, %v15436_v52  ;;  %v15849_v52 = vld [vmem:[%s20061_s3 + $0x98] sm:$0xff]  ;;  %v21446_v10 = vand.u32 4294901760, %v15443_v32  ;;  %v15870_v32 = vld [vmem:[%s20061_s3 + $0x10] sm:$0xff] }
 0x15d   : > { %12014 = vmatpush3.bf16.msra.mxu0 %v12013_v43  ;;  %11796 = vmatprep.subr.bf16.mxu1 %v21419_v15  ;;  %v9289_v43 = vpop.f32.mrb[4].mxu1 }
 0x15e   : > { %12016 = vmatprep.subr.bf16.mxu0 %v12015_v28  ;;  %v9290_v34 = vpop.f32.mrb[5].mxu1 }
 0x15f   : > { %v9291_v28 = vadd.f32 %v9290_v34, %v9289_v43  ;;  %v21443_v43 = vand.u32 4294901760, %v15431_v24  ;;  %v20337_v34 = vand.u32 4294901760, %v15814_v13  ;;  %v15844_v24 = vld [vmem:[%s20061_s3 + $0x90] sm:$0xff] }
 0x160   : > { %11798 = vmatpush3.bf16.msra.mxu1 %v21424_v3 }
 0x161   : > { %12018 = vmatpush3.bf16.msra.mxu0 %v12017_v41  ;;  %11800 = vmatprep.subr.bf16.mxu1 %v21425_v21  ;;  %v15797_v41 = vadd.f32 %v9291_v28, %v15706_v14  ;;  %v12031_v42 = vpack.c.bf16 %v21444_v1, %v21443_v43  ;;  %v15833_v28 = vld [vmem:[%s20061_s3] sm:$0xff]  ;;  %v15890_v1 = vld [vmem:[%s20061_s3 + $0xa8] sm:$0xff] }
 0x162   : > { %12020 = vmatprep.subr.bf16.mxu0 %v12019_v44  ;;  %v9499_v44 = vpop.f32.mrb[4].mxu0  ;;  %v20332_v31 = vand.u32 4294901760, %v15833_v28  ;;  %v15885_v43 = vld [vmem:[%s20061_s3 + $0xa0] sm:$0xff] }
 0x163   : > { %v9500_v14 = vpop.f32.mrb[5].mxu0 }
 0x164   : > { %11802 = vmatpush3.bf16.msra.mxu1 %v21431_v61  ;;  %v15817_v37 = vadd.f32 %v9500_v14, %v9499_v44  ;;  %v20330_v14 = vand.u32 4294901760, %v15844_v24 }
 0x165   : > { %12022 = vmatpush3.bf16.msra.mxu0 %v12021_v22  ;;  %11804 = vmatprep.subr.bf16.mxu1 %v21432_v8  ;;  %v12029_v22 = vpack.c.bf16 %v21442_v45, %v21441_v53  ;;  %v4129_v53 = vsub.f32 %v15804_v16, %v20328_v19  ;;  %v21449_v45 = vld [vmem:[#allocation8_spill] sm:$0xff]  ;;  %v15925_v19 = vld [vmem:[%s20061_s3 + $0xb0] sm:$0xff] }
 0x166   : > { %12024 = vmatprep.subr.bf16.mxu0 %v12023_v49  ;;  %21439 = vst [vmem:[#allocation72_spill] sm:$0xff] %v15817_v37  ;;  %v20338_v49 = vand.u32 4294901760, %v15809_v50 }
 0x168   : > { %11806 = vmatpush3.bf16.msra.mxu1 %v21438_v59  ;;  %v15863_v44 = vpack.c.bf16 %v20337_v34, %v20338_v49  ;;  %v16007_v49 = vld [vmem:[%s20061_s3 + $0xd0] sm:$0xff] }
 0x169   : > { %12026 = vmatpush3.bf16.msra.mxu0 %v12025_v57  ;;  %11808 = vmatprep.subr.bf16.mxu1 %v21440_v2  ;;  %v21447_v57 = vand.u32 4294901760, %v15450_v7  ;;  %v15875_v7 = vld [vmem:[%s20061_s3 + $0x18] sm:$0xff] }
 0x16a   : > { %12028 = vmatprep.subr.bf16.mxu0 %v12027_v47  ;;  %v20331_v47 = vand.u32 4294901760, %v15838_v20  ;;  %21448 = vst [vmem:[#allocation57_spill] sm:$0xff] %v15863_v44 }
 0x16b   : > { %v12033_v12 = vpack.c.bf16 %v21447_v57, %v21446_v10  ;;  %v20334_v10 = vand.u32 4294901760, %v15870_v32  ;;  %v20333_v57 = vand.u32 4294901760, %v15875_v7 }
 0x16c   : > { %11810 = vmatpush3.bf16.msra.mxu1 %v21445_v48 }
 0x16d   : > { %12030 = vmatpush3.bf16.msra.mxu0 %v12029_v22  ;;  %11844 = vmatprep.subr.bf16.mxu1 %v21394_v17  ;;  %v20329_v17 = vand.u32 4294901760, %v15849_v52  ;;  %v21450_v22 = vand.u32 4294901760, %v21449_v45  ;;  %v15920_v45 = vld [vmem:[%s20061_s3 + $0x28] sm:$0xff] }
 0x16e   : > { %12032 = vmatprep.subr.bf16.mxu0 %v12031_v42  ;;  %v15899_v42 = vpack.c.bf16 %v20331_v47, %v20332_v31  ;;  %v20343_v47 = vand.u32 4294901760, %v15920_v45  ;;  %v3958_v31 = vld [vmem:[%s15756_s13] sm:$0xff] }
 0x16f   : > { %2817 = vmatmul.mubr.f32.vlgmr.msra.gmra.mrb[18].mxu1 %v21450_v22  ;;  %v4130_v22 = vand.u32 4294901760, %v4129_v53  ;;  %v15940_v53 = vpack.c.bf16 %v20333_v57, %v20334_v10  ;;  %v15956_v57 = vld [vmem:[%s20061_s3 + $0x30] sm:$0xff]  ;;  %v15961_v10 = vld [vmem:[%s20061_s3 + $0x38] sm:$0xff] }
 0x170   : > { %11846 = vmatpush3.bf16.msra.mxu1 %v21397_v5  ;;  %3087 = vmatprep.mubr.f32.mxu1 %v21376_v35  ;;  %21451 = vst [vmem:[#allocation18_spill] sm:$0xff] %v15899_v42  ;;  %v15908_v35 = vpack.c.bf16 %v20329_v17, %v20330_v14  ;;  %v20336_v5 = vand.u32 4294901760, %v15885_v43  ;;  %v15930_v17 = vld [vmem:[%s20061_s3 + $0xb8] sm:$0xff]  ;;  %v20354_v34 = vand.u32 4294901760, %v15956_v57 }
 0x171   : > { %12034 = vmatpush3.bf16.msra.mxu0 %v12033_v12  ;;  %11848 = vmatprep.subr.bf16.mxu1 %v21400_v9  ;;  %v20335_v9 = vand.u32 4294901760, %v15890_v1  ;;  %v15915_v12 = vld [vmem:[%s20061_s3 + $0x20] sm:$0xff]  ;;  %21453 = vst [vmem:[#allocation29_spill] sm:$0xff] %v15940_v53 }
 0x172   : > { %12068 = vmatprep.subr.bf16.mxu0 %v15863_v44  ;;  %21452 = vst [vmem:[#allocation42_spill] sm:$0xff] %v15908_v35  ;;  %v20344_v14 = vand.u32 4294901760, %v15915_v12 }
 0x174   : > { %3847 = vmatmul.mubr.f32.vlgmr.msra.gmra.mrb[18].mxu0 %v15396_v60  ;;  %11850 = vmatpush3.bf16.msra.mxu1 %v21405_v33  ;;  %v15949_v33 = vpack.c.bf16 %v20335_v9, %v20336_v5  ;;  %v15966_v9 = vld [vmem:[%s20061_s3 + $0xc0] sm:$0xff]  ;;  %v15971_v5 = vld [vmem:[%s20061_s3 + $0xc8] sm:$0xff] }
 0x175   : > { %12070 = vmatpush3.bf16.msra.mxu0 %v15899_v42  ;;  %11852 = vmatprep.subr.bf16.mxu1 %v21406_v54  ;;  %v20345_v54 = vand.u32 4294901760, %v15925_v19  ;;  %v21460_v44 = vand.u32 4294901760, %v15966_v9  ;;  %v16047_v42 = vld [vmem:[%s20061_s3 + $0xe0] sm:$0xff] }
 0x176   : > { %12072 = vmatprep.subr.bf16.mxu0 %v15908_v35  ;;  %21454 = vst [vmem:[#allocation58_spill] sm:$0xff] %v15949_v33  ;;  %4131 = vmatprep.mubr.f32.mxu0 %v4130_v22  ;;  %v15980_v22 = vpack.c.bf16 %v20343_v47, %v20344_v14  ;;  %v15997_v47 = vld [vmem:[%s20061_s3 + $0x40] sm:$0xff]  ;;  %v16002_v14 = vld [vmem:[%s20061_s3 + $0x48] sm:$0xff]  ;;  %v21458_v35 = vand.u32 4294901760, %v15961_v10 }
 0x178   : > { %11854 = vmatpush3.bf16.msra.mxu1 %v21412_v56  ;;  %21455 = vst [vmem:[#allocation19_spill] sm:$0xff] %v15980_v22  ;;  %v21456_v56 = vand.u32 4294901760, %v15930_v17 }
 0x179   : > { %12074 = vmatpush3.bf16.msra.mxu0 %v15940_v53  ;;  %11856 = vmatprep.subr.bf16.mxu1 %v21413_v39  ;;  %v16021_v39 = vpack.c.bf16 %v21458_v35, %v20354_v34  ;;  %v16037_v35 = vld [vmem:[%s20061_s3 + $0x50] sm:$0xff]  ;;  %v16042_v34 = vld [vmem:[%s20061_s3 + $0x58] sm:$0xff] }
 0x17a   : > { %12076 = vmatprep.subr.bf16.mxu0 %v15949_v33  ;;  %v15990_v53 = vpack.c.bf16 %v21456_v56, %v20345_v54  ;;  %v16012_v56 = vld [vmem:[%s20061_s3 + $0xd8] sm:$0xff]  ;;  %v4026_v54 = vmul.f32 %v3958_v31, %v3958_v31  ;;  %v20364_v33 = vand.u32 4294901760, %v15997_v47 }
 0x17b   : > { %21459 = vst [vmem:[#allocation21_spill] sm:$0xff] %v16021_v39  ;;  %v21467_v36 = vand.u32 4294901760, %v16012_v56 }
 0x17c   : > { %21457 = vst [vmem:[#allocation10_spill] sm:$0xff] %v15990_v53  ;;  %11858 = vmatpush3.bf16.msra.mxu1 %v21418_v18  ;;  %v21461_v18 = vand.u32 4294901760, %v15971_v5 }
 0x17d   : > { %12078 = vmatpush3.bf16.msra.mxu0 %v15980_v22  ;;  %11860 = vmatprep.subr.bf16.mxu1 %v21419_v15  ;;  %v21464_v22 = vand.u32 4294901760, %v16002_v14 }
 0x17e   : > { %12080 = vmatprep.subr.bf16.mxu0 %v15990_v53  ;;  %v16030_v31 = vpack.c.bf16 %v21461_v18, %v21460_v44  ;;  %v16052_v44 = vld [vmem:[%s20061_s3 + $0xe8] sm:$0xff]  ;;  %v16055_v18 = vand.u32 4294901760, %v4026_v54  ;;  %v20371_v53 = vand.u32 4294901760, %v16037_v35 }
 0x17f   : > { %v16063_v15 = vpack.c.bf16 %v21464_v22, %v20364_v33  ;;  %v16079_v22 = vld [vmem:[%s20061_s3 + $0x60] sm:$0xff]  ;;  %v16084_v33 = vld [vmem:[%s20061_s3 + $0x68] sm:$0xff] }
 0x180   : > { %21462 = vst [vmem:[#allocation59_spill] sm:$0xff] %v16030_v31  ;;  %11862 = vmatpush3.bf16.msra.mxu1 %v21424_v3  ;;  %21463 = vst [vmem:[#allocation35_spill] sm:$0xff] %v16055_v18  ;;  %v9324_v37 = vpop.f32.mrb[6].mxu1  ;;  %v21466_v3 = vand.u32 4294901760, %v16007_v49  ;;  %v20375_v60 = vand.u32 4294901760, %v16079_v22  ;;  %v20374_v58 = vand.u32 4294901760, %v16084_v33 }
 0x181   : > { %12082 = vmatpush3.bf16.msra.mxu0 %v16021_v39  ;;  %11864 = vmatprep.subr.bf16.mxu1 %v21425_v21  ;;  %21465 = vst [vmem:[#allocation22_spill] sm:$0xff] %v16063_v15  ;;  %v9325_v51 = vpop.f32.mrb[7].mxu1  ;;  %v16098_v21 = vsub.f32 %v4026_v54, %v16055_v18 }
 0x182   : > { %12084 = vmatprep.subr.bf16.mxu0 %v16030_v31  ;;  %v16072_v39 = vpack.c.bf16 %v21467_v36, %v21466_v3  ;;  %v16089_v36 = vld [vmem:[%s20061_s3 + $0xf0] sm:$0xff]  ;;  %v16094_v3 = vld [vmem:[%s20061_s3 + $0xf8] sm:$0xff]  ;;  %v9326_v29 = vadd.f32 %v9325_v51, %v9324_v37  ;;  %v21470_v31 = vand.u32 4294901760, %v16042_v34  ;;  %v21473_v37 = vand.u32 4294901760, %v16052_v44 }
 0x183   : > { %21469 = vst [vmem:[#allocation24_spill] sm:$0xff] %v16098_v21 }
 0x184   : > { %21468 = vst [vmem:[#allocation23_spill] sm:$0xff] %v16072_v39  ;;  %11866 = vmatpush3.bf16.msra.mxu1 %v21431_v61  ;;  %v16106_v38 = vpack.c.bf16 %v21470_v31, %v20371_v53  ;;  %v1095_v51 = vadd.f32 %v9326_v29, %v15797_v41  ;;  %v21472_v61 = vand.u32 4294901760, %v16047_v42  ;;  %v16123_v31 = vld [vmem:[%s20061_s3 + $0x70] sm:$0xff]  ;;  %v16128_v29 = vld [vmem:[%s20061_s3 + $0x78] sm:$0xff]  ;;  %v9569_v41 = vpop.f32.mrb[6].mxu0 }
 0x185   : > { %12086 = vmatpush3.bf16.msra.mxu0 %v16063_v15  ;;  %11868 = vmatprep.subr.bf16.mxu1 %v21432_v8  ;;  %v9570_v53 = vpop.f32.mrb[7].mxu0  ;;  %v16143_v8 = vpack.c.bf16 %v20374_v58, %v20375_v60  ;;  %v21481_v60 = vand.u32 4294901760, %v16098_v21 }
 0x186   : > { %21471 = vst [vmem:[#allocation28_spill] sm:$0xff] %v16106_v38  ;;  %12088 = vmatprep.subr.bf16.mxu0 %v16072_v39  ;;  %v16116_v54 = vpack.c.bf16 %v21473_v37, %v21472_v61  ;;  %v16133_v37 = vadd.f32 %v15577_v0, %v1095_v51  ;;  %v16135_v15 = vadd.f32 %v9570_v53, %v9569_v41  ;;  %v4073_v39 = vand.u32 4294901760, %v16123_v31 }
 0x187   : > { %21475 = vst [vmem:[#allocation20_spill] sm:$0xff] %v16143_v8  ;;  %v21476_v61 = vand.u32 4294901760, %v15809_v50  ;;  %v21477_v53 = vand.u32 4294901760, %v15814_v13  ;;  %v21479_v41 = vand.u32 4294901760, %v16094_v3 }
 0x188   : > { %21474 = vst [vmem:[#allocation9_spill] sm:$0xff] %v16116_v54  ;;  %11870 = vmatpush3.bf16.msra.mxu1 %v21438_v59 }
 0x189   : > { %12090 = vmatpush3.bf16.msra.mxu0 %v16106_v38  ;;  %11872 = vmatprep.subr.bf16.mxu1 %v21440_v2  ;;  %v16150_v0 = vsub.f32 %v15809_v50, %v21476_v61  ;;  %v16155_v51 = vsub.f32 %v15814_v13, %v21477_v53  ;;  %v21478_v2 = vand.u32 4294901760, %v16089_v36  ;;  %v4135_v50 = vsub.f32 %v16098_v21, %v21481_v60 }
 0x18a   : > { %12092 = vmatprep.subr.bf16.mxu0 %v16116_v54  ;;  %v21482_v61 = vand.u32 4294901760, %v15833_v28  ;;  %v21483_v13 = vand.u32 4294901760, %v15838_v20  ;;  %v21486_v60 = vand.u32 4294901760, %v15844_v24 }
 0x18b   : > { %v16162_v58 = vpack.c.bf16 %v21479_v41, %v21478_v2  ;;  %v21487_v41 = vand.u32 4294901760, %v15849_v52 }
 0x18c   : > { %11874 = vmatpush3.bf16.msra.mxu1 %v21445_v48  ;;  %v16171_v59 = vsub.f32 %v15833_v28, %v21482_v61  ;;  %v16176_v53 = vsub.f32 %v15838_v20, %v21483_v13  ;;  %v21484_v48 = vand.u32 4294901760, %v16128_v29  ;;  %v16189_v28 = vsub.f32 %v15844_v24, %v21486_v60 }
 0x18d   : > { %21480 = vst [vmem:[#allocation25_spill] sm:$0xff] %v16162_v58  ;;  %12094 = vmatpush3.bf16.msra.mxu0 %v16143_v8  ;;  %11908 = vmatprep.subr.bf16.mxu1 %v15460_v11  ;;  %v16194_v20 = vsub.f32 %v15849_v52, %v21487_v41  ;;  %v12131_v11 = vpack.c.bf16 %v16155_v51, %v16150_v0  ;;  %v4136_v61 = vand.u32 4294901760, %v4135_v50  ;;  %v21488_v24 = vand.u32 4294901760, %v15870_v32  ;;  %v21492_v41 = vld [vmem:[#allocation26_spill] sm:$0xff] }
 0x18e   : > { %v16184_v2 = vpack.c.bf16 %v21484_v48, %v4073_v39  ;;  %12096 = vmatprep.subr.bf16.mxu0 %v16162_v58  ;;  %v21489_v52 = vand.u32 4294901760, %v15875_v7 }
 0x18f   : > { %3089 = vmatmul.mubr.f32.vlgmr.msra.gmra.mrb[20].mxu1 %v21314_v4  ;;  %v16205_v13 = vsub.f32 %v15870_v32, %v21488_v24  ;;  %v12133_v4 = vpack.c.bf16 %v16176_v53, %v16171_v59  ;;  %v21491_v32 = vand.u32 4294901760, %v15890_v1 }
 0x190   : > { %21485 = vst [vmem:[#allocation32_spill] sm:$0xff] %v16184_v2  ;;  %11910 = vmatpush3.bf16.msra.mxu1 %v15462_v23  ;;  %3431 = vmatprep.mubr.f32.mxu1 %v21411_v25  ;;  %v16210_v48 = vsub.f32 %v15875_v7, %v21489_v52  ;;  %v21490_v23 = vand.u32 4294901760, %v15885_v43  ;;  %v12135_v7 = vpack.c.bf16 %v16194_v20, %v16189_v28 }
 0x191   : > { %12098 = vmatpush3.bf16.msra.mxu0 %v16184_v2  ;;  %11912 = vmatprep.subr.bf16.mxu1 %v15503_v55  ;;  %v16224_v60 = vsub.f32 %v15890_v1, %v21491_v32  ;;  %v21493_v55 = vand.u32 4294901760, %v15915_v12  ;;  %v21495_v1 = vld [vmem:[#allocation43_spill] sm:$0xff]  ;;  %v21497_v32 = vand.u32 4294901760, %v15930_v17  ;;  %v21545_v2 = vld [vmem:[#allocation65_spill] sm:$0xff] }
 0x192   : > { %v16219_v50 = vsub.f32 %v15885_v43, %v21490_v23  ;;  %12132 = vmatprep.subr.bf16.mxu0 %v12131_v11  ;;  %v21494_v43 = vand.u32 4294901760, %v15920_v45  ;;  %v12137_v11 = vpack.c.bf16 %v16210_v48, %v16205_v13 }
 0x193   : > { %v16232_v24 = vsub.f32 %v15915_v12, %v21493_v55  ;;  %v16250_v12 = vsub.f32 %v15930_v17, %v21497_v32  ;;  %v21500_v17 = vld [vmem:[#allocation46_spill] sm:$0xff] }
 0x194   : > { %4137 = vmatmul.mubr.f32.vlgmr.msra.gmra.mrb[20].mxu0 %v4136_v61  ;;  %11914 = vmatpush3.bf16.msra.mxu1 %v21492_v41  ;;  %v16237_v52 = vsub.f32 %v15920_v45, %v21494_v43  ;;  %v21496_v61 = vand.u32 4294901760, %v15925_v19  ;;  %v12139_v45 = vpack.c.bf16 %v16224_v60, %v16219_v50  ;;  %v21501_v43 = vand.u32 4294901760, %v15966_v9 }
 0x195   : > { %12134 = vmatpush3.bf16.msra.mxu0 %v12133_v4  ;;  %11916 = vmatprep.subr.bf16.mxu1 %v21495_v1  ;;  %v21498_v4 = vand.u32 4294901760, %v15956_v57  ;;  %v21502_v1 = vand.u32 4294901760, %v15971_v5 }
 0x196   : > { %v16245_v23 = vsub.f32 %v15925_v19, %v21496_v61  ;;  %12136 = vmatprep.subr.bf16.mxu0 %v12135_v7  ;;  %4504 = vmatprep.mubr.f32.mxu0 %v15804_v16  ;;  %v21499_v19 = vand.u32 4294901760, %v15961_v10  ;;  %v12141_v7 = vpack.c.bf16 %v16237_v52, %v16232_v24  ;;  %v21504_v61 = vand.u32 4294901760, %v15997_v47 }
 0x197   : > { %v16259_v41 = vsub.f32 %v15956_v57, %v21498_v4  ;;  %v16277_v57 = vsub.f32 %v15971_v5, %v21502_v1  ;;  %v21506_v4 = vand.u32 4294901760, %v16002_v14 }
 0x198   : > { %11918 = vmatpush3.bf16.msra.mxu1 %v15542_v6  ;;  %v16264_v55 = vsub.f32 %v15961_v10, %v21499_v19  ;;  %v16272_v6 = vsub.f32 %v15966_v9, %v21501_v43  ;;  %v12143_v10 = vpack.c.bf16 %v16250_v12, %v16245_v23  ;;  %v16285_v32 = vsub.f32 %v15997_v47, %v21504_v61  ;;  %v21508_v19 = vld [vmem:[#allocation74_spill] sm:$0xff] }
 0x199   : > { %12138 = vmatpush3.bf16.msra.mxu0 %v12137_v11  ;;  %11920 = vmatprep.subr.bf16.mxu1 %v21500_v17  ;;  %v21503_v11 = vld [vmem:[#allocation48_spill] sm:$0xff]  ;;  %v16290_v9 = vsub.f32 %v16002_v14, %v21506_v4  ;;  %v21511_v43 = vand.u32 4294901760, %v16012_v56  ;;  %v21519_v61 = vand.u32 4294901760, %v16052_v44 }
 0x19a   : > { %12140 = vmatprep.subr.bf16.mxu0 %v12139_v45  ;;  %21505 = vst [vmem:[#allocation33_spill] sm:$0xff] %v16285_v32  ;;  %v12145_v5 = vpack.c.bf16 %v16264_v55, %v16259_v41  ;;  %v21509_v45 = vand.u32 4294901760, %v16007_v49  ;;  %v12147_v14 = vpack.c.bf16 %v16277_v57, %v16272_v6 }
 0x19b   : > { %21507 = vst [vmem:[#allocation34_spill] sm:$0xff] %v16290_v9  ;;  %v16303_v47 = vsub.f32 %v16012_v56, %v21511_v43  ;;  %v12149_v56 = vpack.c.bf16 %v16290_v9, %v16285_v32  ;;  %v21549_v54 = vand.u32 4294901760, %v16290_v9 }
 0x19c   : > { %11922 = vmatpush3.bf16.msra.mxu1 %v21503_v11  ;;  %v16298_v17 = vsub.f32 %v16007_v49, %v21509_v45  ;;  %v21515_v11 = vand.u32 4294901760, %v16042_v34 }
 0x19d   : > { %12142 = vmatpush3.bf16.msra.mxu0 %v12141_v7  ;;  %11924 = vmatprep.subr.bf16.mxu1 %v21508_v19  ;;  %21512 = vst [vmem:[#allocation37_spill] sm:$0xff] %v16303_v47  ;;  %v21513_v7 = vand.u32 4294901760, %v16037_v35 }
 0x19e   : > { %21510 = vst [vmem:[#allocation36_spill] sm:$0xff] %v16298_v17  ;;  %12144 = vmatprep.subr.bf16.mxu0 %v12143_v10  ;;  %v16316_v49 = vsub.f32 %v16042_v34, %v21515_v11  ;;  %v21517_v10 = vand.u32 4294901760, %v16047_v42  ;;  %v12151_v34 = vpack.c.bf16 %v16303_v47, %v16298_v17 }
 0x19f   : > { %v16311_v1 = vsub.f32 %v16037_v35, %v21513_v7  ;;  %v16329_v35 = vsub.f32 %v16052_v44, %v21519_v61  ;;  %v21527_v7 = vand.u32 4294901760, %v16094_v3 }
 0x1a0   : > { %11926 = vmatpush3.bf16.msra.mxu1 %v15582_v63  ;;  %21516 = vst [vmem:[#allocation39_spill] sm:$0xff] %v16316_v49  ;;  %v16324_v63 = vsub.f32 %v16047_v42, %v21517_v10  ;;  %v9394_v4 = vpop.f32.mrb[8].mxu1  ;;  %v21523_v42 = vand.u32 4294901760, %v16084_v33 }
 0x1a1   : > { %21514 = vst [vmem:[#allocation41_spill] sm:$0xff] %v16311_v1  ;;  %12146 = vmatpush3.bf16.msra.mxu0 %v12145_v5  ;;  %11928 = vmatprep.subr.bf16.mxu1 %v15588_v30  ;;  %21520 = vst [vmem:[#allocation30_spill] sm:$0xff] %v16329_v35  ;;  %v9395_v19 = vpop.f32.mrb[9].mxu1  ;;  %v21521_v5 = vand.u32 4294901760, %v16079_v22  ;;  %v12153_v44 = vpack.c.bf16 %v16316_v49, %v16311_v1 }
 0x1a2   : > { %21518 = vst [vmem:[#allocation44_spill] sm:$0xff] %v16324_v63  ;;  %12148 = vmatprep.subr.bf16.mxu0 %v12147_v14  ;;  %v9396_v30 = vadd.f32 %v9395_v19, %v9394_v4  ;;  %v16342_v43 = vsub.f32 %v16084_v33, %v21523_v42  ;;  %v21525_v14 = vand.u32 4294901760, %v16089_v36  ;;  %v12155_v33 = vpack.c.bf16 %v16329_v35, %v16324_v63  ;;  %v21533_v4 = vld [vmem:[#allocation67_spill] sm:$0xff] }
 0x1a3   : > { %v16337_v45 = vsub.f32 %v16079_v22, %v21521_v5  ;;  %v16355_v22 = vsub.f32 %v16094_v3, %v21527_v7  ;;  %v21530_v3 = vand.u32 4294901760, %v16128_v29  ;;  %v20378_v19 = vand.u32 4294901760, %v16176_v53  ;;  %v21537_v7 = vld [vmem:[#allocation68_spill] sm:$0xff] }
 0x1a4   : > { %11930 = vmatpush3.bf16.msra.mxu1 %v15599_v62  ;;  %21524 = vst [vmem:[#allocation47_spill] sm:$0xff] %v16342_v43  ;;  %v16350_v62 = vsub.f32 %v16089_v36, %v21525_v14  ;;  %v1367_v11 = vadd.f32 %v9396_v30, %v16133_v37  ;;  %v20377_v5 = vand.u32 4294901760, %v16189_v28  ;;  %v20376_v42 = vand.u32 4294901760, %v16194_v20  ;;  %v21536_v14 = vld [vmem:[#allocation31_spill] sm:$0xff] }
 0x1a5   : > { %21522 = vst [vmem:[#allocation45_spill] sm:$0xff] %v16337_v45  ;;  %12150 = vmatpush3.bf16.msra.mxu0 %v12149_v56  ;;  %11932 = vmatprep.subr.bf16.mxu1 %v15621_v40  ;;  %21528 = vst [vmem:[#allocation63_spill] sm:$0xff] %v16355_v22  ;;  %v9639_v40 = vpop.f32.mrb[8].mxu0  ;;  %v16363_v56 = vsub.f32 %v16123_v31, %v4073_v39  ;;  %v16372_v37 = vsub.f32 %v16128_v29, %v21530_v3  ;;  %v20380_v31 = vand.u32 4294901760, %v16155_v51  ;;  %v21534_v29 = vld [vmem:[#allocation27_spill] sm:$0xff] }
 0x1a6   : > { %21526 = vst [vmem:[#allocation49_spill] sm:$0xff] %v16350_v62  ;;  %12152 = vmatprep.subr.bf16.mxu0 %v12151_v34  ;;  %v9640_v10 = vpop.f32.mrb[9].mxu0  ;;  %v16367_v36 = vadd.f32 %v15711_v27, %v1367_v11  ;;  %v12157_v39 = vpack.c.bf16 %v16342_v43, %v16337_v45  ;;  %v20385_v27 = vand.u32 4294901760, %v16150_v0  ;;  %v21538_v11 = vand.u32 4294901760, %v21537_v7  ;;  %v21541_v7 = vld [vmem:[#allocation61_spill] sm:$0xff] }
 0x1a7   : > { %21529 = vst [vmem:[#allocation50_spill] sm:$0xff] %v16363_v56  ;;  %21531 = vst [vmem:[#allocation5_spill] sm:$0xff] %v16372_v37  ;;  %v16374_v61 = vadd.f32 %v9640_v10, %v9639_v40  ;;  %v12161_v34 = vpack.c.bf16 %v16372_v37, %v16363_v56  ;;  %v20382_v10 = vand.u32 4294901760, %v16205_v13  ;;  %v20381_v3 = vand.u32 4294901760, %v16210_v48 }
 0x1a8   : > { %11934 = vmatpush3.bf16.msra.mxu1 %v15631_v46  ;;  %v12159_v46 = vpack.c.bf16 %v16355_v22, %v16350_v62  ;;  %v12195_v30 = vpack.c.bf16 %v20380_v31, %v20385_v27  ;;  %v21543_v31 = vld [vmem:[#allocation62_spill] sm:$0xff]  ;;  %v20404_v27 = vand.u32 4294901760, %v16272_v6 }
 0x1a9   : > { %21532 = vst [vmem:[#allocation6_spill] sm:$0xff] %v16374_v61  ;;  %12154 = vmatpush3.bf16.msra.mxu0 %v12153_v44  ;;  %11936 = vmatprep.subr.bf16.mxu1 %v15648_v26  ;;  %v20379_v26 = vand.u32 4294901760, %v16171_v59  ;;  %v21535_v44 = vld [vmem:[#allocation73_spill] sm:$0xff] }
 0x1aa   : > { %12156 = vmatprep.subr.bf16.mxu0 %v12155_v33  ;;  %v21539_v33 = vld [vmem:[#allocation38_spill] sm:$0xff] }
 0x1ab   : > { %v12197_v40 = vpack.c.bf16 %v20378_v19, %v20379_v26  ;;  %v20393_v19 = vand.u32 4294901760, %v16250_v12  ;;  %v21542_v26 = vld [vmem:[#allocation56_spill] sm:$0xff] }
 0x1ac   : > { %11938 = vmatpush3.bf16.msra.mxu1 %v21533_v4  ;;  %v20383_v4 = vand.u32 4294901760, %v16224_v60 }
 0x1ad   : > { %12158 = vmatpush3.bf16.msra.mxu0 %v12157_v39  ;;  %11972 = vmatprep.subr.bf16.mxu1 %v21534_v29  ;;  %v12199_v39 = vpack.c.bf16 %v20376_v42, %v20377_v5  ;;  %v20391_v42 = vand.u32 4294901760, %v16237_v52 }
 0x1ae   : > { %12160 = vmatprep.subr.bf16.mxu0 %v12159_v46  ;;  %v20384_v46 = vand.u32 4294901760, %v16219_v50 }
 0x1af   : > { %3433 = vmatmul.mubr.f32.vlgmr.msra.gmra.mrb[22].mxu1 %v21535_v44 }
 0x1b0   : > { %11974 = vmatpush3.bf16.msra.mxu1 %v21536_v14  ;;  %3675 = vmatprep.mubr.f32.mxu1 %v21538_v11  ;;  %v20392_v11 = vand.u32 4294901760, %v16232_v24  ;;  %v12203_v5 = vpack.c.bf16 %v20383_v4, %v20384_v46  ;;  %v20401_v4 = vand.u32 4294901760, %v16264_v55 }
 0x1b1   : > { %12162 = vmatpush3.bf16.msra.mxu0 %v12161_v34  ;;  %11976 = vmatprep.subr.bf16.mxu1 %v21539_v33  ;;  %v21540_v34 = vld [vmem:[#allocation40_spill] sm:$0xff] }
 0x1b2   : > { %12196 = vmatprep.subr.bf16.mxu0 %v12195_v30  ;;  %v12201_v30 = vpack.c.bf16 %v20381_v3, %v20382_v10  ;;  %v21544_v3 = vld [vmem:[#allocation64_spill] sm:$0xff]  ;;  %v20402_v10 = vand.u32 4294901760, %v16259_v41 }
 0x1b4   : > { %4507 = vmatmul.mubr.f32.vlgmr.msra.gmra.mrb[22].mxu0 %v16098_v21  ;;  %11978 = vmatpush3.bf16.msra.mxu1 %v21540_v34  ;;  %v3961_v21 = vld [vmem:[%s15756_s13 + $0x18] sm:$0xff] }
 0x1b5   : > { %12198 = vmatpush3.bf16.msra.mxu0 %v12197_v40  ;;  %11980 = vmatprep.subr.bf16.mxu1 %v21541_v7  ;;  %v20394_v40 = vand.u32 4294901760, %v16245_v23  ;;  %v4029_v8 = vmul.f32 %v3961_v21, %v3961_v21  ;;  %v21551_v21 = vand.u32 4294901760, %v16303_v47 }
 0x1b6   : > { %12200 = vmatprep.subr.bf16.mxu0 %v12199_v39  ;;  %4781 = vmatprep.mubr.f32.mxu0 %v21542_v26  ;;  %v12205_v39 = vpack.c.bf16 %v20391_v42, %v20392_v11  ;;  %v21546_v11 = vld [vmem:[#allocation53_spill] sm:$0xff] }
 0x1b7   : > { %v12207_v46 = vpack.c.bf16 %v20393_v19, %v20394_v40  ;;  %v20410_v40 = vand.u32 4294901760, %v16298_v17  ;;  %v21547_v42 = vld [vmem:[#allocation69_spill] sm:$0xff]  ;;  %v16471_v61 = vand.u32 4294901760, %v4029_v8  ;;  %v21557_v17 = vand.u32 4294901760, %v16329_v35 }
 0x1b8   : > { %11982 = vmatpush3.bf16.msra.mxu1 %v21543_v31  ;;  %v20428_v35 = vand.u32 4294901760, %v16372_v37  ;;  %v16560_v37 = vld [vmem:[%s20061_s3 + $0x110] sm:$0xff] }
 0x1b9   : > { %12202 = vmatpush3.bf16.msra.mxu0 %v12201_v30  ;;  %11984 = vmatprep.subr.bf16.mxu1 %v21544_v3  ;;  %v20403_v30 = vand.u32 4294901760, %v16277_v57  ;;  %v12215_v16 = vpack.c.bf16 %v21551_v21, %v20410_v40  ;;  %21552 = vst [vmem:[#allocation7_spill] sm:$0xff] %v16471_v61  ;;  %v20421_v21 = vand.u32 4294901760, %v16337_v45  ;;  %v20420_v40 = vand.u32 4294901760, %v16342_v43  ;;  %v16697_v45 = vld [vmem:[%s20061_s3 + $0x1d0] sm:$0xff] }
 0x1ba   : > { %12204 = vmatprep.subr.bf16.mxu0 %v12203_v5  ;;  %v12209_v5 = vpack.c.bf16 %v20401_v4, %v20402_v10  ;;  %v21550_v4 = vld [vmem:[#allocation54_spill] sm:$0xff]  ;;  %v20413_v10 = vand.u32 4294901760, %v16316_v49  ;;  %21592 = vst [vmem:[#allocation31_spill] sm:$0xff] %v16697_v45 }
 0x1bb   : > { %v12211_v19 = vpack.c.bf16 %v20403_v30, %v20404_v27  ;;  %v21555_v30 = vand.u32 4294901760, %v16311_v1  ;;  %v16489_v1 = vsub.f32 %v4029_v8, %v16471_v61  ;;  %v21562_v8 = vld [vmem:[#allocation66_spill] sm:$0xff]  ;;  %v20429_v61 = vand.u32 4294901760, %v16363_v56 }
 0x1bc   : > { %11986 = vmatpush3.bf16.msra.mxu1 %v21545_v2  ;;  %v16702_v49 = vld [vmem:[%s20061_s3 + $0x1d8] sm:$0xff] }
 0x1bd   : > { %12206 = vmatpush3.bf16.msra.mxu0 %v12205_v39  ;;  %11988 = vmatprep.subr.bf16.mxu1 %v21546_v11  ;;  %v21548_v39 = vand.u32 4294901760, %v16285_v32  ;;  %v12217_v27 = vpack.c.bf16 %v20413_v10, %v21555_v30  ;;  %21558 = vst [vmem:[#allocation11_spill] sm:$0xff] %v16489_v1  ;;  %v16494_v10 = vld [vmem:[%s20061_s3 + $0x180] sm:$0xff]  ;;  %21593 = vst [vmem:[#allocation68_spill] sm:$0xff] %v16702_v49 }
 0x1be   : > { %12208 = vmatprep.subr.bf16.mxu0 %v12207_v46  ;;  %v21554_v46 = vld [vmem:[#allocation51_spill] sm:$0xff] }
 0x1bf   : > { %v12213_v38 = vpack.c.bf16 %v21549_v54, %v21548_v39  ;;  %v21553_v39 = vld [vmem:[#allocation70_spill] sm:$0xff] }
 0x1c0   : > { %11990 = vmatpush3.bf16.msra.mxu1 %v21547_v42  ;;  %v9464_v58 = vpop.f32.mrb[10].mxu1 }
 0x1c1   : > { %12210 = vmatpush3.bf16.msra.mxu0 %v12209_v5  ;;  %11992 = vmatprep.subr.bf16.mxu1 %v21550_v4  ;;  %v9465_v54 = vpop.f32.mrb[11].mxu1 }
 0x1c2   : > { %12212 = vmatprep.subr.bf16.mxu0 %v12211_v19  ;;  %v9466_v5 = vadd.f32 %v9465_v54, %v9464_v58  ;;  %v21556_v19 = vand.u32 4294901760, %v16324_v63  ;;  %v21563_v63 = vand.u32 4294901760, %v16350_v62 }
 0x1c4   : > { %11994 = vmatpush3.bf16.msra.mxu1 %v21553_v39  ;;  %v12219_v47 = vpack.c.bf16 %v21557_v17, %v21556_v19  ;;  %v1711_v58 = vadd.f32 %v9466_v5, %v16367_v36  ;;  %v16499_v17 = vld [vmem:[%s20061_s3 + $0x188] sm:$0xff] }
 0x1c5   : > { %12214 = vmatpush3.bf16.msra.mxu0 %v12213_v38  ;;  %11996 = vmatprep.subr.bf16.mxu1 %v21554_v46  ;;  %v21560_v5 = vld [vmem:[#allocation72_spill] sm:$0xff]  ;;  %v12221_v38 = vpack.c.bf16 %v20420_v40, %v20421_v21  ;;  %v21565_v21 = vld [vmem:[#allocation55_spill] sm:$0xff] }
 0x1c6   : > { %12216 = vmatprep.subr.bf16.mxu0 %v12215_v16  ;;  %v9709_v30 = vpop.f32.mrb[10].mxu0  ;;  %v21559_v16 = vld [vmem:[#allocation52_spill] sm:$0xff]  ;;  %v16503_v19 = vadd.f32 %v21560_v5, %v1711_v58  ;;  %v21564_v58 = vand.u32 4294901760, %v16355_v22  ;;  %v21567_v22 = vand.u32 4294901760, %v16499_v17 }
 0x1c7   : > { %v9710_v36 = vpop.f32.mrb[11].mxu0  ;;  %v16528_v40 = vld [vmem:[%s20061_s3 + $0x108] sm:$0xff] }
 0x1c8   : > { %11998 = vmatpush3.bf16.msra.mxu1 %v21559_v16  ;;  %v16505_v54 = vadd.f32 %v9710_v36, %v9709_v30  ;;  %v12223_v5 = vpack.c.bf16 %v21564_v58, %v21563_v63  ;;  %v16523_v36 = vld [vmem:[%s20061_s3 + $0x100] sm:$0xff]  ;;  %v16534_v63 = vld [vmem:[%s20061_s3 + $0x190] sm:$0xff]  ;;  %v16539_v58 = vld [vmem:[%s20061_s3 + $0x198] sm:$0xff]  ;;  %v20432_v30 = vand.u32 4294901760, %v16528_v40  ;;  %v21604_v32 = vand.u32 4294901760, %v16528_v40 }
 0x1c9   : > { %12218 = vmatpush3.bf16.msra.mxu0 %v12217_v27  ;;  %12000 = vmatprep.subr.bf16.mxu1 %v21562_v8  ;;  %v20433_v27 = vand.u32 4294901760, %v16523_v36  ;;  %v21573_v56 = vand.u32 4294901760, %v16534_v63 }
 0x1ca   : > { %21561 = vst [vmem:[#allocation12_spill] sm:$0xff] %v16505_v54  ;;  %12220 = vmatprep.subr.bf16.mxu0 %v12219_v47  ;;  %v12225_v47 = vpack.c.bf16 %v20428_v35, %v20429_v61  ;;  %v21566_v54 = vand.u32 4294901760, %v16494_v10  ;;  %v16565_v35 = vld [vmem:[%s20061_s3 + $0x118] sm:$0xff] }
 0x1cc   : > { %12002 = vmatpush3.bf16.msra.mxu1 %v21565_v21  ;;  %v16553_v62 = vpack.c.bf16 %v21567_v22, %v21566_v54  ;;  %v21570_v22 = vld [vmem:[#allocation60_spill] sm:$0xff] }
 0x1cd   : > { %12222 = vmatpush3.bf16.msra.mxu0 %v12221_v38  ;;  %12036 = vmatprep.subr.bf16.mxu1 %v21534_v29  ;;  %v21571_v54 = vand.u32 4294901760, %v21570_v22  ;;  %v16575_v29 = vld [vmem:[%s20061_s3 + $0x1a0] sm:$0xff]  ;;  %v16580_v38 = vld [vmem:[%s20061_s3 + $0x1a8] sm:$0xff]  ;;  %v20442_v22 = vand.u32 4294901760, %v16560_v37 }
 0x1ce   : > { %12224 = vmatprep.subr.bf16.mxu0 %v12223_v5  ;;  %21568 = vst [vmem:[#allocation13_spill] sm:$0xff] %v16553_v62  ;;  %v21569_v5 = vand.u32 4294901760, %v16489_v1 }
 0x1cf   : > { %3679 = vmatmul.mubr.f32.vlgmr.msra.gmra.mrb[24].mxu1 %v21571_v54 }
 0x1d0   : > { %v4991_v61 = vsub.f32 %v16489_v1, %v21569_v5  ;;  %12038 = vmatpush3.bf16.msra.mxu1 %v21536_v14  ;;  %3949 = vmatprep.mubr.f32.mxu1 %v21411_v25  ;;  %v16589_v5 = vpack.c.bf16 %v20432_v30, %v20433_v27  ;;  %v21574_v14 = vand.u32 4294901760, %v16539_v58  ;;  %v16605_v30 = vld [vmem:[%s20061_s3 + $0x120] sm:$0xff]  ;;  %v16610_v27 = vld [vmem:[%s20061_s3 + $0x128] sm:$0xff] }
 0x1d1   : > { %12226 = vmatpush3.bf16.msra.mxu0 %v12225_v47  ;;  %12040 = vmatprep.subr.bf16.mxu1 %v21539_v33  ;;  %21576 = vst [vmem:[#allocation16_spill] sm:$0xff] %v16610_v27  ;;  %v20446_v33 = vand.u32 4294901760, %v16605_v30  ;;  %v16725_v1 = vld [vmem:[%s20061_s3 + $0x1e8] sm:$0xff] }
 0x1d2   : > { %21572 = vst [vmem:[#allocation14_spill] sm:$0xff] %v16589_v5  ;;  %12260 = vmatprep.subr.bf16.mxu0 %v16553_v62  ;;  %v16598_v25 = vpack.c.bf16 %v21574_v14, %v21573_v56  ;;  %v4992_v54 = vand.u32 4294901760, %v4991_v61  ;;  %v16615_v56 = vld [vmem:[%s20061_s3 + $0x1b0] sm:$0xff]  ;;  %v16620_v14 = vld [vmem:[%s20061_s3 + $0x1b8] sm:$0xff]  ;;  %v21579_v61 = vand.u32 4294901760, %v16565_v35  ;;  %v20445_v62 = vand.u32 4294901760, %v16610_v27 }
 0x1d3   : > { %21577 = vst [vmem:[#allocation17_spill] sm:$0xff] %v16615_v56  ;;  %21578 = vst [vmem:[#allocation8_spill] sm:$0xff] %v16620_v14 }
 0x1d4   : > { %21575 = vst [vmem:[#allocation15_spill] sm:$0xff] %v16598_v25  ;;  %4783 = vmatmul.mubr.f32.vlgmr.msra.gmra.mrb[24].mxu0 %v16055_v18  ;;  %12042 = vmatpush3.bf16.msra.mxu1 %v21540_v34  ;;  %v16630_v47 = vpack.c.bf16 %v21579_v61, %v20442_v22  ;;  %v21581_v18 = vand.u32 4294901760, %v16575_v29  ;;  %v21582_v34 = vand.u32 4294901760, %v16580_v38  ;;  %v16646_v61 = vld [vmem:[%s20061_s3 + $0x130] sm:$0xff]  ;;  %v16651_v22 = vld [vmem:[%s20061_s3 + $0x138] sm:$0xff]  ;;  %21594 = vst [vmem:[#allocation38_spill] sm:$0xff] %v16725_v1 }
 0x1d5   : > { %12262 = vmatpush3.bf16.msra.mxu0 %v16589_v5  ;;  %12044 = vmatprep.subr.bf16.mxu1 %v21541_v7  ;;  %v16720_v7 = vld [vmem:[%s20061_s3 + $0x1e0] sm:$0xff] }
 0x1d6   : > { %21580 = vst [vmem:[#allocation26_spill] sm:$0xff] %v16630_v47  ;;  %12264 = vmatprep.subr.bf16.mxu0 %v16598_v25  ;;  %v16639_v43 = vpack.c.bf16 %v21582_v34, %v21581_v18  ;;  %4993 = vmatprep.mubr.f32.mxu0 %v4992_v54  ;;  %v16656_v18 = vld [vmem:[%s20061_s3 + $0x1c0] sm:$0xff]  ;;  %v16661_v34 = vld [vmem:[%s20061_s3 + $0x1c8] sm:$0xff]  ;;  %v16670_v54 = vpack.c.bf16 %v20445_v62, %v20446_v33  ;;  %v21589_v62 = vand.u32 4294901760, %v16615_v56  ;;  %v21590_v33 = vand.u32 4294901760, %v16620_v14 }
 0x1d7   : > { %21584 = vst [vmem:[#allocation46_spill] sm:$0xff] %v16656_v18  ;;  %21585 = vst [vmem:[#allocation48_spill] sm:$0xff] %v16661_v34  ;;  %v16677_v25 = vld [vmem:[%s20061_s3 + $0x140] sm:$0xff]  ;;  %v21598_v56 = vand.u32 4294901760, %v16494_v10 }
 0x1d8   : > { %21583 = vst [vmem:[#allocation43_spill] sm:$0xff] %v16639_v43  ;;  %12046 = vmatpush3.bf16.msra.mxu1 %v21543_v31  ;;  %21586 = vst [vmem:[#allocation74_spill] sm:$0xff] %v16670_v54  ;;  %v16682_v31 = vld [vmem:[%s20061_s3 + $0x148] sm:$0xff]  ;;  %v16690_v5 = vpack.c.bf16 %v21590_v33, %v21589_v62  ;;  %v21595_v33 = vand.u32 4294901760, %v16646_v61  ;;  %v21596_v62 = vand.u32 4294901760, %v16651_v22 }
 0x1d9   : > { %12266 = vmatpush3.bf16.msra.mxu0 %v16630_v47  ;;  %12048 = vmatprep.subr.bf16.mxu1 %v21544_v3  ;;  %21587 = vst [vmem:[#allocation67_spill] sm:$0xff] %v16677_v25  ;;  %21588 = vst [vmem:[#allocation27_spill] sm:$0xff] %v16682_v31  ;;  %v3960_v3 = vld [vmem:[%s15756_s13 + $0x10] sm:$0xff]  ;;  %v16715_v47 = vld [vmem:[%s20061_s3 + $0x158] sm:$0xff]  ;;  %v16740_v27 = vsub.f32 %v16494_v10, %v21598_v56  ;;  %v16776_v10 = vsub.f32 %v16528_v40, %v21604_v32  ;;  %v21605_v56 = vand.u32 4294901760, %v16677_v25  ;;  %s9181_s13 = sshll.u32 %s13311_s9, 7 }
 0x1da   : > { %12268 = vmatprep.subr.bf16.mxu0 %v16639_v43  ;;  %21591 = vst [vmem:[#allocation73_spill] sm:$0xff] %v16690_v5  ;;  %v16707_v43 = vld [vmem:[%s20061_s3 + $0x150] sm:$0xff]  ;;  %v16733_v9 = vpack.c.bf16 %v21596_v62, %v21595_v33  ;;  %v21601_v62 = vand.u32 4294901760, %v16661_v34  ;;  %v21606_v14 = vand.u32 4294901760, %v16682_v31  ;;  %v21613_v31 = vand.u32 4294901760, %v16155_v51  ;;  %s13244_s9 = smov [#allocation2]  }
 0x1db   : > { %v21617_v25 = vand.u32 4294901760, %v16539_v58  ;;  %s13178_s12 = sshll.u32 %s13244_s9, 4  ;;  %s13179_s12 = int_to_ptr.vmem [resolvable:$false] %s13178_s12 }
 0x1dc   : > { %12050 = vmatpush3.bf16.msra.mxu1 %v21545_v2  ;;  %v4028_v2 = vmul.f32 %v3960_v3, %v3960_v3  ;;  %21597 = vst [vmem:[#allocation40_spill] sm:$0xff] %v16733_v9  ;;  %v21599_v3 = vand.u32 4294901760, %v16499_v17  ;;  %p13181_p0 = scmp.lt.s32.totalorder %s20015_s10, %s13179_s12 }
 0x1dd   : > { %12270 = vmatpush3.bf16.msra.mxu0 %v16670_v54  ;;  %12052 = vmatprep.subr.bf16.mxu1 %v21546_v11  ;;  %v21600_v11 = vand.u32 4294901760, %v16656_v18  ;;  %v21619_v18 = vand.u32 4294901760, %v16715_v47 }
 0x1de   : > { %v16745_v54 = vsub.f32 %v16499_v17, %v21599_v3  ;;  %12272 = vmatprep.subr.bf16.mxu0 %v16690_v5  ;;  %v16761_v17 = vld [vmem:[%s20061_s3 + $0x160] sm:$0xff]  ;;  %v16766_v3 = vld [vmem:[%s20061_s3 + $0x168] sm:$0xff]  ;;  %v16783_v5 = vpack.c.bf16 %v21606_v14, %v21605_v56  ;;  %v16785_v34 = vand.u32 4294901760, %v4028_v2  ;;  %v4265_v14 = vsub.f32 %v16155_v51, %v21613_v31  ;;  %v16804_v56 = vld [vmem:[%s20061_s3 + $0x1f0] sm:$0xff] }
 0x1df   : > { %v16752_v33 = vpack.c.bf16 %v21601_v62, %v21600_v11  ;;  %v21603_v11 = vand.u32 4294901760, %v16523_v36  ;;  %v21615_v31 = vand.u32 4294901760, %v16176_v53 }
 0x1e0   : > { %12054 = vmatpush3.bf16.msra.mxu1 %v21547_v42  ;;  %21607 = vst [vmem:[#allocation56_spill] sm:$0xff] %v16783_v5  ;;  %21608 = vst [vmem:[#allocation62_spill] sm:$0xff] %v16785_v34  ;;  %v21612_v42 = vand.u32 4294901760, %v16150_v0 }
 0x1e1   : > { %21602 = vst [vmem:[#allocation61_spill] sm:$0xff] %v16752_v33  ;;  %v16771_v62 = vsub.f32 %v16523_v36, %v21603_v11  ;;  %12274 = vmatpush3.bf16.msra.mxu0 %v16733_v9  ;;  %12056 = vmatprep.subr.bf16.mxu1 %v21550_v4  ;;  %v21609_v36 = vand.u32 4294901760, %v16697_v45  ;;  %v21610_v11 = vand.u32 4294901760, %v16702_v49  ;;  %v16809_v4 = vld [vmem:[%s20061_s3 + $0x1f8] sm:$0xff]  ;;  %v4153_v9 = vsub.f32 %v16176_v53, %v21615_v31 }
 0x1e2   : > { %v4258_v40 = vsub.f32 %v16150_v0, %v21612_v42  ;;  %12276 = vmatprep.subr.bf16.mxu0 %v16752_v33  ;;  %v21614_v42 = vand.u32 4294901760, %v16171_v59  ;;  %v21616_v49 = vand.u32 4294901760, %v16534_v63  ;;  %v16828_v33 = vsub.f32 %v16539_v58, %v21617_v25  ;;  %v16848_v25 = vld [vmem:[%s20061_s3 + $0x170] sm:$0xff] }
 0x1e3   : > { %v16793_v32 = vpack.c.bf16 %v21610_v11, %v21609_v36  ;;  %v9534_v36 = vpop.f32.mrb[12].mxu1  ;;  %v21618_v0 = vand.u32 4294901760, %v16707_v43  ;;  %v21622_v53 = vand.u32 4294901760, %v16725_v1 }
 0x1e4   : > { %v4146_v51 = vsub.f32 %v16171_v59, %v21614_v42  ;;  %v16823_v45 = vsub.f32 %v16534_v63, %v21616_v49  ;;  %v9535_v11 = vpop.f32.mrb[13].mxu1  ;;  %v21621_v42 = vand.u32 4294901760, %v16720_v7  ;;  %12058 = vmatpush3.bf16.msra.mxu1 %v21553_v39  ;;  %v4259_v39 = vand.u32 4294901760, %v4258_v40 }
 0x1e5   : > { %21611 = vst [vmem:[#allocation64_spill] sm:$0xff] %v16793_v32  ;;  %v16834_v59 = vpack.c.bf16 %v21619_v18, %v21618_v0  ;;  %v9536_v49 = vadd.f32 %v9535_v11, %v9534_v36  ;;  %v16853_v18 = vld [vmem:[%s20061_s3 + $0x178] sm:$0xff]  ;;  %v16856_v0 = vsub.f32 %v4028_v2, %v16785_v34  ;;  %12278 = vmatpush3.bf16.msra.mxu0 %v16783_v5  ;;  %v4266_v36 = vand.u32 4294901760, %v4265_v14 }
 0x1e6   : > { %v16840_v31 = vpack.c.bf16 %v21622_v53, %v21621_v42  ;;  %12060 = vmatprep.subr.bf16.mxu1 %v21554_v46  ;;  %v21625_v11 = vand.u32 4294901760, %v16189_v28  ;;  %v21626_v53 = vand.u32 4294901760, %v16194_v20  ;;  %12280 = vmatprep.subr.bf16.mxu0 %v16793_v32  ;;  %v21627_v2 = vand.u32 4294901760, %v16761_v17 }
 0x1e7   : > { %21620 = vst [vmem:[#allocation65_spill] sm:$0xff] %v16834_v59  ;;  %21624 = vst [vmem:[#allocation69_spill] sm:$0xff] %v16856_v0  ;;  %v1957_v63 = vadd.f32 %v9536_v49, %v16503_v19  ;;  %v21628_v5 = vand.u32 4294901760, %v16766_v3  ;;  %v4147_v46 = vand.u32 4294901760, %v4146_v51  ;;  %v4154_v40 = vand.u32 4294901760, %v4153_v9  ;;  %v9779_v14 = vpop.f32.mrb[12].mxu0 }
 0x1e8   : > { %21623 = vst [vmem:[#allocation53_spill] sm:$0xff] %v16840_v31  ;;  %v4272_v42 = vsub.f32 %v16189_v28, %v21625_v11  ;;  %v4279_v58 = vsub.f32 %v16194_v20, %v21626_v53  ;;  %v21630_v11 = vand.u32 4294901760, %v16205_v13  ;;  %v21631_v19 = vand.u32 4294901760, %v16210_v48  ;;  %v9780_v53 = vpop.f32.mrb[13].mxu0  ;;  %12062 = vmatpush3.bf16.msra.mxu1 %v21559_v16 }
 0x1e9   : > { %v16872_v34 = vpack.c.bf16 %v21628_v5, %v21627_v2  ;;  %v20493_v5 = vand.u32 4294901760, %v16856_v0  ;;  %v21632_v9 = vand.u32 4294901760, %v16219_v50  ;;  %v21633_v2 = vand.u32 4294901760, %v16224_v60  ;;  %12282 = vmatpush3.bf16.msra.mxu0 %v16834_v59  ;;  %12064 = vmatprep.subr.bf16.mxu1 %v21562_v8 }
 0x1ea   : > { %v4160_v20 = vsub.f32 %v16205_v13, %v21630_v11  ;;  %v4167_v49 = vsub.f32 %v16210_v48, %v21631_v19  ;;  %v16891_v1 = vadd.f32 %v16135_v15, %v1957_v63  ;;  %v16893_v13 = vadd.f32 %v9780_v53, %v9779_v14  ;;  %12284 = vmatprep.subr.bf16.mxu0 %v16840_v31 }
 0x1eb   : > { %21629 = vst [vmem:[#allocation54_spill] sm:$0xff] %v16872_v34  ;;  %v4286_v51 = vsub.f32 %v16219_v50, %v21632_v9  ;;  %v4293_v28 = vsub.f32 %v16224_v60, %v21633_v2  ;;  %v12099_v48 = vpack.c.bf16 %v4266_v36, %v4259_v39  ;;  %v4273_v16 = vand.u32 4294901760, %v4272_v42 }
 0x1ec   : > { %v4280_v11 = vand.u32 4294901760, %v4279_v58  ;;  %v21634_v19 = vand.u32 4294901760, %v16560_v37  ;;  %v21635_v9 = vand.u32 4294901760, %v16565_v35  ;;  %v21636_v15 = vand.u32 4294901760, %v16804_v56  ;;  %12066 = vmatpush3.bf16.msra.mxu1 %v21565_v21 }
 0x1ed   : > { %v21637_v63 = vand.u32 4294901760, %v16809_v4  ;;  %v12101_v39 = vpack.c.bf16 %v4154_v40, %v4147_v46  ;;  %v21639_v58 = vand.u32 4294901760, %v16848_v25  ;;  %v21640_v36 = vand.u32 4294901760, %v16853_v18  ;;  %12286 = vmatpush3.bf16.msra.mxu0 %v16872_v34  ;;  %12100 = vmatprep.subr.bf16.mxu1 %v12099_v48 }
 0x1ee   : > { %v16900_v50 = vsub.f32 %v16560_v37, %v21634_v19  ;;  %v16905_v60 = vsub.f32 %v16565_v35, %v21635_v9  ;;  %v4161_v42 = vand.u32 4294901760, %v4160_v20  ;;  %v21642_v14 = vand.u32 4294901760, %v16232_v24 }
 0x1ef   : > { %v16912_v8 = vpack.c.bf16 %v21637_v63, %v21636_v15  ;;  %v16918_v37 = vpack.c.bf16 %v21640_v36, %v21639_v58  ;;  %v21643_v53 = vand.u32 4294901760, %v16237_v52  ;;  %v4997_v46 = vsub.f32 %v16856_v0, %v20493_v5  ;;  %3951 = vmatmul.mubr.f32.vlgmr.msra.gmra.mrb[26].mxu1 %v21535_v44 }
 0x1f0   : > { %v4174_v35 = vsub.f32 %v16232_v24, %v21642_v14  ;;  %v4168_v40 = vand.u32 4294901760, %v4167_v49  ;;  %v4287_v19 = vand.u32 4294901760, %v4286_v51  ;;  %v4294_v9 = vand.u32 4294901760, %v4293_v28  ;;  %12102 = vmatpush3.bf16.msra.mxu1 %v12101_v39  ;;  %4367 = vmatprep.mubr.f32.mxu1 %v21542_v26 }
 0x1f1   : > { %21638 = vst [vmem:[#allocation70_spill] sm:$0xff] %v16912_v8  ;;  %21641 = vst [vmem:[#allocation51_spill] sm:$0xff] %v16918_v37  ;;  %v4181_v2 = vsub.f32 %v16237_v52, %v21643_v53  ;;  %v12103_v20 = vpack.c.bf16 %v4280_v11, %v4273_v16  ;;  %v21644_v15 = vand.u32 4294901760, %v16245_v23  ;;  %v21645_v63 = vand.u32 4294901760, %v16250_v12  ;;  %12288 = vmatprep.subr.bf16.mxu0 %v16912_v8  ;;  %v21692_v8 = vld [vmem:[#allocation49_spill] sm:$0xff] }
 0x1f2   : > { %v21646_v21 = vand.u32 4294901760, %v16575_v29  ;;  %v21647_v49 = vand.u32 4294901760, %v16580_v38  ;;  %v21648_v51 = vand.u32 4294901760, %v16605_v30  ;;  %v21649_v16 = vand.u32 4294901760, %v16259_v41  ;;  %12290 = vmatpush3.bf16.msra.mxu0 %v16918_v37 }
 0x1f3   : > { %v4300_v24 = vsub.f32 %v16245_v23, %v21644_v15  ;;  %v4307_v52 = vsub.f32 %v16250_v12, %v21645_v63  ;;  %v12323_v23 = vpack.c.bf16 %v16745_v54, %v16740_v27  ;;  %v4175_v12 = vand.u32 4294901760, %v4174_v35  ;;  %12104 = vmatprep.subr.bf16.mxu1 %v12103_v20  ;;  %v21657_v20 = vld [vmem:[#allocation8_spill] sm:$0xff] }
 0x1f4   : > { %v16940_v58 = vsub.f32 %v16575_v29, %v21646_v21  ;;  %v16945_v28 = vsub.f32 %v16580_v38, %v21647_v49  ;;  %v16950_v48 = vsub.f32 %v16605_v30, %v21648_v51  ;;  %v4182_v29 = vand.u32 4294901760, %v4181_v2  ;;  %v21659_v51 = vld [vmem:[#allocation33_spill] sm:$0xff] }
 0x1f5   : > { %v4188_v11 = vsub.f32 %v16259_v41, %v21649_v16  ;;  %v21650_v38 = vand.u32 4294901760, %v16264_v55  ;;  %v4998_v30 = vand.u32 4294901760, %v4997_v46  ;;  %v12105_v14 = vpack.c.bf16 %v4168_v40, %v4161_v42  ;;  %v21653_v42 = vld [vmem:[#allocation16_spill] sm:$0xff]  ;;  %12324 = vmatprep.subr.bf16.mxu0 %v12323_v23 }
 0x1f6   : > { %v12325_v53 = vpack.c.bf16 %v16776_v10, %v16771_v62  ;;  %v12107_v15 = vpack.c.bf16 %v4294_v9, %v4287_v19  ;;  %v4301_v44 = vand.u32 4294901760, %v4300_v24  ;;  %v4308_v35 = vand.u32 4294901760, %v4307_v52  ;;  %v21655_v19 = vld [vmem:[#allocation17_spill] sm:$0xff] }
 0x1f7   : > { %v4195_v36 = vsub.f32 %v16264_v55, %v21650_v38  ;;  %v21651_v41 = vand.u32 4294901760, %v16272_v6  ;;  %v21652_v55 = vand.u32 4294901760, %v16277_v57  ;;  %v21654_v46 = vand.u32 4294901760, %v21653_v42  ;;  %4999 = vmatmul.mubr.f32.vlgmr.msra.gmra.mrb[26].mxu0 %v4998_v30  ;;  %12106 = vmatpush3.bf16.msra.mxu1 %v12105_v14 }
 0x1f8   : > { %v21656_v9 = vand.u32 4294901760, %v21655_v19  ;;  %v21658_v24 = vand.u32 4294901760, %v21657_v20  ;;  %v4189_v21 = vand.u32 4294901760, %v4188_v11  ;;  %v21660_v16 = vand.u32 4294901760, %v21659_v51  ;;  %12326 = vmatpush3.bf16.msra.mxu0 %v12325_v53  ;;  %12108 = vmatprep.subr.bf16.mxu1 %v12107_v15  ;;  %v21669_v15 = vld [vmem:[#allocation11_spill] sm:$0xff] }
 0x1f9   : > { %v4314_v2 = vsub.f32 %v16272_v6, %v21651_v41  ;;  %v4321_v39 = vsub.f32 %v16277_v57, %v21652_v55  ;;  %v16975_v40 = vsub.f32 %v21653_v42, %v21654_v46  ;;  %v12327_v6 = vpack.c.bf16 %v16828_v33, %v16823_v45  ;;  %v21661_v41 = vld [vmem:[#allocation34_spill] sm:$0xff]  ;;  %v21663_v46 = vld [vmem:[#allocation36_spill] sm:$0xff]  ;;  %5366 = vmatprep.mubr.f32.mxu0 %v21669_v15 }
 0x1fa   : > { %v16980_v63 = vsub.f32 %v21655_v19, %v21656_v9  ;;  %v16985_v52 = vsub.f32 %v21657_v20, %v21658_v24  ;;  %v12109_v57 = vpack.c.bf16 %v4182_v29, %v4175_v12  ;;  %v4196_v49 = vand.u32 4294901760, %v4195_v36  ;;  %v21665_v9 = vld [vmem:[#allocation37_spill] sm:$0xff] }
 0x1fb   : > { %v4202_v38 = vsub.f32 %v21659_v51, %v21660_v16  ;;  %v21662_v55 = vand.u32 4294901760, %v21661_v41  ;;  %v21664_v19 = vand.u32 4294901760, %v21663_v46  ;;  %v21666_v20 = vand.u32 4294901760, %v21665_v9  ;;  %12328 = vmatprep.subr.bf16.mxu0 %v12327_v6 }
 0x1fc   : > { %v12329_v29 = vpack.c.bf16 %v16905_v60, %v16900_v50  ;;  %v12111_v11 = vpack.c.bf16 %v4308_v35, %v4301_v44  ;;  %v4315_v36 = vand.u32 4294901760, %v4314_v2  ;;  %v4322_v30 = vand.u32 4294901760, %v4321_v39  ;;  %v21670_v35 = vld [vmem:[#allocation41_spill] sm:$0xff]  ;;  %v21672_v39 = vld [vmem:[#allocation39_spill] sm:$0xff]  ;;  %12110 = vmatpush3.bf16.msra.mxu1 %v12109_v57  ;;  %v21680_v57 = vld [vmem:[#allocation48_spill] sm:$0xff] }
 0x1fd   : > { %v4209_v42 = vsub.f32 %v21661_v41, %v21662_v55  ;;  %v4328_v23 = vsub.f32 %v21663_v46, %v21664_v19  ;;  %v4335_v12 = vsub.f32 %v21665_v9, %v21666_v20  ;;  %v21667_v14 = vand.u32 4294901760, %v16646_v61 }
 0x1fe   : > { %v21668_v51 = vand.u32 4294901760, %v16651_v22  ;;  %v12331_v53 = vpack.c.bf16 %v16945_v28, %v16940_v58  ;;  %v12113_v41 = vpack.c.bf16 %v4196_v49, %v4189_v21  ;;  %v12333_v44 = vpack.c.bf16 %v16975_v40, %v16950_v48  ;;  %12330 = vmatpush3.bf16.msra.mxu0 %v12329_v29  ;;  %12112 = vmatprep.subr.bf16.mxu1 %v12111_v11  ;;  %v21674_v21 = vld [vmem:[#allocation44_spill] sm:$0xff] }
 0x1ff   : > { %v17006_v24 = vsub.f32 %v16646_v61, %v21667_v14  ;;  %v21671_v2 = vand.u32 4294901760, %v21670_v35  ;;  %v21673_v55 = vand.u32 4294901760, %v21672_v39  ;;  %v4210_v6 = vand.u32 4294901760, %v4209_v42 }
 0x200   : > { %v17011_v16 = vsub.f32 %v16651_v22, %v21668_v51  ;;  %v4203_v22 = vand.u32 4294901760, %v4202_v38  ;;  %v4329_v19 = vand.u32 4294901760, %v4328_v23  ;;  %v4336_v9 = vand.u32 4294901760, %v4335_v12  ;;  %v21676_v51 = vld [vmem:[#allocation30_spill] sm:$0xff]  ;;  %v21682_v23 = vld [vmem:[#allocation67_spill] sm:$0xff]  ;;  %12332 = vmatprep.subr.bf16.mxu0 %v12331_v53  ;;  %12114 = vmatpush3.bf16.msra.mxu1 %v12113_v41 }
 0x201   : > { %v4216_v61 = vsub.f32 %v21670_v35, %v21671_v2  ;;  %v4223_v46 = vsub.f32 %v21672_v39, %v21673_v55  ;;  %v12115_v20 = vpack.c.bf16 %v4322_v30, %v4315_v36  ;;  %v21675_v49 = vand.u32 4294901760, %v21674_v21  ;;  %v21678_v2 = vld [vmem:[#allocation46_spill] sm:$0xff] }
 0x202   : > { %v21677_v5 = vand.u32 4294901760, %v21676_v51  ;;  %v21679_v37 = vand.u32 4294901760, %v21678_v2  ;;  %v21681_v38 = vand.u32 4294901760, %v21680_v57  ;;  %v21683_v12 = vand.u32 4294901760, %v21682_v23  ;;  %12334 = vmatpush3.bf16.msra.mxu0 %v12333_v44 }
 0x203   : > { %v4342_v14 = vsub.f32 %v21674_v21, %v21675_v49  ;;  %v12335_v11 = vpack.c.bf16 %v16985_v52, %v16980_v63  ;;  %v4217_v55 = vand.u32 4294901760, %v4216_v61  ;;  %v4224_v21 = vand.u32 4294901760, %v4223_v46  ;;  %12116 = vmatprep.subr.bf16.mxu1 %v12115_v20  ;;  %v21694_v46 = vld [vmem:[#allocation63_spill] sm:$0xff] }
 0x204   : > { %v4349_v35 = vsub.f32 %v21676_v51, %v21677_v5  ;;  %v17033_v39 = vsub.f32 %v21678_v2, %v21679_v37  ;;  %v17038_v42 = vsub.f32 %v21680_v57, %v21681_v38  ;;  %v17043_v29 = vsub.f32 %v21682_v23, %v21683_v12  ;;  %v21685_v5 = vld [vmem:[#allocation27_spill] sm:$0xff]  ;;  %v21688_v2 = vld [vmem:[#allocation45_spill] sm:$0xff] }
 0x205   : > { %v21686_v36 = vand.u32 4294901760, %v21685_v5  ;;  %v12337_v37 = vpack.c.bf16 %v17011_v16, %v17006_v24  ;;  %v12117_v49 = vpack.c.bf16 %v4210_v6, %v4203_v22  ;;  %v12119_v51 = vpack.c.bf16 %v4336_v9, %v4329_v19  ;;  %v21690_v38 = vld [vmem:[#allocation47_spill] sm:$0xff]  ;;  %12336 = vmatprep.subr.bf16.mxu0 %v12335_v11 }
 0x206   : > { %21684 = vst [vmem:[#allocation52_spill] sm:$0xff] %v17043_v29  ;;  %v21689_v57 = vand.u32 4294901760, %v21688_v2  ;;  %v21691_v23 = vand.u32 4294901760, %v21690_v38  ;;  %v21693_v34 = vand.u32 4294901760, %v21692_v8  ;;  %v21695_v41 = vand.u32 4294901760, %v21694_v46  ;;  %v21696_v6 = vld [vmem:[#allocation31_spill] sm:$0xff] }
 0x207   : > { %v17050_v30 = vsub.f32 %v21685_v5, %v21686_v36  ;;  %v4343_v5 = vand.u32 4294901760, %v4342_v14  ;;  %v4350_v36 = vand.u32 4294901760, %v4349_v35  ;;  %v21697_v19 = vand.u32 4294901760, %v21696_v6  ;;  %12118 = vmatpush3.bf16.msra.mxu1 %v12117_v49  ;;  %12338 = vmatpush3.bf16.msra.mxu0 %v12337_v37  ;;  %v21712_v49 = vld [vmem:[#allocation38_spill] sm:$0xff] }
 0x208   : > { %v4230_v53 = vsub.f32 %v21688_v2, %v21689_v57  ;;  %v4237_v12 = vsub.f32 %v21690_v38, %v21691_v23  ;;  %v4356_v61 = vsub.f32 %v21692_v8, %v21693_v34  ;;  %v4363_v22 = vsub.f32 %v21694_v46, %v21695_v41  ;;  %v21699_v2 = vld [vmem:[#allocation68_spill] sm:$0xff]  ;;  %v21706_v41 = vld [vmem:[#allocation50_spill] sm:$0xff]  ;;  %12120 = vmatprep.subr.bf16.mxu1 %v12119_v51 }
 0x209   : > { %21687 = vst [vmem:[#allocation72_spill] sm:$0xff] %v17050_v30  ;;  %v17069_v9 = vsub.f32 %v21696_v6, %v21697_v19  ;;  %v21700_v57 = vand.u32 4294901760, %v21699_v2  ;;  %v12339_v20 = vpack.c.bf16 %v17038_v42, %v17033_v39  ;;  %v21702_v34 = vand.u32 4294901760, %v16707_v43  ;;  %v21708_v19 = vld [vmem:[#allocation5_spill] sm:$0xff] }
 0x20a   : > { %v21704_v14 = vand.u32 4294901760, %v16715_v47  ;;  %v12121_v38 = vpack.c.bf16 %v4224_v21, %v4217_v55  ;;  %v4231_v23 = vand.u32 4294901760, %v4230_v53  ;;  %v4238_v46 = vand.u32 4294901760, %v4237_v12 }
 0x20b   : > { %21698 = vst [vmem:[#allocation66_spill] sm:$0xff] %v17069_v9  ;;  %v17074_v44 = vsub.f32 %v21699_v2, %v21700_v57  ;;  %v17081_v8 = vsub.f32 %v16707_v43, %v21702_v34  ;;  %v21707_v6 = vand.u32 4294901760, %v21706_v41  ;;  %v21709_v2 = vand.u32 4294901760, %v21708_v19  ;;  %12340 = vmatprep.subr.bf16.mxu0 %v12339_v20 }
 0x20c   : > { %v17086_v35 = vsub.f32 %v16715_v47, %v21704_v14  ;;  %v12341_v43 = vpack.c.bf16 %v17050_v30, %v17043_v29  ;;  %v12123_v34 = vpack.c.bf16 %v4350_v36, %v4343_v5  ;;  %v4357_v47 = vand.u32 4294901760, %v4356_v61  ;;  %12122 = vmatpush3.bf16.msra.mxu1 %v12121_v38 }
 0x20d   : > { %21701 = vst [vmem:[#allocation55_spill] sm:$0xff] %v17074_v44  ;;  %21703 = vst [vmem:[#allocation60_spill] sm:$0xff] %v17081_v8  ;;  %v4244_v11 = vsub.f32 %v21706_v41, %v21707_v6  ;;  %v4251_v57 = vsub.f32 %v21708_v19, %v21709_v2  ;;  %v4364_v14 = vand.u32 4294901760, %v4363_v22  ;;  %v21710_v55 = vand.u32 4294901760, %v16720_v7  ;;  %v9604_v41 = vpop.f32.mrb[14].mxu1 }
 0x20e   : > { %21705 = vst [vmem:[#allocation16_spill] sm:$0xff] %v17086_v35  ;;  %v21713_v53 = vand.u32 4294901760, %v21712_v49  ;;  %v12343_v37 = vpack.c.bf16 %v17074_v44, %v17069_v9  ;;  %v21715_v51 = vand.u32 4294901760, %v16761_v17  ;;  %v9605_v36 = vpop.f32.mrb[15].mxu1  ;;  %v21717_v19 = vand.u32 4294901760, %v16766_v3  ;;  %12342 = vmatpush3.bf16.msra.mxu0 %v12341_v43  ;;  %12124 = vmatprep.subr.bf16.mxu1 %v12123_v34 }
 0x20f   : > { %v17099_v21 = vsub.f32 %v16720_v7, %v21710_v55  ;;  %v9606_v61 = vadd.f32 %v9605_v36, %v9604_v41  ;;  %v12125_v7 = vpack.c.bf16 %v4238_v46, %v4231_v23  ;;  %v4245_v22 = vand.u32 4294901760, %v4244_v11  ;;  %v9849_v11 = vpop.f32.mrb[14].mxu0  ;;  %v21729_v36 = vld [vmem:[#allocation57_spill] sm:$0xff] }
 0x210   : > { %v17104_v12 = vsub.f32 %v21712_v49, %v21713_v53  ;;  %v17111_v5 = vsub.f32 %v16761_v17, %v21715_v51  ;;  %v4252_v6 = vand.u32 4294901760, %v4251_v57  ;;  %v17116_v2 = vsub.f32 %v16766_v3, %v21717_v19  ;;  %12344 = vmatprep.subr.bf16.mxu0 %v12343_v37  ;;  %v9850_v34 = vpop.f32.mrb[15].mxu0 }
 0x211   : > { %21711 = vst [vmem:[#allocation17_spill] sm:$0xff] %v17099_v21  ;;  %v12345_v20 = vpack.c.bf16 %v17086_v35, %v17081_v8  ;;  %v12127_v55 = vpack.c.bf16 %v4364_v14, %v4357_v47  ;;  %v21719_v17 = vand.u32 4294901760, %v16804_v56  ;;  %v21721_v38 = vand.u32 4294901760, %v16809_v4  ;;  %12126 = vmatpush3.bf16.msra.mxu1 %v12125_v7  ;;  %v21725_v47 = vld [vmem:[#allocation6_spill] sm:$0xff] }
 0x212   : > { %21714 = vst [vmem:[#allocation8_spill] sm:$0xff] %v17104_v12  ;;  %21716 = vst [vmem:[#allocation33_spill] sm:$0xff] %v17111_v5  ;;  %v2229_v46 = vadd.f32 %v9606_v61, %v16891_v1  ;;  %v12347_v3 = vpack.c.bf16 %v17104_v12, %v17099_v21  ;;  %v21723_v57 = vand.u32 4294901760, %v16848_v25  ;;  %v17146_v53 = vadd.f32 %v9850_v34, %v9849_v11 }
 0x213   : > { %21718 = vst [vmem:[#allocation34_spill] sm:$0xff] %v17116_v2  ;;  %v17123_v49 = vsub.f32 %v16804_v56, %v21719_v17  ;;  %v17128_v23 = vsub.f32 %v16809_v4, %v21721_v38  ;;  %v12129_v56 = vpack.c.bf16 %v4252_v6, %v4245_v22  ;;  %v21726_v4 = vand.u32 4294901760, %v16853_v18  ;;  %12346 = vmatpush3.bf16.msra.mxu0 %v12345_v20  ;;  %v21730_v20 = vld [vmem:[#allocation35_spill] sm:$0xff] }
 0x214   : > { %v17136_v43 = vsub.f32 %v16848_v25, %v21723_v57  ;;  %v17139_v14 = vadd.f32 %v21725_v47, %v2229_v46  ;;  %21728 = vst [vmem:[#allocation44_spill] sm:$0xff] %v17146_v53  ;;  %12128 = vmatprep.subr.bf16.mxu1 %v12127_v55  ;;  %v12349_v41 = vpack.c.bf16 %v17116_v2, %v17111_v5  ;;  %v20509_v37 = vand.u32 4294901760, %v16740_v27  ;;  %v21731_v55 = vld [vmem:[#allocation18_spill] sm:$0xff]  ;;  %v21732_v17 = vld [vmem:[#allocation71_spill] sm:$0xff] }
 0x215   : > { %21720 = vst [vmem:[#allocation36_spill] sm:$0xff] %v17123_v49  ;;  %21722 = vst [vmem:[#allocation37_spill] sm:$0xff] %v17128_v23  ;;  %v17144_v1 = vsub.f32 %v16853_v18, %v21726_v4  ;;  %12348 = vmatprep.subr.bf16.mxu0 %v12347_v3  ;;  %v12351_v25 = vpack.c.bf16 %v17128_v23, %v17123_v49  ;;  %v20508_v51 = vand.u32 4294901760, %v16745_v54  ;;  %12130 = vmatpush3.bf16.msra.mxu1 %v12129_v56  ;;  %v21734_v46 = vld [vmem:[#allocation42_spill] sm:$0xff]  ;;  %v21735_v4 = vld [vmem:[#allocation29_spill] sm:$0xff] }
 0x216   : > { %21724 = vst [vmem:[#allocation41_spill] sm:$0xff] %v17136_v43  ;;  %12164 = vmatprep.subr.bf16.mxu1 %v21729_v36  ;;  %v20507_v61 = vand.u32 4294901760, %v16771_v62  ;;  %v20506_v7 = vand.u32 4294901760, %v16776_v10  ;;  %v20501_v6 = vand.u32 4294901760, %v16823_v45  ;;  %v20500_v19 = vand.u32 4294901760, %v16828_v33 }
 0x217   : > { %21727 = vst [vmem:[#allocation39_spill] sm:$0xff] %v17144_v1  ;;  %12350 = vmatpush3.bf16.msra.mxu0 %v12349_v41  ;;  %v12353_v18 = vpack.c.bf16 %v17144_v1, %v17136_v43  ;;  %v12387_v22 = vpack.c.bf16 %v20508_v51, %v20509_v37  ;;  %v21733_v38 = vand.u32 4294901760, %v21732_v17  ;;  %v20505_v11 = vand.u32 4294901760, %v16900_v50  ;;  %v21736_v41 = vld [vmem:[#allocation58_spill] sm:$0xff]  ;;  %v21740_v51 = vld [vmem:[#allocation21_spill] sm:$0xff] }
 0x218   : > { %12352 = vmatprep.subr.bf16.mxu0 %v12351_v25  ;;  %4369 = vmatmul.mubr.f32.vlgmr.msra.gmra.mrb[28].mxu1 %v21730_v20  ;;  %v12389_v3 = vpack.c.bf16 %v20506_v7, %v20507_v61  ;;  %v20504_v57 = vand.u32 4294901760, %v16905_v60  ;;  %v12391_v34 = vpack.c.bf16 %v20500_v19, %v20501_v6  ;;  %v20503_v56 = vand.u32 4294901760, %v16940_v58  ;;  %v21737_v19 = vld [vmem:[#allocation7_spill] sm:$0xff]  ;;  %v5761_v61 = vld [vmem:[%s17203_s26 + $0x8] sm:$0xff] }
 0x219   : > { %12166 = vmatpush3.bf16.msra.mxu1 %v21731_v55  ;;  %4611 = vmatprep.mubr.f32.mxu1 %v21733_v38  ;;  %v20502_v47 = vand.u32 4294901760, %v16945_v28  ;;  %v20513_v38 = vand.u32 4294901760, %v16980_v63  ;;  %v21738_v6 = vld [vmem:[#allocation19_spill] sm:$0xff]  ;;  %v20522_v7 = vand.u32 4294901760, %v17033_v39  ;;  %v21744_v31 = vand.u32 4294901760, %v17050_v30 }
 0x21a   : > { %12168 = vmatprep.subr.bf16.mxu1 %v21734_v46  ;;  %v12393_v25 = vpack.c.bf16 %v20504_v57, %v20505_v11  ;;  %v20519_v57 = vand.u32 4294901760, %v17011_v16  ;;  %v21752_v53 = vand.u32 4294901760, %v17104_v12  ;;  %v20545_v12 = vand.u32 4294901760, %v17144_v1  ;;  %v17336_v1 = vld [vmem:[%s20063_s5 + $0x10] sm:$0xff] }
 0x21b   : > { %12354 = vmatpush3.bf16.msra.mxu0 %v12353_v18  ;;  %v20511_v18 = vand.u32 4294901760, %v16950_v48  ;;  %v12395_v17 = vpack.c.bf16 %v20502_v47, %v20503_v56  ;;  %v20520_v56 = vand.u32 4294901760, %v17006_v24 }
 0x21c   : > { %12388 = vmatprep.subr.bf16.mxu0 %v12387_v22  ;;  %v20510_v22 = vand.u32 4294901760, %v16975_v40 }
 0x21d   : > { %12170 = vmatpush3.bf16.msra.mxu1 %v21735_v4 }
 0x21e   : > { %5369 = vmatmul.mubr.f32.vlgmr.msra.gmra.mrb[28].mxu0 %v16856_v0  ;;  %12172 = vmatprep.subr.bf16.mxu1 %v21736_v41  ;;  %v12397_v47 = vpack.c.bf16 %v20510_v22, %v20511_v18  ;;  %v21741_v18 = vld [vmem:[#allocation59_spill] sm:$0xff]  ;;  %v5795_v0 = vmul.f32 %v5761_v61, %v5761_v61  ;;  %v21742_v22 = vld [vmem:[#allocation22_spill] sm:$0xff]  ;;  %v21746_v61 = vand.u32 4294901760, %v17074_v44 }
 0x21f   : > { %12390 = vmatpush3.bf16.msra.mxu0 %v12389_v3  ;;  %v20512_v3 = vand.u32 4294901760, %v16985_v52  ;;  %5643 = vmatprep.mubr.f32.mxu0 %v21737_v19 }
 0x220   : > { %12392 = vmatprep.subr.bf16.mxu0 %v12391_v34  ;;  %v21739_v34 = vld [vmem:[#allocation10_spill] sm:$0xff]  ;;  %v17247_v15 = vand.u32 4294901760, %v5795_v0 }
 0x221   : > { %12174 = vmatpush3.bf16.msra.mxu1 %v21738_v6  ;;  %v12399_v11 = vpack.c.bf16 %v20512_v3, %v20513_v38  ;;  %v20527_v38 = vand.u32 4294901760, %v17069_v9  ;;  %v17501_v9 = vld [vmem:[%s20063_s5 + $0xe8] sm:$0xff] }
 0x222   : > { %12176 = vmatprep.subr.bf16.mxu1 %v21739_v34  ;;  %v9674_v37 = vpop.f32.mrb[16].mxu1  ;;  %21747 = vst [vmem:[#allocation30_spill] sm:$0xff] %v17247_v15  ;;  %21790 = vst [vmem:[#allocation42_spill] sm:$0xff] %v17501_v9 }
 0x223   : > { %12394 = vmatpush3.bf16.msra.mxu0 %v12393_v25  ;;  %v20521_v25 = vand.u32 4294901760, %v17038_v42  ;;  %v12407_v32 = vpack.c.bf16 %v21746_v61, %v20527_v38  ;;  %v20538_v61 = vand.u32 4294901760, %v17111_v5  ;;  %v20537_v38 = vand.u32 4294901760, %v17116_v2 }
 0x224   : > { %12396 = vmatprep.subr.bf16.mxu0 %v12395_v17  ;;  %v12401_v17 = vpack.c.bf16 %v20519_v57, %v20520_v56  ;;  %v21745_v57 = vld [vmem:[#allocation23_spill] sm:$0xff]  ;;  %v20530_v56 = vand.u32 4294901760, %v17086_v35  ;;  %v17473_v35 = vld [vmem:[%s20063_s5 + $0xd0] sm:$0xff] }
 0x225   : > { %12178 = vmatpush3.bf16.msra.mxu1 %v21740_v51  ;;  %v12403_v3 = vpack.c.bf16 %v20521_v25, %v20522_v7  ;;  %v21750_v25 = vand.u32 4294901760, %v17081_v8  ;;  %v17265_v8 = vsub.f32 %v5795_v0, %v17247_v15  ;;  %v21757_v0 = vld [vmem:[#allocation25_spill] sm:$0xff]  ;;  %v20546_v15 = vand.u32 4294901760, %v17136_v43  ;;  %21788 = vst [vmem:[#allocation18_spill] sm:$0xff] %v17473_v35 }
 0x226   : > { %12180 = vmatprep.subr.bf16.mxu1 %v21741_v18 }
 0x227   : > { %12398 = vmatpush3.bf16.msra.mxu0 %v12397_v47  ;;  %v21743_v47 = vand.u32 4294901760, %v17043_v29  ;;  %v12409_v7 = vpack.c.bf16 %v20530_v56, %v21750_v25  ;;  %21753 = vst [vmem:[#allocation46_spill] sm:$0xff] %v17265_v8  ;;  %v9919_v25 = vpop.f32.mrb[16].mxu0  ;;  %v17270_v56 = vld [vmem:[%s20063_s5 + $0x80] sm:$0xff] }
 0x228   : > { %12400 = vmatprep.subr.bf16.mxu0 %v12399_v11  ;;  %v21749_v11 = vld [vmem:[#allocation9_spill] sm:$0xff] }
 0x229   : > { %12182 = vmatpush3.bf16.msra.mxu1 %v21742_v22  ;;  %v12405_v59 = vpack.c.bf16 %v21744_v31, %v21743_v47  ;;  %v9675_v31 = vpop.f32.mrb[17].mxu1  ;;  %v21748_v47 = vld [vmem:[#allocation28_spill] sm:$0xff] }
 0x22a   : > { %12184 = vmatprep.subr.bf16.mxu1 %v21745_v57 }
 0x22b   : > { %12402 = vmatpush3.bf16.msra.mxu0 %v12401_v17  ;;  %v9676_v17 = vadd.f32 %v9675_v31, %v9674_v37 }
 0x22c   : > { %12404 = vmatprep.subr.bf16.mxu0 %v12403_v3  ;;  %v21751_v3 = vand.u32 4294901760, %v17099_v21  ;;  %v21758_v21 = vand.u32 4294901760, %v17123_v49 }
 0x22d   : > { %12186 = vmatpush3.bf16.msra.mxu1 %v21748_v47  ;;  %v2573_v37 = vadd.f32 %v9676_v17, %v17139_v14  ;;  %v9920_v14 = vpop.f32.mrb[17].mxu0  ;;  %v21755_v17 = vld [vmem:[#allocation12_spill] sm:$0xff] }
 0x22e   : > { %12188 = vmatprep.subr.bf16.mxu1 %v21749_v11  ;;  %v12411_v44 = vpack.c.bf16 %v21752_v53, %v21751_v3  ;;  %v17275_v53 = vld [vmem:[%s20063_s5 + $0x88] sm:$0xff]  ;;  %v17281_v31 = vadd.f32 %v9920_v14, %v9919_v25  ;;  %v17299_v14 = vld [vmem:[%s20063_s5] sm:$0xff] }
 0x22f   : > { %12406 = vmatpush3.bf16.msra.mxu0 %v12405_v59  ;;  %v17279_v3 = vadd.f32 %v21755_v17, %v2573_v37  ;;  %v12413_v59 = vpack.c.bf16 %v20537_v38, %v20538_v61  ;;  %v21759_v37 = vand.u32 4294901760, %v17128_v23  ;;  %v17304_v38 = vld [vmem:[%s20063_s5 + $0x8] sm:$0xff]  ;;  %v21762_v23 = vand.u32 4294901760, %v17275_v53 }
 0x230   : > { %12408 = vmatprep.subr.bf16.mxu0 %v12407_v32  ;;  %v21754_v32 = vld [vmem:[#allocation20_spill] sm:$0xff]  ;;  %21756 = vst [vmem:[#allocation48_spill] sm:$0xff] %v17281_v31  ;;  %v20549_v25 = vand.u32 4294901760, %v17304_v38  ;;  %v21761_v31 = vand.u32 4294901760, %v17270_v56  ;;  %v21800_v29 = vand.u32 4294901760, %v17304_v38 }
 0x231   : > { %12190 = vmatpush3.bf16.msra.mxu1 %v21754_v32  ;;  %v12415_v17 = vpack.c.bf16 %v21759_v37, %v21758_v21  ;;  %v17310_v21 = vld [vmem:[%s20063_s5 + $0x90] sm:$0xff]  ;;  %v17315_v37 = vld [vmem:[%s20063_s5 + $0x98] sm:$0xff]  ;;  %v21760_v61 = vld [vmem:[#allocation32_spill] sm:$0xff] }
 0x232   : > { %12192 = vmatprep.subr.bf16.mxu1 %v21757_v0  ;;  %v17329_v49 = vpack.c.bf16 %v21762_v23, %v21761_v31  ;;  %v21765_v23 = vld [vmem:[#allocation24_spill] sm:$0xff]  ;;  %v21768_v43 = vand.u32 4294901760, %v17310_v21 }
 0x233   : > { %12410 = vmatpush3.bf16.msra.mxu0 %v12409_v7  ;;  %v20550_v7 = vand.u32 4294901760, %v17299_v14  ;;  %v21766_v31 = vand.u32 4294901760, %v21765_v23  ;;  %v20559_v23 = vand.u32 4294901760, %v17336_v1 }
 0x234   : > { %12412 = vmatprep.subr.bf16.mxu0 %v12411_v44  ;;  %v12417_v44 = vpack.c.bf16 %v20545_v12, %v20546_v15  ;;  %21763 = vst [vmem:[#allocation67_spill] sm:$0xff] %v17329_v49  ;;  %v17341_v12 = vld [vmem:[%s20063_s5 + $0x18] sm:$0xff] }
 0x235   : > { %12194 = vmatpush3.bf16.msra.mxu1 %v21760_v61 }
 0x236   : > { %12228 = vmatprep.subr.bf16.mxu1 %v21729_v36  ;;  %v17351_v36 = vld [vmem:[%s20063_s5 + $0xa0] sm:$0xff] }
 0x237   : > { %12414 = vmatpush3.bf16.msra.mxu0 %v12413_v59  ;;  %v17356_v59 = vld [vmem:[%s20063_s5 + $0xa8] sm:$0xff] }
 0x238   : > { %12416 = vmatprep.subr.bf16.mxu0 %v12415_v17  ;;  %v21764_v17 = vand.u32 4294901760, %v17265_v8  ;;  %4615 = vmatmul.mubr.f32.vlgmr.msra.gmra.mrb[30].mxu1 %v21766_v31 }
 0x239   : > { %12230 = vmatpush3.bf16.msra.mxu1 %v21731_v55  ;;  %4885 = vmatprep.mubr.f32.mxu1 %v21542_v26  ;;  %v21769_v55 = vand.u32 4294901760, %v17315_v37 }
 0x23a   : > { %v5895_v15 = vsub.f32 %v17265_v8, %v21764_v17  ;;  %12232 = vmatprep.subr.bf16.mxu1 %v21734_v46  ;;  %v17365_v17 = vpack.c.bf16 %v20549_v25, %v20550_v7  ;;  %v17381_v25 = vld [vmem:[%s20063_s5 + $0x20] sm:$0xff]  ;;  %v17386_v7 = vld [vmem:[%s20063_s5 + $0x28] sm:$0xff]  ;;  %v17478_v8 = vld [vmem:[%s20063_s5 + $0xd8] sm:$0xff] }
 0x23b   : > { %12418 = vmatpush3.bf16.msra.mxu0 %v12417_v44  ;;  %v17374_v26 = vpack.c.bf16 %v21769_v55, %v21768_v43  ;;  %21771 = vst [vmem:[#allocation47_spill] sm:$0xff] %v17386_v7  ;;  %v17391_v43 = vld [vmem:[%s20063_s5 + $0xb0] sm:$0xff]  ;;  %v17396_v55 = vld [vmem:[%s20063_s5 + $0xb8] sm:$0xff]  ;;  %v20562_v2 = vand.u32 4294901760, %v17386_v7  ;;  %21789 = vst [vmem:[#allocation71_spill] sm:$0xff] %v17478_v8 }
 0x23c   : > { %21767 = vst [vmem:[#allocation27_spill] sm:$0xff] %v17365_v17  ;;  %12452 = vmatprep.subr.bf16.mxu0 %v17329_v49  ;;  %v5896_v31 = vand.u32 4294901760, %v5895_v15  ;;  %21772 = vst [vmem:[#allocation49_spill] sm:$0xff] %v17391_v43  ;;  %v21774_v44 = vld [vmem:[#allocation62_spill] sm:$0xff]  ;;  %v21775_v15 = vand.u32 4294901760, %v17341_v12  ;;  %v20563_v49 = vand.u32 4294901760, %v17381_v25 }
 0x23d   : > { %21770 = vst [vmem:[#allocation45_spill] sm:$0xff] %v17374_v26  ;;  %21773 = vst [vmem:[#allocation63_spill] sm:$0xff] %v17396_v55  ;;  %12234 = vmatpush3.bf16.msra.mxu1 %v21735_v4  ;;  %v21778_v4 = vand.u32 4294901760, %v17356_v59 }
 0x23e   : > { %5645 = vmatmul.mubr.f32.vlgmr.msra.gmra.mrb[30].mxu0 %v21774_v44  ;;  %12236 = vmatprep.subr.bf16.mxu1 %v21736_v41  ;;  %v17406_v46 = vpack.c.bf16 %v21775_v15, %v20559_v23  ;;  %v21777_v44 = vand.u32 4294901760, %v17351_v36  ;;  %v17422_v15 = vld [vmem:[%s20063_s5 + $0x30] sm:$0xff]  ;;  %v17427_v23 = vld [vmem:[%s20063_s5 + $0x38] sm:$0xff]  ;;  %v17496_v41 = vld [vmem:[%s20063_s5 + $0xe0] sm:$0xff] }
 0x23f   : > { %12454 = vmatpush3.bf16.msra.mxu0 %v17365_v17  ;;  %5897 = vmatprep.mubr.f32.mxu0 %v5896_v31  ;;  %v17446_v31 = vpack.c.bf16 %v20562_v2, %v20563_v49  ;;  %v21785_v2 = vand.u32 4294901760, %v17391_v43  ;;  %v21786_v49 = vand.u32 4294901760, %v17396_v55  ;;  %v21794_v43 = vand.u32 4294901760, %v17270_v56 }
 0x240   : > { %21776 = vst [vmem:[#allocation31_spill] sm:$0xff] %v17406_v46  ;;  %12456 = vmatprep.subr.bf16.mxu0 %v17374_v26  ;;  %v17415_v5 = vpack.c.bf16 %v21778_v4, %v21777_v44  ;;  %v17432_v44 = vld [vmem:[%s20063_s5 + $0xc0] sm:$0xff]  ;;  %v17437_v4 = vld [vmem:[%s20063_s5 + $0xc8] sm:$0xff] }
 0x241   : > { %21780 = vst [vmem:[#allocation50_spill] sm:$0xff] %v17432_v44  ;;  %21781 = vst [vmem:[#allocation5_spill] sm:$0xff] %v17437_v4  ;;  %12238 = vmatpush3.bf16.msra.mxu1 %v21738_v6  ;;  %v17453_v26 = vld [vmem:[%s20063_s5 + $0x40] sm:$0xff]  ;;  %v17458_v6 = vld [vmem:[%s20063_s5 + $0x48] sm:$0xff]  ;;  %v17466_v17 = vpack.c.bf16 %v21786_v49, %v21785_v2  ;;  %v21791_v49 = vand.u32 4294901760, %v17422_v15  ;;  %v21792_v2 = vand.u32 4294901760, %v17427_v23  ;;  %v17516_v7 = vsub.f32 %v17270_v56, %v21794_v43 }
 0x242   : > { %21779 = vst [vmem:[#allocation68_spill] sm:$0xff] %v17415_v5  ;;  %12240 = vmatprep.subr.bf16.mxu1 %v21739_v34  ;;  %21782 = vst [vmem:[#allocation38_spill] sm:$0xff] %v17446_v31  ;;  %v5760_v34 = vld [vmem:[%s17203_s26] sm:$0xff]  ;;  %v17552_v56 = vsub.f32 %v17304_v38, %v21800_v29  ;;  %v21801_v43 = vand.u32 4294901760, %v17453_v26  ;;  %v21802_v55 = vand.u32 4294901760, %v17458_v6  ;;  %s13243_s26 = smov 48  }
 0x243   : > { %12458 = vmatpush3.bf16.msra.mxu0 %v17406_v46  ;;  %21783 = vst [vmem:[#allocation6_spill] sm:$0xff] %v17453_v26  ;;  %21784 = vst [vmem:[#allocation57_spill] sm:$0xff] %v17458_v6  ;;  %v17491_v46 = vld [vmem:[%s20063_s5 + $0x58] sm:$0xff]  ;;  %v17509_v30 = vpack.c.bf16 %v21792_v2, %v21791_v49  ;;  %v21797_v2 = vand.u32 4294901760, %v17437_v4  ;;  %v21809_v6 = vand.u32 4294901760, %v16745_v54  ;;  %v21813_v26 = vand.u32 4294901760, %v17315_v37 }
 0x244   : > { %12460 = vmatprep.subr.bf16.mxu0 %v17415_v5  ;;  %21787 = vst [vmem:[#allocation35_spill] sm:$0xff] %v17466_v17  ;;  %v17483_v5 = vld [vmem:[%s20063_s5 + $0x50] sm:$0xff] }
 0x245   : > { %12242 = vmatpush3.bf16.msra.mxu1 %v21740_v51  ;;  %v5794_v51 = vmul.f32 %v5760_v34, %v5760_v34  ;;  %21793 = vst [vmem:[#allocation29_spill] sm:$0xff] %v17509_v30  ;;  %v21795_v34 = vand.u32 4294901760, %v17275_v53 }
 0x246   : > { %12244 = vmatprep.subr.bf16.mxu1 %v21741_v18  ;;  %v21796_v18 = vand.u32 4294901760, %v17432_v44  ;;  %v21815_v44 = vand.u32 4294901760, %v17491_v46 }
 0x247   : > { %12462 = vmatpush3.bf16.msra.mxu0 %v17446_v31  ;;  %v17521_v31 = vsub.f32 %v17275_v53, %v21795_v34  ;;  %v17537_v53 = vld [vmem:[%s20063_s5 + $0x60] sm:$0xff]  ;;  %v17542_v34 = vld [vmem:[%s20063_s5 + $0x68] sm:$0xff]  ;;  %v17561_v4 = vand.u32 4294901760, %v5794_v51 }
 0x248   : > { %12464 = vmatprep.subr.bf16.mxu0 %v17466_v17  ;;  %v17528_v49 = vpack.c.bf16 %v21797_v2, %v21796_v18  ;;  %v21799_v18 = vand.u32 4294901760, %v17299_v14  ;;  %v17559_v17 = vpack.c.bf16 %v21802_v55, %v21801_v43  ;;  %v5127_v55 = vsub.f32 %v16745_v54, %v21809_v6  ;;  %v17580_v43 = vld [vmem:[%s20063_s5 + $0xf0] sm:$0xff] }
 0x249   : > { %12246 = vmatpush3.bf16.msra.mxu1 %v21742_v22  ;;  %21804 = vst [vmem:[#allocation19_spill] sm:$0xff] %v17561_v4  ;;  %v21808_v22 = vand.u32 4294901760, %v16740_v27  ;;  %v21811_v6 = vand.u32 4294901760, %v16776_v10 }
 0x24a   : > { %21798 = vst [vmem:[#allocation58_spill] sm:$0xff] %v17528_v49  ;;  %v17547_v2 = vsub.f32 %v17299_v14, %v21799_v18  ;;  %21803 = vst [vmem:[#allocation7_spill] sm:$0xff] %v17559_v17  ;;  %12248 = vmatprep.subr.bf16.mxu1 %v21745_v57  ;;  %v21805_v14 = vand.u32 4294901760, %v17473_v35  ;;  %v21806_v18 = vand.u32 4294901760, %v17478_v8  ;;  %v17585_v57 = vld [vmem:[%s20063_s5 + $0xf8] sm:$0xff]  ;;  %v21812_v8 = vand.u32 4294901760, %v17310_v21 }
 0x24b   : > { %12466 = vmatpush3.bf16.msra.mxu0 %v17509_v30  ;;  %v5120_v38 = vsub.f32 %v16740_v27, %v21808_v22  ;;  %v21810_v22 = vand.u32 4294901760, %v16771_v62  ;;  %v5015_v30 = vsub.f32 %v16776_v10, %v21811_v6  ;;  %v21814_v27 = vand.u32 4294901760, %v17483_v5 }
 0x24c   : > { %v17569_v29 = vpack.c.bf16 %v21806_v18, %v21805_v14  ;;  %v9744_v14 = vpop.f32.mrb[18].mxu1  ;;  %12468 = vmatprep.subr.bf16.mxu0 %v17528_v49  ;;  %v17599_v35 = vsub.f32 %v17310_v21, %v21812_v8  ;;  %v17604_v49 = vsub.f32 %v17315_v37, %v21813_v26  ;;  %v21818_v10 = vand.u32 4294901760, %v17501_v9  ;;  %v17624_v26 = vld [vmem:[%s20063_s5 + $0x70] sm:$0xff] }
 0x24d   : > { %v5008_v54 = vsub.f32 %v16771_v62, %v21810_v22  ;;  %v9745_v18 = vpop.f32.mrb[19].mxu1  ;;  %v17610_v62 = vpack.c.bf16 %v21815_v44, %v21814_v27  ;;  %v21817_v22 = vand.u32 4294901760, %v17496_v41  ;;  %12250 = vmatpush3.bf16.msra.mxu1 %v21748_v47  ;;  %v17629_v44 = vld [vmem:[%s20063_s5 + $0x78] sm:$0xff]  ;;  %v17632_v27 = vsub.f32 %v5794_v51, %v17561_v4 }
 0x24e   : > { %21807 = vst [vmem:[#allocation10_spill] sm:$0xff] %v17569_v29  ;;  %v9746_v8 = vadd.f32 %v9745_v18, %v9744_v14  ;;  %12252 = vmatprep.subr.bf16.mxu1 %v21749_v11  ;;  %v5121_v47 = vand.u32 4294901760, %v5120_v38  ;;  %v5128_v14 = vand.u32 4294901760, %v5127_v55  ;;  %v21821_v18 = vand.u32 4294901760, %v16823_v45  ;;  %v9989_v55 = vpop.f32.mrb[18].mxu0 }
 0x24f   : > { %21816 = vst [vmem:[#allocation21_spill] sm:$0xff] %v17610_v62  ;;  %v17616_v6 = vpack.c.bf16 %v21818_v10, %v21817_v22  ;;  %21820 = vst [vmem:[#allocation22_spill] sm:$0xff] %v17632_v27  ;;  %12470 = vmatpush3.bf16.msra.mxu0 %v17559_v17  ;;  %v21822_v10 = vand.u32 4294901760, %v16828_v33  ;;  %v21823_v51 = vand.u32 4294901760, %v17537_v53  ;;  %v21824_v17 = vand.u32 4294901760, %v17542_v34 }
 0x250   : > { %v5134_v22 = vsub.f32 %v16823_v45, %v21821_v18  ;;  %v2819_v21 = vadd.f32 %v9746_v8, %v17279_v3  ;;  %12472 = vmatprep.subr.bf16.mxu0 %v17569_v29  ;;  %v5009_v11 = vand.u32 4294901760, %v5008_v54  ;;  %v5016_v38 = vand.u32 4294901760, %v5015_v30 }
 0x251   : > { %21819 = vst [vmem:[#allocation59_spill] sm:$0xff] %v17616_v6  ;;  %v5141_v37 = vsub.f32 %v16828_v33, %v21822_v10  ;;  %v17648_v4 = vpack.c.bf16 %v21824_v17, %v21823_v51  ;;  %v21826_v18 = vand.u32 4294901760, %v16900_v50  ;;  %v21827_v3 = vand.u32 4294901760, %v16905_v60  ;;  %v9990_v10 = vpop.f32.mrb[19].mxu0  ;;  %12254 = vmatpush3.bf16.msra.mxu1 %v21754_v32 }
 0x252   : > { %v20610_v17 = vand.u32 4294901760, %v17632_v27  ;;  %v21828_v30 = vand.u32 4294901760, %v16940_v58  ;;  %v21829_v51 = vand.u32 4294901760, %v16945_v28  ;;  %v17667_v9 = vadd.f32 %v16893_v13, %v2819_v21  ;;  %12256 = vmatprep.subr.bf16.mxu1 %v21757_v0 }
 0x253   : > { %21825 = vst [vmem:[#allocation23_spill] sm:$0xff] %v17648_v4  ;;  %v5022_v33 = vsub.f32 %v16900_v50, %v21826_v18  ;;  %v5029_v8 = vsub.f32 %v16905_v60, %v21827_v3  ;;  %v17669_v50 = vadd.f32 %v9990_v10, %v9989_v55  ;;  %12474 = vmatpush3.bf16.msra.mxu0 %v17610_v62  ;;  %v5135_v32 = vand.u32 4294901760, %v5134_v22 }
 0x254   : > { %v5148_v54 = vsub.f32 %v16940_v58, %v21828_v30  ;;  %v5155_v45 = vsub.f32 %v16945_v28, %v21829_v51  ;;  %v12291_v60 = vpack.c.bf16 %v5128_v14, %v5121_v47  ;;  %v5142_v18 = vand.u32 4294901760, %v5141_v37  ;;  %12476 = vmatprep.subr.bf16.mxu0 %v17616_v6 }
 0x255   : > { %v21830_v3 = vand.u32 4294901760, %v17336_v1  ;;  %v21831_v30 = vand.u32 4294901760, %v17341_v12  ;;  %v21832_v13 = vand.u32 4294901760, %v17580_v43  ;;  %v21833_v21 = vand.u32 4294901760, %v17585_v57  ;;  %12258 = vmatpush3.bf16.msra.mxu1 %v21760_v61 }
 0x256   : > { %v12293_v47 = vpack.c.bf16 %v5016_v38, %v5009_v11  ;;  %v21835_v37 = vand.u32 4294901760, %v17624_v26  ;;  %v21836_v14 = vand.u32 4294901760, %v17629_v44  ;;  %v5023_v22 = vand.u32 4294901760, %v5022_v33  ;;  %12292 = vmatprep.subr.bf16.mxu1 %v12291_v60 }
 0x257   : > { %v17676_v58 = vsub.f32 %v17336_v1, %v21830_v3  ;;  %v17681_v28 = vsub.f32 %v17341_v12, %v21831_v30  ;;  %v17688_v0 = vpack.c.bf16 %v21833_v21, %v21832_v13  ;;  %v21838_v55 = vand.u32 4294901760, %v16950_v48  ;;  %12478 = vmatpush3.bf16.msra.mxu0 %v17648_v4 }
 0x258   : > { %v17694_v1 = vpack.c.bf16 %v21836_v14, %v21835_v37  ;;  %v21839_v10 = vand.u32 4294901760, %v16975_v40  ;;  %v5901_v11 = vsub.f32 %v17632_v27, %v20610_v17  ;;  %v5030_v38 = vand.u32 4294901760, %v5029_v8  ;;  %4887 = vmatmul.mubr.f32.vlgmr.msra.gmra.mrb[32].mxu1 %v21730_v20 }
 0x259   : > { %21834 = vst [vmem:[#allocation28_spill] sm:$0xff] %v17688_v0  ;;  %v5036_v12 = vsub.f32 %v16950_v48, %v21838_v55  ;;  %v5149_v3 = vand.u32 4294901760, %v5148_v54  ;;  %v5156_v30 = vand.u32 4294901760, %v5155_v45  ;;  %v12295_v33 = vpack.c.bf16 %v5142_v18, %v5135_v32  ;;  %12480 = vmatprep.subr.bf16.mxu0 %v17688_v0  ;;  %12294 = vmatpush3.bf16.msra.mxu1 %v12293_v47  ;;  %v21888_v0 = vld [vmem:[#allocation36_spill] sm:$0xff] }
 0x25a   : > { %21837 = vst [vmem:[#allocation9_spill] sm:$0xff] %v17694_v1  ;;  %v5043_v51 = vsub.f32 %v16975_v40, %v21839_v10  ;;  %v21840_v13 = vand.u32 4294901760, %v16980_v63  ;;  %v21841_v21 = vand.u32 4294901760, %v16985_v52  ;;  %v21842_v61 = vand.u32 4294901760, %v17351_v36  ;;  %5229 = vmatprep.mubr.f32.mxu1 %v21737_v19 }
 0x25b   : > { %v21843_v8 = vand.u32 4294901760, %v17356_v59  ;;  %v21844_v54 = vand.u32 4294901760, %v17381_v25  ;;  %v21845_v32 = vand.u32 4294901760, %v17006_v24  ;;  %v12297_v55 = vpack.c.bf16 %v5030_v38, %v5023_v22  ;;  %12482 = vmatpush3.bf16.msra.mxu0 %v17694_v1  ;;  %12296 = vmatprep.subr.bf16.mxu1 %v12295_v33  ;;  %v21849_v22 = vld [vmem:[#allocation47_spill] sm:$0xff] }
 0x25c   : > { %v5162_v48 = vsub.f32 %v16980_v63, %v21840_v13  ;;  %v5169_v40 = vsub.f32 %v16985_v52, %v21841_v21  ;;  %v17716_v37 = vsub.f32 %v17351_v36, %v21842_v61  ;;  %v12515_v63 = vpack.c.bf16 %v17521_v31, %v17516_v7  ;;  %v21853_v33 = vld [vmem:[#allocation63_spill] sm:$0xff] }
 0x25d   : > { %v17721_v45 = vsub.f32 %v17356_v59, %v21843_v8  ;;  %v17726_v60 = vsub.f32 %v17381_v25, %v21844_v54  ;;  %v5037_v52 = vand.u32 4294901760, %v5036_v12  ;;  %v5044_v36 = vand.u32 4294901760, %v5043_v51  ;;  %v21855_v54 = vld [vmem:[#allocation52_spill] sm:$0xff]  ;;  %12298 = vmatpush3.bf16.msra.mxu1 %v12297_v55 }
 0x25e   : > { %v5050_v18 = vsub.f32 %v17006_v24, %v21845_v32  ;;  %v21846_v59 = vand.u32 4294901760, %v17011_v16  ;;  %v5902_v25 = vand.u32 4294901760, %v5901_v11  ;;  %v12517_v10 = vpack.c.bf16 %v17552_v56, %v17547_v2  ;;  %12516 = vmatprep.subr.bf16.mxu0 %v12515_v63 }
 0x25f   : > { %v12299_v13 = vpack.c.bf16 %v5156_v30, %v5149_v3  ;;  %v5163_v20 = vand.u32 4294901760, %v5162_v48  ;;  %v5170_v12 = vand.u32 4294901760, %v5169_v40  ;;  %v21847_v24 = vand.u32 4294901760, %v17033_v39  ;;  %v21851_v3 = vld [vmem:[#allocation49_spill] sm:$0xff] }
 0x260   : > { %v5057_v14 = vsub.f32 %v17011_v16, %v21846_v59  ;;  %v21848_v16 = vand.u32 4294901760, %v17038_v42  ;;  %v21850_v11 = vand.u32 4294901760, %v21849_v22  ;;  %v21852_v30 = vand.u32 4294901760, %v21851_v3  ;;  %5903 = vmatmul.mubr.f32.vlgmr.msra.gmra.mrb[32].mxu0 %v5902_v25 }
 0x261   : > { %v5176_v51 = vsub.f32 %v17033_v39, %v21847_v24  ;;  %v21854_v48 = vand.u32 4294901760, %v21853_v33  ;;  %v12519_v39 = vpack.c.bf16 %v17604_v49, %v17599_v35  ;;  %v5051_v61 = vand.u32 4294901760, %v5050_v18  ;;  %v21857_v24 = vld [vmem:[#allocation72_spill] sm:$0xff]  ;;  %12518 = vmatpush3.bf16.msra.mxu0 %v12517_v10  ;;  %12300 = vmatprep.subr.bf16.mxu1 %v12299_v13  ;;  %v21865_v13 = vld [vmem:[#allocation46_spill] sm:$0xff] }
 0x262   : > { %v5183_v47 = vsub.f32 %v17038_v42, %v21848_v16  ;;  %v17751_v38 = vsub.f32 %v21849_v22, %v21850_v11  ;;  %v17756_v21 = vsub.f32 %v21851_v3, %v21852_v30  ;;  %v12301_v42 = vpack.c.bf16 %v5044_v36, %v5037_v52  ;;  %v21859_v11 = vld [vmem:[#allocation66_spill] sm:$0xff]  ;;  %v21861_v30 = vld [vmem:[#allocation55_spill] sm:$0xff]  ;;  %6270 = vmatprep.mubr.f32.mxu0 %v21865_v13 }
 0x263   : > { %v17761_v40 = vsub.f32 %v21853_v33, %v21854_v48  ;;  %v5058_v8 = vand.u32 4294901760, %v5057_v14  ;;  %v21856_v32 = vand.u32 4294901760, %v21855_v54  ;;  %v21858_v16 = vand.u32 4294901760, %v21857_v24  ;;  %12520 = vmatprep.subr.bf16.mxu0 %v12519_v39 }
 0x264   : > { %v21860_v3 = vand.u32 4294901760, %v21859_v11  ;;  %v21862_v33 = vand.u32 4294901760, %v21861_v30  ;;  %v12521_v36 = vpack.c.bf16 %v17681_v28, %v17676_v58  ;;  %v12303_v18 = vpack.c.bf16 %v5170_v12, %v5163_v20  ;;  %v21866_v12 = vld [vmem:[#allocation60_spill] sm:$0xff]  ;;  %12302 = vmatpush3.bf16.msra.mxu1 %v12301_v42  ;;  %v21876_v42 = vld [vmem:[#allocation5_spill] sm:$0xff] }
 0x265   : > { %v5064_v59 = vsub.f32 %v21855_v54, %v21856_v32  ;;  %v5071_v22 = vsub.f32 %v21857_v24, %v21858_v16  ;;  %v5177_v14 = vand.u32 4294901760, %v5176_v51  ;;  %v5184_v25 = vand.u32 4294901760, %v5183_v47  ;;  %v21868_v47 = vld [vmem:[#allocation16_spill] sm:$0xff] }
 0x266   : > { %v5190_v63 = vsub.f32 %v21859_v11, %v21860_v3  ;;  %v5197_v52 = vsub.f32 %v21861_v30, %v21862_v33  ;;  %v21863_v55 = vand.u32 4294901760, %v17422_v15  ;;  %v21864_v54 = vand.u32 4294901760, %v17427_v23  ;;  %12522 = vmatpush3.bf16.msra.mxu0 %v12521_v36  ;;  %12304 = vmatprep.subr.bf16.mxu1 %v12303_v18 }
 0x267   : > { %v12523_v10 = vpack.c.bf16 %v17721_v45, %v17716_v37  ;;  %v12305_v24 = vpack.c.bf16 %v5058_v8, %v5051_v61  ;;  %v12525_v20 = vpack.c.bf16 %v17751_v38, %v17726_v60  ;;  %v21867_v51 = vand.u32 4294901760, %v21866_v12  ;;  %v21870_v61 = vld [vmem:[#allocation17_spill] sm:$0xff] }
 0x268   : > { %v17782_v48 = vsub.f32 %v17422_v15, %v21863_v55  ;;  %v17787_v32 = vsub.f32 %v17427_v23, %v21864_v54  ;;  %v21869_v16 = vand.u32 4294901760, %v21868_v47  ;;  %v5065_v23 = vand.u32 4294901760, %v5064_v59  ;;  %v21872_v54 = vld [vmem:[#allocation8_spill] sm:$0xff] }
 0x269   : > { %v5078_v15 = vsub.f32 %v21866_v12, %v21867_v51  ;;  %v5072_v39 = vand.u32 4294901760, %v5071_v22  ;;  %v5191_v3 = vand.u32 4294901760, %v5190_v63  ;;  %v5198_v30 = vand.u32 4294901760, %v5197_v52  ;;  %v21874_v51 = vld [vmem:[#allocation50_spill] sm:$0xff]  ;;  %12524 = vmatprep.subr.bf16.mxu0 %v12523_v10  ;;  %12306 = vmatpush3.bf16.msra.mxu1 %v12305_v24 }
 0x26a   : > { %v5085_v11 = vsub.f32 %v21868_v47, %v21869_v16  ;;  %v12307_v33 = vpack.c.bf16 %v5184_v25, %v5177_v14  ;;  %v21871_v8 = vand.u32 4294901760, %v21870_v61  ;;  %v21873_v17 = vand.u32 4294901760, %v21872_v54  ;;  %v21878_v63 = vld [vmem:[#allocation6_spill] sm:$0xff]  ;;  %12526 = vmatpush3.bf16.msra.mxu0 %v12525_v20 }
 0x26b   : > { %v21875_v1 = vand.u32 4294901760, %v21874_v51  ;;  %v21877_v59 = vand.u32 4294901760, %v21876_v42  ;;  %v21879_v52 = vand.u32 4294901760, %v21878_v63  ;;  %v12527_v18 = vpack.c.bf16 %v17761_v40, %v17756_v21 }
 0x26c   : > { %v5204_v55 = vsub.f32 %v21870_v61, %v21871_v8  ;;  %v5211_v12 = vsub.f32 %v21872_v54, %v21873_v17  ;;  %v21881_v17 = vld [vmem:[#allocation57_spill] sm:$0xff]  ;;  %v5079_v16 = vand.u32 4294901760, %v5078_v15  ;;  %v5086_v61 = vand.u32 4294901760, %v5085_v11  ;;  %12308 = vmatprep.subr.bf16.mxu1 %v12307_v33 }
 0x26d   : > { %v17809_v47 = vsub.f32 %v21874_v51, %v21875_v1  ;;  %v17814_v22 = vsub.f32 %v21876_v42, %v21877_v59  ;;  %v17819_v36 = vsub.f32 %v21878_v63, %v21879_v52  ;;  %v21882_v14 = vand.u32 4294901760, %v21881_v17  ;;  %v21884_v51 = vld [vmem:[#allocation33_spill] sm:$0xff]  ;;  %v21886_v59 = vld [vmem:[#allocation34_spill] sm:$0xff]  ;;  %12528 = vmatprep.subr.bf16.mxu0 %v12527_v18 }
 0x26e   : > { %v12529_v1 = vpack.c.bf16 %v17787_v32, %v17782_v48  ;;  %v12309_v8 = vpack.c.bf16 %v5072_v39, %v5065_v23  ;;  %v12311_v54 = vpack.c.bf16 %v5198_v30, %v5191_v3  ;;  %v21885_v42 = vand.u32 4294901760, %v21884_v51  ;;  %v21890_v11 = vld [vmem:[#allocation37_spill] sm:$0xff]  ;;  %v21892_v39 = vld [vmem:[#allocation18_spill] sm:$0xff] }
 0x26f   : > { %21880 = vst [vmem:[#allocation20_spill] sm:$0xff] %v17819_v36  ;;  %v17826_v25 = vsub.f32 %v21881_v17, %v21882_v14  ;;  %v21887_v63 = vand.u32 4294901760, %v21886_v59  ;;  %v5205_v17 = vand.u32 4294901760, %v5204_v55  ;;  %v5212_v14 = vand.u32 4294901760, %v5211_v12 }
 0x270   : > { %v5092_v10 = vsub.f32 %v21884_v51, %v21885_v42  ;;  %v21889_v4 = vand.u32 4294901760, %v21888_v0  ;;  %v21891_v24 = vand.u32 4294901760, %v21890_v11  ;;  %v21893_v3 = vand.u32 4294901760, %v21892_v39  ;;  %v21895_v51 = vld [vmem:[#allocation71_spill] sm:$0xff]  ;;  %12310 = vmatpush3.bf16.msra.mxu1 %v12309_v8  ;;  %12530 = vmatpush3.bf16.msra.mxu0 %v12529_v1  ;;  %v21908_v8 = vld [vmem:[#allocation42_spill] sm:$0xff] }
 0x271   : > { %21883 = vst [vmem:[#allocation12_spill] sm:$0xff] %v17826_v25  ;;  %v5099_v52 = vsub.f32 %v21886_v59, %v21887_v63  ;;  %v21896_v42 = vand.u32 4294901760, %v21895_v51  ;;  %v12531_v33 = vpack.c.bf16 %v17814_v22, %v17809_v47  ;;  %v21900_v55 = vand.u32 4294901760, %v17491_v46  ;;  %12312 = vmatprep.subr.bf16.mxu1 %v12311_v54 }
 0x272   : > { %v5218_v15 = vsub.f32 %v21888_v0, %v21889_v4  ;;  %v5225_v23 = vsub.f32 %v21890_v11, %v21891_v24  ;;  %v17845_v30 = vsub.f32 %v21892_v39, %v21893_v3  ;;  %v21898_v4 = vand.u32 4294901760, %v17483_v5  ;;  %v21902_v24 = vld [vmem:[#allocation41_spill] sm:$0xff]  ;;  %v21904_v3 = vld [vmem:[#allocation39_spill] sm:$0xff] }
 0x273   : > { %v17850_v20 = vsub.f32 %v21895_v51, %v21896_v42  ;;  %v17862_v12 = vsub.f32 %v17491_v46, %v21900_v55  ;;  %v12313_v59 = vpack.c.bf16 %v5086_v61, %v5079_v16  ;;  %v5093_v63 = vand.u32 4294901760, %v5092_v10  ;;  %12532 = vmatprep.subr.bf16.mxu0 %v12531_v33 }
 0x274   : > { %21894 = vst [vmem:[#allocation25_spill] sm:$0xff] %v17845_v30  ;;  %v17857_v0 = vsub.f32 %v17483_v5, %v21898_v4  ;;  %v5100_v11 = vand.u32 4294901760, %v5099_v52  ;;  %v21903_v39 = vand.u32 4294901760, %v21902_v24  ;;  %v21905_v51 = vand.u32 4294901760, %v21904_v3 }
 0x275   : > { %21897 = vst [vmem:[#allocation32_spill] sm:$0xff] %v17850_v20  ;;  %21901 = vst [vmem:[#allocation47_spill] sm:$0xff] %v17862_v12  ;;  %v12533_v5 = vpack.c.bf16 %v17826_v25, %v17819_v36  ;;  %v12315_v4 = vpack.c.bf16 %v5212_v14, %v5205_v17  ;;  %v5219_v46 = vand.u32 4294901760, %v5218_v15  ;;  %v5226_v55 = vand.u32 4294901760, %v5225_v23  ;;  %12314 = vmatpush3.bf16.msra.mxu1 %v12313_v59 }
 0x276   : > { %21899 = vst [vmem:[#allocation24_spill] sm:$0xff] %v17857_v0  ;;  %v5106_v18 = vsub.f32 %v21902_v24, %v21903_v39  ;;  %v5113_v42 = vsub.f32 %v21904_v3, %v21905_v51  ;;  %v21906_v16 = vand.u32 4294901760, %v17496_v41  ;;  %v21909_v10 = vand.u32 4294901760, %v21908_v8  ;;  %v9814_v24 = vpop.f32.mrb[20].mxu1 }
 0x277   : > { %v12535_v1 = vpack.c.bf16 %v17850_v20, %v17845_v30  ;;  %v21911_v54 = vand.u32 4294901760, %v17537_v53  ;;  %v9815_v14 = vpop.f32.mrb[21].mxu1  ;;  %v21913_v3 = vand.u32 4294901760, %v17542_v34  ;;  %12534 = vmatpush3.bf16.msra.mxu0 %v12533_v5  ;;  %12316 = vmatprep.subr.bf16.mxu1 %v12315_v4  ;;  %v12537_v33 = vpack.c.bf16 %v17862_v12, %v17857_v0 }
 0x278   : > { %v17875_v61 = vsub.f32 %v17496_v41, %v21906_v16  ;;  %v17880_v52 = vsub.f32 %v21908_v8, %v21909_v10  ;;  %v9816_v15 = vadd.f32 %v9815_v14, %v9814_v24  ;;  %v12317_v41 = vpack.c.bf16 %v5100_v11, %v5093_v63  ;;  %v21925_v14 = vld [vmem:[#allocation13_spill] sm:$0xff] }
 0x279   : > { %v17887_v17 = vsub.f32 %v17537_v53, %v21911_v54  ;;  %v5107_v23 = vand.u32 4294901760, %v5106_v18  ;;  %v5114_v39 = vand.u32 4294901760, %v5113_v42  ;;  %v17892_v51 = vsub.f32 %v17542_v34, %v21913_v3  ;;  %12536 = vmatprep.subr.bf16.mxu0 %v12535_v1  ;;  %v10059_v18 = vpop.f32.mrb[20].mxu0 }
 0x27a   : > { %21907 = vst [vmem:[#allocation49_spill] sm:$0xff] %v17875_v61  ;;  %21910 = vst [vmem:[#allocation63_spill] sm:$0xff] %v17880_v52  ;;  %v12319_v16 = vpack.c.bf16 %v5226_v55, %v5219_v46  ;;  %v21915_v53 = vand.u32 4294901760, %v17580_v43  ;;  %v21917_v59 = vand.u32 4294901760, %v17585_v57  ;;  %v3091_v11 = vadd.f32 %v9816_v15, %v17667_v9  ;;  %v10060_v4 = vpop.f32.mrb[21].mxu0  ;;  %12318 = vmatpush3.bf16.msra.mxu1 %v12317_v41  ;;  %v21921_v46 = vld [vmem:[#allocation44_spill] sm:$0xff] }
 0x27b   : > { %21912 = vst [vmem:[#allocation52_spill] sm:$0xff] %v17887_v17  ;;  %21914 = vst [vmem:[#allocation72_spill] sm:$0xff] %v17892_v51  ;;  %v12539_v34 = vpack.c.bf16 %v17880_v52, %v17875_v61  ;;  %v21919_v42 = vand.u32 4294901760, %v17624_v26  ;;  %v17922_v10 = vadd.f32 %v10060_v4, %v10059_v18  ;;  %12538 = vmatpush3.bf16.msra.mxu0 %v12537_v33  ;;  %v20626_v1 = vand.u32 4294901760, %v17516_v7  ;;  %v21926_v33 = vld [vmem:[#allocation62_spill] sm:$0xff] }
 0x27c   : > { %v17899_v8 = vsub.f32 %v17580_v43, %v21915_v53  ;;  %v17904_v63 = vsub.f32 %v17585_v57, %v21917_v59  ;;  %v12321_v43 = vpack.c.bf16 %v5114_v39, %v5107_v23  ;;  %v17915_v55 = vadd.f32 %v21921_v46, %v3091_v11  ;;  %12320 = vmatprep.subr.bf16.mxu1 %v12319_v16  ;;  %v21927_v16 = vld [vmem:[#allocation14_spill] sm:$0xff]  ;;  %v21928_v53 = vld [vmem:[#allocation11_spill] sm:$0xff] }
 0x27d   : > { %v17912_v5 = vsub.f32 %v17624_v26, %v21919_v42  ;;  %v21922_v57 = vand.u32 4294901760, %v17629_v44  ;;  %21924 = vst [vmem:[#allocation17_spill] sm:$0xff] %v17922_v10  ;;  %v12541_v24 = vpack.c.bf16 %v17892_v51, %v17887_v17  ;;  %12540 = vmatprep.subr.bf16.mxu0 %v12539_v34  ;;  %v20625_v54 = vand.u32 4294901760, %v17521_v31  ;;  %v21930_v11 = vld [vmem:[#allocation15_spill] sm:$0xff] }
 0x27e   : > { %21916 = vst [vmem:[#allocation66_spill] sm:$0xff] %v17899_v8  ;;  %21918 = vst [vmem:[#allocation55_spill] sm:$0xff] %v17904_v63  ;;  %v12543_v26 = vpack.c.bf16 %v17904_v63, %v17899_v8  ;;  %12322 = vmatpush3.bf16.msra.mxu1 %v12321_v43  ;;  %v20624_v15 = vand.u32 4294901760, %v17547_v2  ;;  %v20623_v41 = vand.u32 4294901760, %v17552_v56  ;;  %v20618_v39 = vand.u32 4294901760, %v17599_v35 }
 0x27f   : > { %21920 = vst [vmem:[#allocation60_spill] sm:$0xff] %v17912_v5  ;;  %v17920_v9 = vsub.f32 %v17629_v44, %v21922_v57  ;;  %12542 = vmatpush3.bf16.msra.mxu0 %v12541_v24  ;;  %12356 = vmatprep.subr.bf16.mxu1 %v21925_v14  ;;  %v12579_v23 = vpack.c.bf16 %v20625_v54, %v20626_v1  ;;  %v20617_v3 = vand.u32 4294901760, %v17604_v49  ;;  %v21929_v59 = vand.u32 4294901760, %v21928_v53  ;;  %v21931_v57 = vld [vmem:[#allocation26_spill] sm:$0xff]  ;;  %v21932_v24 = vld [vmem:[#allocation43_spill] sm:$0xff]  ;;  %v21936_v54 = vld [vmem:[#allocation40_spill] sm:$0xff] }
 0x280   : > { %12544 = vmatprep.subr.bf16.mxu0 %v12543_v26  ;;  %v12581_v34 = vpack.c.bf16 %v20623_v41, %v20624_v15  ;;  %v20622_v18 = vand.u32 4294901760, %v17676_v58  ;;  %v20621_v42 = vand.u32 4294901760, %v17681_v28  ;;  %v20620_v43 = vand.u32 4294901760, %v17716_v37  ;;  %v6665_v15 = vld [vmem:[%s17979_s24 + $0x8] sm:$0xff] }
 0x281   : > { %21923 = vst [vmem:[#allocation16_spill] sm:$0xff] %v17920_v9  ;;  %v12545_v44 = vpack.c.bf16 %v17920_v9, %v17912_v5  ;;  %5231 = vmatmul.mubr.f32.vlgmr.msra.gmra.mrb[34].mxu1 %v21926_v33  ;;  %v12583_v4 = vpack.c.bf16 %v20617_v3, %v20618_v39  ;;  %v20619_v46 = vand.u32 4294901760, %v17721_v45  ;;  %v21933_v3 = vld [vmem:[#allocation30_spill] sm:$0xff]  ;;  %v20637_v41 = vand.u32 4294901760, %v17809_v47 }
 0x282   : > { %12358 = vmatpush3.bf16.msra.mxu1 %v21927_v16  ;;  %5473 = vmatprep.mubr.f32.mxu1 %v21929_v59  ;;  %v12585_v26 = vpack.c.bf16 %v20621_v42, %v20622_v18  ;;  %v20630_v59 = vand.u32 4294901760, %v17756_v21  ;;  %v21934_v39 = vld [vmem:[#allocation74_spill] sm:$0xff]  ;;  %v20634_v42 = vand.u32 4294901760, %v17787_v32  ;;  %v21940_v10 = vand.u32 4294901760, %v17826_v25  ;;  %v9884_v1 = vpop.f32.mrb[22].mxu1 }
 0x283   : > { %12546 = vmatpush3.bf16.msra.mxu0 %v12545_v44  ;;  %12360 = vmatprep.subr.bf16.mxu1 %v21930_v11  ;;  %v20628_v44 = vand.u32 4294901760, %v17726_v60  ;;  %v12587_v53 = vpack.c.bf16 %v20619_v46, %v20620_v43  ;;  %v20635_v43 = vand.u32 4294901760, %v17782_v48  ;;  %v21948_v13 = vand.u32 4294901760, %v17880_v52 }
 0x284   : > { %12580 = vmatprep.subr.bf16.mxu0 %v12579_v23  ;;  %v20627_v23 = vand.u32 4294901760, %v17751_v38  ;;  %v20662_v52 = vand.u32 4294901760, %v17920_v9  ;;  %v18112_v9 = vld [vmem:[%s20065_s7 + $0x10] sm:$0xff] }
 0x286   : > { %6273 = vmatmul.mubr.f32.vlgmr.msra.gmra.mrb[34].mxu0 %v17632_v27  ;;  %12362 = vmatpush3.bf16.msra.mxu1 %v21931_v57  ;;  %v12589_v46 = vpack.c.bf16 %v20627_v23, %v20628_v44  ;;  %v21937_v44 = vld [vmem:[#allocation61_spill] sm:$0xff]  ;;  %v6745_v27 = vmul.f32 %v6665_v15, %v6665_v15  ;;  %v21938_v23 = vld [vmem:[#allocation56_spill] sm:$0xff]  ;;  %v21942_v15 = vand.u32 4294901760, %v17850_v20 }
 0x287   : > { %12582 = vmatpush3.bf16.msra.mxu0 %v12581_v34  ;;  %12364 = vmatprep.subr.bf16.mxu1 %v21932_v24  ;;  %v20629_v34 = vand.u32 4294901760, %v17761_v40 }
 0x288   : > { %12584 = vmatprep.subr.bf16.mxu0 %v12583_v4  ;;  %6547 = vmatprep.mubr.f32.mxu0 %v21933_v3  ;;  %v21935_v4 = vld [vmem:[#allocation73_spill] sm:$0xff]  ;;  %v18023_v29 = vand.u32 4294901760, %v6745_v27 }
 0x289   : > { %v12591_v18 = vpack.c.bf16 %v20629_v34, %v20630_v59  ;;  %v20644_v59 = vand.u32 4294901760, %v17845_v30  ;;  %v18277_v30 = vld [vmem:[%s20065_s7 + $0xe8] sm:$0xff] }
 0x28a   : > { %12366 = vmatpush3.bf16.msra.mxu1 %v21934_v39  ;;  %21943 = vst [vmem:[#allocation8_spill] sm:$0xff] %v18023_v29  ;;  %21986 = vst [vmem:[#allocation15_spill] sm:$0xff] %v18277_v30 }
 0x28b   : > { %12586 = vmatpush3.bf16.msra.mxu0 %v12585_v26  ;;  %12368 = vmatprep.subr.bf16.mxu1 %v21935_v4  ;;  %v20636_v26 = vand.u32 4294901760, %v17814_v22  ;;  %v12599_v62 = vpack.c.bf16 %v21942_v15, %v20644_v59  ;;  %v20655_v15 = vand.u32 4294901760, %v17887_v17  ;;  %v20654_v59 = vand.u32 4294901760, %v17892_v51 }
 0x28c   : > { %12588 = vmatprep.subr.bf16.mxu0 %v12587_v53  ;;  %v12593_v53 = vpack.c.bf16 %v20634_v42, %v20635_v43  ;;  %v21941_v42 = vld [vmem:[#allocation64_spill] sm:$0xff]  ;;  %v20647_v43 = vand.u32 4294901760, %v17862_v12  ;;  %v18249_v12 = vld [vmem:[%s20065_s7 + $0xd0] sm:$0xff] }
 0x28d   : > { %v12595_v34 = vpack.c.bf16 %v20636_v26, %v20637_v41  ;;  %v21946_v26 = vand.u32 4294901760, %v17857_v0  ;;  %v18041_v0 = vsub.f32 %v6745_v27, %v18023_v29  ;;  %v21953_v27 = vld [vmem:[#allocation70_spill] sm:$0xff]  ;;  %v20663_v29 = vand.u32 4294901760, %v17912_v5  ;;  %21984 = vst [vmem:[#allocation14_spill] sm:$0xff] %v18249_v12 }
 0x28e   : > { %12370 = vmatpush3.bf16.msra.mxu1 %v21936_v54 }
 0x28f   : > { %12590 = vmatpush3.bf16.msra.mxu0 %v12589_v46  ;;  %12372 = vmatprep.subr.bf16.mxu1 %v21937_v44  ;;  %v21939_v46 = vand.u32 4294901760, %v17819_v36  ;;  %v12601_v41 = vpack.c.bf16 %v20647_v43, %v21946_v26  ;;  %21949 = vst [vmem:[#allocation50_spill] sm:$0xff] %v18041_v0  ;;  %v10129_v26 = vpop.f32.mrb[22].mxu0  ;;  %v18046_v43 = vld [vmem:[%s20065_s7 + $0x80] sm:$0xff] }
 0x290   : > { %12592 = vmatprep.subr.bf16.mxu0 %v12591_v18  ;;  %v21945_v18 = vld [vmem:[#allocation53_spill] sm:$0xff] }
 0x291   : > { %v12597_v6 = vpack.c.bf16 %v21940_v10, %v21939_v46  ;;  %v9885_v10 = vpop.f32.mrb[23].mxu1  ;;  %v21944_v46 = vld [vmem:[#allocation65_spill] sm:$0xff] }
 0x292   : > { %12374 = vmatpush3.bf16.msra.mxu1 %v21938_v23 }
 0x293   : > { %12594 = vmatpush3.bf16.msra.mxu0 %v12593_v53  ;;  %12376 = vmatprep.subr.bf16.mxu1 %v21941_v42  ;;  %v9886_v53 = vadd.f32 %v9885_v10, %v9884_v1 }
 0x294   : > { %12596 = vmatprep.subr.bf16.mxu0 %v12595_v34  ;;  %v21947_v34 = vand.u32 4294901760, %v17875_v61  ;;  %v21954_v61 = vand.u32 4294901760, %v17899_v8 }
 0x295   : > { %v3435_v1 = vadd.f32 %v9886_v53, %v17915_v55  ;;  %v10130_v55 = vpop.f32.mrb[23].mxu0  ;;  %v21951_v53 = vld [vmem:[#allocation48_spill] sm:$0xff] }
 0x296   : > { %12378 = vmatpush3.bf16.msra.mxu1 %v21944_v46  ;;  %v12603_v20 = vpack.c.bf16 %v21948_v13, %v21947_v34  ;;  %v18051_v13 = vld [vmem:[%s20065_s7 + $0x88] sm:$0xff]  ;;  %v18057_v10 = vadd.f32 %v10130_v55, %v10129_v26  ;;  %v18075_v55 = vld [vmem:[%s20065_s7] sm:$0xff] }
 0x297   : > { %12598 = vmatpush3.bf16.msra.mxu0 %v12597_v6  ;;  %12380 = vmatprep.subr.bf16.mxu1 %v21945_v18  ;;  %v18055_v34 = vadd.f32 %v21951_v53, %v3435_v1  ;;  %v12605_v6 = vpack.c.bf16 %v20654_v59, %v20655_v15  ;;  %v21955_v1 = vand.u32 4294901760, %v17904_v63  ;;  %v18080_v59 = vld [vmem:[%s20065_s7 + $0x8] sm:$0xff]  ;;  %v21956_v15 = vld [vmem:[#allocation51_spill] sm:$0xff]  ;;  %v21958_v63 = vand.u32 4294901760, %v18051_v13 }
 0x298   : > { %12600 = vmatprep.subr.bf16.mxu0 %v12599_v62  ;;  %v21950_v62 = vld [vmem:[#allocation54_spill] sm:$0xff]  ;;  %21952 = vst [vmem:[#allocation5_spill] sm:$0xff] %v18057_v10  ;;  %v20666_v26 = vand.u32 4294901760, %v18080_v59  ;;  %v21957_v10 = vand.u32 4294901760, %v18046_v43  ;;  %v21996_v36 = vand.u32 4294901760, %v18080_v59 }
 0x299   : > { %v12607_v53 = vpack.c.bf16 %v21955_v1, %v21954_v61  ;;  %v18086_v61 = vld [vmem:[%s20065_s7 + $0x90] sm:$0xff]  ;;  %v18091_v1 = vld [vmem:[%s20065_s7 + $0x98] sm:$0xff] }
 0x29a   : > { %12382 = vmatpush3.bf16.msra.mxu1 %v21950_v62  ;;  %v18105_v8 = vpack.c.bf16 %v21958_v63, %v21957_v10  ;;  %v21961_v63 = vld [vmem:[#allocation69_spill] sm:$0xff]  ;;  %v21964_v5 = vand.u32 4294901760, %v18086_v61 }
 0x29b   : > { %12602 = vmatpush3.bf16.msra.mxu0 %v12601_v41  ;;  %12384 = vmatprep.subr.bf16.mxu1 %v21953_v27  ;;  %v20667_v41 = vand.u32 4294901760, %v18075_v55  ;;  %v21962_v10 = vand.u32 4294901760, %v21961_v63  ;;  %v20676_v63 = vand.u32 4294901760, %v18112_v9 }
 0x29c   : > { %12604 = vmatprep.subr.bf16.mxu0 %v12603_v20  ;;  %v12609_v20 = vpack.c.bf16 %v20662_v52, %v20663_v29  ;;  %21959 = vst [vmem:[#allocation6_spill] sm:$0xff] %v18105_v8  ;;  %v18117_v52 = vld [vmem:[%s20065_s7 + $0x18] sm:$0xff] }
 0x29e   : > { %12386 = vmatpush3.bf16.msra.mxu1 %v21956_v15 }
 0x29f   : > { %12606 = vmatpush3.bf16.msra.mxu0 %v12605_v6  ;;  %12420 = vmatprep.subr.bf16.mxu1 %v21925_v14  ;;  %v18127_v14 = vld [vmem:[%s20065_s7 + $0xa0] sm:$0xff]  ;;  %v18132_v6 = vld [vmem:[%s20065_s7 + $0xa8] sm:$0xff] }
 0x2a0   : > { %12608 = vmatprep.subr.bf16.mxu0 %v12607_v53  ;;  %v21960_v53 = vand.u32 4294901760, %v18041_v0 }
 0x2a1   : > { %5477 = vmatmul.mubr.f32.vlgmr.msra.gmra.mrb[36].mxu1 %v21962_v10 }
 0x2a2   : > { %v6852_v29 = vsub.f32 %v18041_v0, %v21960_v53  ;;  %12422 = vmatpush3.bf16.msra.mxu1 %v21927_v16  ;;  %5747 = vmatprep.mubr.f32.mxu1 %v21737_v19  ;;  %v18141_v53 = vpack.c.bf16 %v20666_v26, %v20667_v41  ;;  %v21965_v16 = vand.u32 4294901760, %v18091_v1  ;;  %v18157_v26 = vld [vmem:[%s20065_s7 + $0x20] sm:$0xff]  ;;  %v18162_v41 = vld [vmem:[%s20065_s7 + $0x28] sm:$0xff]  ;;  %v18254_v0 = vld [vmem:[%s20065_s7 + $0xd8] sm:$0xff] }
 0x2a3   : > { %12610 = vmatpush3.bf16.msra.mxu0 %v12609_v20  ;;  %12424 = vmatprep.subr.bf16.mxu1 %v21930_v11  ;;  %21967 = vst [vmem:[#allocation34_spill] sm:$0xff] %v18162_v41  ;;  %v21970_v20 = vld [vmem:[#allocation19_spill] sm:$0xff]  ;;  %v20679_v51 = vand.u32 4294901760, %v18162_v41  ;;  %21985 = vst [vmem:[#allocation11_spill] sm:$0xff] %v18254_v0 }
 0x2a4   : > { %21963 = vst [vmem:[#allocation57_spill] sm:$0xff] %v18141_v53  ;;  %12644 = vmatprep.subr.bf16.mxu0 %v18105_v8  ;;  %v18150_v19 = vpack.c.bf16 %v21965_v16, %v21964_v5  ;;  %v6853_v10 = vand.u32 4294901760, %v6852_v29  ;;  %v18167_v5 = vld [vmem:[%s20065_s7 + $0xb0] sm:$0xff]  ;;  %v18172_v16 = vld [vmem:[%s20065_s7 + $0xb8] sm:$0xff]  ;;  %v21971_v29 = vand.u32 4294901760, %v18117_v52  ;;  %v20680_v8 = vand.u32 4294901760, %v18157_v26 }
 0x2a5   : > { %21968 = vst [vmem:[#allocation36_spill] sm:$0xff] %v18167_v5  ;;  %21969 = vst [vmem:[#allocation37_spill] sm:$0xff] %v18172_v16 }
 0x2a6   : > { %21966 = vst [vmem:[#allocation33_spill] sm:$0xff] %v18150_v19  ;;  %6549 = vmatmul.mubr.f32.vlgmr.msra.gmra.mrb[36].mxu0 %v21970_v20  ;;  %12426 = vmatpush3.bf16.msra.mxu1 %v21931_v57  ;;  %v18182_v11 = vpack.c.bf16 %v21971_v29, %v20676_v63  ;;  %v21973_v20 = vand.u32 4294901760, %v18127_v14  ;;  %v21974_v57 = vand.u32 4294901760, %v18132_v6  ;;  %v18198_v29 = vld [vmem:[%s20065_s7 + $0x30] sm:$0xff]  ;;  %v18203_v63 = vld [vmem:[%s20065_s7 + $0x38] sm:$0xff] }
 0x2a7   : > { %12646 = vmatpush3.bf16.msra.mxu0 %v18141_v53  ;;  %12428 = vmatprep.subr.bf16.mxu1 %v21932_v24  ;;  %v18272_v24 = vld [vmem:[%s20065_s7 + $0xe0] sm:$0xff] }
 0x2a8   : > { %21972 = vst [vmem:[#allocation18_spill] sm:$0xff] %v18182_v11  ;;  %12648 = vmatprep.subr.bf16.mxu0 %v18150_v19  ;;  %v18191_v17 = vpack.c.bf16 %v21974_v57, %v21973_v20  ;;  %6854 = vmatprep.mubr.f32.mxu0 %v6853_v10  ;;  %v18208_v20 = vld [vmem:[%s20065_s7 + $0xc0] sm:$0xff]  ;;  %v18213_v57 = vld [vmem:[%s20065_s7 + $0xc8] sm:$0xff]  ;;  %v18222_v10 = vpack.c.bf16 %v20679_v51, %v20680_v8  ;;  %v21981_v51 = vand.u32 4294901760, %v18167_v5  ;;  %v21982_v8 = vand.u32 4294901760, %v18172_v16 }
 0x2a9   : > { %21976 = vst [vmem:[#allocation41_spill] sm:$0xff] %v18208_v20  ;;  %21977 = vst [vmem:[#allocation39_spill] sm:$0xff] %v18213_v57  ;;  %v18229_v19 = vld [vmem:[%s20065_s7 + $0x40] sm:$0xff]  ;;  %v21990_v5 = vand.u32 4294901760, %v18046_v43 }
 0x2aa   : > { %21975 = vst [vmem:[#allocation71_spill] sm:$0xff] %v18191_v17  ;;  %12430 = vmatpush3.bf16.msra.mxu1 %v21934_v39  ;;  %21978 = vst [vmem:[#allocation42_spill] sm:$0xff] %v18222_v10  ;;  %v18234_v39 = vld [vmem:[%s20065_s7 + $0x48] sm:$0xff]  ;;  %v18242_v53 = vpack.c.bf16 %v21982_v8, %v21981_v51  ;;  %v21987_v8 = vand.u32 4294901760, %v18198_v29  ;;  %v21988_v51 = vand.u32 4294901760, %v18203_v63 }
 0x2ab   : > { %12650 = vmatpush3.bf16.msra.mxu0 %v18182_v11  ;;  %12432 = vmatprep.subr.bf16.mxu1 %v21935_v4  ;;  %21979 = vst [vmem:[#allocation44_spill] sm:$0xff] %v18229_v19  ;;  %21980 = vst [vmem:[#allocation13_spill] sm:$0xff] %v18234_v39  ;;  %v6664_v4 = vld [vmem:[%s17979_s24] sm:$0xff]  ;;  %v18267_v11 = vld [vmem:[%s20065_s7 + $0x58] sm:$0xff]  ;;  %v18292_v41 = vsub.f32 %v18046_v43, %v21990_v5  ;;  %v18328_v43 = vsub.f32 %v18080_v59, %v21996_v36  ;;  %v21997_v5 = vand.u32 4294901760, %v18229_v19 }
 0x2ac   : > { %12652 = vmatprep.subr.bf16.mxu0 %v18191_v17  ;;  %21983 = vst [vmem:[#allocation62_spill] sm:$0xff] %v18242_v53  ;;  %v18259_v17 = vld [vmem:[%s20065_s7 + $0x50] sm:$0xff]  ;;  %v18285_v25 = vpack.c.bf16 %v21988_v51, %v21987_v8  ;;  %v21993_v51 = vand.u32 4294901760, %v18213_v57  ;;  %v21998_v16 = vand.u32 4294901760, %v18234_v39  ;;  %v22005_v39 = vand.u32 4294901760, %v17521_v31 }
 0x2ad   : > { %v22009_v19 = vand.u32 4294901760, %v18091_v1 }
 0x2ae   : > { %12434 = vmatpush3.bf16.msra.mxu1 %v21936_v54  ;;  %v6744_v54 = vmul.f32 %v6664_v4, %v6664_v4  ;;  %21989 = vst [vmem:[#allocation26_spill] sm:$0xff] %v18285_v25  ;;  %v21991_v4 = vand.u32 4294901760, %v18051_v13 }
 0x2af   : > { %12654 = vmatpush3.bf16.msra.mxu0 %v18222_v10  ;;  %12436 = vmatprep.subr.bf16.mxu1 %v21937_v44  ;;  %v21992_v44 = vand.u32 4294901760, %v18208_v20  ;;  %v22011_v20 = vand.u32 4294901760, %v18267_v11 }
 0x2b0   : > { %v18297_v10 = vsub.f32 %v18051_v13, %v21991_v4  ;;  %12656 = vmatprep.subr.bf16.mxu0 %v18242_v53  ;;  %v18313_v13 = vld [vmem:[%s20065_s7 + $0x60] sm:$0xff]  ;;  %v18318_v4 = vld [vmem:[%s20065_s7 + $0x68] sm:$0xff]  ;;  %v18335_v53 = vpack.c.bf16 %v21998_v16, %v21997_v5  ;;  %v18337_v57 = vand.u32 4294901760, %v6744_v54  ;;  %v6031_v16 = vsub.f32 %v17521_v31, %v22005_v39  ;;  %v18356_v5 = vld [vmem:[%s20065_s7 + $0xf0] sm:$0xff] }
 0x2b1   : > { %v18304_v8 = vpack.c.bf16 %v21993_v51, %v21992_v44  ;;  %v21995_v44 = vand.u32 4294901760, %v18075_v55  ;;  %v22007_v39 = vand.u32 4294901760, %v17552_v56 }
 0x2b2   : > { %12438 = vmatpush3.bf16.msra.mxu1 %v21938_v23  ;;  %21999 = vst [vmem:[#allocation30_spill] sm:$0xff] %v18335_v53  ;;  %22000 = vst [vmem:[#allocation74_spill] sm:$0xff] %v18337_v57  ;;  %v22004_v23 = vand.u32 4294901760, %v17516_v7 }
 0x2b3   : > { %21994 = vst [vmem:[#allocation43_spill] sm:$0xff] %v18304_v8  ;;  %v18323_v51 = vsub.f32 %v18075_v55, %v21995_v44  ;;  %12658 = vmatpush3.bf16.msra.mxu0 %v18285_v25  ;;  %12440 = vmatprep.subr.bf16.mxu1 %v21941_v42  ;;  %v22001_v55 = vand.u32 4294901760, %v18249_v12  ;;  %v22002_v44 = vand.u32 4294901760, %v18254_v0  ;;  %v18361_v42 = vld [vmem:[%s20065_s7 + $0xf8] sm:$0xff]  ;;  %v5919_v25 = vsub.f32 %v17552_v56, %v22007_v39 }
 0x2b4   : > { %v6024_v59 = vsub.f32 %v17516_v7, %v22004_v23  ;;  %12660 = vmatprep.subr.bf16.mxu0 %v18304_v8  ;;  %v22006_v23 = vand.u32 4294901760, %v17547_v2  ;;  %v22008_v0 = vand.u32 4294901760, %v18086_v61  ;;  %v18380_v8 = vsub.f32 %v18091_v1, %v22009_v19  ;;  %v18400_v19 = vld [vmem:[%s20065_s7 + $0x70] sm:$0xff] }
 0x2b5   : > { %v18345_v36 = vpack.c.bf16 %v22002_v44, %v22001_v55  ;;  %v9954_v55 = vpop.f32.mrb[24].mxu1  ;;  %v22010_v7 = vand.u32 4294901760, %v18259_v17  ;;  %v22014_v56 = vand.u32 4294901760, %v18277_v30 }
 0x2b6   : > { %v5912_v31 = vsub.f32 %v17547_v2, %v22006_v23  ;;  %v18375_v12 = vsub.f32 %v18086_v61, %v22008_v0  ;;  %v9955_v44 = vpop.f32.mrb[25].mxu1  ;;  %v22013_v23 = vand.u32 4294901760, %v18272_v24  ;;  %12442 = vmatpush3.bf16.msra.mxu1 %v21944_v46  ;;  %v6025_v46 = vand.u32 4294901760, %v6024_v59 }
 0x2b7   : > { %22003 = vst [vmem:[#allocation73_spill] sm:$0xff] %v18345_v36  ;;  %v18386_v2 = vpack.c.bf16 %v22011_v20, %v22010_v7  ;;  %v9956_v0 = vadd.f32 %v9955_v44, %v9954_v55  ;;  %v18405_v20 = vld [vmem:[%s20065_s7 + $0x78] sm:$0xff]  ;;  %v18408_v7 = vsub.f32 %v6744_v54, %v18337_v57  ;;  %12662 = vmatpush3.bf16.msra.mxu0 %v18335_v53  ;;  %v6032_v55 = vand.u32 4294901760, %v6031_v16  ;;  %v10199_v16 = vpop.f32.mrb[24].mxu0 }
 0x2b8   : > { %v18392_v39 = vpack.c.bf16 %v22014_v56, %v22013_v23  ;;  %12444 = vmatprep.subr.bf16.mxu1 %v21945_v18  ;;  %v22017_v44 = vand.u32 4294901760, %v17599_v35  ;;  %v22018_v56 = vand.u32 4294901760, %v17604_v49  ;;  %12664 = vmatprep.subr.bf16.mxu0 %v18345_v36  ;;  %v22019_v54 = vand.u32 4294901760, %v18313_v13 }
 0x2b9   : > { %22012 = vst [vmem:[#allocation40_spill] sm:$0xff] %v18386_v2  ;;  %22016 = vst [vmem:[#allocation56_spill] sm:$0xff] %v18408_v7  ;;  %v3681_v61 = vadd.f32 %v9956_v0, %v18055_v34  ;;  %v22020_v53 = vand.u32 4294901760, %v18318_v4  ;;  %v5913_v18 = vand.u32 4294901760, %v5912_v31  ;;  %v5920_v59 = vand.u32 4294901760, %v5919_v25 }
 0x2ba   : > { %22015 = vst [vmem:[#allocation61_spill] sm:$0xff] %v18392_v39  ;;  %v6038_v23 = vsub.f32 %v17599_v35, %v22017_v44  ;;  %v6045_v1 = vsub.f32 %v17604_v49, %v22018_v56  ;;  %v22022_v44 = vand.u32 4294901760, %v17676_v58  ;;  %v22023_v34 = vand.u32 4294901760, %v17681_v28  ;;  %v10200_v56 = vpop.f32.mrb[25].mxu0  ;;  %12446 = vmatpush3.bf16.msra.mxu1 %v21950_v62 }
 0x2bb   : > { %v18424_v57 = vpack.c.bf16 %v22020_v53, %v22019_v54  ;;  %v20727_v53 = vand.u32 4294901760, %v18408_v7  ;;  %v22024_v25 = vand.u32 4294901760, %v17716_v37  ;;  %v22025_v54 = vand.u32 4294901760, %v17721_v45  ;;  %12666 = vmatpush3.bf16.msra.mxu0 %v18386_v2  ;;  %12448 = vmatprep.subr.bf16.mxu1 %v21953_v27 }
 0x2bc   : > { %v5926_v49 = vsub.f32 %v17676_v58, %v22022_v44  ;;  %v5933_v0 = vsub.f32 %v17681_v28, %v22023_v34  ;;  %v18443_v30 = vadd.f32 %v17669_v50, %v3681_v61  ;;  %v18445_v58 = vadd.f32 %v10200_v56, %v10199_v16  ;;  %12668 = vmatprep.subr.bf16.mxu0 %v18392_v39 }
 0x2bd   : > { %22021 = vst [vmem:[#allocation64_spill] sm:$0xff] %v18424_v57  ;;  %v6052_v31 = vsub.f32 %v17716_v37, %v22024_v25  ;;  %v6059_v35 = vsub.f32 %v17721_v45, %v22025_v54  ;;  %v12483_v28 = vpack.c.bf16 %v6032_v55, %v6025_v46  ;;  %v6039_v62 = vand.u32 4294901760, %v6038_v23 }
 0x2be   : > { %v6046_v44 = vand.u32 4294901760, %v6045_v1  ;;  %v22026_v34 = vand.u32 4294901760, %v18112_v9  ;;  %v22027_v25 = vand.u32 4294901760, %v18117_v52  ;;  %v22028_v50 = vand.u32 4294901760, %v18356_v5  ;;  %12450 = vmatpush3.bf16.msra.mxu1 %v21956_v15 }
 0x2bf   : > { %v22029_v61 = vand.u32 4294901760, %v18361_v42  ;;  %v12485_v46 = vpack.c.bf16 %v5920_v59, %v5913_v18  ;;  %v22031_v1 = vand.u32 4294901760, %v18400_v19  ;;  %v22032_v55 = vand.u32 4294901760, %v18405_v20  ;;  %12670 = vmatpush3.bf16.msra.mxu0 %v18424_v57  ;;  %12484 = vmatprep.subr.bf16.mxu1 %v12483_v28 }
 0x2c0   : > { %v18452_v37 = vsub.f32 %v18112_v9, %v22026_v34  ;;  %v18457_v45 = vsub.f32 %v18117_v52, %v22027_v25  ;;  %v5927_v23 = vand.u32 4294901760, %v5926_v49  ;;  %v22034_v16 = vand.u32 4294901760, %v17726_v60 }
 0x2c1   : > { %v18464_v27 = vpack.c.bf16 %v22029_v61, %v22028_v50  ;;  %v18470_v9 = vpack.c.bf16 %v22032_v55, %v22031_v1  ;;  %v22035_v56 = vand.u32 4294901760, %v17751_v38  ;;  %v6858_v18 = vsub.f32 %v18408_v7, %v20727_v53  ;;  %5749 = vmatmul.mubr.f32.vlgmr.msra.gmra.mrb[38].mxu1 %v21926_v33 }
 0x2c2   : > { %v5940_v52 = vsub.f32 %v17726_v60, %v22034_v16  ;;  %v5934_v59 = vand.u32 4294901760, %v5933_v0  ;;  %v6053_v34 = vand.u32 4294901760, %v6052_v31  ;;  %v6060_v25 = vand.u32 4294901760, %v6059_v35  ;;  %12486 = vmatpush3.bf16.msra.mxu1 %v12485_v46  ;;  %6133 = vmatprep.mubr.f32.mxu1 %v21933_v3 }
 0x2c3   : > { %22030 = vst [vmem:[#allocation65_spill] sm:$0xff] %v18464_v27  ;;  %22033 = vst [vmem:[#allocation53_spill] sm:$0xff] %v18470_v9  ;;  %v5947_v54 = vsub.f32 %v17751_v38, %v22035_v56  ;;  %v12487_v49 = vpack.c.bf16 %v6046_v44, %v6039_v62  ;;  %v22036_v50 = vand.u32 4294901760, %v17756_v21  ;;  %v22037_v61 = vand.u32 4294901760, %v17761_v40  ;;  %12672 = vmatprep.subr.bf16.mxu0 %v18464_v27  ;;  %v22084_v27 = vld [vmem:[#allocation66_spill] sm:$0xff] }
 0x2c4   : > { %v22038_v15 = vand.u32 4294901760, %v18127_v14  ;;  %v22039_v0 = vand.u32 4294901760, %v18132_v6  ;;  %v22040_v31 = vand.u32 4294901760, %v18157_v26  ;;  %v22041_v62 = vand.u32 4294901760, %v17782_v48  ;;  %12674 = vmatpush3.bf16.msra.mxu0 %v18470_v9 }
 0x2c5   : > { %v6066_v60 = vsub.f32 %v17756_v21, %v22036_v50  ;;  %v6073_v38 = vsub.f32 %v17761_v40, %v22037_v61  ;;  %v12707_v21 = vpack.c.bf16 %v18297_v10, %v18292_v41  ;;  %v5941_v40 = vand.u32 4294901760, %v5940_v52  ;;  %12488 = vmatprep.subr.bf16.mxu1 %v12487_v49  ;;  %v22049_v49 = vld [vmem:[#allocation37_spill] sm:$0xff] }
 0x2c6   : > { %v18492_v1 = vsub.f32 %v18127_v14, %v22038_v15  ;;  %v18497_v35 = vsub.f32 %v18132_v6, %v22039_v0  ;;  %v18502_v28 = vsub.f32 %v18157_v26, %v22040_v31  ;;  %v5948_v14 = vand.u32 4294901760, %v5947_v54  ;;  %v22051_v31 = vld [vmem:[#allocation20_spill] sm:$0xff] }
 0x2c7   : > { %v5954_v44 = vsub.f32 %v17782_v48, %v22041_v62  ;;  %v22042_v6 = vand.u32 4294901760, %v17787_v32  ;;  %v6859_v26 = vand.u32 4294901760, %v6858_v18  ;;  %v12489_v16 = vpack.c.bf16 %v5934_v59, %v5927_v23  ;;  %v22045_v23 = vld [vmem:[#allocation34_spill] sm:$0xff]  ;;  %12708 = vmatprep.subr.bf16.mxu0 %v12707_v21 }
 0x2c8   : > { %v12709_v56 = vpack.c.bf16 %v18328_v43, %v18323_v51  ;;  %v12491_v50 = vpack.c.bf16 %v6060_v25, %v6053_v34  ;;  %v6067_v33 = vand.u32 4294901760, %v6066_v60  ;;  %v6074_v52 = vand.u32 4294901760, %v6073_v38  ;;  %v22047_v34 = vld [vmem:[#allocation36_spill] sm:$0xff] }
 0x2c9   : > { %v5961_v55 = vsub.f32 %v17787_v32, %v22042_v6  ;;  %v22043_v48 = vand.u32 4294901760, %v17809_v47  ;;  %v22044_v32 = vand.u32 4294901760, %v17814_v22  ;;  %v22046_v18 = vand.u32 4294901760, %v22045_v23  ;;  %6860 = vmatmul.mubr.f32.vlgmr.msra.gmra.mrb[38].mxu0 %v6859_v26  ;;  %12490 = vmatpush3.bf16.msra.mxu1 %v12489_v16 }
 0x2ca   : > { %v22048_v25 = vand.u32 4294901760, %v22047_v34  ;;  %v22050_v60 = vand.u32 4294901760, %v22049_v49  ;;  %v5955_v15 = vand.u32 4294901760, %v5954_v44  ;;  %v22052_v62 = vand.u32 4294901760, %v22051_v31  ;;  %12710 = vmatpush3.bf16.msra.mxu0 %v12709_v56  ;;  %12492 = vmatprep.subr.bf16.mxu1 %v12491_v50  ;;  %v22061_v50 = vld [vmem:[#allocation50_spill] sm:$0xff] }
 0x2cb   : > { %v6080_v54 = vsub.f32 %v17809_v47, %v22043_v48  ;;  %v6087_v46 = vsub.f32 %v17814_v22, %v22044_v32  ;;  %v18527_v59 = vsub.f32 %v22045_v23, %v22046_v18  ;;  %v12711_v47 = vpack.c.bf16 %v18380_v8, %v18375_v12  ;;  %v22053_v48 = vld [vmem:[#allocation12_spill] sm:$0xff]  ;;  %v22055_v18 = vld [vmem:[#allocation25_spill] sm:$0xff]  ;;  %7227 = vmatprep.mubr.f32.mxu0 %v22061_v50 }
 0x2cc   : > { %v18532_v61 = vsub.f32 %v22047_v34, %v22048_v25  ;;  %v18537_v38 = vsub.f32 %v22049_v49, %v22050_v60  ;;  %v12493_v22 = vpack.c.bf16 %v5948_v14, %v5941_v40  ;;  %v5962_v0 = vand.u32 4294901760, %v5961_v55  ;;  %v22057_v25 = vld [vmem:[#allocation32_spill] sm:$0xff] }
 0x2cd   : > { %v5968_v6 = vsub.f32 %v22051_v31, %v22052_v62  ;;  %v22054_v32 = vand.u32 4294901760, %v22053_v48  ;;  %v22056_v34 = vand.u32 4294901760, %v22055_v18  ;;  %v22058_v49 = vand.u32 4294901760, %v22057_v25  ;;  %12712 = vmatprep.subr.bf16.mxu0 %v12711_v47 }
 0x2ce   : > { %v12713_v14 = vpack.c.bf16 %v18457_v45, %v18452_v37  ;;  %v12495_v44 = vpack.c.bf16 %v6074_v52, %v6067_v33  ;;  %v6081_v55 = vand.u32 4294901760, %v6080_v54  ;;  %v6088_v26 = vand.u32 4294901760, %v6087_v46  ;;  %v22062_v52 = vld [vmem:[#allocation24_spill] sm:$0xff]  ;;  %v22064_v46 = vld [vmem:[#allocation47_spill] sm:$0xff]  ;;  %12494 = vmatpush3.bf16.msra.mxu1 %v12493_v22 }
 0x2cf   : > { %v5975_v23 = vsub.f32 %v22053_v48, %v22054_v32  ;;  %v6094_v21 = vsub.f32 %v22055_v18, %v22056_v34  ;;  %v6101_v40 = vsub.f32 %v22057_v25, %v22058_v49  ;;  %v22059_v16 = vand.u32 4294901760, %v18198_v29  ;;  %v22072_v22 = vld [vmem:[#allocation39_spill] sm:$0xff] }
 0x2d0   : > { %v22060_v31 = vand.u32 4294901760, %v18203_v63  ;;  %v12715_v56 = vpack.c.bf16 %v18497_v35, %v18492_v1  ;;  %v12497_v48 = vpack.c.bf16 %v5962_v0, %v5955_v15  ;;  %v12717_v33 = vpack.c.bf16 %v18527_v59, %v18502_v28  ;;  %12714 = vmatpush3.bf16.msra.mxu0 %v12713_v14  ;;  %12496 = vmatprep.subr.bf16.mxu1 %v12495_v44  ;;  %v22066_v15 = vld [vmem:[#allocation49_spill] sm:$0xff] }
 0x2d1   : > { %v18558_v60 = vsub.f32 %v18198_v29, %v22059_v16  ;;  %v22063_v54 = vand.u32 4294901760, %v22062_v52  ;;  %v22065_v32 = vand.u32 4294901760, %v22064_v46  ;;  %v5976_v47 = vand.u32 4294901760, %v5975_v23 }
 0x2d2   : > { %v18563_v62 = vsub.f32 %v18203_v63, %v22060_v31  ;;  %v5969_v63 = vand.u32 4294901760, %v5968_v6  ;;  %v6095_v34 = vand.u32 4294901760, %v6094_v21  ;;  %v6102_v25 = vand.u32 4294901760, %v6101_v40  ;;  %v22068_v31 = vld [vmem:[#allocation63_spill] sm:$0xff]  ;;  %v22074_v21 = vld [vmem:[#allocation44_spill] sm:$0xff]  ;;  %12716 = vmatprep.subr.bf16.mxu0 %v12715_v56  ;;  %12498 = vmatpush3.bf16.msra.mxu1 %v12497_v48 }
 0x2d3   : > { %v5982_v29 = vsub.f32 %v22062_v52, %v22063_v54  ;;  %v5989_v18 = vsub.f32 %v22064_v46, %v22065_v32  ;;  %v12499_v49 = vpack.c.bf16 %v6088_v26, %v6081_v55  ;;  %v22067_v0 = vand.u32 4294901760, %v22066_v15  ;;  %v22070_v54 = vld [vmem:[#allocation41_spill] sm:$0xff]  ;;  %v22086_v48 = vld [vmem:[#allocation55_spill] sm:$0xff] }
 0x2d4   : > { %v22069_v53 = vand.u32 4294901760, %v22068_v31  ;;  %v22071_v9 = vand.u32 4294901760, %v22070_v54  ;;  %v22073_v6 = vand.u32 4294901760, %v22072_v22  ;;  %v22075_v40 = vand.u32 4294901760, %v22074_v21  ;;  %12718 = vmatpush3.bf16.msra.mxu0 %v12717_v33 }
 0x2d5   : > { %v6108_v16 = vsub.f32 %v22066_v15, %v22067_v0  ;;  %v12719_v44 = vpack.c.bf16 %v18537_v38, %v18532_v61  ;;  %v5983_v32 = vand.u32 4294901760, %v5982_v29  ;;  %v5990_v15 = vand.u32 4294901760, %v5989_v18  ;;  %12500 = vmatprep.subr.bf16.mxu1 %v12499_v49 }
 0x2d6   : > { %v6115_v52 = vsub.f32 %v22068_v31, %v22069_v53  ;;  %v18585_v46 = vsub.f32 %v22070_v54, %v22071_v9  ;;  %v18590_v23 = vsub.f32 %v22072_v22, %v22073_v6  ;;  %v18595_v14 = vsub.f32 %v22074_v21, %v22075_v40  ;;  %v22077_v53 = vld [vmem:[#allocation13_spill] sm:$0xff]  ;;  %v22080_v54 = vld [vmem:[#allocation52_spill] sm:$0xff] }
 0x2d7   : > { %v22078_v55 = vand.u32 4294901760, %v22077_v53  ;;  %v12721_v9 = vpack.c.bf16 %v18563_v62, %v18558_v60  ;;  %v12501_v0 = vpack.c.bf16 %v5976_v47, %v5969_v63  ;;  %v12503_v31 = vpack.c.bf16 %v6102_v25, %v6095_v34  ;;  %v22082_v6 = vld [vmem:[#allocation72_spill] sm:$0xff]  ;;  %v22088_v47 = vld [vmem:[#allocation14_spill] sm:$0xff]  ;;  %12720 = vmatprep.subr.bf16.mxu0 %v12719_v44 }
 0x2d8   : > { %22076 = vst [vmem:[#allocation54_spill] sm:$0xff] %v18595_v14  ;;  %v22081_v22 = vand.u32 4294901760, %v22080_v54  ;;  %v22083_v21 = vand.u32 4294901760, %v22082_v6  ;;  %v22085_v57 = vand.u32 4294901760, %v22084_v27  ;;  %v22087_v18 = vand.u32 4294901760, %v22086_v48  ;;  %v22098_v44 = vld [vmem:[#allocation60_spill] sm:$0xff] }
 0x2d9   : > { %v18602_v26 = vsub.f32 %v22077_v53, %v22078_v55  ;;  %v6109_v53 = vand.u32 4294901760, %v6108_v16  ;;  %v6116_v55 = vand.u32 4294901760, %v6115_v52  ;;  %v22089_v34 = vand.u32 4294901760, %v22088_v47  ;;  %12502 = vmatpush3.bf16.msra.mxu1 %v12501_v0  ;;  %12722 = vmatpush3.bf16.msra.mxu0 %v12721_v9 }
 0x2da   : > { %v5996_v56 = vsub.f32 %v22080_v54, %v22081_v22  ;;  %v6003_v40 = vsub.f32 %v22082_v6, %v22083_v21  ;;  %v6122_v29 = vsub.f32 %v22084_v27, %v22085_v57  ;;  %v6129_v63 = vsub.f32 %v22086_v48, %v22087_v18  ;;  %v22091_v54 = vld [vmem:[#allocation11_spill] sm:$0xff]  ;;  %12504 = vmatprep.subr.bf16.mxu1 %v12503_v31 }
 0x2db   : > { %22079 = vst [vmem:[#allocation48_spill] sm:$0xff] %v18602_v26  ;;  %v18621_v25 = vsub.f32 %v22088_v47, %v22089_v34  ;;  %v22092_v22 = vand.u32 4294901760, %v22091_v54  ;;  %v12723_v49 = vpack.c.bf16 %v18590_v23, %v18585_v46  ;;  %v22094_v57 = vand.u32 4294901760, %v18259_v17  ;;  %v22100_v34 = vld [vmem:[#allocation16_spill] sm:$0xff] }
 0x2dc   : > { %v22096_v16 = vand.u32 4294901760, %v18267_v11  ;;  %v12505_v6 = vpack.c.bf16 %v5990_v15, %v5983_v32  ;;  %v5997_v21 = vand.u32 4294901760, %v5996_v56  ;;  %v6004_v48 = vand.u32 4294901760, %v6003_v40  ;;  %v22104_v40 = vld [vmem:[#allocation15_spill] sm:$0xff] }
 0x2dd   : > { %22090 = vst [vmem:[#allocation70_spill] sm:$0xff] %v18621_v25  ;;  %v18626_v33 = vsub.f32 %v22091_v54, %v22092_v22  ;;  %v18633_v27 = vsub.f32 %v18259_v17, %v22094_v57  ;;  %v22099_v18 = vand.u32 4294901760, %v22098_v44  ;;  %v22101_v54 = vand.u32 4294901760, %v22100_v34  ;;  %12724 = vmatprep.subr.bf16.mxu0 %v12723_v49 }
 0x2de   : > { %v18638_v52 = vsub.f32 %v18267_v11, %v22096_v16  ;;  %v12725_v11 = vpack.c.bf16 %v18602_v26, %v18595_v14  ;;  %v12507_v22 = vpack.c.bf16 %v6116_v55, %v6109_v53  ;;  %v6123_v32 = vand.u32 4294901760, %v6122_v29  ;;  %12506 = vmatpush3.bf16.msra.mxu1 %v12505_v6 }
 0x2df   : > { %22093 = vst [vmem:[#allocation51_spill] sm:$0xff] %v18626_v33  ;;  %22095 = vst [vmem:[#allocation69_spill] sm:$0xff] %v18633_v27  ;;  %v6010_v47 = vsub.f32 %v22098_v44, %v22099_v18  ;;  %v6017_v17 = vsub.f32 %v22100_v34, %v22101_v54  ;;  %v6130_v15 = vand.u32 4294901760, %v6129_v63  ;;  %v22102_v0 = vand.u32 4294901760, %v18272_v24  ;;  %v10024_v44 = vpop.f32.mrb[26].mxu1 }
 0x2e0   : > { %22097 = vst [vmem:[#allocation34_spill] sm:$0xff] %v18638_v52  ;;  %v22105_v57 = vand.u32 4294901760, %v22104_v40  ;;  %v12727_v9 = vpack.c.bf16 %v18626_v33, %v18621_v25  ;;  %v22107_v31 = vand.u32 4294901760, %v18313_v13  ;;  %v10025_v55 = vpop.f32.mrb[27].mxu1  ;;  %v12509_v29 = vpack.c.bf16 %v6004_v48, %v5997_v21  ;;  %12726 = vmatpush3.bf16.msra.mxu0 %v12725_v11  ;;  %12508 = vmatprep.subr.bf16.mxu1 %v12507_v22 }
 0x2e1   : > { %v18652_v56 = vsub.f32 %v18272_v24, %v22102_v0  ;;  %v10026_v24 = vadd.f32 %v10025_v55, %v10024_v44  ;;  %v6011_v63 = vand.u32 4294901760, %v6010_v47  ;;  %v6018_v18 = vand.u32 4294901760, %v6017_v17  ;;  %v10269_v47 = vpop.f32.mrb[26].mxu0 }
 0x2e2   : > { %v18657_v16 = vsub.f32 %v22104_v40, %v22105_v57  ;;  %v18666_v53 = vsub.f32 %v18313_v13, %v22107_v31  ;;  %v22109_v34 = vand.u32 4294901760, %v18318_v4  ;;  %v12729_v54 = vpack.c.bf16 %v18638_v52, %v18633_v27  ;;  %12728 = vmatprep.subr.bf16.mxu0 %v12727_v9  ;;  %v10270_v22 = vpop.f32.mrb[27].mxu0  ;;  %12510 = vmatpush3.bf16.msra.mxu1 %v12509_v29  ;;  %v22120_v9 = vld [vmem:[#allocation67_spill] sm:$0xff] }
 0x2e3   : > { %22103 = vst [vmem:[#allocation36_spill] sm:$0xff] %v18652_v56  ;;  %v12511_v0 = vpack.c.bf16 %v6130_v15, %v6123_v32  ;;  %v22111_v13 = vand.u32 4294901760, %v18356_v5  ;;  %v22113_v6 = vand.u32 4294901760, %v18361_v42  ;;  %v22115_v17 = vand.u32 4294901760, %v18400_v19 }
 0x2e4   : > { %22106 = vst [vmem:[#allocation37_spill] sm:$0xff] %v18657_v16  ;;  %22108 = vst [vmem:[#allocation20_spill] sm:$0xff] %v18666_v53  ;;  %v18671_v49 = vsub.f32 %v18318_v4, %v22109_v34  ;;  %v3953_v4 = vadd.f32 %v10026_v24, %v18443_v30  ;;  %v12731_v48 = vpack.c.bf16 %v18657_v16, %v18652_v56  ;;  %12730 = vmatpush3.bf16.msra.mxu0 %v12729_v54  ;;  %v22122_v34 = vld [vmem:[#allocation27_spill] sm:$0xff]  ;;  %v22123_v54 = vld [vmem:[#allocation46_spill] sm:$0xff] }
 0x2e5   : > { %v18678_v40 = vsub.f32 %v18356_v5, %v22111_v13  ;;  %v18683_v21 = vsub.f32 %v18361_v42, %v22113_v6  ;;  %v18691_v11 = vsub.f32 %v18400_v19, %v22115_v17  ;;  %v12513_v5 = vpack.c.bf16 %v6018_v18, %v6011_v63  ;;  %12512 = vmatprep.subr.bf16.mxu1 %v12511_v0  ;;  %v22121_v18 = vld [vmem:[#allocation19_spill] sm:$0xff]  ;;  %v22125_v13 = vld [vmem:[#allocation45_spill] sm:$0xff] }
 0x2e6   : > { %22110 = vst [vmem:[#allocation12_spill] sm:$0xff] %v18671_v49  ;;  %3957 = vst.msk [vmem:[%s18693_s19] sm:$0xff] %vm3956_vm0, %v3953_v4  ;;  %v22117_v42 = vand.u32 4294901760, %v18405_v20  ;;  %v18701_v32 = vadd.f32 %v10270_v22, %v10269_v47  ;;  %v12733_v19 = vpack.c.bf16 %v18671_v49, %v18666_v53  ;;  %12732 = vmatprep.subr.bf16.mxu0 %v12731_v48  ;;  %v20747_v57 = vand.u32 4294901760, %v18292_v41 }
 0x2e7   : > { %22112 = vst [vmem:[#allocation25_spill] sm:$0xff] %v18678_v40  ;;  %22114 = vst [vmem:[#allocation32_spill] sm:$0xff] %v18683_v21  ;;  %v12735_v15 = vpack.c.bf16 %v18683_v21, %v18678_v40  ;;  %v20742_v44 = vand.u32 4294901760, %v18297_v10  ;;  %12514 = vmatpush3.bf16.msra.mxu1 %v12513_v5  ;;  %v20741_v31 = vand.u32 4294901760, %v18323_v51  ;;  %v20740_v55 = vand.u32 4294901760, %v18328_v43  ;;  %v22126_v5 = vld [vmem:[#allocation31_spill] sm:$0xff] }
 0x2e8   : > { %22116 = vst [vmem:[#allocation24_spill] sm:$0xff] %v18691_v11  ;;  %v18699_v30 = vsub.f32 %v18405_v20, %v22117_v42  ;;  %22119 = vst [vmem:[#allocation49_spill] sm:$0xff] %v18701_v32  ;;  %12734 = vmatpush3.bf16.msra.mxu0 %v12733_v19  ;;  %12548 = vmatprep.subr.bf16.mxu1 %v22120_v9  ;;  %v20739_v29 = vand.u32 4294901760, %v18375_v12  ;;  %v20734_v63 = vand.u32 4294901760, %v18380_v8  ;;  %v22124_v0 = vand.u32 4294901760, %v22123_v54  ;;  %v22127_v42 = vld [vmem:[#allocation68_spill] sm:$0xff] }
 0x2e9   : > { %12736 = vmatprep.subr.bf16.mxu0 %v12735_v15  ;;  %v12771_v24 = vpack.c.bf16 %v20742_v44, %v20747_v57  ;;  %v12773_v6 = vpack.c.bf16 %v20740_v55, %v20741_v31  ;;  %v20736_v4 = vand.u32 4294901760, %v18452_v37  ;;  %v20735_v48 = vand.u32 4294901760, %v18457_v45  ;;  %v6667_v55 = vld [vmem:[%s17979_s24 + $0x18] sm:$0xff]  ;;  %v22131_v31 = vld [vmem:[#allocation29_spill] sm:$0xff] }
 0x2ea   : > { %22118 = vst [vmem:[#allocation47_spill] sm:$0xff] %v18699_v30  ;;  %v12737_v20 = vpack.c.bf16 %v18699_v30, %v18691_v11  ;;  %6135 = vmatmul.mubr.f32.vlgmr.msra.gmra.mrb[40].mxu1 %v22121_v18  ;;  %v12775_v47 = vpack.c.bf16 %v20734_v63, %v20739_v29  ;;  %v20738_v17 = vand.u32 4294901760, %v18492_v1  ;;  %v20737_v22 = vand.u32 4294901760, %v18497_v35  ;;  %v22129_v63 = vld [vmem:[#allocation38_spill] sm:$0xff] }
 0x2eb   : > { %12550 = vmatpush3.bf16.msra.mxu1 %v22122_v34  ;;  %6377 = vmatprep.mubr.f32.mxu1 %v22124_v0  ;;  %v12777_v19 = vpack.c.bf16 %v20735_v48, %v20736_v4  ;;  %v20744_v15 = vand.u32 4294901760, %v18502_v28  ;;  %v20746_v54 = vand.u32 4294901760, %v18532_v61  ;;  %v20745_v0 = vand.u32 4294901760, %v18537_v38  ;;  %v22130_v48 = vld [vmem:[#allocation35_spill] sm:$0xff]  ;;  %v10094_v57 = vpop.f32.mrb[28].mxu1 }
 0x2ec   : > { %12738 = vmatpush3.bf16.msra.mxu0 %v12737_v20  ;;  %12552 = vmatprep.subr.bf16.mxu1 %v22125_v13  ;;  %v20743_v20 = vand.u32 4294901760, %v18527_v59  ;;  %v20752_v4 = vand.u32 4294901760, %v18558_v60  ;;  %v20754_v29 = vand.u32 4294901760, %v18585_v46  ;;  %v6747_v44 = vmul.f32 %v6667_v55, %v6667_v55 }
 0x2ed   : > { %12772 = vmatprep.subr.bf16.mxu0 %v12771_v24  ;;  %v12779_v24 = vpack.c.bf16 %v20737_v22, %v20738_v17  ;;  %v20751_v22 = vand.u32 4294901760, %v18563_v62  ;;  %v12783_v17 = vpack.c.bf16 %v20745_v0, %v20746_v54  ;;  %v20759_v54 = vand.u32 4294901760, %v18621_v25  ;;  %v19050_v25 = vld [vmem:[%s20065_s7 + $0x1e8] sm:$0xff] }
 0x2ee   : > { %v22137_v55 = vand.u32 4294901760, %v18626_v33  ;;  %v18796_v36 = vand.u32 4294901760, %v6747_v44  ;;  %v22143_v50 = vand.u32 4294901760, %v18657_v16  ;;  %v20779_v16 = vand.u32 4294901760, %v18699_v30  ;;  %v18885_v30 = vld [vmem:[%s20065_s7 + $0x110] sm:$0xff]  ;;  %22182 = vst [vmem:[#allocation31_spill] sm:$0xff] %v19050_v25 }
 0x2ef   : > { %7230 = vmatmul.mubr.f32.vlgmr.msra.gmra.mrb[40].mxu0 %v18408_v7  ;;  %12554 = vmatpush3.bf16.msra.mxu1 %v22126_v5  ;;  %v22135_v7 = vand.u32 4294901760, %v18602_v26 }
 0x2f0   : > { %12774 = vmatpush3.bf16.msra.mxu0 %v12773_v6  ;;  %12556 = vmatprep.subr.bf16.mxu1 %v22127_v42  ;;  %v22128_v6 = vld [vmem:[#allocation8_spill] sm:$0xff]  ;;  %v12791_v2 = vpack.c.bf16 %v22137_v55, %v20759_v54  ;;  %22138 = vst [vmem:[#allocation63_spill] sm:$0xff] %v18796_v36  ;;  %v20772_v55 = vand.u32 4294901760, %v18666_v53  ;;  %v20771_v54 = vand.u32 4294901760, %v18671_v49 }
 0x2f1   : > { %12776 = vmatprep.subr.bf16.mxu0 %v12775_v47  ;;  %7504 = vmatprep.mubr.f32.mxu0 %v22128_v6  ;;  %v12781_v47 = vpack.c.bf16 %v20743_v20, %v20744_v15  ;;  %v22132_v15 = vld [vmem:[#allocation58_spill] sm:$0xff]  ;;  %v22133_v20 = vld [vmem:[#allocation7_spill] sm:$0xff] }
 0x2f3   : > { %12558 = vmatpush3.bf16.msra.mxu1 %v22129_v63 }
 0x2f4   : > { %12778 = vmatpush3.bf16.msra.mxu0 %v12777_v19  ;;  %12560 = vmatprep.subr.bf16.mxu1 %v22130_v48  ;;  %v20753_v19 = vand.u32 4294901760, %v18590_v23 }
 0x2f5   : > { %12780 = vmatprep.subr.bf16.mxu0 %v12779_v24  ;;  %v12785_v24 = vpack.c.bf16 %v20751_v22, %v20752_v4  ;;  %v22136_v22 = vld [vmem:[#allocation10_spill] sm:$0xff]  ;;  %v20764_v4 = vand.u32 4294901760, %v18638_v52  ;;  %v19022_v52 = vld [vmem:[%s20065_s7 + $0x1d0] sm:$0xff] }
 0x2f6   : > { %v12787_v0 = vpack.c.bf16 %v20753_v19, %v20754_v29  ;;  %v22141_v19 = vand.u32 4294901760, %v18633_v27  ;;  %v18814_v27 = vsub.f32 %v6747_v44, %v18796_v36  ;;  %v22149_v44 = vld [vmem:[#allocation28_spill] sm:$0xff]  ;;  %v20780_v36 = vand.u32 4294901760, %v18691_v11  ;;  %22180 = vst [vmem:[#allocation46_spill] sm:$0xff] %v19022_v52 }
 0x2f7   : > { %12562 = vmatpush3.bf16.msra.mxu1 %v22131_v31 }
 0x2f8   : > { %12782 = vmatpush3.bf16.msra.mxu0 %v12781_v47  ;;  %12564 = vmatprep.subr.bf16.mxu1 %v22132_v15  ;;  %v22134_v47 = vand.u32 4294901760, %v18595_v14  ;;  %v12793_v29 = vpack.c.bf16 %v20764_v4, %v22141_v19  ;;  %22145 = vst [vmem:[#allocation41_spill] sm:$0xff] %v18814_v27  ;;  %v10339_v19 = vpop.f32.mrb[28].mxu0  ;;  %v18819_v4 = vld [vmem:[%s20065_s7 + $0x180] sm:$0xff] }
 0x2f9   : > { %12784 = vmatprep.subr.bf16.mxu0 %v12783_v17  ;;  %v22140_v17 = vld [vmem:[#allocation59_spill] sm:$0xff] }
 0x2fa   : > { %v12789_v39 = vpack.c.bf16 %v22135_v7, %v22134_v47  ;;  %v10095_v7 = vpop.f32.mrb[29].mxu1  ;;  %v22139_v47 = vld [vmem:[#allocation21_spill] sm:$0xff] }
 0x2fb   : > { %12566 = vmatpush3.bf16.msra.mxu1 %v22133_v20 }
 0x2fc   : > { %12786 = vmatpush3.bf16.msra.mxu0 %v12785_v24  ;;  %12568 = vmatprep.subr.bf16.mxu1 %v22136_v22  ;;  %v10096_v24 = vadd.f32 %v10095_v7, %v10094_v57  ;;  %v22144_v57 = vld [vmem:[#allocation17_spill] sm:$0xff] }
 0x2fd   : > { %12788 = vmatprep.subr.bf16.mxu0 %v12787_v0  ;;  %v22142_v0 = vand.u32 4294901760, %v18652_v56  ;;  %v22150_v56 = vand.u32 4294901760, %v18678_v40 }
 0x2fe   : > { %v4371_v7 = vadd.f32 %v10096_v24, %v22144_v57  ;;  %v10340_v24 = vpop.f32.mrb[29].mxu0 }
 0x2ff   : > { %12570 = vmatpush3.bf16.msra.mxu1 %v22139_v47  ;;  %v12795_v32 = vpack.c.bf16 %v22143_v50, %v22142_v0  ;;  %v18824_v50 = vld [vmem:[%s20065_s7 + $0x188] sm:$0xff]  ;;  %v22147_v0 = vld [vmem:[#allocation5_spill] sm:$0xff]  ;;  %v18830_v33 = vadd.f32 %v10340_v24, %v10339_v19  ;;  %v18848_v24 = vld [vmem:[%s20065_s7 + $0x100] sm:$0xff] }
 0x300   : > { %12790 = vmatpush3.bf16.msra.mxu0 %v12789_v39  ;;  %12572 = vmatprep.subr.bf16.mxu1 %v22140_v17  ;;  %v18828_v57 = vadd.f32 %v22147_v0, %v4371_v7  ;;  %v12797_v39 = vpack.c.bf16 %v20771_v54, %v20772_v55  ;;  %v22151_v7 = vand.u32 4294901760, %v18683_v21  ;;  %v18853_v54 = vld [vmem:[%s20065_s7 + $0x108] sm:$0xff]  ;;  %v22152_v55 = vld [vmem:[#allocation9_spill] sm:$0xff]  ;;  %v22154_v21 = vand.u32 4294901760, %v18824_v50 }
 0x301   : > { %12792 = vmatprep.subr.bf16.mxu0 %v12791_v2  ;;  %v22146_v2 = vld [vmem:[#allocation23_spill] sm:$0xff]  ;;  %22148 = vst [vmem:[#allocation39_spill] sm:$0xff] %v18830_v33  ;;  %v20783_v19 = vand.u32 4294901760, %v18853_v54  ;;  %v22153_v33 = vand.u32 4294901760, %v18819_v4  ;;  %v22192_v14 = vand.u32 4294901760, %v18853_v54 }
 0x302   : > { %v12799_v0 = vpack.c.bf16 %v22151_v7, %v22150_v56  ;;  %v18859_v56 = vld [vmem:[%s20065_s7 + $0x190] sm:$0xff]  ;;  %v18864_v7 = vld [vmem:[%s20065_s7 + $0x198] sm:$0xff] }
 0x303   : > { %12574 = vmatpush3.bf16.msra.mxu1 %v22146_v2  ;;  %v18878_v40 = vpack.c.bf16 %v22154_v21, %v22153_v33  ;;  %v22157_v33 = vld [vmem:[#allocation22_spill] sm:$0xff]  ;;  %v22160_v11 = vand.u32 4294901760, %v18859_v56 }
 0x304   : > { %12794 = vmatpush3.bf16.msra.mxu0 %v12793_v29  ;;  %12576 = vmatprep.subr.bf16.mxu1 %v22149_v44  ;;  %v20784_v29 = vand.u32 4294901760, %v18848_v24  ;;  %v22158_v21 = vand.u32 4294901760, %v22157_v33  ;;  %v20793_v33 = vand.u32 4294901760, %v18885_v30 }
 0x305   : > { %12796 = vmatprep.subr.bf16.mxu0 %v12795_v32  ;;  %v12801_v32 = vpack.c.bf16 %v20779_v16, %v20780_v36  ;;  %22155 = vst [vmem:[#allocation44_spill] sm:$0xff] %v18878_v40  ;;  %v18890_v16 = vld [vmem:[%s20065_s7 + $0x118] sm:$0xff] }
 0x307   : > { %12578 = vmatpush3.bf16.msra.mxu1 %v22152_v55 }
 0x308   : > { %12798 = vmatpush3.bf16.msra.mxu0 %v12797_v39  ;;  %12612 = vmatprep.subr.bf16.mxu1 %v22120_v9  ;;  %v18900_v9 = vld [vmem:[%s20065_s7 + $0x1a0] sm:$0xff]  ;;  %v18905_v39 = vld [vmem:[%s20065_s7 + $0x1a8] sm:$0xff] }
 0x309   : > { %12800 = vmatprep.subr.bf16.mxu0 %v12799_v0  ;;  %v22156_v0 = vand.u32 4294901760, %v18814_v27 }
 0x30a   : > { %6381 = vmatmul.mubr.f32.vlgmr.msra.gmra.mrb[42].mxu1 %v22158_v21 }
 0x30b   : > { %v7714_v36 = vsub.f32 %v18814_v27, %v22156_v0  ;;  %12614 = vmatpush3.bf16.msra.mxu1 %v22122_v34  ;;  %6651 = vmatprep.mubr.f32.mxu1 %v21933_v3  ;;  %v18914_v0 = vpack.c.bf16 %v20783_v19, %v20784_v29  ;;  %v22161_v34 = vand.u32 4294901760, %v18864_v7  ;;  %v18930_v19 = vld [vmem:[%s20065_s7 + $0x120] sm:$0xff]  ;;  %v18935_v29 = vld [vmem:[%s20065_s7 + $0x128] sm:$0xff]  ;;  %v19027_v27 = vld [vmem:[%s20065_s7 + $0x1d8] sm:$0xff] }
 0x30c   : > { %12802 = vmatpush3.bf16.msra.mxu0 %v12801_v32  ;;  %12616 = vmatprep.subr.bf16.mxu1 %v22125_v13  ;;  %22163 = vst [vmem:[#allocation72_spill] sm:$0xff] %v18935_v29  ;;  %v22166_v32 = vld [vmem:[#allocation74_spill] sm:$0xff]  ;;  %v20796_v49 = vand.u32 4294901760, %v18935_v29  ;;  %22181 = vst [vmem:[#allocation45_spill] sm:$0xff] %v19027_v27 }
 0x30d   : > { %22159 = vst [vmem:[#allocation13_spill] sm:$0xff] %v18914_v0  ;;  %12836 = vmatprep.subr.bf16.mxu0 %v18878_v40  ;;  %v18923_v3 = vpack.c.bf16 %v22161_v34, %v22160_v11  ;;  %v7715_v21 = vand.u32 4294901760, %v7714_v36  ;;  %v18940_v11 = vld [vmem:[%s20065_s7 + $0x1b0] sm:$0xff]  ;;  %v18945_v34 = vld [vmem:[%s20065_s7 + $0x1b8] sm:$0xff]  ;;  %v22167_v36 = vand.u32 4294901760, %v18890_v16  ;;  %v20797_v40 = vand.u32 4294901760, %v18930_v19 }
 0x30e   : > { %22164 = vst [vmem:[#allocation66_spill] sm:$0xff] %v18940_v11  ;;  %22165 = vst [vmem:[#allocation55_spill] sm:$0xff] %v18945_v34 }
 0x30f   : > { %22162 = vst [vmem:[#allocation52_spill] sm:$0xff] %v18923_v3  ;;  %7506 = vmatmul.mubr.f32.vlgmr.msra.gmra.mrb[42].mxu0 %v22166_v32  ;;  %12618 = vmatpush3.bf16.msra.mxu1 %v22126_v5  ;;  %v18955_v13 = vpack.c.bf16 %v22167_v36, %v20793_v33  ;;  %v22169_v32 = vand.u32 4294901760, %v18900_v9  ;;  %v22170_v5 = vand.u32 4294901760, %v18905_v39  ;;  %v18971_v36 = vld [vmem:[%s20065_s7 + $0x130] sm:$0xff]  ;;  %v18976_v33 = vld [vmem:[%s20065_s7 + $0x138] sm:$0xff] }
 0x310   : > { %12838 = vmatpush3.bf16.msra.mxu0 %v18914_v0  ;;  %12620 = vmatprep.subr.bf16.mxu1 %v22127_v42  ;;  %v19045_v42 = vld [vmem:[%s20065_s7 + $0x1e0] sm:$0xff] }
 0x311   : > { %22168 = vst [vmem:[#allocation14_spill] sm:$0xff] %v18955_v13  ;;  %12840 = vmatprep.subr.bf16.mxu0 %v18923_v3  ;;  %v18964_v53 = vpack.c.bf16 %v22170_v5, %v22169_v32  ;;  %7716 = vmatprep.mubr.f32.mxu0 %v7715_v21  ;;  %v18981_v32 = vld [vmem:[%s20065_s7 + $0x1c0] sm:$0xff]  ;;  %v18986_v5 = vld [vmem:[%s20065_s7 + $0x1c8] sm:$0xff]  ;;  %v18995_v21 = vpack.c.bf16 %v20796_v49, %v20797_v40  ;;  %v22177_v49 = vand.u32 4294901760, %v18940_v11  ;;  %v22178_v40 = vand.u32 4294901760, %v18945_v34 }
 0x312   : > { %22172 = vst [vmem:[#allocation60_spill] sm:$0xff] %v18981_v32  ;;  %22173 = vst [vmem:[#allocation16_spill] sm:$0xff] %v18986_v5  ;;  %v19002_v3 = vld [vmem:[%s20065_s7 + $0x140] sm:$0xff]  ;;  %v22186_v11 = vand.u32 4294901760, %v18819_v4 }
 0x313   : > { %22171 = vst [vmem:[#allocation11_spill] sm:$0xff] %v18964_v53  ;;  %12622 = vmatpush3.bf16.msra.mxu1 %v22129_v63  ;;  %22174 = vst [vmem:[#allocation15_spill] sm:$0xff] %v18995_v21  ;;  %v19007_v63 = vld [vmem:[%s20065_s7 + $0x148] sm:$0xff]  ;;  %v19015_v0 = vpack.c.bf16 %v22178_v40, %v22177_v49  ;;  %v22183_v40 = vand.u32 4294901760, %v18971_v36  ;;  %v22184_v49 = vand.u32 4294901760, %v18976_v33 }
 0x314   : > { %12842 = vmatpush3.bf16.msra.mxu0 %v18955_v13  ;;  %12624 = vmatprep.subr.bf16.mxu1 %v22130_v48  ;;  %22175 = vst [vmem:[#allocation67_spill] sm:$0xff] %v19002_v3  ;;  %22176 = vst [vmem:[#allocation19_spill] sm:$0xff] %v19007_v63  ;;  %v6666_v48 = vld [vmem:[%s17979_s24 + $0x10] sm:$0xff]  ;;  %v19040_v13 = vld [vmem:[%s20065_s7 + $0x158] sm:$0xff]  ;;  %v19065_v29 = vsub.f32 %v18819_v4, %v22186_v11  ;;  %v19101_v4 = vsub.f32 %v18853_v54, %v22192_v14  ;;  %v22193_v11 = vand.u32 4294901760, %v19002_v3 }
 0x315   : > { %12844 = vmatprep.subr.bf16.mxu0 %v18964_v53  ;;  %22179 = vst [vmem:[#allocation27_spill] sm:$0xff] %v19015_v0  ;;  %v19032_v53 = vld [vmem:[%s20065_s7 + $0x150] sm:$0xff]  ;;  %v19058_v26 = vpack.c.bf16 %v22184_v49, %v22183_v40  ;;  %v22189_v49 = vand.u32 4294901760, %v18986_v5  ;;  %v22194_v34 = vand.u32 4294901760, %v19007_v63  ;;  %v22201_v63 = vand.u32 4294901760, %v18297_v10 }
 0x316   : > { %v22205_v3 = vand.u32 4294901760, %v18864_v7 }
 0x317   : > { %12626 = vmatpush3.bf16.msra.mxu1 %v22131_v31  ;;  %v6746_v31 = vmul.f32 %v6666_v48, %v6666_v48  ;;  %22185 = vst [vmem:[#allocation68_spill] sm:$0xff] %v19058_v26  ;;  %v22187_v48 = vand.u32 4294901760, %v18824_v50 }
 0x318   : > { %12846 = vmatpush3.bf16.msra.mxu0 %v18995_v21  ;;  %12628 = vmatprep.subr.bf16.mxu1 %v22132_v15  ;;  %v22188_v15 = vand.u32 4294901760, %v18981_v32  ;;  %v22207_v32 = vand.u32 4294901760, %v19040_v13 }
 0x319   : > { %v19070_v21 = vsub.f32 %v18824_v50, %v22187_v48  ;;  %12848 = vmatprep.subr.bf16.mxu0 %v19015_v0  ;;  %v19086_v50 = vld [vmem:[%s20065_s7 + $0x160] sm:$0xff]  ;;  %v19091_v48 = vld [vmem:[%s20065_s7 + $0x168] sm:$0xff]  ;;  %v19108_v0 = vpack.c.bf16 %v22194_v34, %v22193_v11  ;;  %v19110_v5 = vand.u32 4294901760, %v6746_v31  ;;  %v6988_v34 = vsub.f32 %v18297_v10, %v22201_v63  ;;  %v19129_v11 = vld [vmem:[%s20065_s7 + $0x1f0] sm:$0xff] }
 0x31a   : > { %v19077_v40 = vpack.c.bf16 %v22189_v49, %v22188_v15  ;;  %v22191_v15 = vand.u32 4294901760, %v18848_v24  ;;  %v22203_v63 = vand.u32 4294901760, %v18328_v43 }
 0x31b   : > { %12630 = vmatpush3.bf16.msra.mxu1 %v22133_v20  ;;  %22195 = vst [vmem:[#allocation38_spill] sm:$0xff] %v19108_v0  ;;  %22196 = vst [vmem:[#allocation35_spill] sm:$0xff] %v19110_v5  ;;  %v22200_v20 = vand.u32 4294901760, %v18292_v41 }
 0x31c   : > { %22190 = vst [vmem:[#allocation8_spill] sm:$0xff] %v19077_v40  ;;  %v19096_v49 = vsub.f32 %v18848_v24, %v22191_v15  ;;  %12850 = vmatpush3.bf16.msra.mxu0 %v19058_v26  ;;  %12632 = vmatprep.subr.bf16.mxu1 %v22136_v22  ;;  %v22197_v24 = vand.u32 4294901760, %v19022_v52  ;;  %v22198_v15 = vand.u32 4294901760, %v19027_v27  ;;  %v19134_v22 = vld [vmem:[%s20065_s7 + $0x1f8] sm:$0xff]  ;;  %v6876_v26 = vsub.f32 %v18328_v43, %v22203_v63 }
 0x31d   : > { %v6981_v54 = vsub.f32 %v18292_v41, %v22200_v20  ;;  %12852 = vmatprep.subr.bf16.mxu0 %v19077_v40  ;;  %v22202_v20 = vand.u32 4294901760, %v18323_v51  ;;  %v22204_v27 = vand.u32 4294901760, %v18859_v56  ;;  %v19153_v40 = vsub.f32 %v18864_v7, %v22205_v3  ;;  %v19173_v3 = vld [vmem:[%s20065_s7 + $0x170] sm:$0xff] }
 0x31e   : > { %v19118_v14 = vpack.c.bf16 %v22198_v15, %v22197_v24  ;;  %v10164_v24 = vpop.f32.mrb[30].mxu1  ;;  %v22206_v41 = vand.u32 4294901760, %v19032_v53  ;;  %v22210_v43 = vand.u32 4294901760, %v19050_v25 }
 0x31f   : > { %v6869_v10 = vsub.f32 %v18323_v51, %v22202_v20  ;;  %v19148_v52 = vsub.f32 %v18859_v56, %v22204_v27  ;;  %v10165_v15 = vpop.f32.mrb[31].mxu1  ;;  %v22209_v20 = vand.u32 4294901760, %v19045_v42  ;;  %12634 = vmatpush3.bf16.msra.mxu1 %v22139_v47  ;;  %v6982_v47 = vand.u32 4294901760, %v6981_v54 }
 0x320   : > { %22199 = vst [vmem:[#allocation29_spill] sm:$0xff] %v19118_v14  ;;  %v19159_v51 = vpack.c.bf16 %v22207_v32, %v22206_v41  ;;  %v10166_v27 = vadd.f32 %v10165_v15, %v10164_v24  ;;  %v19178_v32 = vld [vmem:[%s20065_s7 + $0x178] sm:$0xff]  ;;  %v19181_v41 = vsub.f32 %v6746_v31, %v19110_v5  ;;  %12854 = vmatpush3.bf16.msra.mxu0 %v19108_v0  ;;  %v6989_v24 = vand.u32 4294901760, %v6988_v34  ;;  %v10409_v34 = vpop.f32.mrb[30].mxu0 }
 0x321   : > { %v19165_v63 = vpack.c.bf16 %v22210_v43, %v22209_v20  ;;  %12636 = vmatprep.subr.bf16.mxu1 %v22140_v17  ;;  %v22213_v15 = vand.u32 4294901760, %v18375_v12  ;;  %v22214_v43 = vand.u32 4294901760, %v18380_v8  ;;  %12856 = vmatprep.subr.bf16.mxu0 %v19118_v14  ;;  %v22215_v31 = vand.u32 4294901760, %v19086_v50  ;;  %v22325_v14 = vld [vmem:[#allocation40_spill] sm:$0xff] }
 0x322   : > { %22208 = vst [vmem:[#allocation58_spill] sm:$0xff] %v19159_v51  ;;  %22212 = vst [vmem:[#allocation10_spill] sm:$0xff] %v19181_v41  ;;  %v4617_v56 = vadd.f32 %v10166_v27, %v18828_v57  ;;  %v22216_v0 = vand.u32 4294901760, %v19091_v48  ;;  %v6870_v17 = vand.u32 4294901760, %v6869_v10  ;;  %v6877_v54 = vand.u32 4294901760, %v6876_v26 }
 0x323   : > { %22211 = vst [vmem:[#allocation7_spill] sm:$0xff] %v19165_v63  ;;  %v6995_v20 = vsub.f32 %v18375_v12, %v22213_v15  ;;  %v7002_v7 = vsub.f32 %v18380_v8, %v22214_v43  ;;  %v22218_v15 = vand.u32 4294901760, %v18452_v37  ;;  %v22219_v57 = vand.u32 4294901760, %v18457_v45  ;;  %v10410_v43 = vpop.f32.mrb[31].mxu0  ;;  %12638 = vmatpush3.bf16.msra.mxu1 %v22146_v2 }
 0x324   : > { %v19197_v5 = vpack.c.bf16 %v22216_v0, %v22215_v31  ;;  %v20844_v0 = vand.u32 4294901760, %v19181_v41  ;;  %v22220_v26 = vand.u32 4294901760, %v18492_v1  ;;  %v22221_v31 = vand.u32 4294901760, %v18497_v35  ;;  %12858 = vmatpush3.bf16.msra.mxu0 %v19159_v51  ;;  %12640 = vmatprep.subr.bf16.mxu1 %v22149_v44 }
 0x325   : > { %v6883_v8 = vsub.f32 %v18452_v37, %v22218_v15  ;;  %v6890_v27 = vsub.f32 %v18457_v45, %v22219_v57  ;;  %v19216_v25 = vadd.f32 %v18445_v58, %v4617_v56  ;;  %v19218_v37 = vadd.f32 %v10410_v43, %v10409_v34  ;;  %12860 = vmatprep.subr.bf16.mxu0 %v19165_v63 }
 0x326   : > { %22217 = vst [vmem:[#allocation21_spill] sm:$0xff] %v19197_v5  ;;  %v7009_v10 = vsub.f32 %v18492_v1, %v22220_v26  ;;  %v7016_v12 = vsub.f32 %v18497_v35, %v22221_v31  ;;  %v12675_v45 = vpack.c.bf16 %v6989_v24, %v6982_v47  ;;  %v6996_v2 = vand.u32 4294901760, %v6995_v20 }
 0x327   : > { %v7003_v15 = vand.u32 4294901760, %v7002_v7  ;;  %v22222_v57 = vand.u32 4294901760, %v18885_v30  ;;  %v22223_v26 = vand.u32 4294901760, %v18890_v16  ;;  %v22224_v58 = vand.u32 4294901760, %v19129_v11  ;;  %12642 = vmatpush3.bf16.msra.mxu1 %v22152_v55 }
 0x328   : > { %v22225_v56 = vand.u32 4294901760, %v19134_v22  ;;  %v12677_v47 = vpack.c.bf16 %v6877_v54, %v6870_v17  ;;  %v22227_v7 = vand.u32 4294901760, %v19173_v3  ;;  %v22228_v24 = vand.u32 4294901760, %v19178_v32  ;;  %12862 = vmatpush3.bf16.msra.mxu0 %v19197_v5  ;;  %12676 = vmatprep.subr.bf16.mxu1 %v12675_v45 }
 0x329   : > { %v19225_v1 = vsub.f32 %v18885_v30, %v22222_v57  ;;  %v19230_v35 = vsub.f32 %v18890_v16, %v22223_v26  ;;  %v6884_v20 = vand.u32 4294901760, %v6883_v8  ;;  %v22230_v34 = vand.u32 4294901760, %v18502_v28 }
 0x32a   : > { %v19237_v44 = vpack.c.bf16 %v22225_v56, %v22224_v58  ;;  %v19243_v30 = vpack.c.bf16 %v22228_v24, %v22227_v7  ;;  %v22231_v43 = vand.u32 4294901760, %v18527_v59  ;;  %v7720_v17 = vsub.f32 %v19181_v41, %v20844_v0  ;;  %6653 = vmatmul.mubr.f32.vlgmr.msra.gmra.mrb[44].mxu1 %v22121_v18 }
 0x32b   : > { %v6897_v16 = vsub.f32 %v18502_v28, %v22230_v34  ;;  %v6891_v54 = vand.u32 4294901760, %v6890_v27  ;;  %v7010_v57 = vand.u32 4294901760, %v7009_v10  ;;  %v7017_v26 = vand.u32 4294901760, %v7016_v12  ;;  %12678 = vmatpush3.bf16.msra.mxu1 %v12677_v47  ;;  %7090 = vmatprep.mubr.f32.mxu1 %v22128_v6 }
 0x32c   : > { %22226 = vst [vmem:[#allocation59_spill] sm:$0xff] %v19237_v44  ;;  %22229 = vst [vmem:[#allocation17_spill] sm:$0xff] %v19243_v30  ;;  %v6904_v31 = vsub.f32 %v18527_v59, %v22231_v43  ;;  %v12679_v8 = vpack.c.bf16 %v7003_v15, %v6996_v2  ;;  %v22232_v58 = vand.u32 4294901760, %v18532_v61  ;;  %v22233_v56 = vand.u32 4294901760, %v18537_v38  ;;  %12864 = vmatprep.subr.bf16.mxu0 %v19237_v44  ;;  %v22278_v44 = vld [vmem:[#allocation25_spill] sm:$0xff] }
 0x32d   : > { %v22234_v55 = vand.u32 4294901760, %v18900_v9  ;;  %v22235_v27 = vand.u32 4294901760, %v18905_v39  ;;  %v22236_v10 = vand.u32 4294901760, %v18930_v19  ;;  %v22237_v2 = vand.u32 4294901760, %v18558_v60  ;;  %12866 = vmatpush3.bf16.msra.mxu0 %v19243_v30 }
 0x32e   : > { %v7023_v28 = vsub.f32 %v18532_v61, %v22232_v58  ;;  %v7030_v59 = vsub.f32 %v18537_v38, %v22233_v56  ;;  %v12899_v61 = vpack.c.bf16 %v19070_v21, %v19065_v29  ;;  %v6898_v38 = vand.u32 4294901760, %v6897_v16  ;;  %12680 = vmatprep.subr.bf16.mxu1 %v12679_v8  ;;  %v22245_v8 = vld [vmem:[#allocation55_spill] sm:$0xff] }
 0x32f   : > { %v19265_v7 = vsub.f32 %v18900_v9, %v22234_v55  ;;  %v19270_v12 = vsub.f32 %v18905_v39, %v22235_v27  ;;  %v19275_v45 = vsub.f32 %v18930_v19, %v22236_v10  ;;  %v6905_v9 = vand.u32 4294901760, %v6904_v31  ;;  %v22247_v10 = vld [vmem:[#allocation54_spill] sm:$0xff] }
 0x330   : > { %v6911_v15 = vsub.f32 %v18558_v60, %v22237_v2  ;;  %v22238_v39 = vand.u32 4294901760, %v18563_v62  ;;  %v7721_v19 = vand.u32 4294901760, %v7720_v17  ;;  %v12681_v34 = vpack.c.bf16 %v6891_v54, %v6884_v20  ;;  %v22241_v20 = vld [vmem:[#allocation72_spill] sm:$0xff]  ;;  %12900 = vmatprep.subr.bf16.mxu0 %v12899_v61 }
 0x331   : > { %v12901_v43 = vpack.c.bf16 %v19101_v4, %v19096_v49  ;;  %v12683_v58 = vpack.c.bf16 %v7017_v26, %v7010_v57  ;;  %v7024_v18 = vand.u32 4294901760, %v7023_v28  ;;  %v7031_v16 = vand.u32 4294901760, %v7030_v59  ;;  %v22243_v57 = vld [vmem:[#allocation66_spill] sm:$0xff] }
 0x332   : > { %v6918_v24 = vsub.f32 %v18563_v62, %v22238_v39  ;;  %v22239_v60 = vand.u32 4294901760, %v18585_v46  ;;  %v22240_v62 = vand.u32 4294901760, %v18590_v23  ;;  %v22242_v17 = vand.u32 4294901760, %v22241_v20  ;;  %7722 = vmatmul.mubr.f32.vlgmr.msra.gmra.mrb[44].mxu0 %v7721_v19  ;;  %12682 = vmatpush3.bf16.msra.mxu1 %v12681_v34 }
 0x333   : > { %v22244_v26 = vand.u32 4294901760, %v22243_v57  ;;  %v22246_v28 = vand.u32 4294901760, %v22245_v8  ;;  %v6912_v55 = vand.u32 4294901760, %v6911_v15  ;;  %v22248_v2 = vand.u32 4294901760, %v22247_v10  ;;  %12902 = vmatpush3.bf16.msra.mxu0 %v12901_v43  ;;  %12684 = vmatprep.subr.bf16.mxu1 %v12683_v58  ;;  %v22257_v58 = vld [vmem:[#allocation41_spill] sm:$0xff] }
 0x334   : > { %v7037_v31 = vsub.f32 %v18585_v46, %v22239_v60  ;;  %v7044_v47 = vsub.f32 %v18590_v23, %v22240_v62  ;;  %v19300_v54 = vsub.f32 %v22241_v20, %v22242_v17  ;;  %v12903_v46 = vpack.c.bf16 %v19153_v40, %v19148_v52  ;;  %v22249_v60 = vld [vmem:[#allocation48_spill] sm:$0xff]  ;;  %v22251_v17 = vld [vmem:[#allocation70_spill] sm:$0xff]  ;;  %8089 = vmatprep.mubr.f32.mxu0 %v22257_v58 }
 0x335   : > { %v19305_v56 = vsub.f32 %v22243_v57, %v22244_v26  ;;  %v19310_v59 = vsub.f32 %v22245_v8, %v22246_v28  ;;  %v12685_v23 = vpack.c.bf16 %v6905_v9, %v6898_v38  ;;  %v6919_v27 = vand.u32 4294901760, %v6918_v24  ;;  %v22253_v26 = vld [vmem:[#allocation51_spill] sm:$0xff] }
 0x336   : > { %v6925_v39 = vsub.f32 %v22247_v10, %v22248_v2  ;;  %v22250_v62 = vand.u32 4294901760, %v22249_v60  ;;  %v22252_v57 = vand.u32 4294901760, %v22251_v17  ;;  %v22254_v8 = vand.u32 4294901760, %v22253_v26  ;;  %12904 = vmatprep.subr.bf16.mxu0 %v12903_v46 }
 0x337   : > { %v12905_v9 = vpack.c.bf16 %v19230_v35, %v19225_v1  ;;  %v12687_v15 = vpack.c.bf16 %v7031_v16, %v7024_v18  ;;  %v7038_v24 = vand.u32 4294901760, %v7037_v31  ;;  %v7045_v19 = vand.u32 4294901760, %v7044_v47  ;;  %v22258_v16 = vld [vmem:[#allocation69_spill] sm:$0xff]  ;;  %v22260_v47 = vld [vmem:[#allocation34_spill] sm:$0xff]  ;;  %12686 = vmatpush3.bf16.msra.mxu1 %v12685_v23  ;;  %v22268_v23 = vld [vmem:[#allocation16_spill] sm:$0xff] }
 0x338   : > { %v6932_v20 = vsub.f32 %v22249_v60, %v22250_v62  ;;  %v7051_v61 = vsub.f32 %v22251_v17, %v22252_v57  ;;  %v7058_v38 = vsub.f32 %v22253_v26, %v22254_v8  ;;  %v22255_v34 = vand.u32 4294901760, %v18971_v36 }
 0x339   : > { %v22256_v10 = vand.u32 4294901760, %v18976_v33  ;;  %v12907_v43 = vpack.c.bf16 %v19270_v12, %v19265_v7  ;;  %v12689_v60 = vpack.c.bf16 %v6919_v27, %v6912_v55  ;;  %v12909_v18 = vpack.c.bf16 %v19300_v54, %v19275_v45  ;;  %12906 = vmatpush3.bf16.msra.mxu0 %v12905_v9  ;;  %12688 = vmatprep.subr.bf16.mxu1 %v12687_v15  ;;  %v22262_v55 = vld [vmem:[#allocation36_spill] sm:$0xff] }
 0x33a   : > { %v19331_v28 = vsub.f32 %v18971_v36, %v22255_v34  ;;  %v22259_v31 = vand.u32 4294901760, %v22258_v16  ;;  %v22261_v62 = vand.u32 4294901760, %v22260_v47  ;;  %v6933_v46 = vand.u32 4294901760, %v6932_v20 }
 0x33b   : > { %v19336_v2 = vsub.f32 %v18976_v33, %v22256_v10  ;;  %v6926_v33 = vand.u32 4294901760, %v6925_v39  ;;  %v7052_v57 = vand.u32 4294901760, %v7051_v61  ;;  %v7059_v26 = vand.u32 4294901760, %v7058_v38  ;;  %v22264_v10 = vld [vmem:[#allocation37_spill] sm:$0xff]  ;;  %v22270_v61 = vld [vmem:[#allocation67_spill] sm:$0xff]  ;;  %12908 = vmatprep.subr.bf16.mxu0 %v12907_v43  ;;  %12690 = vmatpush3.bf16.msra.mxu1 %v12689_v60 }
 0x33c   : > { %v6939_v36 = vsub.f32 %v22258_v16, %v22259_v31  ;;  %v6946_v17 = vsub.f32 %v22260_v47, %v22261_v62  ;;  %v12691_v8 = vpack.c.bf16 %v7045_v19, %v7038_v24  ;;  %v22263_v27 = vand.u32 4294901760, %v22262_v55  ;;  %v22266_v31 = vld [vmem:[#allocation60_spill] sm:$0xff] }
 0x33d   : > { %v22265_v0 = vand.u32 4294901760, %v22264_v10  ;;  %v22267_v30 = vand.u32 4294901760, %v22266_v31  ;;  %v22269_v39 = vand.u32 4294901760, %v22268_v23  ;;  %v22271_v38 = vand.u32 4294901760, %v22270_v61  ;;  %12910 = vmatpush3.bf16.msra.mxu0 %v12909_v18 }
 0x33e   : > { %v7065_v34 = vsub.f32 %v22262_v55, %v22263_v27  ;;  %v12911_v15 = vpack.c.bf16 %v19310_v59, %v19305_v56  ;;  %v6940_v62 = vand.u32 4294901760, %v6939_v36  ;;  %v6947_v55 = vand.u32 4294901760, %v6946_v17  ;;  %12692 = vmatprep.subr.bf16.mxu1 %v12691_v8  ;;  %v22280_v17 = vld [vmem:[#allocation32_spill] sm:$0xff] }
 0x33f   : > { %v7072_v16 = vsub.f32 %v22264_v10, %v22265_v0  ;;  %v19358_v47 = vsub.f32 %v22266_v31, %v22267_v30  ;;  %v19363_v20 = vsub.f32 %v22268_v23, %v22269_v39  ;;  %v19368_v9 = vsub.f32 %v22270_v61, %v22271_v38  ;;  %v22272_v0 = vld [vmem:[#allocation19_spill] sm:$0xff]  ;;  %v22274_v31 = vld [vmem:[#allocation20_spill] sm:$0xff] }
 0x340   : > { %v22273_v24 = vand.u32 4294901760, %v22272_v0  ;;  %v12913_v30 = vpack.c.bf16 %v19336_v2, %v19331_v28  ;;  %v12693_v27 = vpack.c.bf16 %v6933_v46, %v6926_v33  ;;  %v12695_v10 = vpack.c.bf16 %v7059_v26, %v7052_v57  ;;  %v22276_v39 = vld [vmem:[#allocation12_spill] sm:$0xff]  ;;  %v22282_v46 = vld [vmem:[#allocation46_spill] sm:$0xff]  ;;  %12912 = vmatprep.subr.bf16.mxu0 %v12911_v15 }
 0x341   : > { %v22275_v23 = vand.u32 4294901760, %v22274_v31  ;;  %v22277_v61 = vand.u32 4294901760, %v22276_v39  ;;  %v22279_v5 = vand.u32 4294901760, %v22278_v44  ;;  %v22281_v60 = vand.u32 4294901760, %v22280_v17 }
 0x342   : > { %v19375_v19 = vsub.f32 %v22272_v0, %v22273_v24  ;;  %v7066_v0 = vand.u32 4294901760, %v7065_v34  ;;  %v7073_v24 = vand.u32 4294901760, %v7072_v16  ;;  %v22283_v57 = vand.u32 4294901760, %v22282_v46  ;;  %12694 = vmatpush3.bf16.msra.mxu1 %v12693_v27  ;;  %12914 = vmatpush3.bf16.msra.mxu0 %v12913_v30  ;;  %v22294_v27 = vld [vmem:[#allocation31_spill] sm:$0xff] }
 0x343   : > { %v6953_v43 = vsub.f32 %v22274_v31, %v22275_v23  ;;  %v6960_v38 = vsub.f32 %v22276_v39, %v22277_v61  ;;  %v7079_v36 = vsub.f32 %v22278_v44, %v22279_v5  ;;  %v7086_v33 = vsub.f32 %v22280_v17, %v22281_v60  ;;  %v22284_v31 = vld [vmem:[#allocation45_spill] sm:$0xff]  ;;  %v22289_v60 = vld [vmem:[#allocation24_spill] sm:$0xff]  ;;  %12696 = vmatprep.subr.bf16.mxu1 %v12695_v10 }
 0x344   : > { %v19394_v26 = vsub.f32 %v22282_v46, %v22283_v57  ;;  %v22285_v23 = vand.u32 4294901760, %v22284_v31  ;;  %v12915_v8 = vpack.c.bf16 %v19363_v20, %v19358_v47  ;;  %v22286_v5 = vand.u32 4294901760, %v19032_v53  ;;  %v22291_v57 = vld [vmem:[#allocation47_spill] sm:$0xff] }
 0x345   : > { %v22287_v34 = vand.u32 4294901760, %v19040_v13  ;;  %v12697_v39 = vpack.c.bf16 %v6947_v55, %v6940_v62  ;;  %v6954_v61 = vand.u32 4294901760, %v6953_v43  ;;  %v6961_v17 = vand.u32 4294901760, %v6960_v38 }
 0x346   : > { %v19399_v18 = vsub.f32 %v22284_v31, %v22285_v23  ;;  %v19406_v44 = vsub.f32 %v19032_v53, %v22286_v5  ;;  %v22290_v46 = vand.u32 4294901760, %v22289_v60  ;;  %v22292_v31 = vand.u32 4294901760, %v22291_v57  ;;  %12916 = vmatprep.subr.bf16.mxu0 %v12915_v8 }
 0x347   : > { %v19411_v16 = vsub.f32 %v19040_v13, %v22287_v34  ;;  %v12917_v53 = vpack.c.bf16 %v19375_v19, %v19368_v9  ;;  %v12699_v5 = vpack.c.bf16 %v7073_v24, %v7066_v0  ;;  %v7080_v13 = vand.u32 4294901760, %v7079_v36  ;;  %12698 = vmatpush3.bf16.msra.mxu1 %v12697_v39 }
 0x348   : > { %v6967_v15 = vsub.f32 %v22289_v60, %v22290_v46  ;;  %v6974_v23 = vsub.f32 %v22291_v57, %v22292_v31  ;;  %v7087_v34 = vand.u32 4294901760, %v7086_v33  ;;  %v22293_v62 = vand.u32 4294901760, %v19045_v42  ;;  %v10234_v60 = vpop.f32.mrb[32].mxu1 }
 0x349   : > { %22288 = vst [vmem:[#allocation23_spill] sm:$0xff] %v19411_v16  ;;  %v22295_v43 = vand.u32 4294901760, %v22294_v27  ;;  %v12919_v30 = vpack.c.bf16 %v19399_v18, %v19394_v26  ;;  %v22296_v10 = vand.u32 4294901760, %v19086_v50  ;;  %v10235_v24 = vpop.f32.mrb[33].mxu1  ;;  %v22298_v57 = vand.u32 4294901760, %v19091_v48  ;;  %12918 = vmatpush3.bf16.msra.mxu0 %v12917_v53  ;;  %12700 = vmatprep.subr.bf16.mxu1 %v12699_v5 }
 0x34a   : > { %v19424_v55 = vsub.f32 %v19045_v42, %v22293_v62  ;;  %v10236_v36 = vadd.f32 %v10235_v24, %v10234_v60  ;;  %v12701_v42 = vpack.c.bf16 %v6961_v17, %v6954_v61  ;;  %v6968_v33 = vand.u32 4294901760, %v6967_v15  ;;  %v10479_v15 = vpop.f32.mrb[32].mxu0  ;;  %v22310_v24 = vld [vmem:[#allocation6_spill] sm:$0xff] }
 0x34b   : > { %v19429_v38 = vsub.f32 %v22294_v27, %v22295_v43  ;;  %v19436_v0 = vsub.f32 %v19086_v50, %v22296_v10  ;;  %v6975_v46 = vand.u32 4294901760, %v6974_v23  ;;  %v19441_v31 = vsub.f32 %v19091_v48, %v22298_v57  ;;  %12920 = vmatprep.subr.bf16.mxu0 %v12919_v30  ;;  %v10480_v5 = vpop.f32.mrb[33].mxu0 }
 0x34c   : > { %v12921_v8 = vpack.c.bf16 %v19411_v16, %v19406_v44  ;;  %v12703_v62 = vpack.c.bf16 %v7087_v34, %v7080_v13  ;;  %v22300_v50 = vand.u32 4294901760, %v19129_v11  ;;  %v22302_v39 = vand.u32 4294901760, %v19134_v22  ;;  %12702 = vmatpush3.bf16.msra.mxu1 %v12701_v42  ;;  %v22306_v13 = vld [vmem:[#allocation49_spill] sm:$0xff] }
 0x34d   : > { %22297 = vst [vmem:[#allocation5_spill] sm:$0xff] %v19436_v0  ;;  %22299 = vst [vmem:[#allocation28_spill] sm:$0xff] %v19441_v31  ;;  %v4889_v17 = vadd.f32 %v10236_v36, %v19216_v25  ;;  %v12923_v48 = vpack.c.bf16 %v19429_v38, %v19424_v55  ;;  %v22304_v23 = vand.u32 4294901760, %v19173_v3  ;;  %v19471_v43 = vadd.f32 %v10480_v5, %v10479_v15 }
 0x34e   : > { %v19448_v27 = vsub.f32 %v19129_v11, %v22300_v50  ;;  %v19453_v61 = vsub.f32 %v19134_v22, %v22302_v39  ;;  %v12705_v11 = vpack.c.bf16 %v6975_v46, %v6968_v33  ;;  %v22307_v22 = vand.u32 4294901760, %v19178_v32  ;;  %12922 = vmatpush3.bf16.msra.mxu0 %v12921_v8  ;;  %12704 = vmatprep.subr.bf16.mxu1 %v12703_v62  ;;  %v22311_v8 = vld [vmem:[#allocation74_spill] sm:$0xff]  ;;  %v22312_v62 = vld [vmem:[#allocation57_spill] sm:$0xff] }
 0x34f   : > { %v19461_v53 = vsub.f32 %v19173_v3, %v22304_v23  ;;  %v19464_v34 = vadd.f32 %v22306_v13, %v4889_v17  ;;  %22309 = vst [vmem:[#allocation55_spill] sm:$0xff] %v19471_v43  ;;  %v12925_v60 = vpack.c.bf16 %v19441_v31, %v19436_v0  ;;  %12924 = vmatprep.subr.bf16.mxu0 %v12923_v48  ;;  %v20864_v30 = vand.u32 4294901760, %v19065_v29  ;;  %v22313_v50 = vld [vmem:[#allocation50_spill] sm:$0xff]  ;;  %v22315_v17 = vld [vmem:[#allocation33_spill] sm:$0xff] }
 0x350   : > { %22301 = vst [vmem:[#allocation9_spill] sm:$0xff] %v19448_v27  ;;  %22303 = vst [vmem:[#allocation22_spill] sm:$0xff] %v19453_v61  ;;  %v19469_v25 = vsub.f32 %v19178_v32, %v22307_v22  ;;  %v12927_v3 = vpack.c.bf16 %v19453_v61, %v19448_v27  ;;  %v20859_v10 = vand.u32 4294901760, %v19070_v21  ;;  %12706 = vmatpush3.bf16.msra.mxu1 %v12705_v11  ;;  %v20858_v36 = vand.u32 4294901760, %v19096_v49  ;;  %v22316_v22 = vld [vmem:[#allocation18_spill] sm:$0xff] }
 0x351   : > { %22305 = vst [vmem:[#allocation72_spill] sm:$0xff] %v19461_v53  ;;  %12740 = vmatprep.subr.bf16.mxu1 %v22310_v24  ;;  %v20857_v42 = vand.u32 4294901760, %v19101_v4  ;;  %v20852_v46 = vand.u32 4294901760, %v19148_v52  ;;  %v20851_v57 = vand.u32 4294901760, %v19153_v40  ;;  %v22314_v39 = vand.u32 4294901760, %v22313_v50 }
 0x352   : > { %22308 = vst [vmem:[#allocation66_spill] sm:$0xff] %v19469_v25  ;;  %12926 = vmatpush3.bf16.msra.mxu0 %v12925_v60  ;;  %v12929_v32 = vpack.c.bf16 %v19469_v25, %v19461_v53  ;;  %v12963_v33 = vpack.c.bf16 %v20859_v10, %v20864_v30  ;;  %v20854_v15 = vand.u32 4294901760, %v19225_v1  ;;  %v20853_v23 = vand.u32 4294901760, %v19230_v35  ;;  %v22317_v60 = vld [vmem:[#allocation71_spill] sm:$0xff]  ;;  %v22323_v30 = vld [vmem:[#allocation30_spill] sm:$0xff] }
 0x353   : > { %12928 = vmatprep.subr.bf16.mxu0 %v12927_v3  ;;  %7092 = vmatmul.mubr.f32.vlgmr.msra.gmra.mrb[46].mxu1 %v22311_v8  ;;  %v12965_v48 = vpack.c.bf16 %v20857_v42, %v20858_v36  ;;  %v12967_v5 = vpack.c.bf16 %v20851_v57, %v20852_v46  ;;  %v20856_v11 = vand.u32 4294901760, %v19265_v7  ;;  %v20855_v13 = vand.u32 4294901760, %v19270_v12  ;;  %v22318_v57 = vld [vmem:[#allocation63_spill] sm:$0xff]  ;;  %v22319_v46 = vld [vmem:[#allocation42_spill] sm:$0xff] }
 0x354   : > { %12742 = vmatpush3.bf16.msra.mxu1 %v22312_v62  ;;  %7334 = vmatprep.mubr.f32.mxu1 %v22314_v39  ;;  %v12969_v3 = vpack.c.bf16 %v20853_v23, %v20854_v15  ;;  %v20863_v39 = vand.u32 4294901760, %v19305_v56  ;;  %v22320_v23 = vld [vmem:[#allocation62_spill] sm:$0xff]  ;;  %v20867_v15 = vand.u32 4294901760, %v19331_v28  ;;  %v20869_v42 = vand.u32 4294901760, %v19358_v47  ;;  %v22322_v10 = vld [vmem:[#allocation43_spill] sm:$0xff]  ;;  %v10304_v43 = vpop.f32.mrb[34].mxu1 }
 0x355   : > { %12744 = vmatprep.subr.bf16.mxu1 %v22315_v17  ;;  %v12971_v50 = vpack.c.bf16 %v20855_v13, %v20856_v11  ;;  %v20866_v13 = vand.u32 4294901760, %v19336_v2  ;;  %v22321_v36 = vld [vmem:[#allocation26_spill] sm:$0xff]  ;;  %v10305_v63 = vpop.f32.mrb[35].mxu1 }
 0x356   : > { %12930 = vmatpush3.bf16.msra.mxu0 %v12929_v32  ;;  %v20861_v32 = vand.u32 4294901760, %v19275_v45  ;;  %v10306_v51 = vadd.f32 %v10305_v63, %v10304_v43  ;;  %v20886_v43 = vand.u32 4294901760, %v19448_v27  ;;  %v22342_v27 = vmov 0.0|0.0  }
 0x357   : > { %12964 = vmatprep.subr.bf16.mxu0 %v12963_v33  ;;  %v20860_v33 = vand.u32 4294901760, %v19300_v54 }
 0x358   : > { %12746 = vmatpush3.bf16.msra.mxu1 %v22316_v22 }
 0x359   : > { %8092 = vmatmul.mubr.f32.vlgmr.msra.gmra.mrb[46].mxu0 %v19181_v41  ;;  %12748 = vmatprep.subr.bf16.mxu1 %v22317_v60  ;;  %v22324_v41 = vld [vmem:[#allocation73_spill] sm:$0xff]  ;;  %v10549_v58 = vpop.f32.mrb[34].mxu0 }
 0x35a   : > { %12966 = vmatpush3.bf16.msra.mxu0 %v12965_v48  ;;  %v20862_v48 = vand.u32 4294901760, %v19310_v59  ;;  %8366 = vmatprep.mubr.f32.mxu0 %v22318_v57 }
 0x35b   : > { %12968 = vmatprep.subr.bf16.mxu0 %v12967_v5  ;;  %v12973_v5 = vpack.c.bf16 %v20860_v33, %v20861_v32  ;;  %v12977_v33 = vpack.c.bf16 %v20866_v13, %v20867_v15  ;;  %v20876_v32 = vand.u32 4294901760, %v19375_v19  ;;  %v20882_v15 = vand.u32 4294901760, %v19411_v16  ;;  %v10550_v16 = vpop.f32.mrb[35].mxu0 }
 0x35c   : > { %12750 = vmatpush3.bf16.msra.mxu1 %v22319_v46  ;;  %v12975_v11 = vpack.c.bf16 %v20862_v48, %v20863_v39  ;;  %v20879_v39 = vand.u32 4294901760, %v19394_v26 }
 0x35d   : > { %12752 = vmatprep.subr.bf16.mxu1 %v22320_v23 }
 0x35e   : > { %12970 = vmatpush3.bf16.msra.mxu0 %v12969_v3  ;;  %v20868_v3 = vand.u32 4294901760, %v19363_v20 }
 0x35f   : > { %12972 = vmatprep.subr.bf16.mxu0 %v12971_v50  ;;  %v20877_v50 = vand.u32 4294901760, %v19368_v9 }
 0x360   : > { %12754 = vmatpush3.bf16.msra.mxu1 %v22321_v36  ;;  %v12979_v48 = vpack.c.bf16 %v20868_v3, %v20869_v42  ;;  %v20884_v42 = vand.u32 4294901760, %v19429_v38 }
 0x361   : > { %12756 = vmatprep.subr.bf16.mxu1 %v22322_v10  ;;  %v12981_v13 = vpack.c.bf16 %v20876_v32, %v20877_v50  ;;  %v22326_v32 = vld [vmem:[#allocation61_spill] sm:$0xff] }
 0x362   : > { %12974 = vmatpush3.bf16.msra.mxu0 %v12973_v5  ;;  %v20878_v5 = vand.u32 4294901760, %v19399_v18 }
 0x363   : > { %12976 = vmatprep.subr.bf16.mxu0 %v12975_v11  ;;  %v20883_v11 = vand.u32 4294901760, %v19406_v44 }
 0x364   : > { %12758 = vmatpush3.bf16.msra.mxu1 %v22323_v30  ;;  %v12983_v3 = vpack.c.bf16 %v20878_v5, %v20879_v39  ;;  %v5233_v39 = vadd.f32 %v10306_v51, %v19464_v34  ;;  %v19584_v5 = vadd.f32 %v10550_v16, %v10549_v58  ;;  %v22330_v51 = vld [vmem:[#allocation65_spill] sm:$0xff]  ;;  %v22331_v34 = vand.u32 4294901760, %v19436_v0  ;;  %v6733_v58 = vld [vmem:[%s20065_s7 + $0x200] sm:$0xff]  ;;  %v6734_v16 = vld [vmem:[%s20065_s7 + $0x208] sm:$0xff] }
 0x365   : > { %12760 = vmatprep.subr.bf16.mxu1 %v22324_v41 }
 0x366   : > { %12978 = vmatpush3.bf16.msra.mxu0 %v12977_v33  ;;  %v20885_v33 = vand.u32 4294901760, %v19424_v55  ;;  %22329 = vst [vmem:[#allocation54_spill] sm:$0xff] %v19584_v5  ;;  %v6735_v5 = vld [vmem:[%s20065_s7 + $0x210] sm:$0xff] }
 0x367   : > { %12980 = vmatprep.subr.bf16.mxu0 %v12979_v48  ;;  %v12985_v48 = vpack.c.bf16 %v20882_v15, %v20883_v11  ;;  %v22327_v15 = vld [vmem:[#allocation64_spill] sm:$0xff]  ;;  %v22328_v11 = vld [vmem:[#allocation39_spill] sm:$0xff] }
 0x368   : > { %12762 = vmatpush3.bf16.msra.mxu1 %v22325_v14  ;;  %v12987_v63 = vpack.c.bf16 %v20884_v42, %v20885_v33  ;;  %v19582_v50 = vadd.f32 %v22328_v11, %v5233_v39  ;;  %v20890_v33 = vand.u32 4294901760, %v19461_v53  ;;  %v22333_v39 = vand.u32 4294901760, %v19453_v61  ;;  %v6736_v61 = vld [vmem:[%s20065_s7 + $0x218] sm:$0xff] }
 0x369   : > { %12764 = vmatprep.subr.bf16.mxu1 %v22326_v32 }
 0x36a   : > { %12982 = vmatpush3.bf16.msra.mxu0 %v12981_v13  ;;  %v20889_v13 = vand.u32 4294901760, %v19469_v25  ;;  %v12991_v11 = vpack.c.bf16 %v22333_v39, %v20886_v43  ;;  %v8481_v39 = vand.u32 4294901760, %v6734_v16  ;;  %v20893_v25 = vmov 0.0|0.0  }
 0x36b   : > { %12984 = vmatprep.subr.bf16.mxu0 %v12983_v3  ;;  %v22332_v3 = vand.u32 4294901760, %v19441_v31 }
 0x36c   : > { %12766 = vmatpush3.bf16.msra.mxu1 %v22327_v15 }
 0x36d   : > { %12768 = vmatprep.subr.bf16.mxu1 %v22330_v51  ;;  %v12989_v42 = vpack.c.bf16 %v22332_v3, %v22331_v34  ;;  %v22334_v34 = vld [vmem:[#allocation53_spill] sm:$0xff]  ;;  %v8478_v3 = vand.u32 4294901760, %v6733_v58 }
 0x36e   : > { %12986 = vmatpush3.bf16.msra.mxu0 %v12985_v48  ;;  %v6668_v48 = vld [vmem:[%s17979_s24 + $0x20] sm:$0xff]  ;;  %s20013_s24 = scalar_lea.hbm %s20066_s8, %s9181_s13 }
 0x36f   : > { %12988 = vmatprep.subr.bf16.mxu0 %v12987_v63  ;;  %v12993_v63 = vpack.c.bf16 %v20889_v13, %v20890_v33  ;;  %v6748_v43 = vmul.f32 %v6668_v48, %v6668_v48  ;;  %v8484_v48 = vand.u32 4294901760, %v6735_v5  ;;  %v8487_v13 = vand.u32 4294901760, %v6736_v61 }
 0x370   : > { %12770 = vmatpush3.bf16.msra.mxu1 %v22334_v34 }
 0x371   : > { %12804 = vmatprep.subr.bf16.mxu1 %v22310_v24  ;;  %v6751_v33 = vsel %vm6749_vm1, %v6748_v43, 0  ;;  %v19643_v31 = vsub.f32 %v6735_v5, %v8484_v48 }
 0x372   : > { %12990 = vmatpush3.bf16.msra.mxu0 %v12989_v42  ;;  %v22335_v42 = vld [vmem:[#allocation56_spill] sm:$0xff]  ;;  %v19636_v43 = vand.u32 4294901760, %v6751_v33 }
 0x373   : > { %12992 = vmatprep.subr.bf16.mxu0 %v12991_v11  ;;  %v22336_v24 = vand.u32 4294901760, %v22335_v42  ;;  %v19621_v11 = vpack.c.bf16 %v8481_v39, %v8478_v3  ;;  %v6737_v42 = vld [vmem:[%s20065_s7 + $0x220] sm:$0xff]  ;;  %22343 = vst [vmem:[#allocation34_spill] sm:$0xff] %v19643_v31 }
 0x374   : > { %22340 = vst [vmem:[#allocation51_spill] sm:$0xff] %v19636_v43  ;;  %v19657_v5 = vsub.f32 %v6751_v33, %v19636_v43  ;;  %v20912_v33 = vand.u32 4294901760, %v19643_v31 }
 0x375   : > { %7338 = vmatmul.mubr.f32.vlgmr.msra.gmra.mrb[48].mxu1 %v22336_v24  ;;  %22337 = vst [vmem:[#allocation48_spill] sm:$0xff] %v19621_v11  ;;  %v19640_v24 = vpack.c.bf16 %v8487_v13, %v8484_v48 }
 0x376   : > { %12806 = vmatpush3.bf16.msra.mxu1 %v22312_v62  ;;  %7608 = vmatprep.mubr.f32.mxu1 %v22128_v6  ;;  %v6738_v62 = vld [vmem:[%s20065_s7 + $0x228] sm:$0xff]  ;;  %v22338_v6 = vld [vmem:[#allocation35_spill] sm:$0xff]  ;;  %22345 = vst [vmem:[#allocation37_spill] sm:$0xff] %v19657_v5 }
 0x377   : > { %12994 = vmatpush3.bf16.msra.mxu0 %v12993_v63  ;;  %12808 = vmatprep.subr.bf16.mxu1 %v22315_v17  ;;  %v19632_v17 = vsub.f32 %v6733_v58, %v8478_v3  ;;  %v19634_v63 = vsub.f32 %v6734_v16, %v8481_v39  ;;  %22341 = vst [vmem:[#allocation69_spill] sm:$0xff] %v19640_v24  ;;  %v8493_v53 = vand.u32 4294901760, %v6738_v62  ;;  %v6740_v58 = vld [vmem:[%s20065_s7 + $0x238] sm:$0xff]  ;;  %v20903_v16 = vmov 0.0  }
 0x378   : > { %13027 = vmatprep.subr.bf16.mxu0 %v20893_v25  ;;  %v8490_v25 = vand.u32 4294901760, %v6737_v42  ;;  %v22349_v39 = vand.u32 4294901760, %v19065_v29 }
 0x379   : > { %22339 = vst [vmem:[#allocation70_spill] sm:$0xff] %v19634_v63  ;;  %v20911_v3 = vand.u32 4294901760, %v19632_v17  ;;  %v22347_v43 = vand.u32 4294901760, %v19634_v63 }
 0x37a   : > { %8368 = vmatmul.mubr.f32.vlgmr.msra.gmra.mrb[48].mxu0 %v22338_v6  ;;  %12810 = vmatpush3.bf16.msra.mxu1 %v22316_v22  ;;  %v6739_v22 = vld [vmem:[%s20065_s7 + $0x230] sm:$0xff]  ;;  %v19663_v48 = vpack.c.bf16 %v8493_v53, %v8490_v25  ;;  %v8499_v6 = vand.u32 4294901760, %v6740_v58 }
 0x37b   : > { %13029 = vmatpush3.bf16.msra.mxu0 %v19621_v11  ;;  %12812 = vmatprep.subr.bf16.mxu1 %v22317_v60  ;;  %v19653_v60 = vsub.f32 %v6736_v61, %v8487_v13  ;;  %v8496_v11 = vand.u32 4294901760, %v6739_v22  ;;  %v6741_v61 = vld [vmem:[%s20065_s7 + $0x240] sm:$0xff]  ;;  %v19673_v13 = vsub.f32 %v6737_v42, %v8490_v25  ;;  %v8574_v0 = vsub.f32 %v19634_v63, %v22347_v43  ;;  %v19701_v43 = vld [vmem:[%s20065_s7 + $0x250] sm:$0xff] }
 0x37c   : > { %13030 = vmatprep.subr.bf16.mxu0 %v22342_v27  ;;  %11171 = vmatprep.mubr.msk.f32.mxu0 %vm13239_vm2, %v20903_v16  ;;  %22346 = vst [vmem:[#allocation60_spill] sm:$0xff] %v19663_v48  ;;  %v19677_v16 = vsub.f32 %v6738_v62, %v8493_v53  ;;  %v8502_v42 = vand.u32 4294901760, %v6741_v61  ;;  %v19693_v62 = vsub.f32 %v6740_v58, %v8499_v6 }
 0x37d   : > { %22344 = vst [vmem:[#allocation36_spill] sm:$0xff] %v19653_v60  ;;  %v19688_v25 = vpack.c.bf16 %v8499_v6, %v8496_v11  ;;  %v19691_v53 = vsub.f32 %v6739_v22, %v8496_v11  ;;  %v7843_v11 = vsub.f32 %v19065_v29, %v22349_v39  ;;  %v22350_v6 = vand.u32 4294901760, %v19070_v21 }
 0x37e   : > { %12814 = vmatpush3.bf16.msra.mxu1 %v22319_v46  ;;  %v6742_v46 = vld [vmem:[%s20065_s7 + $0x248] sm:$0xff]  ;;  %v8575_v63 = vand.u32 4294901760, %v8574_v0  ;;  %v19722_v39 = vsub.f32 %v6741_v61, %v8502_v42  ;;  %v19731_v0 = vand.u32 4294901760, %v19701_v43 }
 0x37f   : > { %13032 = vmatpush3.bf16.msra.mxu0 %v19640_v24  ;;  %12816 = vmatprep.subr.bf16.mxu1 %v22320_v23  ;;  %v20919_v23 = vand.u32 4294901760, %v19653_v60  ;;  %v8567_v24 = vsub.f32 %v19632_v17, %v20911_v3  ;;  %22348 = vst [vmem:[#allocation16_spill] sm:$0xff] %v19688_v25  ;;  %v8581_v3 = vsub.f32 %v19643_v31, %v20912_v33  ;;  %v22351_v33 = vand.u32 4294901760, %v19657_v5 }
 0x380   : > { %13033 = vmatprep.subr.bf16.mxu0 %v22342_v27  ;;  %v7850_v22 = vsub.f32 %v19070_v21, %v22350_v6  ;;  %v22352_v21 = vand.u32 4294901760, %v19096_v49  ;;  %v10374_v6 = vpop.f32.mrb[36].mxu1 }
 0x381   : > { %v8568_v31 = vand.u32 4294901760, %v8567_v24  ;;  %v8582_v24 = vand.u32 4294901760, %v8581_v3  ;;  %v10375_v58 = vpop.f32.mrb[37].mxu1 }
 0x382   : > { %12818 = vmatpush3.bf16.msra.mxu1 %v22321_v36  ;;  %v8505_v36 = vand.u32 4294901760, %v6742_v46 }
 0x383   : > { %13035 = vmatpush3.bf16.msra.mxu0 %v19663_v48  ;;  %12820 = vmatprep.subr.bf16.mxu1 %v22322_v10  ;;  %v8588_v10 = vsub.f32 %v19653_v60, %v20919_v23  ;;  %v8556_v48 = vsub.f32 %v19657_v5, %v22351_v33  ;;  %v22353_v23 = vand.u32 4294901760, %v19101_v4  ;;  %v22354_v5 = vand.u32 4294901760, %v19673_v13 }
 0x384   : > { %13036 = vmatprep.subr.bf16.mxu0 %v22342_v27  ;;  %v19720_v29 = vpack.c.bf16 %v8505_v36, %v8502_v42  ;;  %v19728_v33 = vsub.f32 %v6742_v46, %v8505_v36  ;;  %v7844_v42 = vand.u32 4294901760, %v7843_v11  ;;  %v13043_v36 = vpack.c.bf16 %v8575_v63, %v8568_v31 }
 0x385   : > { %v8589_v61 = vand.u32 4294901760, %v8588_v10  ;;  %v8557_v46 = vand.u32 4294901760, %v8556_v48  ;;  %v22355_v60 = vand.u32 4294901760, %v19677_v16 }
 0x386   : > { %12822 = vmatpush3.bf16.msra.mxu1 %v22323_v30  ;;  %v7731_v30 = vsub.f32 %v19096_v49, %v22352_v21  ;;  %v8595_v49 = vsub.f32 %v19673_v13, %v22354_v5  ;;  %v10376_v21 = vadd.f32 %v10375_v58, %v10374_v6  ;;  %v22357_v5 = vand.u32 4294901760, %v19153_v40 }
 0x387   : > { %13038 = vmatpush3.bf16.msra.mxu0 %v19688_v25  ;;  %12824 = vmatprep.subr.bf16.mxu1 %v22324_v41  ;;  %v7738_v41 = vsub.f32 %v19101_v4, %v22353_v23  ;;  %v7851_v25 = vand.u32 4294901760, %v7850_v22  ;;  %v8602_v3 = vsub.f32 %v19677_v16, %v22355_v60  ;;  %v22356_v23 = vand.u32 4294901760, %v19148_v52 }
 0x388   : > { %13039 = vmatprep.subr.bf16.mxu0 %v22342_v27  ;;  %v7732_v4 = vand.u32 4294901760, %v7731_v30  ;;  %v7864_v11 = vsub.f32 %v19153_v40, %v22357_v5  ;;  %v5479_v63 = vadd.f32 %v10376_v21, %v19582_v50  ;;  %v22359_v60 = vmov 0.0  }
 0x389   : > { %v7857_v10 = vsub.f32 %v19148_v52, %v22356_v23  ;;  %v7739_v48 = vand.u32 4294901760, %v7738_v41  ;;  %v8608_v58 = vand.u32 4294901760, %v19691_v53  ;;  %v10619_v52 = vpop.f32.mrb[36].mxu0  ;;  %v13046_v30 = vpack.c.bf16 %v8589_v61, %v8582_v24 }
 0x38a   : > { %12826 = vmatpush3.bf16.msra.mxu1 %v22325_v14  ;;  %v22358_v14 = vand.u32 4294901760, %v19225_v1  ;;  %v12867_v6 = vpack.c.bf16 %v7851_v25, %v7844_v42  ;;  %v8596_v23 = vand.u32 4294901760, %v8595_v49  ;;  %v8615_v40 = vand.u32 4294901760, %v19693_v62  ;;  %v10620_v5 = vpop.f32.mrb[37].mxu0 }
 0x38b   : > { %13041 = vmatpush3.bf16.msra.mxu0 %v19720_v29  ;;  %12828 = vmatprep.subr.bf16.mxu1 %v22326_v32  ;;  %v22360_v32 = vand.u32 4294901760, %v19230_v35  ;;  %v22361_v50 = vand.u32 4294901760, %v19265_v7  ;;  %v22362_v21 = vand.u32 4294901760, %v19270_v12  ;;  %v19771_v24 = vadd.f32 %v10620_v5, %v10619_v52 }
 0x38c   : > { %v7745_v31 = vsub.f32 %v19225_v1, %v22358_v14  ;;  %11169 = vmatprep.subr.mxu0 %v22359_v60  ;;  %v8603_v1 = vand.u32 4294901760, %v8602_v3  ;;  %v19769_v14 = vadd.f32 %v19218_v37, %v5479_v63  ;;  %v7858_v25 = vand.u32 4294901760, %v7857_v10 }
 0x38d   : > { %v7752_v22 = vsub.f32 %v19230_v35, %v22360_v32  ;;  %v7871_v41 = vsub.f32 %v19265_v7, %v22361_v50  ;;  %v7878_v35 = vsub.f32 %v19270_v12, %v22362_v21  ;;  %v8609_v12 = vsub.f32 %v19691_v53, %v8608_v58 }
 0x38e   : > { %12830 = vmatpush3.bf16.msra.mxu1 %v22327_v15  ;;  %v7865_v15 = vand.u32 4294901760, %v7864_v11  ;;  %v7746_v61 = vand.u32 4294901760, %v7745_v31  ;;  %v8622_v37 = vand.u32 4294901760, %v19722_v39  ;;  %v8629_v42 = vand.u32 4294901760, %v19728_v33 }
 0x38f   : > { %11170 = vmatpush3.msra.mxu0 %v19731_v0  ;;  %12832 = vmatprep.subr.bf16.mxu1 %v22330_v51  ;;  %v7753_v7 = vand.u32 4294901760, %v7752_v22  ;;  %v8616_v51 = vsub.f32 %v19693_v62, %v8615_v40  ;;  %v22363_v49 = vand.u32 4294901760, %v19275_v45  ;;  %v7872_v11 = vand.u32 4294901760, %v7871_v41 }
 0x390   : > { %13042 = vmatprep.subr.bf16.mxu0 %v22342_v27  ;;  %11172 = vmatmul.mubr.f32.vlgmr.msra.gmra.mrb[50].mxu0 %v8557_v46  ;;  %v22364_v46 = vand.u32 4294901760, %v19300_v54  ;;  %v7879_v31 = vand.u32 4294901760, %v7878_v35  ;;  %v19796_v63 = vsub.f32 %v19701_v43, %v19731_v0  ;;  %v22365_v32 = vand.u32 4294901760, %v19305_v56 }
 0x391   : > { %13044 = vmatpush3.bf16.msra.mxu0 %v13043_v36  ;;  %v7759_v3 = vsub.f32 %v19275_v45, %v22363_v49  ;;  %11196 = vmatprep.mubr.msk.f32.mxu0 %vm13239_vm2, %v22359_v60  ;;  %v12869_v36 = vpack.c.bf16 %v7739_v48, %v7732_v4  ;;  %v12871_v45 = vpack.c.bf16 %v7865_v15, %v7858_v25  ;;  %v22366_v22 = vand.u32 4294901760, %v19310_v59 }
 0x392   : > { %v7766_v10 = vsub.f32 %v19300_v54, %v22364_v46  ;;  %12834 = vmatpush3.bf16.msra.mxu1 %v22334_v34  ;;  %13045 = vmatprep.subr.bf16.mxu0 %v22342_v27  ;;  %v7885_v54 = vsub.f32 %v19305_v56, %v22365_v32  ;;  %v13049_v34 = vpack.c.bf16 %v8603_v1, %v8596_v23  ;;  %v8610_v48 = vand.u32 4294901760, %v8609_v12 }
 0x393   : > { %12868 = vmatprep.subr.bf16.mxu1 %v12867_v6  ;;  %v7892_v52 = vsub.f32 %v19310_v59, %v22366_v22  ;;  %v12873_v5 = vpack.c.bf16 %v7753_v7, %v7746_v61  ;;  %v8623_v4 = vsub.f32 %v19722_v39, %v8622_v37  ;;  %v8630_v43 = vsub.f32 %v19728_v33, %v8629_v42 }
 0x394   : > { %v8617_v6 = vand.u32 4294901760, %v8616_v51  ;;  %v7760_v56 = vand.u32 4294901760, %v7759_v3  ;;  %v7767_v50 = vand.u32 4294901760, %v7766_v10  ;;  %v12875_v59 = vpack.c.bf16 %v7879_v31, %v7872_v11 }
 0x395   : > { %13047 = vmatpush3.bf16.msra.mxu0 %v13046_v30  ;;  %7610 = vmatmul.mubr.f32.vlgmr.msra.gmra.mrb[50].mxu1 %v22311_v8  ;;  %v22367_v23 = vand.u32 4294901760, %v19331_v28  ;;  %v22368_v41 = vand.u32 4294901760, %v19336_v2  ;;  %v7886_v30 = vand.u32 4294901760, %v7885_v54  ;;  %v7893_v35 = vand.u32 4294901760, %v7892_v52 }
 0x396   : > { %12870 = vmatpush3.bf16.msra.mxu1 %v12869_v36  ;;  %13048 = vmatprep.subr.bf16.mxu0 %v22342_v27  ;;  %v22369_v8 = vand.u32 4294901760, %v19358_v47  ;;  %v22370_v15 = vand.u32 4294901760, %v19363_v20  ;;  %v8624_v7 = vand.u32 4294901760, %v8623_v4  ;;  %v8631_v12 = vand.u32 4294901760, %v8630_v43  ;;  %v22376_v4 = vld [vmem:[#allocation23_spill] sm:$0xff] }
 0x397   : > { %v7773_v1 = vsub.f32 %v19331_v28, %v22367_v23  ;;  %v7780_v21 = vsub.f32 %v19336_v2, %v22368_v41  ;;  %12872 = vmatprep.subr.bf16.mxu1 %v12871_v45  ;;  %7952 = vmatprep.mubr.f32.mxu1 %v22318_v57  ;;  %v8636_v28 = vand.u32 4294901760, %v19796_v63  ;;  %v13052_v51 = vpack.c.bf16 %v8617_v6, %v8610_v48 }
 0x398   : > { %v7899_v25 = vsub.f32 %v19358_v47, %v22369_v8  ;;  %v7906_v61 = vsub.f32 %v19363_v20, %v22370_v15  ;;  %v12877_v2 = vpack.c.bf16 %v7767_v50, %v7760_v56  ;;  %v22371_v49 = vand.u32 4294901760, %v19368_v9 }
 0x399   : > { %13050 = vmatpush3.bf16.msra.mxu0 %v13049_v34  ;;  %v22372_v46 = vand.u32 4294901760, %v19375_v19  ;;  %v7774_v20 = vand.u32 4294901760, %v7773_v1  ;;  %v7781_v10 = vand.u32 4294901760, %v7780_v21  ;;  %v22373_v36 = vand.u32 4294901760, %v19394_v26 }
 0x39a   : > { %v7787_v3 = vsub.f32 %v19368_v9, %v22371_v49  ;;  %12874 = vmatpush3.bf16.msra.mxu1 %v12873_v5  ;;  %13051 = vmatprep.subr.bf16.mxu0 %v22342_v27  ;;  %v22374_v31 = vand.u32 4294901760, %v19399_v18  ;;  %v12879_v32 = vpack.c.bf16 %v7893_v35, %v7886_v30  ;;  %v7900_v9 = vand.u32 4294901760, %v7899_v25  ;;  %v22380_v25 = vld [vmem:[#allocation5_spill] sm:$0xff] }
 0x39b   : > { %v7794_v47 = vsub.f32 %v19375_v19, %v22372_v46  ;;  %v7913_v11 = vsub.f32 %v19394_v26, %v22373_v36  ;;  %12876 = vmatprep.subr.bf16.mxu1 %v12875_v59  ;;  %v7907_v54 = vand.u32 4294901760, %v7906_v61  ;;  %v13055_v22 = vpack.c.bf16 %v8631_v12, %v8624_v7  ;;  %v22382_v7 = vld [vmem:[#allocation28_spill] sm:$0xff]  ;;  %v22386_v46 = vld [vmem:[#allocation22_spill] sm:$0xff] }
 0x39c   : > { %v7920_v45 = vsub.f32 %v19399_v18, %v22374_v31  ;;  %v8637_v19 = vsub.f32 %v19796_v63, %v8636_v28  ;;  %v7788_v52 = vand.u32 4294901760, %v7787_v3  ;;  %v22375_v5 = vand.u32 4294901760, %v19406_v44 }
 0x39d   : > { %13053 = vmatpush3.bf16.msra.mxu0 %v13052_v51  ;;  %v7795_v34 = vand.u32 4294901760, %v7794_v47  ;;  %v22377_v43 = vand.u32 4294901760, %v22376_v4  ;;  %v12881_v48 = vpack.c.bf16 %v7781_v10, %v7774_v20  ;;  %v7914_v6 = vand.u32 4294901760, %v7913_v11  ;;  %v22388_v10 = vld [vmem:[#allocation70_spill] sm:$0xff] }
 0x39e   : > { %v7801_v26 = vsub.f32 %v19406_v44, %v22375_v5  ;;  %12878 = vmatpush3.bf16.msra.mxu1 %v12877_v2  ;;  %13054 = vmatprep.subr.bf16.mxu0 %v22342_v27  ;;  %v7921_v56 = vand.u32 4294901760, %v7920_v45  ;;  %v12883_v50 = vpack.c.bf16 %v7907_v54, %v7900_v9  ;;  %v22378_v59 = vand.u32 4294901760, %v19424_v55  ;;  %v22384_v2 = vld [vmem:[#allocation9_spill] sm:$0xff] }
 0x39f   : > { %v7808_v18 = vsub.f32 %v22376_v4, %v22377_v43  ;;  %12880 = vmatprep.subr.bf16.mxu1 %v12879_v32  ;;  %v22379_v1 = vand.u32 4294901760, %v19429_v38  ;;  %v8638_v41 = vand.u32 4294901760, %v8637_v19  ;;  %v12885_v21 = vpack.c.bf16 %v7795_v34, %v7788_v52  ;;  %v22389_v32 = vld [vmem:[#allocation72_spill] sm:$0xff]  ;;  %v22393_v34 = vld [vmem:[#allocation51_spill] sm:$0xff]  ;;  %v10444_v43 = vpop.f32.mrb[38].mxu1 }
 0x3a0   : > { %v7927_v23 = vsub.f32 %v19424_v55, %v22378_v59  ;;  %v7802_v30 = vand.u32 4294901760, %v7801_v26  ;;  %v12887_v8 = vpack.c.bf16 %v7921_v56, %v7914_v6  ;;  %v22381_v15 = vand.u32 4294901760, %v22380_v25  ;;  %v10445_v56 = vpop.f32.mrb[39].mxu1 }
 0x3a1   : > { %v7934_v44 = vsub.f32 %v19429_v38, %v22379_v1  ;;  %13056 = vmatpush3.bf16.msra.mxu0 %v13055_v22  ;;  %v7809_v35 = vand.u32 4294901760, %v7808_v18  ;;  %v22383_v12 = vand.u32 4294901760, %v22382_v7  ;;  %v22385_v49 = vand.u32 4294901760, %v22384_v2  ;;  %v22391_v22 = vld [vmem:[#allocation66_spill] sm:$0xff] }
 0x3a2   : > { %12882 = vmatpush3.bf16.msra.mxu1 %v12881_v48  ;;  %11194 = vmatprep.subr.mxu0 %v22359_v60  ;;  %v7815_v61 = vsub.f32 %v22380_v25, %v22381_v15  ;;  %v7928_v51 = vand.u32 4294901760, %v7927_v23  ;;  %v22387_v47 = vand.u32 4294901760, %v22386_v46  ;;  %v13058_v36 = vpack.c.bf16 %v22388_v10, %v19632_v17  ;;  %v22394_v18 = vld [vmem:[#allocation34_spill] sm:$0xff]  ;;  %v22395_v48 = vld [vmem:[#allocation36_spill] sm:$0xff] }
 0x3a3   : > { %v7822_v55 = vsub.f32 %v22382_v7, %v22383_v12  ;;  %12884 = vmatprep.subr.bf16.mxu1 %v12883_v50  ;;  %v7935_v38 = vand.u32 4294901760, %v7934_v44  ;;  %v7941_v3 = vsub.f32 %v22384_v2, %v22385_v49  ;;  %v12889_v11 = vpack.c.bf16 %v7809_v35, %v7802_v30  ;;  %v10689_v30 = vpop.f32.mrb[38].mxu0  ;;  %v22397_v7 = vld [vmem:[#allocation35_spill] sm:$0xff]  ;;  %v22398_v12 = vld [vmem:[#allocation13_spill] sm:$0xff]  ;;  %v22402_v2 = vld [vmem:[#allocation14_spill] sm:$0xff] }
 0x3a4   : > { %v7948_v20 = vsub.f32 %v22386_v46, %v22387_v47  ;;  %v7816_v31 = vand.u32 4294901760, %v7815_v61  ;;  %v22390_v9 = vand.u32 4294901760, %v22389_v32  ;;  %v22392_v19 = vand.u32 4294901760, %v22391_v22  ;;  %v10690_v35 = vpop.f32.mrb[39].mxu0  ;;  %v22396_v61 = vld [vmem:[#allocation44_spill] sm:$0xff]  ;;  %v22403_v49 = vld [vmem:[#allocation11_spill] sm:$0xff] }
 0x3a5   : > { %11195 = vmatpush3.msra.mxu0 %v8638_v41  ;;  %v7823_v45 = vand.u32 4294901760, %v7822_v55  ;;  %v12891_v5 = vpack.c.bf16 %v7935_v38, %v7928_v51  ;;  %v7942_v26 = vand.u32 4294901760, %v7941_v3  ;;  %v13061_v6 = vpack.c.bf16 %v22395_v48, %v22394_v18  ;;  %v22399_v55 = vld [vmem:[#allocation41_spill] sm:$0xff]  ;;  %v22401_v38 = vld [vmem:[#allocation52_spill] sm:$0xff]  ;;  %v22406_v47 = vld [vmem:[#allocation15_spill] sm:$0xff] }
 0x3a6   : > { %13057 = vmatprep.subr.bf16.mxu0 %v22342_v27  ;;  %12886 = vmatpush3.bf16.msra.mxu1 %v12885_v21  ;;  %v7829_v54 = vsub.f32 %v22389_v32, %v22390_v9  ;;  %v7836_v52 = vsub.f32 %v22391_v22, %v22392_v19  ;;  %v7949_v4 = vand.u32 4294901760, %v7948_v20  ;;  %v10446_v50 = vadd.f32 %v10445_v56, %v10444_v43  ;;  %v22404_v3 = vld [vmem:[#allocation37_spill] sm:$0xff]  ;;  %v22405_v46 = vld [vmem:[#allocation48_spill] sm:$0xff]  ;;  %v22407_v20 = vld [vmem:[#allocation27_spill] sm:$0xff] }
 0x3a7   : > { %11197 = vmatmul.mubr.f32.vlgmr.msra.gmra.mrb[50].mxu0 %v22393_v34  ;;  %12888 = vmatprep.subr.bf16.mxu1 %v12887_v8  ;;  %v12893_v59 = vpack.c.bf16 %v7823_v45, %v7816_v31  ;;  %v13064_v41 = vpack.c.bf16 %v19677_v16, %v19673_v13  ;;  %v19887_v25 = vadd.f32 %v10690_v35, %v10689_v30  ;;  %v22400_v51 = vand.u32 4294901760, %v22399_v55  ;;  %v22410_v31 = vld [vmem:[#allocation8_spill] sm:$0xff]  ;;  %v22412_v32 = vld [vmem:[#allocation38_spill] sm:$0xff]  ;;  %v22413_v9 = vld [vmem:[#allocation29_spill] sm:$0xff] }
 0x3a8   : > { %13059 = vmatpush3.bf16.msra.mxu0 %v13058_v36  ;;  %11221 = vmatprep.mubr.msk.f32.mxu0 %vm13239_vm2, %v22359_v60  ;;  %v7830_v23 = vand.u32 4294901760, %v7829_v54  ;;  %v7837_v1 = vand.u32 4294901760, %v7836_v52  ;;  %v12895_v44 = vpack.c.bf16 %v7949_v4, %v7942_v26  ;;  %v5751_v21 = vadd.f32 %v10446_v50, %v19769_v14  ;;  %v22408_v36 = vld [vmem:[#allocation69_spill] sm:$0xff]  ;;  %v22411_v45 = vld [vmem:[#allocation60_spill] sm:$0xff]  ;;  %v22416_v26 = vld [vmem:[#allocation7_spill] sm:$0xff] }
 0x3a9   : > { %13060 = vmatprep.subr.bf16.mxu0 %v22342_v27  ;;  %v13067_v15 = vpack.c.bf16 %v19693_v62, %v19691_v53  ;;  %v13070_v14 = vpack.c.bf16 %v19728_v33, %v19722_v39  ;;  %v22414_v19 = vld [vmem:[#allocation16_spill] sm:$0xff]  ;;  %v22417_v4 = vld [vmem:[#allocation55_spill] sm:$0xff]  ;;  %v22418_v50 = vld [vmem:[#allocation21_spill] sm:$0xff] }
 0x3aa   : > { %12890 = vmatpush3.bf16.msra.mxu1 %v12889_v11  ;;  %5755 = vrot.lane.b32.xlu0 %v5751_v21, %s13241_s23  ;;  %v12897_v8 = vpack.c.bf16 %v7837_v1, %v7830_v23  ;;  %v22409_v11 = vld [vmem:[#allocation68_spill] sm:$0xff]  ;;  %v22422_v21 = vand.u32 4294901760, %v22388_v10  ;;  %v22423_v35 = vld [vmem:[#allocation17_spill] sm:$0xff]  ;;  %v22427_v55 = vld [vmem:[#allocation10_spill] sm:$0xff]  ;;  %s13180_s23 = scalar_lea.vmem %s13179_s12, 256 }
 0x3ab   : > { %12892 = vmatprep.subr.bf16.mxu1 %v12891_v5  ;;  %v22415_v5 = vld [vmem:[#allocation58_spill] sm:$0xff]  ;;  %v22428_v10 = vand.u32 4294901760, %v22427_v55  ;;  %p13182_p1 = scmp.lt.s32.totalorder %s13180_s23, %s13174_s22 }
 0x3ac   : > { %13062 = vmatpush3.bf16.msra.mxu0 %v13061_v6 }
 0x3ad   : > { %13063 = vmatprep.subr.bf16.mxu0 %v22342_v27  ;;  %p13183_p2 = por %p13182_p1, %p13181_p0 }
 0x3ae   : > { %12894 = vmatpush3.bf16.msra.mxu1 %v12893_v59  ;;  %v22419_v59 = vld [vmem:[#allocation54_spill] sm:$0xff] }
 0x3af   : > { %12896 = vmatprep.subr.bf16.mxu1 %v12895_v44  ;;  %v22420_v44 = vld [vmem:[#allocation59_spill] sm:$0xff]  ;;  %p13184_p3 = pnand %p13183_p2, %p13177_p13 }
 0x3b0   : > { %13065 = vmatpush3.bf16.msra.mxu0 %v13064_v41  ;;  %v22421_v41 = vand.u32 4294901760, %v19632_v17 }
 0x3b1   : > { %13066 = vmatprep.subr.bf16.mxu0 %v22342_v27 }
 0x3b2   : > { %12898 = vmatpush3.bf16.msra.mxu1 %v12897_v8  ;;  %v13088_v30 = vpack.c.bf16 %v22422_v21, %v22421_v41  ;;  %v22424_v8 = vand.u32 4294901760, %v22404_v3 }
 0x3b3   : > { %12932 = vmatprep.subr.bf16.mxu1 %v22396_v61 }
 0x3b4   : > { %13068 = vmatpush3.bf16.msra.mxu0 %v13067_v15  ;;  %v22425_v15 = vand.u32 4294901760, %v22394_v18  ;;  %v22429_v18 = vand.u32 4294901760, %v19673_v13 }
 0x3b5   : > { %7954 = vmatmul.mubr.f32.vlgmr.msra.gmra.mrb[52].mxu1 %v22397_v7  ;;  %13069 = vmatprep.subr.bf16.mxu0 %v22342_v27 }
 0x3b6   : > { %12934 = vmatpush3.bf16.msra.mxu1 %v22398_v12  ;;  %8196 = vmatprep.mubr.f32.mxu1 %v22400_v51 }
 0x3b7   : > { %12936 = vmatprep.subr.bf16.mxu1 %v22401_v38 }
 0x3b8   : > { %13071 = vmatpush3.bf16.msra.mxu0 %v13070_v14  ;;  %v22426_v14 = vand.u32 4294901760, %v22395_v48  ;;  %v22430_v48 = vand.u32 4294901760, %v19677_v16 }
 0x3b9   : > { %11219 = vmatprep.subr.mxu0 %v22359_v60 }
 0x3ba   : > { %12938 = vmatpush3.bf16.msra.mxu1 %v22402_v2  ;;  %v13091_v17 = vpack.c.bf16 %v22426_v14, %v22425_v15 }
 0x3bb   : > { %12940 = vmatprep.subr.bf16.mxu1 %v22403_v49 }
 0x3bc   : > { %11220 = vmatpush3.msra.mxu0 %v19796_v63 }
 0x3bd   : > { %13072 = vmatprep.subr.bf16.mxu0 %v22342_v27  ;;  %11222 = vmatmul.mubr.f32.vlgmr.msra.gmra.mrb[50].mxu0 %v22404_v3  ;;  %v10514_v54 = vpop.f32.mrb[40].mxu1 }
 0x3be   : > { %13074 = vmatpush3.bf16.msra.mxu0 %v22405_v46  ;;  %12942 = vmatpush3.bf16.msra.mxu1 %v22406_v47  ;;  %v10515_v22 = vpop.f32.mrb[41].mxu1 }
 0x3bf   : > { %13075 = vmatprep.subr.bf16.mxu0 %v22342_v27  ;;  %12944 = vmatprep.subr.bf16.mxu1 %v22407_v20  ;;  %v10516_v52 = vadd.f32 %v10515_v22, %v10514_v54 }
 0x3c0   : > { %11246 = vmatprep.mubr.msk.f32.mxu0 %vm13239_vm2, %v22359_v60 }
 0x3c1   : > { %v6137_v43 = vadd.f32 %v10516_v52, %v22417_v4 }
 0x3c2   : > { %13077 = vmatpush3.bf16.msra.mxu0 %v22408_v36  ;;  %12946 = vmatpush3.bf16.msra.mxu1 %v22409_v11  ;;  %v10759_v6 = vpop.f32.mrb[40].mxu0 }
 0x3c3   : > { %13078 = vmatprep.subr.bf16.mxu0 %v22342_v27  ;;  %12948 = vmatprep.subr.bf16.mxu1 %v22410_v31  ;;  %v10760_v56 = vpop.f32.mrb[41].mxu0  ;;  %v6275_v23 = vadd.f32 %v22419_v59, %v6137_v43 }
 0x3c4   : > { %v19929_v1 = vadd.f32 %v10760_v56, %v10759_v6 }
 0x3c6   : > { %13080 = vmatpush3.bf16.msra.mxu0 %v22411_v45  ;;  %12950 = vmatpush3.bf16.msra.mxu1 %v22412_v32 }
 0x3c7   : > { %13081 = vmatprep.subr.bf16.mxu0 %v22342_v27  ;;  %12952 = vmatprep.subr.bf16.mxu1 %v22413_v9 }
 0x3ca   : > { %13083 = vmatpush3.bf16.msra.mxu0 %v22414_v19  ;;  %12954 = vmatpush3.bf16.msra.mxu1 %v22415_v5 }
 0x3cb   : > { %13084 = vmatprep.subr.bf16.mxu0 %v22342_v27  ;;  %12956 = vmatprep.subr.bf16.mxu1 %v22416_v26 }
 0x3ce   : > { %13086 = vmatpush3.bf16.msra.mxu0 %v19720_v29  ;;  %12958 = vmatpush3.bf16.msra.mxu1 %v22418_v50 }
 0x3cf   : > { %11244 = vmatprep.subr.mxu0 %v22359_v60  ;;  %12960 = vmatprep.subr.bf16.mxu1 %v22420_v44 }
 0x3d2   : > { %11245 = vmatpush3.msra.mxu0 %v19731_v0  ;;  %12962 = vmatpush3.bf16.msra.mxu1 %v22423_v35 }
 0x3d3   : > { %13087 = vmatprep.subr.bf16.mxu0 %v22342_v27  ;;  %11247 = vmatmul.mubr.f32.vlgmr.msra.gmra.mrb[50].mxu0 %v22424_v8 }
 0x3d4   : > { %13089 = vmatpush3.bf16.msra.mxu0 %v13088_v30  ;;  %12996 = vmatprep.subr.bf16.mxu1 %v22396_v61  ;;  %v13094_v61 = vpack.c.bf16 %v22430_v48, %v22429_v18 }
 0x3d5   : > { %8200 = vmatmul.mubr.f32.vlgmr.msra.gmra.mrb[54].mxu1 %v22428_v10  ;;  %13090 = vmatprep.subr.bf16.mxu0 %v22342_v27 }
 0x3d6   : > { %12998 = vmatpush3.bf16.msra.mxu1 %v22398_v12  ;;  %11271 = vmatprep.mubr.msk.f32.mxu0 %vm13239_vm2, %v22359_v60  ;;  %v13097_v12 = vpack.c.bf16 %v8615_v40, %v8608_v58 }
 0x3d7   : > { %13000 = vmatprep.subr.bf16.mxu1 %v22401_v38  ;;  %8470 = vmatprep.mubr.f32.mxu1 %v22318_v57  ;;  %v13100_v57 = vpack.c.bf16 %v8629_v42, %v8622_v37 }
 0x3d8   : > { %13092 = vmatpush3.bf16.msra.mxu0 %v13091_v17 }
 0x3d9   : > { %13093 = vmatprep.subr.bf16.mxu0 %v22342_v27 }
 0x3da   : > { %13002 = vmatpush3.bf16.msra.mxu1 %v22402_v2 }
 0x3db   : > { %13004 = vmatprep.subr.bf16.mxu1 %v22403_v49 }
 0x3dc   : > { %13095 = vmatpush3.bf16.msra.mxu0 %v13094_v61 }
 0x3dd   : > { %13096 = vmatprep.subr.bf16.mxu0 %v22342_v27  ;;  %v10584_v16 = vpop.f32.mrb[42].mxu1 }
 0x3de   : > { %13006 = vmatpush3.bf16.msra.mxu1 %v22406_v47  ;;  %v10585_v13 = vpop.f32.mrb[43].mxu1 }
 0x3df   : > { %13008 = vmatprep.subr.bf16.mxu1 %v22407_v20  ;;  %v10586_v53 = vadd.f32 %v10585_v13, %v10584_v16 }
 0x3e0   : > { %13098 = vmatpush3.bf16.msra.mxu0 %v13097_v12 }
 0x3e1   : > { %13099 = vmatprep.subr.bf16.mxu0 %v22342_v27  ;;  %v6383_v62 = vadd.f32 %v10586_v53, %v6275_v23 }
 0x3e2   : > { %13010 = vmatpush3.bf16.msra.mxu1 %v22409_v11  ;;  %v10829_v39 = vpop.f32.mrb[42].mxu0 }
 0x3e3   : > { %13012 = vmatprep.subr.bf16.mxu1 %v22410_v31  ;;  %v10830_v33 = vpop.f32.mrb[43].mxu0  ;;  %v6551_v58 = vadd.f32 %v19771_v24, %v6383_v62 }
 0x3e4   : > { %13101 = vmatpush3.bf16.msra.mxu0 %v13100_v57  ;;  %v10831_v40 = vadd.f32 %v10830_v33, %v10829_v39 }
 0x3e5   : > { %11269 = vmatprep.subr.mxu0 %v22359_v60 }
 0x3e6   : > { %13014 = vmatpush3.bf16.msra.mxu1 %v22412_v32 }
 0x3e7   : > { %13016 = vmatprep.subr.bf16.mxu1 %v22413_v9 }
 0x3e8   : > { %11270 = vmatpush3.msra.mxu0 %v8636_v28 }
 0x3e9   : > { %13102 = vmatprep.subr.bf16.mxu0 %v22342_v27  ;;  %11272 = vmatmul.mubr.f32.vlgmr.msra.gmra.mrb[50].mxu0 %v22393_v34 }
 0x3ea   : > { %13104 = vmatpush3.bf16.msra.mxu0 %v22405_v46  ;;  %13018 = vmatpush3.bf16.msra.mxu1 %v22415_v5 }
 0x3eb   : > { %13105 = vmatprep.subr.bf16.mxu0 %v22342_v27  ;;  %13020 = vmatprep.subr.bf16.mxu1 %v22416_v26 }
 0x3ec   : > { %11296 = vmatprep.mubr.msk.f32.mxu0 %vm13239_vm2, %v22359_v60 }
 0x3ee   : > { %13107 = vmatpush3.bf16.msra.mxu0 %v22408_v36  ;;  %13022 = vmatpush3.bf16.msra.mxu1 %v22418_v50 }
 0x3ef   : > { %13108 = vmatprep.subr.bf16.mxu0 %v22342_v27  ;;  %13024 = vmatprep.subr.bf16.mxu1 %v22420_v44 }
 0x3f2   : > { %13110 = vmatpush3.bf16.msra.mxu0 %v22411_v45  ;;  %13026 = vmatpush3.bf16.msra.mxu1 %v22423_v35 }
 0x3f3   : > { %13111 = vmatprep.subr.bf16.mxu0 %v22342_v27 }
 0x3f5   : > { %8472 = vmatmul.mubr.f32.vlgmr.msra.gmra.mrb[56].mxu1 %v22397_v7 }
 0x3f6   : > { %13113 = vmatpush3.bf16.msra.mxu0 %v22414_v19 }
 0x3f7   : > { %13114 = vmatprep.subr.bf16.mxu0 %v22342_v27 }
 0x3fa   : > { %13116 = vmatpush3.bf16.msra.mxu0 %v19720_v29 }
 0x3fb   : > { %11294 = vmatprep.subr.mxu0 %v22359_v60 }
 0x3fd   : > { %v10654_v24 = vpop.f32.mrb[44].mxu1 }
 0x3fe   : > { %11295 = vmatpush3.msra.mxu0 %v19731_v0  ;;  %v10655_v37 = vpop.f32.mrb[45].mxu1 }
 0x3ff   : > { %11297 = vmatmul.mubr.f32.vlgmr.msra.gmra.mrb[50].mxu0 %v22393_v34  ;;  %v10656_v42 = vadd.f32 %v10655_v37, %v10654_v24 }
 0x401   : > { %v6655_v63 = vadd.f32 %v10656_v42, %v6551_v58 }
 0x403   : > { %6659 = vrot.lane.b32.xlu0 %v6655_v63, %s13242_s25 }
 0x405   : > { %v10899_v28 = vpop.f32.mrb[44].mxu0 }
 0x406   : > { %v10900_v51 = vpop.f32.mrb[45].mxu0 }
 0x407   : > { %v10901_v7 = vadd.f32 %v10900_v51, %v10899_v28 }
 0x41c   : > { %v5756_v27 = vpop.permute.xlu0 %5755 }
 0x41d   : > { %5759 = vst.msk [vmem:[%s18693_s19] sm:$0xff] %vm5758_vm3, %v5756_v27 }
 0x426   : > { %v10724_v38 = vpop.f32.mrb[46].mxu1 }
 0x427   : > { %v10725_v29 = vpop.f32.mrb[47].mxu1 }
 0x428   : > { %v10726_v2 = vadd.f32 %v10725_v29, %v10724_v38 }
 0x42a   : > { %v7094_v60 = vadd.f32 %v10726_v2, %v19887_v25 }
 0x42c   : > { %v10969_v0 = vpop.f32.mrb[46].mxu0  ;;  %v7232_v34 = vadd.f32 %v19929_v1, %v7094_v60 }
 0x42d   : > { %v10970_v49 = vpop.f32.mrb[47].mxu0 }
 0x42e   : > { %v10971_v3 = vadd.f32 %v10970_v49, %v10969_v0 }
 0x448   : > { %v10794_v46 = vpop.f32.mrb[48].mxu1 }
 0x449   : > { %v10795_v47 = vpop.f32.mrb[49].mxu1 }
 0x44a   : > { %v10796_v20 = vadd.f32 %v10795_v47, %v10794_v46 }
 0x44c   : > { %v7340_v36 = vadd.f32 %v10796_v20, %v7232_v34 }
 0x44d   : > { %v11039_v11 = vpop.f32.mrb[48].mxu0 }
 0x44e   : > { %v11040_v31 = vpop.f32.mrb[49].mxu0  ;;  %v7508_v45 = vadd.f32 %v10831_v40, %v7340_v36 }
 0x44f   : > { %v11041_v32 = vadd.f32 %v11040_v31, %v11039_v11 }
 0x468   : > { %v10864_v9 = vpop.f32.mrb[50].mxu1 }
 0x469   : > { %v10865_v54 = vpop.f32.mrb[51].mxu1 }
 0x46a   : > { %v10866_v22 = vadd.f32 %v10865_v54, %v10864_v9 }
 0x46c   : > { %v7612_v19 = vadd.f32 %v10866_v22, %v7508_v45 }
 0x46e   : > { %v7724_v52 = vadd.f32 %v10901_v7, %v7612_v19 }
 0x475   : > { %v6660_v25 = vpop.permute.xlu0 %6659 }
 0x476   : > { %6663 = vst.msk [vmem:[%s18693_s19] sm:$0xff] %vm6662_vm4, %v6660_v25 }
 0x488   : > { %v10934_v5 = vpop.f32.mrb[52].mxu1 }
 0x489   : > { %v10935_v26 = vpop.f32.mrb[53].mxu1 }
 0x48a   : > { %v10936_v4 = vadd.f32 %v10935_v26, %v10934_v5 }
 0x48c   : > { %v7956_v43 = vadd.f32 %v10936_v4, %v7724_v52 }
 0x48e   : > { %v8094_v6 = vadd.f32 %v10971_v3, %v7956_v43 }
 0x4a8   : > { %v11004_v56 = vpop.f32.mrb[54].mxu1 }
 0x4a9   : > { %v11005_v50 = vpop.f32.mrb[55].mxu1 }
 0x4aa   : > { %v11006_v59 = vadd.f32 %v11005_v50, %v11004_v56 }
 0x4ac   : > { %v8202_v23 = vadd.f32 %v11006_v59, %v8094_v6 }
 0x4ae   : > { %v8370_v1 = vadd.f32 %v11041_v32, %v8202_v23 }
 0x4c8   : > { %v11074_v44 = vpop.f32.mrb[56].mxu1 }
 0x4c9   : > { %v11075_v41 = vpop.f32.mrb[57].mxu1 }
 0x4ca   : > { %v11076_v21 = vadd.f32 %v11075_v41, %v11074_v44 }
 0x4cc   : > { %v8474_v30 = vadd.f32 %v11076_v21, %v8370_v1 }
 0x4d2   : > { %v9049_v35 = vpop.f32.mrb[50].mxu0 }
 0x4d3   : > { %v13117_v8 = vadd.f32 %v9049_v35, %v8474_v30  ;;  %v11298_v15 = vpop.f32.mrb[51].mxu0 }
 0x4d5   : > { %9054 = vrot.lane.b32.xlu1 %v13117_v8, %s13243_s26 }
 0x547   : > { %v9055_v14 = vpop.permute.xlu1 %9054 }
 0x548   : > { %9058 = vst.msk [vmem:[%s18693_s19] sm:$0xff] %vm9057_vm5, %v9055_v14 }
 0x549   : > { %13187 = shalt.err (!%p13184_p3)
}
 0x54a   : > { %s13188_s17 = scalar_lea.hbm %s20013_s24, 128  ;;  %s13192_s26 = scalar_lea.hbm %s20066_s8, 256 }
 0x54b   : > { %p13189_p4 = scmp.ne.s32.totalorder %s20013_s24, %s13188_s17  ;;  %p13193_p9 = scmp.lt.u32.totalorder %s20013_s24, %s20066_s8 }
 0x54c   : > { %p13194_p10 = scmp.lt.u32.totalorder %s13192_s26, %s13188_s17  ;;  %p13196_p12 = scmp.lt.u32.totalorder %s13188_s17, %s20013_s24 }
 0x54d   : > { %p13190_p7 = pnand %p13189_p4, %p13328_p5 }
 0x54e   : > { %p13195_p11 = por %p13194_p10, %p13193_p9 }
 0x54f   : > { %p13191_p8 = pneg %p13190_p7 }
 0x550   : > { %p13197_p13 = por %p13196_p12, %p13195_p11 }
 0x552   : > { %p13198_p0 = pnand %p13197_p13, %p13191_p8 }
 0x554   : > { %13201 = shalt.err (!%p13198_p0)
}
 0x555   : > { %13129 = dma.vmem_to_hbm [thread:$0]  (%p13328_p5), %s20015_s10, 128, %s20013_s24, %s9060_s21  }
 0x556 PF: > { %p13135_p1 = scmp.ge.s32.totalorder %s13236_s30, 2  ;;  %s9085_s20 = sand.u32 1, %s13224_s27  }
 0x557   : > { %s9086_s22 = scalar_lea.sflag [#allocation3], %s9085_s20 }
 0x558   : > { %p13132_p2 = pnand %p13135_p1, %p13332_p6 }
 0x55a   : > { %13219 = dma.done.wait (!%p13132_p2), %s9086_s22, 128  }
 0x55b   : > { %13221 = vsyncadd (!%p13132_p2), %s9086_s22, 4294967168  ;;  %p18_p3 = scmp.ge.s32.totalorder %s13315_s11, 4   ;;  %s22431_s27 = smov %s13228_s28 }
 0x55c   : > { %s22432_s28 = smov %s13232_s29  ;;  %s22433_s29 = smov %s13326_s14 }
 0x55d   : > { %s22434_s30 = smov %s13315_s11  ;;  %20 = sbr.rel (!%p18_p3) target bundleno = 3 (0x3), region = 96 }
 0x564   :  { %9091 = vsyncpa [#allocation3], 1 }
 0x565   :  { %9093 = vsyncpa [#allocation3 + $0x1], 1 }

</bundles_post_ra>
